<compile_context>
chip_gen: v7x
topology: tpu7x:2x2x1
jax: 0.10.0
libtpu: 0.0.40
codegen_flags: <defaults>
</compile_context>

<pallas_src>
import functools

import jax
import jax.numpy as jnp
from jax.experimental import pallas as pl
from jax.experimental.pallas import tpu as pltpu

HIDDEN = 1024


def _round_up(n, m):
    return ((n + m - 1) // m) * m


def _leaky_relu(v):
    # LeakyReLU(0.01) == max(v, 0.01*v): mul+max instead of mul+cmp+select.
    return jnp.maximum(v, 0.01 * v)


# ---------------------------------------------------------------------------
# Fused kernel: simple_encoder MLP + forward-kinematics chain epilogue.
# ---------------------------------------------------------------------------
def fused_fkopt_kernel(x_ref, w1_ref, b1_ref, w2_ref, b2_ref, w3_ref, b3_ref,
                       w4_ref, b4_ref, out_ref, *, num_joint, joint_length):
    # ---------------- simple_encoder MLP (batch on sublanes) ----------------
    x = x_ref[...]                                   # (bt, 3) f32
    w1 = w1_ref[...]                                 # (3, 1024) f32

    # Layer 1 (3 -> 1024): rank-3 contraction as three VPU outer-product MACs.
    # TODO(synk): measure-then-try a tiny bf16 MXU matmul here (K=3) per the
    # review; keeping the proven VPU path for compile safety.
    h = (b1_ref[...]
         + x[:, 0:1] * w1[0:1, :]
         + x[:, 1:2] * w1[1:2, :]
         + x[:, 2:3] * w1[2:3, :])
    h = _leaky_relu(h)
    # Dropout(0.1) -> identity (inference mode)

    # Layers 2-4 on the MXU: bf16 operands, f32 accumulation, f32 epilogue.
    h = jnp.dot(h.astype(jnp.bfloat16), w2_ref[...],
                preferred_element_type=jnp.float32) + b2_ref[...]
    h = _leaky_relu(h)
    h = jnp.dot(h.astype(jnp.bfloat16), w3_ref[...],
                preferred_element_type=jnp.float32) + b3_ref[...]
    h = _leaky_relu(h)
    h = jnp.dot(h.astype(jnp.bfloat16), w4_ref[...],
                preferred_element_type=jnp.float32) + b4_ref[...]
    joints = jnp.tanh(h)                             # (bt, 4*num_joint) f32

    # -------- forward kinematics epilogue (lane-dense: batch on lanes) --------
    # coordi_j = [[R_j, L*R_j[:,1]], [0,0,0,1]],  C_j = C_{j-1} @ coordi_j.
    # Bottom rows stay [0,0,0,1], so only the 3x3 rotation chain + translation
    # recursion is needed:  Rc_j = Rc_{j-1} @ R_j,
    # tc_j = Rc_{j-1} @ (L*R_j[:,1]) + tc_{j-1},  fake[:, j] = tc_j.
    # (The reference divides by 1 + 1e-9, which is exactly 1.0 in f32.)
    jt = joints.T                                    # (4*num_joint, bt): one small XLU transpose
    L = joint_length
    Rc = None                                        # cumulative rotation: 3x3 of (1, bt) rows
    tc = None                                        # cumulative translation: 3 of (1, bt) rows
    out_rows = []
    for j in range(num_joint):                       # num_joint static -> fully unrolled
        qw = jt[4 * j + 0: 4 * j + 1, :]             # (1, bt) lane-dense rows
        qi = jt[4 * j + 1: 4 * j + 2, :]
        qj = jt[4 * j + 2: 4 * j + 3, :]
        qk = jt[4 * j + 3: 4 * j + 4, :]
        two_s = 2.0 / (qw * qw + qi * qi + qj * qj + qk * qk)  # pytorch3d convention
        R = [
            [1.0 - two_s * (qj * qj + qk * qk),
             two_s * (qi * qj - qk * qw),
             two_s * (qi * qk + qj * qw)],
            [two_s * (qi * qj + qk * qw),
             1.0 - two_s * (qi * qi + qk * qk),
             two_s * (qj * qk - qi * qw)],
            [two_s * (qi * qk - qj * qw),
             two_s * (qj * qk + qi * qw),
             1.0 - two_s * (qi * qi + qj * qj)],
        ]
        t = [L * R[0][1], L * R[1][1], L * R[2][1]]  # R_j @ [0, L, 0]^T
        if Rc is None:
            Rc, tc = R, t
        else:
            tc = [Rc[r][0] * t[0] + Rc[r][1] * t[1] + Rc[r][2] * t[2] + tc[r]
                  for r in range(3)]
            Rc = [[Rc[r][0] * R[0][c] + Rc[r][1] * R[1][c] + Rc[r][2] * R[2][c]
                   for c in range(3)] for r in range(3)]
        out_rows.extend([tc[0], tc[1], tc[2]])

    # Single lane-dense store of the whole (out_dim, bt) tile.
    out_ref[...] = jnp.concatenate(out_rows, axis=0)


# ---------------------------------------------------------------------------
# Wrapper
# ---------------------------------------------------------------------------
def fkopt_net_forward(params, x, num_joint, joint_length, batch_tile=None):
    """x: (B, 3) f32  ->  fake_points (B, num_joint, 3) f32."""
    w1, b1, w2, b2, w3, b3, w4, b4 = params
    B = x.shape[0]
    out_dim = 3 * num_joint

    # Batch tile (multiple of 16 for bf16 sublane packing):
    #   B <= 128   : single full-block grid step (no gross over-padding).
    #   B <= 1024  : bt = 128 -> >= 2 grid steps (v7x megacore) and legal
    #                128-lane-wide output blocks.
    #   B  > 1024  : bt = 256 to amortize per-grid-step overhead.
    if batch_tile is not None:
        bt = batch_tile
    elif B <= 128:
        bt = _round_up(max(B, 1), 16)
    elif B <= 1024:
        bt = 128
    else:
        bt = 256
    B_pad = _round_up(B, bt)

    x = x.astype(jnp.float32)
    if B_pad != B:
        x = jnp.pad(x, ((0, B_pad - B), (0, 0)))

    def wspec(shape):
        # Constant index_map -> block is DMA'd once and stays resident.
        # pl.Buffered(1) intentionally skipped: even double-buffered, the bf16
        # weights total ~8.6 MiB, well inside the 32 MiB VMEM cap.
        return pl.BlockSpec(shape, lambda i: (0, 0))

    kernel = functools.partial(fused_fkopt_kernel,
                               num_joint=num_joint,
                               joint_length=float(joint_length))

    # Kernel output is batch-on-lanes: (out_dim, B_pad).
    out_t = pl.pallas_call(
        kernel,
        out_shape=jax.ShapeDtypeStruct((out_dim, B_pad), jnp.float32),
        grid=(B_pad // bt,),
        in_specs=[
            pl.BlockSpec((bt, 3), lambda i: (i, 0)),
            wspec((3, HIDDEN)), wspec((1, HIDDEN)),
            wspec((HIDDEN, HIDDEN)), wspec((1, HIDDEN)),
            wspec((HIDDEN, HIDDEN)), wspec((1, HIDDEN)),
            wspec((HIDDEN, 4 * num_joint)), wspec((1, 4 * num_joint)),
        ],
        out_specs=pl.BlockSpec((out_dim, bt), lambda i: (0, i)),
        compiler_params=pltpu.CompilerParams(
            dimension_semantics=("parallel",),          # megacore shard on v7x
            vmem_limit_bytes=32 * 1024 * 1024,          # fits v5e/v6e/v7x
        ),
    )(x, w1, b1, w2, b2, w3, b3, w4, b4)

    # Cheap wrapper-side un-transpose: (out_dim, B_pad) -> (B, num_joint, 3).
    return out_t[:, :B].T.reshape(B, num_joint, 3)


# ---------------------------------------------------------------------------
# Deterministic parameter init (PyTorch nn.Linear default: U(+-1/sqrt(fan_in)))
# ---------------------------------------------------------------------------
def init_linear(key, fan_in, fan_out, w_dtype=jnp.float32):
    kw, kb = jax.random.split(key)
    bound = 1.0 / (fan_in ** 0.5)
    w = jax.random.uniform(kw, (fan_in, fan_out), jnp.float32, -bound, bound)
    b = jax.random.uniform(kb, (1, fan_out), jnp.float32, -bound, bound)
    return w.astype(w_dtype), b                        # biases stay f32


if __name__ == "__main__":
    num_joint = 4
    joint_length = 0.5
    out_feature = num_joint * 4
    B = 4

    key = jax.random.PRNGKey(0)
    k_in, k1, k2, k3, k4 = jax.random.split(key, 5)

    x = jax.random.normal(k_in, (B, 3), jnp.float32)

    # Wide layers stored in bf16 (HBM-bandwidth lever); tiny first layer and
    # all biases kept f32 for accuracy.
    w1, b1 = init_linear(k1, 3, HIDDEN, w_dtype=jnp.float32)
    w2, b2 = init_linear(k2, HIDDEN, HIDDEN, w_dtype=jnp.bfloat16)
    w3, b3 = init_linear(k3, HIDDEN, HIDDEN, w_dtype=jnp.bfloat16)
    w4, b4 = init_linear(k4, HIDDEN, out_feature, w_dtype=jnp.bfloat16)
    params = (w1, b1, w2, b2, w3, b3, w4, b4)

    fwd = jax.jit(fkopt_net_forward, static_argnums=(2, 3))
    fake_points = fwd(params, x, num_joint, joint_length)
    jax.block_until_ready(fake_points)

    assert fake_points.shape == (B, num_joint, 3)
    assert bool(jnp.all(jnp.isfinite(fake_points)))
    print("KERNEL_OK")
</pallas_src>

<mosaic_0001>
module attributes {stable_mosaic.version = 11 : i64} {
  func.func @fused_fkopt_kernel(%arg0: i32, %arg1: memref<16x3xf32, #tpu.memory_space<vmem>>, %arg2: memref<3x1024xf32, #tpu.memory_space<vmem>>, %arg3: memref<1x1024xf32, #tpu.memory_space<vmem>>, %arg4: memref<1024x1024xbf16, #tpu.memory_space<vmem>>, %arg5: memref<1x1024xf32, #tpu.memory_space<vmem>>, %arg6: memref<1024x1024xbf16, #tpu.memory_space<vmem>>, %arg7: memref<1x1024xf32, #tpu.memory_space<vmem>>, %arg8: memref<1024x16xbf16, #tpu.memory_space<vmem>>, %arg9: memref<1x16xf32, #tpu.memory_space<vmem>>, %arg10: memref<12x16xf32, #tpu.memory_space<vmem>>) attributes {dimension_semantics = [#tpu.dimension_semantics<parallel>], iteration_bounds = array<i64: 1>, scalar_prefetch = 0 : i64, scratch_operands = 0 : i64, tpu.core_type = #tpu.core_type<tc>, window_params = [{transform_indices = @transform_0, window_bounds = array<i64: 16, 3>}, {pipeline_mode = #tpu.pipeline_mode<synchronous>, transform_indices = @transform_1, window_bounds = array<i64: 3, 1024>}, {pipeline_mode = #tpu.pipeline_mode<synchronous>, transform_indices = @transform_2, window_bounds = array<i64: 1, 1024>}, {pipeline_mode = #tpu.pipeline_mode<synchronous>, transform_indices = @transform_3, window_bounds = array<i64: 1024, 1024>}, {pipeline_mode = #tpu.pipeline_mode<synchronous>, transform_indices = @transform_4, window_bounds = array<i64: 1, 1024>}, {pipeline_mode = #tpu.pipeline_mode<synchronous>, transform_indices = @transform_5, window_bounds = array<i64: 1024, 1024>}, {pipeline_mode = #tpu.pipeline_mode<synchronous>, transform_indices = @transform_6, window_bounds = array<i64: 1, 1024>}, {pipeline_mode = #tpu.pipeline_mode<synchronous>, transform_indices = @transform_7, window_bounds = array<i64: 1024, 16>}, {pipeline_mode = #tpu.pipeline_mode<synchronous>, transform_indices = @transform_8, window_bounds = array<i64: 1, 16>}, {transform_indices = @transform_9, window_bounds = array<i64: 12, 16>}]} {
    %c0 = arith.constant 0 : index
    %c0_0 = arith.constant 0 : index
    %0 = vector.load %arg1[%c0, %c0_0] : memref<16x3xf32, #tpu.memory_space<vmem>>, vector<16x3xf32>
    %c0_1 = arith.constant 0 : index
    %c0_2 = arith.constant 0 : index
    %1 = vector.load %arg2[%c0_1, %c0_2] : memref<3x1024xf32, #tpu.memory_space<vmem>>, vector<3x1024xf32>
    %c0_3 = arith.constant 0 : index
    %c0_4 = arith.constant 0 : index
    %2 = vector.load %arg3[%c0_3, %c0_4] : memref<1x1024xf32, #tpu.memory_space<vmem>>, vector<1x1024xf32>
    %3 = vector.extract_strided_slice %0 {offsets = [0, 0], sizes = [16, 1], strides = [1, 1]} : vector<16x3xf32> to vector<16x1xf32>
    %4 = vector.extract_strided_slice %1 {offsets = [0, 0], sizes = [1, 1024], strides = [1, 1]} : vector<3x1024xf32> to vector<1x1024xf32>
    %5 = vector.broadcast %3 : vector<16x1xf32> to vector<16x1024xf32>
    %6 = vector.broadcast %4 : vector<1x1024xf32> to vector<16x1024xf32>
    %7 = arith.mulf %5, %6 : vector<16x1024xf32>
    %8 = vector.broadcast %2 : vector<1x1024xf32> to vector<16x1024xf32>
    %9 = arith.addf %8, %7 : vector<16x1024xf32>
    %10 = vector.extract_strided_slice %0 {offsets = [0, 1], sizes = [16, 1], strides = [1, 1]} : vector<16x3xf32> to vector<16x1xf32>
    %11 = vector.extract_strided_slice %1 {offsets = [1, 0], sizes = [1, 1024], strides = [1, 1]} : vector<3x1024xf32> to vector<1x1024xf32>
    %12 = vector.broadcast %10 : vector<16x1xf32> to vector<16x1024xf32>
    %13 = vector.broadcast %11 : vector<1x1024xf32> to vector<16x1024xf32>
    %14 = arith.mulf %12, %13 : vector<16x1024xf32>
    %15 = arith.addf %9, %14 : vector<16x1024xf32>
    %16 = vector.extract_strided_slice %0 {offsets = [0, 2], sizes = [16, 1], strides = [1, 1]} : vector<16x3xf32> to vector<16x1xf32>
    %17 = vector.extract_strided_slice %1 {offsets = [2, 0], sizes = [1, 1024], strides = [1, 1]} : vector<3x1024xf32> to vector<1x1024xf32>
    %18 = vector.broadcast %16 : vector<16x1xf32> to vector<16x1024xf32>
    %19 = vector.broadcast %17 : vector<1x1024xf32> to vector<16x1024xf32>
    %20 = arith.mulf %18, %19 : vector<16x1024xf32>
    %21 = arith.addf %15, %20 : vector<16x1024xf32>
    %cst = arith.constant 0.00999999977 : f32
    %22 = vector.broadcast %cst : f32 to vector<16x1024xf32>
    %23 = arith.mulf %22, %21 : vector<16x1024xf32>
    %24 = arith.maximumf %21, %23 : vector<16x1024xf32>
    %25 = arith.truncf %24 : vector<16x1024xf32> to vector<16x1024xbf16>
    %c0_5 = arith.constant 0 : index
    %c0_6 = arith.constant 0 : index
    %26 = vector.load %arg4[%c0_5, %c0_6] : memref<1024x1024xbf16, #tpu.memory_space<vmem>>, vector<1024x1024xbf16>
    %cst_7 = arith.constant dense<0.000000e+00> : vector<16x1024xf32>
    %27 = tpu.matmul %25, %26, %cst_7 {dimension_numbers = #tpu.dot_dimension_numbers<[1], [0], [0], [1], [0, 0, 1, 1], [], []>} : vector<16x1024xbf16>, vector<1024x1024xbf16>, vector<16x1024xf32> -> vector<16x1024xf32>
    %c0_8 = arith.constant 0 : index
    %c0_9 = arith.constant 0 : index
    %28 = vector.load %arg5[%c0_8, %c0_9] : memref<1x1024xf32, #tpu.memory_space<vmem>>, vector<1x1024xf32>
    %29 = vector.broadcast %28 : vector<1x1024xf32> to vector<16x1024xf32>
    %30 = arith.addf %27, %29 : vector<16x1024xf32>
    %cst_10 = arith.constant 0.00999999977 : f32
    %31 = vector.broadcast %cst_10 : f32 to vector<16x1024xf32>
    %32 = arith.mulf %31, %30 : vector<16x1024xf32>
    %33 = arith.maximumf %30, %32 : vector<16x1024xf32>
    %34 = arith.truncf %33 : vector<16x1024xf32> to vector<16x1024xbf16>
    %c0_11 = arith.constant 0 : index
    %c0_12 = arith.constant 0 : index
    %35 = vector.load %arg6[%c0_11, %c0_12] : memref<1024x1024xbf16, #tpu.memory_space<vmem>>, vector<1024x1024xbf16>
    %cst_13 = arith.constant dense<0.000000e+00> : vector<16x1024xf32>
    %36 = tpu.matmul %34, %35, %cst_13 {dimension_numbers = #tpu.dot_dimension_numbers<[1], [0], [0], [1], [0, 0, 1, 1], [], []>} : vector<16x1024xbf16>, vector<1024x1024xbf16>, vector<16x1024xf32> -> vector<16x1024xf32>
    %c0_14 = arith.constant 0 : index
    %c0_15 = arith.constant 0 : index
    %37 = vector.load %arg7[%c0_14, %c0_15] : memref<1x1024xf32, #tpu.memory_space<vmem>>, vector<1x1024xf32>
    %38 = vector.broadcast %37 : vector<1x1024xf32> to vector<16x1024xf32>
    %39 = arith.addf %36, %38 : vector<16x1024xf32>
    %cst_16 = arith.constant 0.00999999977 : f32
    %40 = vector.broadcast %cst_16 : f32 to vector<16x1024xf32>
    %41 = arith.mulf %40, %39 : vector<16x1024xf32>
    %42 = arith.maximumf %39, %41 : vector<16x1024xf32>
    %43 = arith.truncf %42 : vector<16x1024xf32> to vector<16x1024xbf16>
    %c0_17 = arith.constant 0 : index
    %c0_18 = arith.constant 0 : index
    %44 = vector.load %arg8[%c0_17, %c0_18] : memref<1024x16xbf16, #tpu.memory_space<vmem>>, vector<1024x16xbf16>
    %cst_19 = arith.constant dense<0.000000e+00> : vector<16x16xf32>
    %45 = tpu.matmul %43, %44, %cst_19 {dimension_numbers = #tpu.dot_dimension_numbers<[1], [0], [0], [1], [0, 0, 1, 1], [], []>} : vector<16x1024xbf16>, vector<1024x16xbf16>, vector<16x16xf32> -> vector<16x16xf32>
    %c0_20 = arith.constant 0 : index
    %c0_21 = arith.constant 0 : index
    %46 = vector.load %arg9[%c0_20, %c0_21] : memref<1x16xf32, #tpu.memory_space<vmem>>, vector<1x16xf32>
    %47 = vector.broadcast %46 : vector<1x16xf32> to vector<16x16xf32>
    %48 = arith.addf %45, %47 : vector<16x16xf32>
    %49 = math.tanh %48 : vector<16x16xf32>
    %50 = tpu.transpose %49, [1, 0] : vector<16x16xf32> -> vector<16x16xf32>
    %51 = vector.extract_strided_slice %50 {offsets = [0, 0], sizes = [1, 16], strides = [1, 1]} : vector<16x16xf32> to vector<1x16xf32>
    %52 = vector.extract_strided_slice %50 {offsets = [1, 0], sizes = [1, 16], strides = [1, 1]} : vector<16x16xf32> to vector<1x16xf32>
    %53 = vector.extract_strided_slice %50 {offsets = [2, 0], sizes = [1, 16], strides = [1, 1]} : vector<16x16xf32> to vector<1x16xf32>
    %54 = vector.extract_strided_slice %50 {offsets = [3, 0], sizes = [1, 16], strides = [1, 1]} : vector<16x16xf32> to vector<1x16xf32>
    %55 = arith.mulf %51, %51 : vector<1x16xf32>
    %56 = arith.mulf %52, %52 : vector<1x16xf32>
    %57 = arith.addf %55, %56 : vector<1x16xf32>
    %58 = arith.mulf %53, %53 : vector<1x16xf32>
    %59 = arith.addf %57, %58 : vector<1x16xf32>
    %60 = arith.mulf %54, %54 : vector<1x16xf32>
    %61 = arith.addf %59, %60 : vector<1x16xf32>
    %cst_22 = arith.constant 2.000000e+00 : f32
    %62 = vector.broadcast %cst_22 : f32 to vector<1x16xf32>
    %63 = arith.divf %62, %61 : vector<1x16xf32>
    %64 = arith.mulf %53, %53 : vector<1x16xf32>
    %65 = arith.mulf %54, %54 : vector<1x16xf32>
    %66 = arith.addf %64, %65 : vector<1x16xf32>
    %67 = arith.mulf %63, %66 : vector<1x16xf32>
    %cst_23 = arith.constant 1.000000e+00 : f32
    %68 = vector.broadcast %cst_23 : f32 to vector<1x16xf32>
    %69 = arith.subf %68, %67 : vector<1x16xf32>
    %70 = arith.mulf %52, %53 : vector<1x16xf32>
    %71 = arith.mulf %54, %51 : vector<1x16xf32>
    %72 = arith.subf %70, %71 : vector<1x16xf32>
    %73 = arith.mulf %63, %72 : vector<1x16xf32>
    %74 = arith.mulf %52, %54 : vector<1x16xf32>
    %75 = arith.mulf %53, %51 : vector<1x16xf32>
    %76 = arith.addf %74, %75 : vector<1x16xf32>
    %77 = arith.mulf %63, %76 : vector<1x16xf32>
    %78 = arith.mulf %52, %53 : vector<1x16xf32>
    %79 = arith.mulf %54, %51 : vector<1x16xf32>
    %80 = arith.addf %78, %79 : vector<1x16xf32>
    %81 = arith.mulf %63, %80 : vector<1x16xf32>
    %82 = arith.mulf %52, %52 : vector<1x16xf32>
    %83 = arith.mulf %54, %54 : vector<1x16xf32>
    %84 = arith.addf %82, %83 : vector<1x16xf32>
    %85 = arith.mulf %63, %84 : vector<1x16xf32>
    %cst_24 = arith.constant 1.000000e+00 : f32
    %86 = vector.broadcast %cst_24 : f32 to vector<1x16xf32>
    %87 = arith.subf %86, %85 : vector<1x16xf32>
    %88 = arith.mulf %53, %54 : vector<1x16xf32>
    %89 = arith.mulf %52, %51 : vector<1x16xf32>
    %90 = arith.subf %88, %89 : vector<1x16xf32>
    %91 = arith.mulf %63, %90 : vector<1x16xf32>
    %92 = arith.mulf %52, %54 : vector<1x16xf32>
    %93 = arith.mulf %53, %51 : vector<1x16xf32>
    %94 = arith.subf %92, %93 : vector<1x16xf32>
    %95 = arith.mulf %63, %94 : vector<1x16xf32>
    %96 = arith.mulf %53, %54 : vector<1x16xf32>
    %97 = arith.mulf %52, %51 : vector<1x16xf32>
    %98 = arith.addf %96, %97 : vector<1x16xf32>
    %99 = arith.mulf %63, %98 : vector<1x16xf32>
    %100 = arith.mulf %52, %52 : vector<1x16xf32>
    %101 = arith.mulf %53, %53 : vector<1x16xf32>
    %102 = arith.addf %100, %101 : vector<1x16xf32>
    %103 = arith.mulf %63, %102 : vector<1x16xf32>
    %cst_25 = arith.constant 1.000000e+00 : f32
    %104 = vector.broadcast %cst_25 : f32 to vector<1x16xf32>
    %105 = arith.subf %104, %103 : vector<1x16xf32>
    %cst_26 = arith.constant 5.000000e-01 : f32
    %106 = vector.broadcast %cst_26 : f32 to vector<1x16xf32>
    %107 = arith.mulf %106, %73 : vector<1x16xf32>
    %cst_27 = arith.constant 5.000000e-01 : f32
    %108 = vector.broadcast %cst_27 : f32 to vector<1x16xf32>
    %109 = arith.mulf %108, %87 : vector<1x16xf32>
    %cst_28 = arith.constant 5.000000e-01 : f32
    %110 = vector.broadcast %cst_28 : f32 to vector<1x16xf32>
    %111 = arith.mulf %110, %99 : vector<1x16xf32>
    %112 = vector.extract_strided_slice %50 {offsets = [4, 0], sizes = [1, 16], strides = [1, 1]} : vector<16x16xf32> to vector<1x16xf32>
    %113 = vector.extract_strided_slice %50 {offsets = [5, 0], sizes = [1, 16], strides = [1, 1]} : vector<16x16xf32> to vector<1x16xf32>
    %114 = vector.extract_strided_slice %50 {offsets = [6, 0], sizes = [1, 16], strides = [1, 1]} : vector<16x16xf32> to vector<1x16xf32>
    %115 = vector.extract_strided_slice %50 {offsets = [7, 0], sizes = [1, 16], strides = [1, 1]} : vector<16x16xf32> to vector<1x16xf32>
    %116 = arith.mulf %112, %112 : vector<1x16xf32>
    %117 = arith.mulf %113, %113 : vector<1x16xf32>
    %118 = arith.addf %116, %117 : vector<1x16xf32>
    %119 = arith.mulf %114, %114 : vector<1x16xf32>
    %120 = arith.addf %118, %119 : vector<1x16xf32>
    %121 = arith.mulf %115, %115 : vector<1x16xf32>
    %122 = arith.addf %120, %121 : vector<1x16xf32>
    %cst_29 = arith.constant 2.000000e+00 : f32
    %123 = vector.broadcast %cst_29 : f32 to vector<1x16xf32>
    %124 = arith.divf %123, %122 : vector<1x16xf32>
    %125 = arith.mulf %114, %114 : vector<1x16xf32>
    %126 = arith.mulf %115, %115 : vector<1x16xf32>
    %127 = arith.addf %125, %126 : vector<1x16xf32>
    %128 = arith.mulf %124, %127 : vector<1x16xf32>
    %cst_30 = arith.constant 1.000000e+00 : f32
    %129 = vector.broadcast %cst_30 : f32 to vector<1x16xf32>
    %130 = arith.subf %129, %128 : vector<1x16xf32>
    %131 = arith.mulf %113, %114 : vector<1x16xf32>
    %132 = arith.mulf %115, %112 : vector<1x16xf32>
    %133 = arith.subf %131, %132 : vector<1x16xf32>
    %134 = arith.mulf %124, %133 : vector<1x16xf32>
    %135 = arith.mulf %113, %115 : vector<1x16xf32>
    %136 = arith.mulf %114, %112 : vector<1x16xf32>
    %137 = arith.addf %135, %136 : vector<1x16xf32>
    %138 = arith.mulf %124, %137 : vector<1x16xf32>
    %139 = arith.mulf %113, %114 : vector<1x16xf32>
    %140 = arith.mulf %115, %112 : vector<1x16xf32>
    %141 = arith.addf %139, %140 : vector<1x16xf32>
    %142 = arith.mulf %124, %141 : vector<1x16xf32>
    %143 = arith.mulf %113, %113 : vector<1x16xf32>
    %144 = arith.mulf %115, %115 : vector<1x16xf32>
    %145 = arith.addf %143, %144 : vector<1x16xf32>
    %146 = arith.mulf %124, %145 : vector<1x16xf32>
    %cst_31 = arith.constant 1.000000e+00 : f32
    %147 = vector.broadcast %cst_31 : f32 to vector<1x16xf32>
    %148 = arith.subf %147, %146 : vector<1x16xf32>
    %149 = arith.mulf %114, %115 : vector<1x16xf32>
    %150 = arith.mulf %113, %112 : vector<1x16xf32>
    %151 = arith.subf %149, %150 : vector<1x16xf32>
    %152 = arith.mulf %124, %151 : vector<1x16xf32>
    %153 = arith.mulf %113, %115 : vector<1x16xf32>
    %154 = arith.mulf %114, %112 : vector<1x16xf32>
    %155 = arith.subf %153, %154 : vector<1x16xf32>
    %156 = arith.mulf %124, %155 : vector<1x16xf32>
    %157 = arith.mulf %114, %115 : vector<1x16xf32>
    %158 = arith.mulf %113, %112 : vector<1x16xf32>
    %159 = arith.addf %157, %158 : vector<1x16xf32>
    %160 = arith.mulf %124, %159 : vector<1x16xf32>
    %161 = arith.mulf %113, %113 : vector<1x16xf32>
    %162 = arith.mulf %114, %114 : vector<1x16xf32>
    %163 = arith.addf %161, %162 : vector<1x16xf32>
    %164 = arith.mulf %124, %163 : vector<1x16xf32>
    %cst_32 = arith.constant 1.000000e+00 : f32
    %165 = vector.broadcast %cst_32 : f32 to vector<1x16xf32>
    %166 = arith.subf %165, %164 : vector<1x16xf32>
    %cst_33 = arith.constant 5.000000e-01 : f32
    %167 = vector.broadcast %cst_33 : f32 to vector<1x16xf32>
    %168 = arith.mulf %167, %134 : vector<1x16xf32>
    %cst_34 = arith.constant 5.000000e-01 : f32
    %169 = vector.broadcast %cst_34 : f32 to vector<1x16xf32>
    %170 = arith.mulf %169, %148 : vector<1x16xf32>
    %cst_35 = arith.constant 5.000000e-01 : f32
    %171 = vector.broadcast %cst_35 : f32 to vector<1x16xf32>
    %172 = arith.mulf %171, %160 : vector<1x16xf32>
    %173 = arith.mulf %69, %168 : vector<1x16xf32>
    %174 = arith.mulf %73, %170 : vector<1x16xf32>
    %175 = arith.addf %173, %174 : vector<1x16xf32>
    %176 = arith.mulf %77, %172 : vector<1x16xf32>
    %177 = arith.addf %175, %176 : vector<1x16xf32>
    %178 = arith.addf %177, %107 : vector<1x16xf32>
    %179 = arith.mulf %81, %168 : vector<1x16xf32>
    %180 = arith.mulf %87, %170 : vector<1x16xf32>
    %181 = arith.addf %179, %180 : vector<1x16xf32>
    %182 = arith.mulf %91, %172 : vector<1x16xf32>
    %183 = arith.addf %181, %182 : vector<1x16xf32>
    %184 = arith.addf %183, %109 : vector<1x16xf32>
    %185 = arith.mulf %95, %168 : vector<1x16xf32>
    %186 = arith.mulf %99, %170 : vector<1x16xf32>
    %187 = arith.addf %185, %186 : vector<1x16xf32>
    %188 = arith.mulf %105, %172 : vector<1x16xf32>
    %189 = arith.addf %187, %188 : vector<1x16xf32>
    %190 = arith.addf %189, %111 : vector<1x16xf32>
    %191 = arith.mulf %69, %130 : vector<1x16xf32>
    %192 = arith.mulf %73, %142 : vector<1x16xf32>
    %193 = arith.addf %191, %192 : vector<1x16xf32>
    %194 = arith.mulf %77, %156 : vector<1x16xf32>
    %195 = arith.addf %193, %194 : vector<1x16xf32>
    %196 = arith.mulf %69, %134 : vector<1x16xf32>
    %197 = arith.mulf %73, %148 : vector<1x16xf32>
    %198 = arith.addf %196, %197 : vector<1x16xf32>
    %199 = arith.mulf %77, %160 : vector<1x16xf32>
    %200 = arith.addf %198, %199 : vector<1x16xf32>
    %201 = arith.mulf %69, %138 : vector<1x16xf32>
    %202 = arith.mulf %73, %152 : vector<1x16xf32>
    %203 = arith.addf %201, %202 : vector<1x16xf32>
    %204 = arith.mulf %77, %166 : vector<1x16xf32>
    %205 = arith.addf %203, %204 : vector<1x16xf32>
    %206 = arith.mulf %81, %130 : vector<1x16xf32>
    %207 = arith.mulf %87, %142 : vector<1x16xf32>
    %208 = arith.addf %206, %207 : vector<1x16xf32>
    %209 = arith.mulf %91, %156 : vector<1x16xf32>
    %210 = arith.addf %208, %209 : vector<1x16xf32>
    %211 = arith.mulf %81, %134 : vector<1x16xf32>
    %212 = arith.mulf %87, %148 : vector<1x16xf32>
    %213 = arith.addf %211, %212 : vector<1x16xf32>
    %214 = arith.mulf %91, %160 : vector<1x16xf32>
    %215 = arith.addf %213, %214 : vector<1x16xf32>
    %216 = arith.mulf %81, %138 : vector<1x16xf32>
    %217 = arith.mulf %87, %152 : vector<1x16xf32>
    %218 = arith.addf %216, %217 : vector<1x16xf32>
    %219 = arith.mulf %91, %166 : vector<1x16xf32>
    %220 = arith.addf %218, %219 : vector<1x16xf32>
    %221 = arith.mulf %95, %130 : vector<1x16xf32>
    %222 = arith.mulf %99, %142 : vector<1x16xf32>
    %223 = arith.addf %221, %222 : vector<1x16xf32>
    %224 = arith.mulf %105, %156 : vector<1x16xf32>
    %225 = arith.addf %223, %224 : vector<1x16xf32>
    %226 = arith.mulf %95, %134 : vector<1x16xf32>
    %227 = arith.mulf %99, %148 : vector<1x16xf32>
    %228 = arith.addf %226, %227 : vector<1x16xf32>
    %229 = arith.mulf %105, %160 : vector<1x16xf32>
    %230 = arith.addf %228, %229 : vector<1x16xf32>
    %231 = arith.mulf %95, %138 : vector<1x16xf32>
    %232 = arith.mulf %99, %152 : vector<1x16xf32>
    %233 = arith.addf %231, %232 : vector<1x16xf32>
    %234 = arith.mulf %105, %166 : vector<1x16xf32>
    %235 = arith.addf %233, %234 : vector<1x16xf32>
    %236 = vector.extract_strided_slice %50 {offsets = [8, 0], sizes = [1, 16], strides = [1, 1]} : vector<16x16xf32> to vector<1x16xf32>
    %237 = vector.extract_strided_slice %50 {offsets = [9, 0], sizes = [1, 16], strides = [1, 1]} : vector<16x16xf32> to vector<1x16xf32>
    %238 = vector.extract_strided_slice %50 {offsets = [10, 0], sizes = [1, 16], strides = [1, 1]} : vector<16x16xf32> to vector<1x16xf32>
    %239 = vector.extract_strided_slice %50 {offsets = [11, 0], sizes = [1, 16], strides = [1, 1]} : vector<16x16xf32> to vector<1x16xf32>
    %240 = arith.mulf %236, %236 : vector<1x16xf32>
    %241 = arith.mulf %237, %237 : vector<1x16xf32>
    %242 = arith.addf %240, %241 : vector<1x16xf32>
    %243 = arith.mulf %238, %238 : vector<1x16xf32>
    %244 = arith.addf %242, %243 : vector<1x16xf32>
    %245 = arith.mulf %239, %239 : vector<1x16xf32>
    %246 = arith.addf %244, %245 : vector<1x16xf32>
    %cst_36 = arith.constant 2.000000e+00 : f32
    %247 = vector.broadcast %cst_36 : f32 to vector<1x16xf32>
    %248 = arith.divf %247, %246 : vector<1x16xf32>
    %249 = arith.mulf %238, %238 : vector<1x16xf32>
    %250 = arith.mulf %239, %239 : vector<1x16xf32>
    %251 = arith.addf %249, %250 : vector<1x16xf32>
    %252 = arith.mulf %248, %251 : vector<1x16xf32>
    %cst_37 = arith.constant 1.000000e+00 : f32
    %253 = vector.broadcast %cst_37 : f32 to vector<1x16xf32>
    %254 = arith.subf %253, %252 : vector<1x16xf32>
    %255 = arith.mulf %237, %238 : vector<1x16xf32>
    %256 = arith.mulf %239, %236 : vector<1x16xf32>
    %257 = arith.subf %255, %256 : vector<1x16xf32>
    %258 = arith.mulf %248, %257 : vector<1x16xf32>
    %259 = arith.mulf %237, %239 : vector<1x16xf32>
    %260 = arith.mulf %238, %236 : vector<1x16xf32>
    %261 = arith.addf %259, %260 : vector<1x16xf32>
    %262 = arith.mulf %248, %261 : vector<1x16xf32>
    %263 = arith.mulf %237, %238 : vector<1x16xf32>
    %264 = arith.mulf %239, %236 : vector<1x16xf32>
    %265 = arith.addf %263, %264 : vector<1x16xf32>
    %266 = arith.mulf %248, %265 : vector<1x16xf32>
    %267 = arith.mulf %237, %237 : vector<1x16xf32>
    %268 = arith.mulf %239, %239 : vector<1x16xf32>
    %269 = arith.addf %267, %268 : vector<1x16xf32>
    %270 = arith.mulf %248, %269 : vector<1x16xf32>
    %cst_38 = arith.constant 1.000000e+00 : f32
    %271 = vector.broadcast %cst_38 : f32 to vector<1x16xf32>
    %272 = arith.subf %271, %270 : vector<1x16xf32>
    %273 = arith.mulf %238, %239 : vector<1x16xf32>
    %274 = arith.mulf %237, %236 : vector<1x16xf32>
    %275 = arith.subf %273, %274 : vector<1x16xf32>
    %276 = arith.mulf %248, %275 : vector<1x16xf32>
    %277 = arith.mulf %237, %239 : vector<1x16xf32>
    %278 = arith.mulf %238, %236 : vector<1x16xf32>
    %279 = arith.subf %277, %278 : vector<1x16xf32>
    %280 = arith.mulf %248, %279 : vector<1x16xf32>
    %281 = arith.mulf %238, %239 : vector<1x16xf32>
    %282 = arith.mulf %237, %236 : vector<1x16xf32>
    %283 = arith.addf %281, %282 : vector<1x16xf32>
    %284 = arith.mulf %248, %283 : vector<1x16xf32>
    %285 = arith.mulf %237, %237 : vector<1x16xf32>
    %286 = arith.mulf %238, %238 : vector<1x16xf32>
    %287 = arith.addf %285, %286 : vector<1x16xf32>
    %288 = arith.mulf %248, %287 : vector<1x16xf32>
    %cst_39 = arith.constant 1.000000e+00 : f32
    %289 = vector.broadcast %cst_39 : f32 to vector<1x16xf32>
    %290 = arith.subf %289, %288 : vector<1x16xf32>
    %cst_40 = arith.constant 5.000000e-01 : f32
    %291 = vector.broadcast %cst_40 : f32 to vector<1x16xf32>
    %292 = arith.mulf %291, %258 : vector<1x16xf32>
    %cst_41 = arith.constant 5.000000e-01 : f32
    %293 = vector.broadcast %cst_41 : f32 to vector<1x16xf32>
    %294 = arith.mulf %293, %272 : vector<1x16xf32>
    %cst_42 = arith.constant 5.000000e-01 : f32
    %295 = vector.broadcast %cst_42 : f32 to vector<1x16xf32>
    %296 = arith.mulf %295, %284 : vector<1x16xf32>
    %297 = arith.mulf %195, %292 : vector<1x16xf32>
    %298 = arith.mulf %200, %294 : vector<1x16xf32>
    %299 = arith.addf %297, %298 : vector<1x16xf32>
    %300 = arith.mulf %205, %296 : vector<1x16xf32>
    %301 = arith.addf %299, %300 : vector<1x16xf32>
    %302 = arith.addf %301, %178 : vector<1x16xf32>
    %303 = arith.mulf %210, %292 : vector<1x16xf32>
    %304 = arith.mulf %215, %294 : vector<1x16xf32>
    %305 = arith.addf %303, %304 : vector<1x16xf32>
    %306 = arith.mulf %220, %296 : vector<1x16xf32>
    %307 = arith.addf %305, %306 : vector<1x16xf32>
    %308 = arith.addf %307, %184 : vector<1x16xf32>
    %309 = arith.mulf %225, %292 : vector<1x16xf32>
    %310 = arith.mulf %230, %294 : vector<1x16xf32>
    %311 = arith.addf %309, %310 : vector<1x16xf32>
    %312 = arith.mulf %235, %296 : vector<1x16xf32>
    %313 = arith.addf %311, %312 : vector<1x16xf32>
    %314 = arith.addf %313, %190 : vector<1x16xf32>
    %315 = arith.mulf %195, %254 : vector<1x16xf32>
    %316 = arith.mulf %200, %266 : vector<1x16xf32>
    %317 = arith.addf %315, %316 : vector<1x16xf32>
    %318 = arith.mulf %205, %280 : vector<1x16xf32>
    %319 = arith.addf %317, %318 : vector<1x16xf32>
    %320 = arith.mulf %195, %258 : vector<1x16xf32>
    %321 = arith.mulf %200, %272 : vector<1x16xf32>
    %322 = arith.addf %320, %321 : vector<1x16xf32>
    %323 = arith.mulf %205, %284 : vector<1x16xf32>
    %324 = arith.addf %322, %323 : vector<1x16xf32>
    %325 = arith.mulf %195, %262 : vector<1x16xf32>
    %326 = arith.mulf %200, %276 : vector<1x16xf32>
    %327 = arith.addf %325, %326 : vector<1x16xf32>
    %328 = arith.mulf %205, %290 : vector<1x16xf32>
    %329 = arith.addf %327, %328 : vector<1x16xf32>
    %330 = arith.mulf %210, %254 : vector<1x16xf32>
    %331 = arith.mulf %215, %266 : vector<1x16xf32>
    %332 = arith.addf %330, %331 : vector<1x16xf32>
    %333 = arith.mulf %220, %280 : vector<1x16xf32>
    %334 = arith.addf %332, %333 : vector<1x16xf32>
    %335 = arith.mulf %210, %258 : vector<1x16xf32>
    %336 = arith.mulf %215, %272 : vector<1x16xf32>
    %337 = arith.addf %335, %336 : vector<1x16xf32>
    %338 = arith.mulf %220, %284 : vector<1x16xf32>
    %339 = arith.addf %337, %338 : vector<1x16xf32>
    %340 = arith.mulf %210, %262 : vector<1x16xf32>
    %341 = arith.mulf %215, %276 : vector<1x16xf32>
    %342 = arith.addf %340, %341 : vector<1x16xf32>
    %343 = arith.mulf %220, %290 : vector<1x16xf32>
    %344 = arith.addf %342, %343 : vector<1x16xf32>
    %345 = arith.mulf %225, %254 : vector<1x16xf32>
    %346 = arith.mulf %230, %266 : vector<1x16xf32>
    %347 = arith.addf %345, %346 : vector<1x16xf32>
    %348 = arith.mulf %235, %280 : vector<1x16xf32>
    %349 = arith.addf %347, %348 : vector<1x16xf32>
    %350 = arith.mulf %225, %258 : vector<1x16xf32>
    %351 = arith.mulf %230, %272 : vector<1x16xf32>
    %352 = arith.addf %350, %351 : vector<1x16xf32>
    %353 = arith.mulf %235, %284 : vector<1x16xf32>
    %354 = arith.addf %352, %353 : vector<1x16xf32>
    %355 = arith.mulf %225, %262 : vector<1x16xf32>
    %356 = arith.mulf %230, %276 : vector<1x16xf32>
    %357 = arith.addf %355, %356 : vector<1x16xf32>
    %358 = arith.mulf %235, %290 : vector<1x16xf32>
    %359 = arith.addf %357, %358 : vector<1x16xf32>
    %360 = vector.extract_strided_slice %50 {offsets = [12, 0], sizes = [1, 16], strides = [1, 1]} : vector<16x16xf32> to vector<1x16xf32>
    %361 = vector.extract_strided_slice %50 {offsets = [13, 0], sizes = [1, 16], strides = [1, 1]} : vector<16x16xf32> to vector<1x16xf32>
    %362 = vector.extract_strided_slice %50 {offsets = [14, 0], sizes = [1, 16], strides = [1, 1]} : vector<16x16xf32> to vector<1x16xf32>
    %363 = vector.extract_strided_slice %50 {offsets = [15, 0], sizes = [1, 16], strides = [1, 1]} : vector<16x16xf32> to vector<1x16xf32>
    %364 = arith.mulf %360, %360 : vector<1x16xf32>
    %365 = arith.mulf %361, %361 : vector<1x16xf32>
    %366 = arith.addf %364, %365 : vector<1x16xf32>
    %367 = arith.mulf %362, %362 : vector<1x16xf32>
    %368 = arith.addf %366, %367 : vector<1x16xf32>
    %369 = arith.mulf %363, %363 : vector<1x16xf32>
    %370 = arith.addf %368, %369 : vector<1x16xf32>
    %cst_43 = arith.constant 2.000000e+00 : f32
    %371 = vector.broadcast %cst_43 : f32 to vector<1x16xf32>
    %372 = arith.divf %371, %370 : vector<1x16xf32>
    %373 = arith.mulf %361, %362 : vector<1x16xf32>
    %374 = arith.mulf %363, %360 : vector<1x16xf32>
    %375 = arith.subf %373, %374 : vector<1x16xf32>
    %376 = arith.mulf %372, %375 : vector<1x16xf32>
    %377 = arith.mulf %361, %361 : vector<1x16xf32>
    %378 = arith.mulf %363, %363 : vector<1x16xf32>
    %379 = arith.addf %377, %378 : vector<1x16xf32>
    %380 = arith.mulf %372, %379 : vector<1x16xf32>
    %cst_44 = arith.constant 1.000000e+00 : f32
    %381 = vector.broadcast %cst_44 : f32 to vector<1x16xf32>
    %382 = arith.subf %381, %380 : vector<1x16xf32>
    %383 = arith.mulf %362, %363 : vector<1x16xf32>
    %384 = arith.mulf %361, %360 : vector<1x16xf32>
    %385 = arith.addf %383, %384 : vector<1x16xf32>
    %386 = arith.mulf %372, %385 : vector<1x16xf32>
    %cst_45 = arith.constant 5.000000e-01 : f32
    %387 = vector.broadcast %cst_45 : f32 to vector<1x16xf32>
    %388 = arith.mulf %387, %376 : vector<1x16xf32>
    %cst_46 = arith.constant 5.000000e-01 : f32
    %389 = vector.broadcast %cst_46 : f32 to vector<1x16xf32>
    %390 = arith.mulf %389, %382 : vector<1x16xf32>
    %cst_47 = arith.constant 5.000000e-01 : f32
    %391 = vector.broadcast %cst_47 : f32 to vector<1x16xf32>
    %392 = arith.mulf %391, %386 : vector<1x16xf32>
    %393 = arith.mulf %319, %388 : vector<1x16xf32>
    %394 = arith.mulf %324, %390 : vector<1x16xf32>
    %395 = arith.addf %393, %394 : vector<1x16xf32>
    %396 = arith.mulf %329, %392 : vector<1x16xf32>
    %397 = arith.addf %395, %396 : vector<1x16xf32>
    %398 = arith.addf %397, %302 : vector<1x16xf32>
    %399 = arith.mulf %334, %388 : vector<1x16xf32>
    %400 = arith.mulf %339, %390 : vector<1x16xf32>
    %401 = arith.addf %399, %400 : vector<1x16xf32>
    %402 = arith.mulf %344, %392 : vector<1x16xf32>
    %403 = arith.addf %401, %402 : vector<1x16xf32>
    %404 = arith.addf %403, %308 : vector<1x16xf32>
    %405 = arith.mulf %349, %388 : vector<1x16xf32>
    %406 = arith.mulf %354, %390 : vector<1x16xf32>
    %407 = arith.addf %405, %406 : vector<1x16xf32>
    %408 = arith.mulf %359, %392 : vector<1x16xf32>
    %409 = arith.addf %407, %408 : vector<1x16xf32>
    %410 = arith.addf %409, %314 : vector<1x16xf32>
    %411 = tpu.concatenate %107, %109, %111, %178, %184, %190, %302, %308, %314, %398, %404, %410 in 0 : vector<1x16xf32>, vector<1x16xf32>, vector<1x16xf32>, vector<1x16xf32>, vector<1x16xf32>, vector<1x16xf32>, vector<1x16xf32>, vector<1x16xf32>, vector<1x16xf32>, vector<1x16xf32>, vector<1x16xf32>, vector<1x16xf32> -> vector<12x16xf32>
    %c0_48 = arith.constant 0 : index
    %c0_49 = arith.constant 0 : index
    %412 = vector.load %arg10[%c0_48, %c0_49] : memref<12x16xf32, #tpu.memory_space<vmem>>, vector<12x16xf32>
    tpu.vector_store %arg10[%c0_48, %c0_49], %411 {strides = array<i32>} : memref<12x16xf32, #tpu.memory_space<vmem>>, vector<12x16xf32>,
    return
  }
  func.func @transform_0(%arg0: i32) -> (i32, i32) {
    %c0_i32 = arith.constant 0 : i32
    %c0_i32_0 = arith.constant 0 : i32
    return %arg0, %c0_i32 : i32, i32
  }
  func.func @transform_1(%arg0: i32) -> (i32, i32) {
    %c0_i32 = arith.constant 0 : i32
    %c0_i32_0 = arith.constant 0 : i32
    %c0_i32_1 = arith.constant 0 : i32
    return %c0_i32, %c0_i32_0 : i32, i32
  }
  func.func @transform_2(%arg0: i32) -> (i32, i32) {
    %c0_i32 = arith.constant 0 : i32
    %c0_i32_0 = arith.constant 0 : i32
    %c0_i32_1 = arith.constant 0 : i32
    return %c0_i32, %c0_i32_0 : i32, i32
  }
  func.func @transform_3(%arg0: i32) -> (i32, i32) {
    %c0_i32 = arith.constant 0 : i32
    %c0_i32_0 = arith.constant 0 : i32
    %c0_i32_1 = arith.constant 0 : i32
    return %c0_i32, %c0_i32_0 : i32, i32
  }
  func.func @transform_4(%arg0: i32) -> (i32, i32) {
    %c0_i32 = arith.constant 0 : i32
    %c0_i32_0 = arith.constant 0 : i32
    %c0_i32_1 = arith.constant 0 : i32
    return %c0_i32, %c0_i32_0 : i32, i32
  }
  func.func @transform_5(%arg0: i32) -> (i32, i32) {
    %c0_i32 = arith.constant 0 : i32
    %c0_i32_0 = arith.constant 0 : i32
    %c0_i32_1 = arith.constant 0 : i32
    return %c0_i32, %c0_i32_0 : i32, i32
  }
  func.func @transform_6(%arg0: i32) -> (i32, i32) {
    %c0_i32 = arith.constant 0 : i32
    %c0_i32_0 = arith.constant 0 : i32
    %c0_i32_1 = arith.constant 0 : i32
    return %c0_i32, %c0_i32_0 : i32, i32
  }
  func.func @transform_7(%arg0: i32) -> (i32, i32) {
    %c0_i32 = arith.constant 0 : i32
    %c0_i32_0 = arith.constant 0 : i32
    %c0_i32_1 = arith.constant 0 : i32
    return %c0_i32, %c0_i32_0 : i32, i32
  }
  func.func @transform_8(%arg0: i32) -> (i32, i32) {
    %c0_i32 = arith.constant 0 : i32
    %c0_i32_0 = arith.constant 0 : i32
    %c0_i32_1 = arith.constant 0 : i32
    return %c0_i32, %c0_i32_0 : i32, i32
  }
  func.func @transform_9(%arg0: i32) -> (i32, i32) {
    %c0_i32 = arith.constant 0 : i32
    %c0_i32_0 = arith.constant 0 : i32
    return %c0_i32, %arg0 : i32, i32
  }
}

</mosaic_0001>

<bundles_post_ra>
// kernel: fkopt_net_forward.1
= control target key start
LH: loop header
LB: loop body
LE: loop exit
PB: predicated region body
PF: predicated region fallthrough
CT: control target
= control target key end

     0   :  { %14 = vsyncpa [#allocation3], 0  ;;  %s12015_s0 = inlined_call_operand.vmem [shape: f32[16,3], index: 0, kind: input, shape index: {}]   ;;  %s12016_s1 = inlined_call_operand.hbm [shape: f32[3,1024], index: 1, kind: input, shape index: {}]   ;;  %s12017_s2 = inlined_call_operand.hbm [shape: f32[1,1024], index: 2, kind: input, shape index: {}]   ;;  %s12018_s3 = inlined_call_operand.hbm [shape: bf16[1024,1024], index: 3, kind: input, shape index: {}]   ;;  %s12019_s4 = inlined_call_operand.hbm [shape: f32[1,1024], index: 4, kind: input, shape index: {}]   ;;  %s12020_s5 = inlined_call_operand.hbm [shape: bf16[1024,1024], index: 5, kind: input, shape index: {}]   ;;  %s12021_s6 = inlined_call_operand.hbm [shape: f32[1,1024], index: 6, kind: input, shape index: {}]   ;;  %s12022_s7 = inlined_call_operand.vmem [shape: bf16[1024,16], index: 7, kind: input, shape index: {}]   ;;  %s12023_s8 = inlined_call_operand.hbm [shape: f32[1,16], index: 8, kind: input, shape index: {}]   ;;  %s12024_s9 = inlined_call_operand.vmem [shape: f32[12,16], index: 9, kind: output, shape index: {}]  }
   0x1   :  { %15 = vsyncpa [#allocation5], 0 }
   0x2   :  { %16 = vsyncpa [#allocation8], 0 }
   0x3   :  { %17 = vsyncpa [#allocation11], 0  ;;  %s10924_s30 = smov [#allocation4]   ;;  %s10925_s11 = smov [#allocation7]  }
   0x4   :  { %s36_s10 = sshll.u32 %s10924_s30, 4  ;;  %s58_s12 = sshll.u32 %s10925_s11, 4  ;;  %s37_s10 = int_to_ptr.vmem [resolvable:$true] %s36_s10  ;;  %s59_s12 = int_to_ptr.vmem [resolvable:$true] %s58_s12 }
   0x5   :  { %s10762_s15 = scalar_lea.hbm %s12017_s2, 128 }
   0x6   :  { %p10763_p0 = scmp.ne.s32.totalorder %s12017_s2, %s10762_s15  ;;  %p10766_p1 = scmp.lt.u32.totalorder %s10762_s15, %s12017_s2 }
   0x8   :  { %p10768_p2 = pnand %p10766_p1, %p10763_p0 }
   0xa   :  { %10771 = shalt.err (!%p10768_p2)
}
   0xb   :  { %s10772_s20 = scalar_lea.vmem %s37_s10, 128  ;;  %p10777_p4 = scmp.lt.s32.totalorder %s37_s10, %s37_s10 }
   0xc   :  { %p10773_p3 = scmp.ne.s32.totalorder %s37_s10, %s10772_s20  ;;  %p10778_p5 = scmp.lt.s32.totalorder %s10772_s20, %s10772_s20 }
   0xe   :  { %p10779_p6 = por %p10778_p5, %p10777_p4 }
  0x10   :  { %p10780_p7 = pnand %p10779_p6, %p10773_p3 }
  0x12   :  { %10783 = shalt.err (!%p10780_p7)
}
  0x13   :  { %39 = dma.hbm_to_vmem [thread:$0]  %s12017_s2, 128, %s37_s10, [#allocation5]  }
  0x14   :  { %s10784_s25 = scalar_lea.hbm %s12019_s4, 128 }
  0x15   :  { %p10785_p8 = scmp.ne.s32.totalorder %s12019_s4, %s10784_s25  ;;  %p10788_p9 = scmp.lt.u32.totalorder %s10784_s25, %s12019_s4 }
  0x17   :  { %p10790_p10 = pnand %p10788_p9, %p10785_p8 }
  0x19   :  { %10793 = shalt.err (!%p10790_p10)
}
  0x1a   :  { %s10794_s30 = scalar_lea.vmem %s59_s12, 128  ;;  %p10799_p12 = scmp.lt.s32.totalorder %s59_s12, %s59_s12 }
  0x1b   :  { %p10795_p11 = scmp.ne.s32.totalorder %s59_s12, %s10794_s30  ;;  %p10800_p13 = scmp.lt.s32.totalorder %s10794_s30, %s10794_s30 }
  0x1d   :  { %p10801_p0 = por %p10800_p13, %p10799_p12 }
  0x1f   :  { %p10802_p1 = pnand %p10801_p0, %p10795_p11 }
  0x21   :  { %10805 = shalt.err (!%p10802_p1)
}
  0x22   :  { %61 = dma.hbm_to_vmem [thread:$0]  %s12019_s4, 128, %s59_s12, [#allocation8]  }
  0x23   :  { %s10926_s11 = smov [#allocation10]   ;;  %s10927_s14 = smov [#allocation2]  }
  0x24   :  { %s80_s13 = sshll.u32 %s10926_s11, 4  ;;  %s26_s15 = sshll.u32 %s10927_s14, 4  ;;  %s81_s13 = int_to_ptr.vmem [resolvable:$true] %s80_s13  ;;  %s27_s15 = int_to_ptr.vmem [resolvable:$true] %s26_s15 }
  0x25   :  { %s10806_s18 = scalar_lea.hbm %s12021_s6, 128 }
  0x26   :  { %p10807_p2 = scmp.ne.s32.totalorder %s12021_s6, %s10806_s18  ;;  %p10810_p3 = scmp.lt.u32.totalorder %s10806_s18, %s12021_s6 }
  0x28   :  { %p10812_p4 = pnand %p10810_p3, %p10807_p2 }
  0x2a   :  { %10815 = shalt.err (!%p10812_p4)
}
  0x2b   :  { %s10816_s4 = scalar_lea.vmem %s81_s13, 128  ;;  %p10821_p6 = scmp.lt.s32.totalorder %s81_s13, %s81_s13 }
  0x2c   :  { %p10817_p5 = scmp.ne.s32.totalorder %s81_s13, %s10816_s4  ;;  %p10822_p7 = scmp.lt.s32.totalorder %s10816_s4, %s10816_s4 }
  0x2e   :  { %p10823_p8 = por %p10822_p7, %p10821_p6 }
  0x30   :  { %p10824_p9 = pnand %p10823_p8, %p10817_p5 }
  0x32   :  { %10827 = shalt.err (!%p10824_p9)
}
  0x33   :  { %83 = dma.hbm_to_vmem [thread:$0]  %s12021_s6, 128, %s81_s13, [#allocation11]  }
  0x34   :  { %s10828_s26 = scalar_lea.hbm %s12016_s1, 512 }
  0x35   :  { %p10829_p10 = scmp.ne.s32.totalorder %s12016_s1, %s10828_s26  ;;  %p10832_p11 = scmp.lt.u32.totalorder %s10828_s26, %s12016_s1 }
  0x37   :  { %p10834_p12 = pnand %p10832_p11, %p10829_p10 }
  0x39   :  { %10837 = shalt.err (!%p10834_p12)
}
  0x3a   :  { %s10838_s2 = scalar_lea.vmem %s27_s15, 512  ;;  %p10843_p0 = scmp.lt.s32.totalorder %s27_s15, %s27_s15 }
  0x3b   :  { %p10839_p13 = scmp.ne.s32.totalorder %s27_s15, %s10838_s2  ;;  %p10844_p1 = scmp.lt.s32.totalorder %s10838_s2, %s10838_s2 }
  0x3d   :  { %p10845_p2 = por %p10844_p1, %p10843_p0 }
  0x3f   :  { %p10846_p3 = pnand %p10845_p2, %p10839_p13 }
  0x41   :  { %10849 = shalt.err (!%p10846_p3)
}
  0x42   :  { %29 = dma.hbm_to_vmem [thread:$0]  %s12016_s1, 512, %s27_s15, [#allocation3]  }
  0x43   :  { %s10928_s11 = smov [#allocation6]   ;;  %s10850_s17 = scalar_lea.hbm %s12018_s3, 65536 }
  0x44   :  { %s45_s13 = sshll.u32 %s10928_s11, 4  ;;  %p10851_p4 = scmp.ne.s32.totalorder %s12018_s3, %s10850_s17  ;;  %s46_s13 = int_to_ptr.vmem [resolvable:$true] %s45_s13 }
  0x45   :  { %p10854_p5 = scmp.lt.u32.totalorder %s10850_s17, %s12018_s3 }
  0x47   :  { %p10856_p6 = pnand %p10854_p5, %p10851_p4 }
  0x49   :  { %10859 = shalt.err (!%p10856_p6)
}
  0x4a   :  { %s10860_s22 = scalar_lea.vmem %s46_s13, 65536  ;;  %p10865_p8 = scmp.lt.s32.totalorder %s46_s13, %s46_s13 }
  0x4b   :  { %p10861_p7 = scmp.ne.s32.totalorder %s46_s13, %s10860_s22  ;;  %p10866_p9 = scmp.lt.s32.totalorder %s10860_s22, %s10860_s22 }
  0x4d   :  { %p10867_p10 = por %p10866_p9, %p10865_p8 }
  0x4f   :  { %p10868_p11 = pnand %p10867_p10, %p10861_p7 }
  0x51   :  { %10871 = shalt.err (!%p10868_p11)
}
  0x52   :  { %s10929_s1 = smov 512   ;;  %s10930_s15 = smov 32  }
  0x53   :  { %51 = dma.hbm_to_vmem [thread:$0]  %s12018_s3, 65536, %s46_s13, [#allocation5], %s10929_s1, %s10929_s1, %s10930_s15  }
  0x54   :  { %s10931_s23 = smov [#allocation9]   ;;  %s10932_s25 = smov [#allocation12]  }
  0x55   :  { %s67_s24 = sshll.u32 %s10931_s23, 4  ;;  %s92_s26 = sshll.u32 %s10932_s25, 4  ;;  %s68_s24 = int_to_ptr.vmem [resolvable:$true] %s67_s24  ;;  %s93_s26 = int_to_ptr.vmem [resolvable:$true] %s92_s26 }
  0x56   :  { %s10872_s29 = scalar_lea.hbm %s12020_s5, 65536 }
  0x57   :  { %p10873_p12 = scmp.ne.s32.totalorder %s12020_s5, %s10872_s29  ;;  %p10876_p13 = scmp.lt.u32.totalorder %s10872_s29, %s12020_s5 }
  0x59   :  { %p10878_p0 = pnand %p10876_p13, %p10873_p12 }
  0x5b   :  { %10881 = shalt.err (!%p10878_p0)
}
  0x5c   :  { %s10882_s3 = scalar_lea.vmem %s68_s24, 65536  ;;  %p10887_p2 = scmp.lt.s32.totalorder %s68_s24, %s68_s24 }
  0x5d   :  { %p10883_p1 = scmp.ne.s32.totalorder %s68_s24, %s10882_s3  ;;  %p10888_p3 = scmp.lt.s32.totalorder %s10882_s3, %s10882_s3 }
  0x5f   :  { %p10889_p4 = por %p10888_p3, %p10887_p2 }
  0x61   :  { %p10890_p5 = pnand %p10889_p4, %p10883_p1 }
  0x63   :  { %10893 = shalt.err (!%p10890_p5)
}
  0x64   :  { %73 = dma.hbm_to_vmem [thread:$0]  %s12020_s5, 65536, %s68_s24, [#allocation8], %s10929_s1, %s10929_s1, %s10930_s15  }
  0x65   :  { %s10894_s17 = scalar_lea.hbm %s12023_s8, 16 }
  0x66   :  { %p10895_p6 = scmp.ne.s32.totalorder %s12023_s8, %s10894_s17  ;;  %p10898_p7 = scmp.lt.u32.totalorder %s10894_s17, %s12023_s8 }
  0x68   :  { %p10900_p8 = pnand %p10898_p7, %p10895_p6 }
  0x6a   :  { %10903 = shalt.err (!%p10900_p8)
}
  0x6b   :  { %s10904_s22 = scalar_lea.vmem %s93_s26, 16  ;;  %s10908_s4 = scalar_lea.vmem %s93_s26, 32 }
  0x6c   :  { %p10905_p9 = scmp.ne.s32.totalorder %s93_s26, %s10904_s22  ;;  %p10909_p10 = scmp.lt.s32.totalorder %s93_s26, %s93_s26 }
  0x6d   :  { %p10910_p11 = scmp.lt.s32.totalorder %s10908_s4, %s10904_s22 }
  0x6f   :  { %p10911_p12 = por %p10910_p11, %p10909_p10 }
  0x71   :  { %p10912_p13 = pnand %p10911_p12, %p10905_p9 }
  0x73   :  { %10915 = shalt.err (!%p10912_p13)
}
  0x74   :  { %95 = dma.hbm_to_vmem [thread:$0]  %s12023_s8, 16, %s93_s26, [#allocation11]  }
  0x75   :  { %10916 = dma.done.wait [#allocation3], 512  }
  0x76   :  { %10917 = vsyncadd [#allocation3], 4294966784 }
  0x77   :  { %10918 = dma.done.wait [#allocation5], 65664  }
  0x78   :  { %10919 = vsyncadd [#allocation5], 4294901632 }
  0x79   :  { %10920 = dma.done.wait [#allocation8], 65664  }
  0x7a   :  { %10921 = vsyncadd [#allocation8], 4294901632 }
  0x7b   :  { %10922 = dma.done.wait [#allocation11], 144  }
  0x7c   :  { %10923 = vsyncadd [#allocation11], 4294967152  ;;  %v10933_v0 = vmov 1   ;;  %v10934_v1 = vmov 0   ;;  %v118_v2 = vld [vmem:[%s12015_s0] sm:$0xff]  ;;  %v119_v3 = vld [vmem:[%s12015_s0 + $0x8] sm:$0xff] }
  0x7d   :  { %10686 = vset.pattern.permute.xlu1 %v10933_v0  ;;  %10685 = vset.pattern.permute.xlu0 %v10934_v1  ;;  %v548_v4 = vld [vmem:[#allocation6] sm:$0xff]  ;;  %v549_v6 = vld [vmem:[#allocation6 + $0x8] sm:$0xff]  ;;  %v10935_v27 = vmov 2   ;;  %vm9338_vm0 = vcmask 1040384   ;;  %vm9340_vm1 = vcmask 1041408   ;;  %vm9342_vm2 = vcmask 1042432  }
  0x7e   :  { %285 = vperm.xlu1 %10686, %v118_v2   ;;  %127 = vperm.xlu0 %10685, %v118_v2   ;;  %v552_v5 = vld [vmem:[#allocation6 + $0x20] sm:$0xff]  ;;  %v553_v7 = vld [vmem:[#allocation6 + $0x28] sm:$0xff]  ;;  %vm9344_vm3 = vcmask 1043456   ;;  %vm9346_vm4 = vcmask 1044480   ;;  %vm9348_vm5 = vcmask 1045504   ;;  %vm9350_vm6 = vcmask 1046528  }
  0x7f   :  { %v9368_v8 = vcombine.high %v548_v4, %v552_v5  ;;  %v9370_v9 = vcombine.high %v549_v6, %v553_v7  ;;  %v9367_v10 = vcombine.low %v548_v4, %v552_v5  ;;  %v9369_v11 = vcombine.low %v549_v6, %v553_v7  ;;  %v556_v12 = vld [vmem:[#allocation6 + $0x40] sm:$0xff]  ;;  %v557_v14 = vld [vmem:[#allocation6 + $0x48] sm:$0xff] }
  0x80   :  { %v560_v13 = vld [vmem:[#allocation6 + $0x60] sm:$0xff]  ;;  %v561_v16 = vld [vmem:[#allocation6 + $0x68] sm:$0xff]  ;;  %vm9355_vm7 = vcmask 130048   ;;  %vm9357_vm8 = vcmask 125952  }
  0x81   :  { %v9376_v15 = vcombine.high %v556_v12, %v560_v13  ;;  %3662 = vmatprep.subr.bf16.mxu0 %v9368_v8  ;;  %3834 = vmatprep.subr.bf16.mxu1 %v9370_v9  ;;  %v9378_v17 = vcombine.high %v557_v14, %v561_v16  ;;  %v564_v18 = vld [vmem:[#allocation6 + $0x80] sm:$0xff]  ;;  %v565_v20 = vld [vmem:[#allocation6 + $0x88] sm:$0xff]  ;;  %v9375_v22 = vcombine.low %v556_v12, %v560_v13 }
  0x82   :  { %289 = vperm.xlu1 %10686, %v119_v3   ;;  %132 = vperm.xlu0 %10685, %v119_v3   ;;  %v568_v19 = vld [vmem:[#allocation6 + $0xa0] sm:$0xff]  ;;  %v569_v21 = vld [vmem:[#allocation6 + $0xa8] sm:$0xff]  ;;  %v9377_v23 = vcombine.low %v557_v14, %v561_v16 }
  0x83   :  { %3663 = vmatpush1.bf16.msra.mxu0 %v9367_v10  ;;  %3835 = vmatpush1.bf16.msra.mxu1 %v9369_v11  ;;  %v9384_v24 = vcombine.high %v564_v18, %v568_v19  ;;  %v9386_v25 = vcombine.high %v565_v20, %v569_v21  ;;  %v572_v26 = vld [vmem:[#allocation6 + $0xc0] sm:$0xff]  ;;  %v573_v29 = vld [vmem:[#allocation6 + $0xc8] sm:$0xff]  ;;  %v9383_v31 = vcombine.low %v564_v18, %v568_v19 }
  0x84   :  { %3664 = vmatprep.subr.bf16.mxu0 %v9376_v15  ;;  %3836 = vmatprep.subr.bf16.mxu1 %v9378_v17  ;;  %v576_v28 = vld [vmem:[#allocation6 + $0xe0] sm:$0xff]  ;;  %v577_v30 = vld [vmem:[#allocation6 + $0xe8] sm:$0xff]  ;;  %v9385_v32 = vcombine.low %v565_v20, %v569_v21 }
  0x85   :  { %v9392_v33 = vcombine.high %v572_v26, %v576_v28  ;;  %v9394_v34 = vcombine.high %v573_v29, %v577_v30  ;;  %v580_v35 = vld [vmem:[#allocation6 + $0x100] sm:$0xff]  ;;  %v581_v37 = vld [vmem:[#allocation6 + $0x108] sm:$0xff]  ;;  %v9391_v39 = vcombine.low %v572_v26, %v576_v28  ;;  %v9393_v40 = vcombine.low %v573_v29, %v577_v30 }
  0x86   :  { %10688 = vset.pattern.permute.xlu1 %v10935_v27  ;;  %10687 = vset.pattern.permute.xlu0 %v10935_v27  ;;  %v584_v36 = vld [vmem:[#allocation6 + $0x120] sm:$0xff]  ;;  %v585_v38 = vld [vmem:[#allocation6 + $0x128] sm:$0xff] }
  0x87   :  { %401 = vperm.xlu1 %10688, %v119_v3   ;;  %397 = vperm.xlu0 %10687, %v118_v2   ;;  %v9400_v41 = vcombine.high %v580_v35, %v584_v36  ;;  %v9402_v42 = vcombine.high %v581_v37, %v585_v38  ;;  %v588_v43 = vld [vmem:[#allocation6 + $0x140] sm:$0xff]  ;;  %v589_v45 = vld [vmem:[#allocation6 + $0x148] sm:$0xff]  ;;  %v9399_v47 = vcombine.low %v580_v35, %v584_v36 }
  0x88   :  { %3665 = vmatpush1.bf16.msra.mxu0 %v9375_v22  ;;  %3837 = vmatpush1.bf16.msra.mxu1 %v9377_v23  ;;  %v592_v44 = vld [vmem:[#allocation6 + $0x160] sm:$0xff]  ;;  %v593_v46 = vld [vmem:[#allocation6 + $0x168] sm:$0xff]  ;;  %v9401_v48 = vcombine.low %v581_v37, %v585_v38 }
  0x89   :  { %3666 = vmatprep.subr.bf16.mxu0 %v9384_v24  ;;  %3838 = vmatprep.subr.bf16.mxu1 %v9386_v25  ;;  %v9408_v49 = vcombine.high %v588_v43, %v592_v44  ;;  %v9410_v50 = vcombine.high %v589_v45, %v593_v46  ;;  %v596_v51 = vld [vmem:[#allocation6 + $0x180] sm:$0xff]  ;;  %v597_v53 = vld [vmem:[#allocation6 + $0x188] sm:$0xff]  ;;  %v9407_v56 = vcombine.low %v588_v43, %v592_v44 }
  0x8a   :  { %v600_v52 = vld [vmem:[#allocation6 + $0x1a0] sm:$0xff]  ;;  %v601_v54 = vld [vmem:[#allocation6 + $0x1a8] sm:$0xff]  ;;  %v9409_v57 = vcombine.low %v589_v45, %v593_v46 }
  0x8b   :  { %v11076_v55 = vld [vmem:[#allocation6 + $0x400] sm:$0xff]  ;;  %v11080_v59 = vld [vmem:[#allocation6 + $0x408] sm:$0xff]  ;;  %v9416_v61 = vcombine.high %v596_v51, %v600_v52  ;;  %v9418_v62 = vcombine.high %v597_v53, %v601_v54  ;;  %v9415_v5 = vcombine.low %v596_v51, %v600_v52  ;;  %v9417_v6 = vcombine.low %v597_v53, %v601_v54 }
  0x8c   :  { %3667 = vmatpush1.bf16.msra.mxu0 %v9383_v31  ;;  %3839 = vmatpush1.bf16.msra.mxu1 %v9385_v32  ;;  %v11078_v58 = vld [vmem:[#allocation6 + $0x420] sm:$0xff]  ;;  %v11082_v60 = vld [vmem:[#allocation6 + $0x428] sm:$0xff] }
  0x8d   :  { %3668 = vmatprep.subr.bf16.mxu0 %v9392_v33  ;;  %3840 = vmatprep.subr.bf16.mxu1 %v9394_v34  ;;  %v604_v63 = vld [vmem:[#allocation6 + $0x1c0] sm:$0xff]  ;;  %v605_v2 = vld [vmem:[#allocation6 + $0x1c8] sm:$0xff] }
  0x8e   :  { %v608_v1 = vld [vmem:[#allocation6 + $0x1e0] sm:$0xff]  ;;  %v609_v3 = vld [vmem:[#allocation6 + $0x1e8] sm:$0xff] }
  0x8f   :  { %v612_v7 = vld [vmem:[#allocation6 + $0x200] sm:$0xff]  ;;  %v613_v9 = vld [vmem:[#allocation6 + $0x208] sm:$0xff]  ;;  %v9424_v11 = vcombine.high %v604_v63, %v608_v1  ;;  %v9426_v12 = vcombine.high %v605_v2, %v609_v3  ;;  %v9423_v13 = vcombine.low %v604_v63, %v608_v1  ;;  %v9425_v14 = vcombine.low %v605_v2, %v609_v3 }
  0x90   :  { %3669 = vmatpush1.bf16.msra.mxu0 %v9391_v39  ;;  %3841 = vmatpush1.bf16.msra.mxu1 %v9393_v40  ;;  %v616_v8 = vld [vmem:[#allocation6 + $0x220] sm:$0xff]  ;;  %v617_v10 = vld [vmem:[#allocation6 + $0x228] sm:$0xff] }
  0x91   :  { %3670 = vmatprep.subr.bf16.mxu0 %v9400_v41  ;;  %3842 = vmatprep.subr.bf16.mxu1 %v9402_v42  ;;  %v620_v15 = vld [vmem:[#allocation6 + $0x240] sm:$0xff]  ;;  %v621_v17 = vld [vmem:[#allocation6 + $0x248] sm:$0xff]  ;;  %v9432_v19 = vcombine.high %v612_v7, %v616_v8  ;;  %v9434_v20 = vcombine.high %v613_v9, %v617_v10  ;;  %v9431_v21 = vcombine.low %v612_v7, %v616_v8 }
  0x92   :  { %v624_v16 = vld [vmem:[#allocation6 + $0x260] sm:$0xff]  ;;  %v625_v18 = vld [vmem:[#allocation6 + $0x268] sm:$0xff]  ;;  %v9433_v22 = vcombine.low %v613_v9, %v617_v10 }
  0x93   :  { %v628_v23 = vld [vmem:[#allocation6 + $0x280] sm:$0xff]  ;;  %v629_v25 = vld [vmem:[#allocation6 + $0x288] sm:$0xff]  ;;  %v9440_v27 = vcombine.high %v620_v15, %v624_v16  ;;  %v9442_v28 = vcombine.high %v621_v17, %v625_v18  ;;  %v9439_v29 = vcombine.low %v620_v15, %v624_v16  ;;  %v9441_v30 = vcombine.low %v621_v17, %v625_v18 }
  0x94   :  { %3671 = vmatpush1.bf16.msra.mxu0 %v9399_v47  ;;  %3843 = vmatpush1.bf16.msra.mxu1 %v9401_v48  ;;  %v632_v24 = vld [vmem:[#allocation6 + $0x2a0] sm:$0xff]  ;;  %v633_v26 = vld [vmem:[#allocation6 + $0x2a8] sm:$0xff]  ;;  %v9496_v17 = vcombine.high %v11076_v55, %v11078_v58  ;;  %v9498_v18 = vcombine.high %v11080_v59, %v11082_v60 }
  0x95   :  { %3672 = vmatprep.subr.bf16.mxu0 %v9408_v49  ;;  %3844 = vmatprep.subr.bf16.mxu1 %v9410_v50  ;;  %v636_v31 = vld [vmem:[#allocation6 + $0x2c0] sm:$0xff]  ;;  %v637_v33 = vld [vmem:[#allocation6 + $0x2c8] sm:$0xff]  ;;  %v9448_v35 = vcombine.high %v628_v23, %v632_v24  ;;  %v9450_v36 = vcombine.high %v629_v25, %v633_v26  ;;  %v9447_v37 = vcombine.low %v628_v23, %v632_v24  ;;  %v120_v23 = vld [vmem:[#allocation2] sm:$0x77] }
  0x96   :  { %v640_v32 = vld [vmem:[#allocation6 + $0x2e0] sm:$0xff]  ;;  %v641_v34 = vld [vmem:[#allocation6 + $0x2e8] sm:$0xff]  ;;  %v9449_v38 = vcombine.low %v629_v25, %v633_v26 }
  0x97   :  { %v644_v39 = vld [vmem:[#allocation6 + $0x300] sm:$0xff]  ;;  %v645_v41 = vld [vmem:[#allocation6 + $0x308] sm:$0xff]  ;;  %v9456_v43 = vcombine.high %v636_v31, %v640_v32  ;;  %v9458_v44 = vcombine.high %v637_v33, %v641_v34  ;;  %v9455_v45 = vcombine.low %v636_v31, %v640_v32  ;;  %v9457_v46 = vcombine.low %v637_v33, %v641_v34 }
  0x98   :  { %3673 = vmatpush1.bf16.msra.mxu0 %v9407_v56  ;;  %3845 = vmatpush1.bf16.msra.mxu1 %v9409_v57  ;;  %v648_v40 = vld [vmem:[#allocation6 + $0x320] sm:$0xff]  ;;  %v649_v42 = vld [vmem:[#allocation6 + $0x328] sm:$0xff] }
  0x99   :  { %3674 = vmatprep.subr.bf16.mxu0 %v9416_v61  ;;  %3846 = vmatprep.subr.bf16.mxu1 %v9418_v62  ;;  %v652_v47 = vld [vmem:[#allocation6 + $0x340] sm:$0xff]  ;;  %v653_v49 = vld [vmem:[#allocation6 + $0x348] sm:$0xff]  ;;  %v9464_v51 = vcombine.high %v644_v39, %v648_v40  ;;  %v9466_v52 = vcombine.high %v645_v41, %v649_v42  ;;  %v9463_v53 = vcombine.low %v644_v39, %v648_v40 }
  0x9a   :  { %v656_v48 = vld [vmem:[#allocation6 + $0x360] sm:$0xff]  ;;  %v657_v50 = vld [vmem:[#allocation6 + $0x368] sm:$0xff]  ;;  %v9465_v54 = vcombine.low %v645_v41, %v649_v42 }
  0x9b   :  { %v660_v56 = vld [vmem:[#allocation6 + $0x380] sm:$0xff]  ;;  %v661_v61 = vld [vmem:[#allocation6 + $0x388] sm:$0xff]  ;;  %v9472_v63 = vcombine.high %v652_v47, %v656_v48  ;;  %v9474_v1 = vcombine.high %v653_v49, %v657_v50  ;;  %v9471_v2 = vcombine.low %v652_v47, %v656_v48  ;;  %v9473_v3 = vcombine.low %v653_v49, %v657_v50 }
  0x9c   :  { %3675 = vmatpush1.bf16.msra.mxu0 %v9415_v5  ;;  %3847 = vmatpush1.bf16.msra.mxu1 %v9417_v6  ;;  %v664_v57 = vld [vmem:[#allocation6 + $0x3a0] sm:$0xff]  ;;  %v665_v62 = vld [vmem:[#allocation6 + $0x3a8] sm:$0xff] }
  0x9d   :  { %3676 = vmatprep.subr.bf16.mxu0 %v9424_v11  ;;  %3848 = vmatprep.subr.bf16.mxu1 %v9426_v12  ;;  %v668_v5 = vld [vmem:[#allocation6 + $0x3c0] sm:$0xff]  ;;  %v669_v7 = vld [vmem:[#allocation6 + $0x3c8] sm:$0xff]  ;;  %v9480_v9 = vcombine.high %v660_v56, %v664_v57  ;;  %v9482_v10 = vcombine.high %v661_v61, %v665_v62  ;;  %v9479_v11 = vcombine.low %v660_v56, %v664_v57 }
  0x9e   :  { %v672_v6 = vld [vmem:[#allocation6 + $0x3e0] sm:$0xff]  ;;  %v673_v8 = vld [vmem:[#allocation6 + $0x3e8] sm:$0xff]  ;;  %v9481_v12 = vcombine.low %v661_v61, %v665_v62 }
  0x9f   :  { %v9487_v15 = vcombine.low %v668_v5, %v672_v6  ;;  %v9489_v16 = vcombine.low %v669_v7, %v673_v8  ;;  %v11135_v42 = vld [vmem:[#allocation6 + $0x440] sm:$0xff]  ;;  %v11151_v48 = vld [vmem:[#allocation2 + $0x10] sm:$0x77] }
  0xa0   :  { %3677 = vmatpush1.bf16.msra.mxu0 %v9423_v13  ;;  %3849 = vmatpush1.bf16.msra.mxu1 %v9425_v14  ;;  %v9488_v13 = vcombine.high %v668_v5, %v672_v6  ;;  %v9490_v14 = vcombine.high %v669_v7, %v673_v8  ;;  %v11176_v5 = vld [vmem:[#allocation6 + $0x4a8] sm:$0xff]  ;;  %v11178_v6 = vld [vmem:[#allocation6 + $0x4c0] sm:$0xff] }
  0xa1   :  { %3678 = vmatprep.subr.bf16.mxu0 %v9432_v19  ;;  %3850 = vmatprep.subr.bf16.mxu1 %v9434_v20  ;;  %v139_v19 = vlaneseq  ;;  %12040 = vst [vmem:[#allocation20_spill] sm:$0xff] %v11176_v5  ;;  %v11180_v7 = vld [vmem:[#allocation6 + $0x4e0] sm:$0xff] }
  0xa3   :  { %v11092_v20 = vshrl.u32 %v139_v19, 7 }
  0xa4   :  { %3679 = vmatpush1.bf16.msra.mxu0 %v9431_v21  ;;  %3851 = vmatpush1.bf16.msra.mxu1 %v9433_v22 }
  0xa5   :  { %3680 = vmatprep.subr.bf16.mxu0 %v9440_v27  ;;  %3852 = vmatprep.subr.bf16.mxu1 %v9442_v28  ;;  %v11095_v21 = vsub.s32 4, %v11092_v20  ;;  %v11098_v22 = vsub.s32 5, %v11092_v20  ;;  %v11101_v24 = vsub.s32 0, %v11092_v20  ;;  %v11104_v25 = vsub.s32 1, %v11092_v20 }
  0xa6   :  { %v11107_v26 = vsub.s32 6, %v11092_v20  ;;  %v11114_v31 = vsub.s32 2, %v11092_v20  ;;  %v11118_v33 = vsub.s32 3, %v11092_v20 }
  0xa7   :  { %v146_v27 = vrot.slane %v120_v23, %v11095_v21  ;;  %v299_v28 = vrot.slane %v120_v23, %v11098_v22  ;;  %v142_v34 = vrot.slane %v120_v23, %v11101_v24 }
  0xa8   :  { %3681 = vmatpush1.bf16.msra.mxu0 %v9439_v29  ;;  %3853 = vmatpush1.bf16.msra.mxu1 %v9441_v30  ;;  %v121_v29 = vld [vmem:[#allocation2 + $0x8] sm:$0x77]  ;;  %v11111_v30 = vld [vmem:[#allocation4] sm:$0xff]  ;;  %v411_v32 = vrot.slane %v120_v23, %v11107_v26  ;;  %12037 = vst [vmem:[#allocation17_spill] sm:$0xff] %v11118_v33 }
  0xa9   :  { %3682 = vmatprep.subr.bf16.mxu0 %v9448_v35  ;;  %3854 = vmatprep.subr.bf16.mxu1 %v9450_v36  ;;  %v295_v35 = vrot.slane %v120_v23, %v11104_v25  ;;  %v407_v36 = vrot.slane %v120_v23, %v11114_v31  ;;  %v11126_v39 = vrot.slane %v146_v27, %v11101_v24 }
  0xaa   :  { %v11130_v40 = vrot.slane %v11111_v30, %v11104_v25  ;;  %v11133_v41 = vrot.slane %v299_v28, %v11104_v25  ;;  %v419_v47 = vrot.slane %v121_v29, %v11107_v26  ;;  %v182_v49 = vrot.slane %v142_v34, %v11101_v24 }
  0xab   :  { %v335_v50 = vrot.slane %v295_v35, %v11104_v25  ;;  %v11162_v56 = vrot.slane %v407_v36, %v11114_v31  ;;  %v415_v8 = vrot.slane %v121_v29, %v11114_v31  ;;  %v239_v28 = vrot.slane %v11111_v30, %v11114_v31 }
  0xac   :  { %3683 = vmatpush1.bf16.msra.mxu0 %v9447_v37  ;;  %3855 = vmatpush1.bf16.msra.mxu1 %v9449_v38  ;;  %v154_v37 = vrot.slane %v121_v29, %v11095_v21  ;;  %v307_v38 = vrot.slane %v121_v29, %v11098_v22  ;;  %v251_v36 = vrot.slane %v11111_v30, %v11098_v22 }
  0xad   :  { %3684 = vmatprep.subr.bf16.mxu0 %v9456_v43  ;;  %3856 = vmatprep.subr.bf16.mxu1 %v9458_v44  ;;  %v11137_v43 = vld [vmem:[#allocation6 + $0x460] sm:$0xff]  ;;  %v11140_v44 = vrot.slane %v411_v32, %v11114_v31  ;;  %v455_v34 = vrot.slane %v415_v8, %v11114_v31 }
  0xae   :  { %v194_v57 = vrot.slane %v154_v37, %v11101_v24  ;;  %v347_v61 = vrot.slane %v307_v38, %v11104_v25 }
  0xb0   :  { %3685 = vmatpush1.bf16.msra.mxu0 %v9455_v45  ;;  %3857 = vmatpush1.bf16.msra.mxu1 %v9457_v46  ;;  %v11144_v45 = vrot.slane %v11111_v30, %v11101_v24  ;;  %v11148_v46 = vrot.slane %v11111_v30, %v11118_v33 }
  0xb1   :  { %3686 = vmatprep.subr.bf16.mxu0 %v9464_v51  ;;  %3858 = vmatprep.subr.bf16.mxu1 %v9466_v52  ;;  %v11155_v51 = vld [vmem:[#allocation6 + $0x448] sm:$0xff] }
  0xb2   :  { %v11157_v52 = vld [vmem:[#allocation6 + $0x468] sm:$0xff] }
  0xb4   :  { %3687 = vmatpush1.bf16.msra.mxu0 %v9463_v53  ;;  %3859 = vmatpush1.bf16.msra.mxu1 %v9465_v54  ;;  %v150_v53 = vrot.slane %v121_v29, %v11101_v24  ;;  %v303_v54 = vrot.slane %v121_v29, %v11104_v25 }
  0xb5   :  { %3688 = vmatprep.subr.bf16.mxu0 %v9472_v63  ;;  %3860 = vmatprep.subr.bf16.mxu1 %v9474_v1  ;;  %v11168_v63 = vld [vmem:[#allocation6 + $0x480] sm:$0xff] }
  0xb6   :  { %v11170_v1 = vld [vmem:[#allocation6 + $0x4a0] sm:$0xff] }
  0xb7   :  { %12038 = vst [vmem:[#allocation18_spill] sm:$0xff] %v11170_v1 }
  0xb8   :  { %3689 = vmatpush1.bf16.msra.mxu0 %v9471_v2  ;;  %3861 = vmatpush1.bf16.msra.mxu1 %v9473_v3  ;;  %v11172_v2 = vld [vmem:[#allocation6 + $0x488] sm:$0xff] }
  0xb9   :  { %3690 = vmatprep.subr.bf16.mxu0 %v9480_v9  ;;  %3862 = vmatprep.subr.bf16.mxu1 %v9482_v10  ;;  %12039 = vst [vmem:[#allocation19_spill] sm:$0xff] %v11172_v2  ;;  %v162_v9 = vrot.slane %v11151_v48, %v11095_v21  ;;  %v315_v10 = vrot.slane %v11151_v48, %v11098_v22 }
  0xbb   :  { %v202_v35 = vrot.slane %v162_v9, %v11101_v24  ;;  %v11219_v37 = vrot.slane %v315_v10, %v11104_v25 }
  0xbc   :  { %3691 = vmatpush1.bf16.msra.mxu0 %v9479_v11  ;;  %3863 = vmatpush1.bf16.msra.mxu1 %v9481_v12  ;;  %v11188_v11 = vrot.slane %v419_v47, %v11114_v31 }
  0xbd   :  { %3692 = vmatprep.subr.bf16.mxu0 %v9488_v13  ;;  %3864 = vmatprep.subr.bf16.mxu1 %v9490_v14  ;;  %v427_v14 = vrot.slane %v11151_v48, %v11107_v26 }
  0xc0   :  { %3693 = vmatpush1.bf16.msra.mxu0 %v9487_v15  ;;  %3865 = vmatpush1.bf16.msra.mxu1 %v9489_v16 }
  0xc1   :  { %3705 = vmatprep.subr.bf16.mxu0 %v9496_v17  ;;  %3877 = vmatprep.subr.bf16.mxu1 %v9498_v18  ;;  %v190_v17 = vrot.slane %v150_v53, %v11101_v24  ;;  %v343_v18 = vrot.slane %v303_v54, %v11104_v25  ;;  %v11225_v53 = vrot.slane %v427_v14, %v11114_v31 }
  0xfd   :  { %v11210_v29 = vpop.permute.xlu1 %285  ;;  %v11212_v32 = vpop.permute.xlu0 %127 }
  0xfe   :  { %12041 = vst [vmem:[#allocation21_spill] sm:$0xff] %v11210_v29  ;;  %12042 = vst [vmem:[#allocation22_spill] sm:$0xff] %v11212_v32  ;;  %v212_v38 = vmul.f32 %v11126_v39, %v11212_v32  ;;  %v211_v47 = vmul.f32 %v182_v49, %v11212_v32  ;;  %v365_v8 = vmul.f32 %v11133_v41, %v11210_v29 }
  0xff   :  { %v214_v9 = vmul.f32 %v194_v57, %v11212_v32  ;;  %v213_v27 = vmul.f32 %v190_v17, %v11212_v32  ;;  %v366_v10 = vmul.f32 %v343_v18, %v11210_v29  ;;  %v364_v23 = vmul.f32 %v335_v50, %v11210_v29 }
 0x100   :  { %v269_v19 = vadd.f32 %v11130_v40, %v212_v38  ;;  %v268_v15 = vadd.f32 %v11144_v45, %v211_v47  ;;  %v367_v14 = vmul.f32 %v347_v61, %v11210_v29  ;;  %v216_v3 = vmul.f32 %v202_v35, %v11212_v32 }
 0x101   :  { %v11238_v16 = vpop.permute.xlu1 %289  ;;  %v11240_v12 = vpop.permute.xlu0 %132  ;;  %v271_v62 = vadd.f32 %v11148_v46, %v214_v9  ;;  %v270_v13 = vadd.f32 %v239_v28, %v213_v27  ;;  %v369_v54 = vmul.f32 %v11219_v37, %v11210_v29 }
 0x102   :  { %v220_v38 = vmul.f32 %v11126_v39, %v11240_v12  ;;  %v373_v47 = vmul.f32 %v11133_v41, %v11238_v16  ;;  %v381_v4 = vadd.f32 %v365_v8, %v269_v19  ;;  %v219_v0 = vmul.f32 %v182_v49, %v11240_v12 }
 0x103   :  { %v372_v33 = vmul.f32 %v335_v50, %v11238_v16  ;;  %v380_v5 = vadd.f32 %v364_v23, %v268_v15  ;;  %v222_v9 = vmul.f32 %v194_v57, %v11240_v12  ;;  %v375_v27 = vmul.f32 %v347_v61, %v11238_v16 }
 0x104   :  { %v277_v32 = vadd.f32 %v11130_v40, %v220_v38  ;;  %v276_v29 = vadd.f32 %v11144_v45, %v219_v0  ;;  %v383_v2 = vadd.f32 %v367_v14, %v271_v62  ;;  %v221_v39 = vmul.f32 %v190_v17, %v11240_v12 }
 0x105   :  { %v279_v1 = vadd.f32 %v11148_v46, %v222_v9  ;;  %v374_v41 = vmul.f32 %v343_v18, %v11238_v16  ;;  %v382_v19 = vadd.f32 %v366_v10, %v270_v13  ;;  %v224_v49 = vmul.f32 %v202_v35, %v11240_v12 }
 0x106   :  { %v11260_v50 = vpop.permute.xlu1 %401  ;;  %v11262_v15 = vpop.permute.xlu0 %397  ;;  %v389_v57 = vadd.f32 %v373_v47, %v277_v32  ;;  %v388_v61 = vadd.f32 %v372_v33, %v276_v29  ;;  %v278_v23 = vadd.f32 %v239_v28, %v221_v39  ;;  %v273_v40 = vadd.f32 %v251_v36, %v216_v3 }
 0x107   :  { %v477_v0 = vmul.f32 %v11140_v44, %v11262_v15  ;;  %v485_v45 = vmul.f32 %v11140_v44, %v11260_v50  ;;  %v476_v46 = vmul.f32 %v11162_v56, %v11262_v15  ;;  %v484_v62 = vmul.f32 %v11162_v56, %v11260_v50 }
 0x108   :  { %v391_v13 = vadd.f32 %v375_v27, %v279_v1  ;;  %v479_v17 = vmul.f32 %v11188_v11, %v11262_v15  ;;  %v487_v33 = vmul.f32 %v11188_v11, %v11260_v50  ;;  %v390_v3 = vadd.f32 %v374_v41, %v278_v23 }
 0x109   :  { %v493_v18 = vadd.f32 %v477_v0, %v381_v4  ;;  %v501_v28 = vadd.f32 %v485_v45, %v389_v57  ;;  %v492_v29 = vadd.f32 %v476_v46, %v380_v5  ;;  %v500_v32 = vadd.f32 %v484_v62, %v388_v61 }
 0x10a   :  { %v495_v35 = vadd.f32 %v479_v17, %v383_v2  ;;  %v503_v44 = vadd.f32 %v487_v33, %v391_v13  ;;  %v478_v8 = vmul.f32 %v455_v34, %v11262_v15  ;;  %v486_v10 = vmul.f32 %v455_v34, %v11260_v50 }
 0x10b   :  { %v509_v14 = vmul.f32 0.01, %v493_v18  ;;  %v517_v56 = vmul.f32 0.01, %v501_v28  ;;  %v508_v1 = vmul.f32 0.01, %v492_v29  ;;  %v281_v38 = vadd.f32 %v251_v36, %v224_v49 }
 0x10c   :  { %v516_v47 = vmul.f32 0.01, %v500_v32  ;;  %v511_v9 = vmul.f32 0.01, %v495_v35  ;;  %v519_v27 = vmul.f32 0.01, %v503_v44  ;;  %v494_v39 = vadd.f32 %v478_v8, %v382_v19 }
 0x10d   :  { %v525_v11 = vmax.f32 %v493_v18, %v509_v14  ;;  %v533_v41 = vmax.f32 %v501_v28, %v517_v56  ;;  %v524_v4 = vmax.f32 %v492_v29, %v508_v1  ;;  %v502_v57 = vadd.f32 %v486_v10, %v390_v3  ;;  %v11300_v3 = vld [vmem:[#allocation6 + $0x4e8] sm:$0xff]  ;;  %v11319_v10 = vld [vmem:[#allocation6 + $0x500] sm:$0xff] }
 0x10e   :  { %v532_v5 = vmax.f32 %v500_v32, %v516_v47  ;;  %v527_v61 = vmax.f32 %v495_v35, %v511_v9  ;;  %v535_v2 = vmax.f32 %v503_v44, %v519_v27  ;;  %v510_v23 = vmul.f32 0.01, %v494_v39 }
 0x10f   :  { %v11278_v0 = vpack.c.bf16 %v533_v41, %v525_v11  ;;  %v518_v45 = vmul.f32 0.01, %v502_v57  ;;  %v377_v34 = vmul.f32 %v11219_v37, %v11238_v16  ;;  %v385_v46 = vadd.f32 %v369_v54, %v273_v40  ;;  %v11292_v37 = vld [vmem:[#allocation2 + $0x18] sm:$0x77]  ;;  %v11298_v40 = vld [vmem:[#allocation6 + $0x4c8] sm:$0xff] }
 0x110   :  { %v11282_v36 = vpack.c.bf16 %v532_v5, %v524_v4  ;;  %v526_v49 = vmax.f32 %v494_v39, %v510_v23  ;;  %v481_v19 = vmul.f32 %v11225_v53, %v11262_v15  ;;  %v311_v62 = vrot.slane %v11151_v48, %v11104_v25  ;;  %v12050_v23 = vld [vmem:[#allocation18_spill] sm:$0xff] }
 0x111   :  { %3694 = vmatprep.mubr.bf16.mxu0 %v11278_v0  ;;  %3866 = vmatprep.mubr.bf16.mxu1 %v11278_v0  ;;  %v534_v13 = vmax.f32 %v502_v57, %v518_v45  ;;  %v393_v17 = vadd.f32 %v377_v34, %v281_v38  ;;  %v489_v33 = vmul.f32 %v11225_v53, %v11260_v50  ;;  %v11315_v8 = vsub.s32 7, %v11092_v20  ;;  %v12052_v34 = vld [vmem:[#allocation19_spill] sm:$0xff] }
 0x112   :  { %3695 = vmatmul.mubr.bf16.vlgmr.msra.gmra.mrb[0].mxu0 %v11282_v36  ;;  %3867 = vmatmul.mubr.bf16.vlgmr.msra.gmra.mrb[0].mxu1 %v11282_v36  ;;  %v11296_v54 = vpack.c.bf16 %v535_v2, %v527_v61  ;;  %v497_v18 = vadd.f32 %v481_v19, %v385_v46  ;;  %v423_v28 = vrot.slane %v11151_v48, %v11114_v31  ;;  %v12053_v46 = vld [vmem:[#allocation20_spill] sm:$0xff]  ;;  %v12055_v19 = vld [vmem:[#allocation22_spill] sm:$0xff] }
 0x113   :  { %v12043_v29 = vcombine.low %v11076_v55, %v11078_v58  ;;  %v12044_v53 = vcombine.low %v11080_v59, %v11082_v60  ;;  %v9520_v32 = vcombine.high %v11178_v6, %v11180_v7  ;;  %v11312_v35 = vpack.c.bf16 %v534_v13, %v526_v49  ;;  %v11321_v55 = vld [vmem:[#allocation6 + $0x520] sm:$0xff] }
 0x114   :  { %v505_v44 = vadd.f32 %v489_v33, %v393_v17  ;;  %3737 = vmatprep.mubr.bf16.mxu0 %v11296_v54  ;;  %3909 = vmatprep.mubr.bf16.mxu1 %v11296_v54  ;;  %v513_v58 = vmul.f32 0.01, %v497_v18  ;;  %v12045_v59 = vrot.slane %v11151_v48, %v11101_v24  ;;  %v170_v14 = vrot.slane %v11292_v37, %v11095_v21  ;;  %v12056_v33 = vld [vmem:[#allocation21_spill] sm:$0xff] }
 0x115   :  { %3706 = vmatpush1.bf16.msra.mxu0 %v12043_v29  ;;  %3878 = vmatpush1.bf16.msra.mxu1 %v12044_v53  ;;  %v323_v20 = vrot.slane %v11292_v37, %v11098_v22  ;;  %v12046_v56 = vcombine.high %v11135_v42, %v11137_v43  ;;  %v12047_v1 = vcombine.high %v11155_v51, %v11157_v52 }
 0x116   :  { %v198_v60 = vrot.slane %v12045_v59, %v11101_v24  ;;  %v9521_v38 = vcombine.low %v11298_v40, %v11300_v3  ;;  %v9522_v48 = vcombine.high %v11298_v40, %v11300_v3  ;;  %v521_v47 = vmul.f32 0.01, %v505_v44 }
 0x117   :  { %3707 = vmatprep.subr.bf16.mxu0 %v12046_v56  ;;  %3879 = vmatprep.subr.bf16.mxu1 %v12047_v1  ;;  %v351_v9 = vrot.slane %v311_v62, %v11104_v25  ;;  %v529_v27 = vmax.f32 %v497_v18, %v513_v58  ;;  %v247_v39 = vrot.slane %v11111_v30, %v11095_v21  ;;  %v11371_v18 = vld [vmem:[#allocation6 + $0x540] sm:$0xff] }
 0x118   :  { %v463_v11 = vrot.slane %v423_v28, %v11114_v31  ;;  %v435_v41 = vrot.slane %v11292_v37, %v11107_v26  ;;  %v12048_v4 = vcombine.low %v11135_v42, %v11137_v43  ;;  %v12049_v57 = vcombine.low %v11155_v51, %v11157_v52  ;;  %v709_v42 = vld [vmem:[#allocation6 + $0x508] sm:$0xff]  ;;  %v11373_v28 = vld [vmem:[#allocation6 + $0x560] sm:$0xff] }
 0x119   :  { %v9527_v5 = vcombine.low %v11319_v10, %v11321_v55  ;;  %v9528_v61 = vcombine.high %v11319_v10, %v11321_v55  ;;  %v537_v2 = vmax.f32 %v505_v44, %v521_v47  ;;  %v12051_v45 = vcombine.high %v11168_v63, %v12050_v23  ;;  %v713_v43 = vld [vmem:[#allocation6 + $0x528] sm:$0xff] }
 0x11a   :  { %3708 = vmatpush1.bf16.msra.mxu0 %v12048_v4  ;;  %3880 = vmatpush1.bf16.msra.mxu1 %v12049_v57  ;;  %v12054_v49 = vcombine.high %v12052_v34, %v12053_v46  ;;  %v215_v51 = vmul.f32 %v198_v60, %v12055_v19  ;;  %v210_v52 = vrot.slane %v170_v14, %v11101_v24 }
 0x11b   :  { %3709 = vmatprep.subr.bf16.mxu0 %v12051_v45  ;;  %v363_v62 = vrot.slane %v323_v20, %v11104_v25  ;;  %v11366_v13 = vpack.c.bf16 %v537_v2, %v529_v27  ;;  %v223_v17 = vmul.f32 %v198_v60, %v11240_v12  ;;  %v368_v40 = vmul.f32 %v351_v9, %v12056_v33 }
 0x11c   :  { %3881 = vmatprep.subr.bf16.mxu1 %v12054_v49  ;;  %v376_v3 = vmul.f32 %v351_v9, %v11238_v16  ;;  %v272_v29 = vadd.f32 %v247_v39, %v215_v51  ;;  %v480_v53 = vmul.f32 %v463_v11, %v11262_v15  ;;  %v259_v44 = vrot.slane %v11111_v30, %v11315_v8  ;;  %v717_v9 = vld [vmem:[#allocation6 + $0x548] sm:$0xff] }
 0x11d   :  { %v475_v10 = vrot.slane %v435_v41, %v11114_v31  ;;  %v12057_v55 = vcombine.low %v11168_v63, %v12050_v23  ;;  %v12058_v58 = vcombine.low %v12052_v34, %v12053_v46  ;;  %v9529_v59 = vcombine.low %v709_v42, %v713_v43  ;;  %v721_v63 = vld [vmem:[#allocation6 + $0x568] sm:$0xff]  ;;  %v724_v46 = vld [vmem:[#allocation6 + $0x580] sm:$0xff] }
 0x11e   :  { %v280_v60 = vadd.f32 %v247_v39, %v223_v17  ;;  %v488_v14 = vmul.f32 %v463_v11, %v11260_v50  ;;  %v9530_v20 = vcombine.high %v709_v42, %v713_v43  ;;  %v384_v56 = vadd.f32 %v368_v40, %v272_v29 }
 0x11f   :  { %3710 = vmatpush1.bf16.msra.mxu0 %v12057_v55  ;;  %3882 = vmatpush1.bf16.msra.mxu1 %v12058_v58  ;;  %v218_v1 = vmul.f32 %v210_v52, %v12055_v19  ;;  %v9536_v47 = vcombine.high %v11371_v18, %v11373_v28  ;;  %v226_v41 = vmul.f32 %v210_v52, %v11240_v12  ;;  %v728_v52 = vld [vmem:[#allocation6 + $0x5a0] sm:$0xff] }
 0x120   :  { %3711 = vmatprep.subr.bf16.mxu0 %v9520_v32  ;;  %3883 = vmatprep.subr.bf16.mxu1 %v9522_v48  ;;  %v392_v27 = vadd.f32 %v376_v3, %v280_v60  ;;  %v371_v4 = vmul.f32 %v363_v62, %v12056_v33  ;;  %v496_v57 = vadd.f32 %v480_v53, %v384_v56  ;;  %v736_v60 = vld [vmem:[#allocation6 + $0x5e0] sm:$0xff] }
 0x121   :  { %v275_v39 = vadd.f32 %v259_v44, %v218_v1  ;;  %v379_v11 = vmul.f32 %v363_v62, %v11238_v16  ;;  %v483_v32 = vmul.f32 %v475_v10, %v11262_v15  ;;  %v12059_v48 = vcombine.low %v11178_v6, %v11180_v7  ;;  %v725_v6 = vld [vmem:[#allocation6 + $0x588] sm:$0xff] }
 0x122   :  { %v504_v2 = vadd.f32 %v488_v14, %v392_v27  ;;  %v283_v23 = vadd.f32 %v259_v44, %v226_v41  ;;  %v491_v45 = vmul.f32 %v475_v10, %v11260_v50  ;;  %v9538_v34 = vcombine.high %v717_v9, %v721_v63  ;;  %v729_v7 = vld [vmem:[#allocation6 + $0x5a8] sm:$0xff]  ;;  %v732_v10 = vld [vmem:[#allocation6 + $0x5c0] sm:$0xff] }
 0x123   :  { %3712 = vmatpush1.bf16.msra.mxu0 %v12059_v48  ;;  %3884 = vmatpush1.bf16.msra.mxu1 %v9521_v38  ;;  %v512_v49 = vmul.f32 0.01, %v496_v57  ;;  %v387_v42 = vadd.f32 %v371_v4, %v275_v39  ;;  %v166_v43 = vrot.slane %v11292_v37, %v11101_v24  ;;  %v9535_v51 = vcombine.low %v11371_v18, %v11373_v28  ;;  %v733_v14 = vld [vmem:[#allocation6 + $0x5c8] sm:$0xff]  ;;  %v744_v27 = vld [vmem:[#allocation6 + $0x620] sm:$0xff] }
 0x124   :  { %3713 = vmatprep.subr.bf16.mxu0 %v9528_v61  ;;  %3885 = vmatprep.subr.bf16.mxu1 %v9530_v20  ;;  %v520_v38 = vmul.f32 0.01, %v504_v2  ;;  %v395_v62 = vadd.f32 %v379_v11, %v283_v23  ;;  %v9537_v17 = vcombine.low %v717_v9, %v721_v63  ;;  %v319_v61 = vrot.slane %v11292_v37, %v11104_v25  ;;  %v737_v20 = vld [vmem:[#allocation6 + $0x5e8] sm:$0xff]  ;;  %v740_v63 = vld [vmem:[#allocation6 + $0x600] sm:$0xff] }
 0x125   :  { %v528_v40 = vmax.f32 %v496_v57, %v512_v49  ;;  %v499_v3 = vadd.f32 %v483_v32, %v387_v42  ;;  %v431_v44 = vrot.slane %v11292_v37, %v11114_v31  ;;  %v9544_v18 = vcombine.high %v724_v46, %v728_v52  ;;  %v741_v48 = vld [vmem:[#allocation6 + $0x608] sm:$0xff] }
 0x126   :  { %v536_v29 = vmax.f32 %v504_v2, %v520_v38  ;;  %v507_v53 = vadd.f32 %v491_v45, %v395_v62  ;;  %v9546_v28 = vcombine.high %v725_v6, %v729_v7  ;;  %v206_v58 = vrot.slane %v166_v43, %v11101_v24  ;;  %v745_v2 = vld [vmem:[#allocation6 + $0x628] sm:$0xff] }
 0x127   :  { %3714 = vmatpush1.bf16.msra.mxu0 %v9527_v5  ;;  %3886 = vmatpush1.bf16.msra.mxu1 %v9529_v59  ;;  %v515_v55 = vmul.f32 0.01, %v499_v3  ;;  %v9543_v59 = vcombine.low %v724_v46, %v728_v52  ;;  %v255_v9 = vrot.slane %v11111_v30, %v11107_v26  ;;  %v359_v37 = vrot.slane %v319_v61, %v11104_v25  ;;  %v748_v52 = vld [vmem:[#allocation6 + $0x640] sm:$0xff]  ;;  %v749_v38 = vld [vmem:[#allocation6 + $0x648] sm:$0xff] }
 0x128   :  { %3715 = vmatprep.subr.bf16.mxu0 %v9536_v47  ;;  %3887 = vmatprep.subr.bf16.mxu1 %v9538_v34  ;;  %v11406_v56 = vpack.c.bf16 %v536_v29, %v528_v40  ;;  %v523_v5 = vmul.f32 0.01, %v507_v53  ;;  %v9545_v47 = vcombine.low %v725_v6, %v729_v7  ;;  %v471_v4 = vrot.slane %v431_v44, %v11114_v31  ;;  %v753_v62 = vld [vmem:[#allocation6 + $0x668] sm:$0xff]  ;;  %v756_v29 = vld [vmem:[#allocation6 + $0x680] sm:$0xff] }
 0x129   :  { %v531_v1 = vmax.f32 %v499_v3, %v515_v55  ;;  %v9552_v57 = vcombine.high %v732_v10, %v736_v60  ;;  %v9554_v39 = vcombine.high %v733_v14, %v737_v20  ;;  %v217_v11 = vmul.f32 %v206_v58, %v12055_v19  ;;  %v760_v44 = vld [vmem:[#allocation6 + $0x6a0] sm:$0xff] }
 0x12a   :  { %v539_v41 = vmax.f32 %v507_v53, %v523_v5  ;;  %v9551_v32 = vcombine.low %v732_v10, %v736_v60  ;;  %v225_v23 = vmul.f32 %v206_v58, %v11240_v12  ;;  %v9553_v45 = vcombine.low %v733_v14, %v737_v20  ;;  %v752_v12 = vld [vmem:[#allocation6 + $0x660] sm:$0xff] }
 0x12b   :  { %3716 = vmatpush1.bf16.msra.mxu0 %v9535_v51  ;;  %3888 = vmatpush1.bf16.msra.mxu1 %v9537_v17  ;;  %v9560_v34 = vcombine.high %v740_v63, %v744_v27  ;;  %v274_v46 = vadd.f32 %v255_v9, %v217_v11  ;;  %v370_v49 = vmul.f32 %v359_v37, %v12056_v33  ;;  %v764_v5 = vld [vmem:[#allocation6 + $0x6c0] sm:$0xff]  ;;  %v777_v11 = vld [vmem:[#allocation6 + $0x728] sm:$0xff] }
 0x12c   :  { %3717 = vmatprep.subr.bf16.mxu0 %v9544_v18  ;;  %3889 = vmatprep.subr.bf16.mxu1 %v9546_v28  ;;  %v11413_v30 = vpack.c.bf16 %v539_v41, %v531_v1  ;;  %v282_v42 = vadd.f32 %v255_v9, %v225_v23  ;;  %v378_v43 = vmul.f32 %v359_v37, %v11238_v16  ;;  %v757_v18 = vld [vmem:[#allocation6 + $0x688] sm:$0xff] }
 0x12d   :  { %v482_v51 = vmul.f32 %v471_v4, %v11262_v15  ;;  %v9562_v19 = vcombine.high %v741_v48, %v745_v2  ;;  %v386_v6 = vadd.f32 %v370_v49, %v274_v46  ;;  %v490_v7 = vmul.f32 %v471_v4, %v11260_v50  ;;  %v761_v28 = vld [vmem:[#allocation6 + $0x6a8] sm:$0xff]  ;;  %v772_v4 = vld [vmem:[#allocation6 + $0x700] sm:$0xff] }
 0x12e   :  { %v394_v17 = vadd.f32 %v378_v43, %v282_v42  ;;  %v9559_v33 = vcombine.low %v740_v63, %v744_v27  ;;  %v9561_v3 = vcombine.low %v741_v48, %v745_v2  ;;  %v9568_v16 = vcombine.high %v748_v52, %v752_v12  ;;  %v765_v1 = vld [vmem:[#allocation6 + $0x6c8] sm:$0xff] }
 0x12f   :  { %3718 = vmatpush1.bf16.msra.mxu0 %v9543_v59  ;;  %3890 = vmatpush1.bf16.msra.mxu1 %v9545_v47  ;;  %v498_v40 = vadd.f32 %v482_v51, %v386_v6  ;;  %v9570_v15 = vcombine.high %v749_v38, %v753_v62  ;;  %v9567_v55 = vcombine.low %v748_v52, %v752_v12  ;;  %v768_v59 = vld [vmem:[#allocation6 + $0x6e0] sm:$0xff]  ;;  %v769_v9 = vld [vmem:[#allocation6 + $0x6e8] sm:$0xff] }
 0x130   :  { %3719 = vmatprep.subr.bf16.mxu0 %v9552_v57  ;;  %3891 = vmatprep.subr.bf16.mxu1 %v9554_v39  ;;  %v506_v61 = vadd.f32 %v490_v7, %v394_v17  ;;  %v9569_v58 = vcombine.low %v749_v38, %v753_v62  ;;  %v9576_v14 = vcombine.high %v756_v29, %v760_v44  ;;  %v776_v57 = vld [vmem:[#allocation6 + $0x720] sm:$0xff]  ;;  %v773_v39 = vld [vmem:[#allocation6 + $0x708] sm:$0xff] }
 0x131   :  { %v514_v53 = vmul.f32 0.01, %v498_v40  ;;  %v9578_v20 = vcombine.high %v757_v18, %v761_v28  ;;  %v9575_v47 = vcombine.low %v756_v29, %v760_v44  ;;  %v9577_v63 = vcombine.low %v757_v18, %v761_v28  ;;  %v781_v46 = vld [vmem:[#allocation6 + $0x748] sm:$0xff]  ;;  %v788_v52 = vld [vmem:[#allocation6 + $0x780] sm:$0xff] }
 0x132   :  { %v522_v50 = vmul.f32 0.01, %v506_v61  ;;  %v9584_v27 = vcombine.high %v764_v5, %v768_v59  ;;  %v9586_v41 = vcombine.high %v765_v1, %v769_v9  ;;  %v9585_v48 = vcombine.low %v765_v1, %v769_v9  ;;  %v785_v49 = vld [vmem:[#allocation6 + $0x768] sm:$0xff]  ;;  %v792_v6 = vld [vmem:[#allocation6 + $0x7a0] sm:$0xff] }
 0x133   :  { %3720 = vmatpush1.bf16.msra.mxu0 %v9551_v32  ;;  %3892 = vmatpush1.bf16.msra.mxu1 %v9553_v45  ;;  %v530_v10 = vmax.f32 %v498_v40, %v514_v53  ;;  %v9583_v32 = vcombine.low %v764_v5, %v768_v59  ;;  %v9592_v2 = vcombine.high %v772_v4, %v776_v57  ;;  %v780_v45 = vld [vmem:[#allocation6 + $0x740] sm:$0xff]  ;;  %v789_v7 = vld [vmem:[#allocation6 + $0x788] sm:$0xff] }
 0x134   :  { %3721 = vmatprep.subr.bf16.mxu0 %v9560_v34  ;;  %3893 = vmatprep.subr.bf16.mxu1 %v9562_v19  ;;  %v538_v60 = vmax.f32 %v506_v61, %v522_v50  ;;  %v9594_v23 = vcombine.high %v773_v39, %v777_v11  ;;  %v784_v34 = vld [vmem:[#allocation6 + $0x760] sm:$0xff]  ;;  %v9591_v42 = vcombine.low %v772_v4, %v776_v57  ;;  %v793_v12 = vld [vmem:[#allocation6 + $0x7a8] sm:$0xff] }
 0x135   :  { %v9593_v43 = vcombine.low %v773_v39, %v777_v11  ;;  %v9600_v51 = vcombine.high %v780_v45, %v784_v34  ;;  %v9602_v19 = vcombine.high %v781_v46, %v785_v49  ;;  %v9599_v38 = vcombine.low %v780_v45, %v784_v34  ;;  %v797_v61 = vld [vmem:[#allocation6 + $0x7c8] sm:$0xff]  ;;  %v804_v18 = vld [vmem:[#allocation6 + $0x800] sm:$0xff] }
 0x136   :  { %v11420_v37 = vpack.c.bf16 %v538_v60, %v530_v10  ;;  %v9601_v62 = vcombine.low %v781_v46, %v785_v49  ;;  %v9608_v17 = vcombine.high %v788_v52, %v792_v6  ;;  %v9610_v40 = vcombine.high %v789_v7, %v793_v12  ;;  %v808_v28 = vld [vmem:[#allocation6 + $0x820] sm:$0xff]  ;;  %v805_v50 = vld [vmem:[#allocation6 + $0x808] sm:$0xff] }
 0x137   :  { %3722 = vmatpush1.bf16.msra.mxu0 %v9559_v33  ;;  %3894 = vmatpush1.bf16.msra.mxu1 %v9561_v3  ;;  %v796_v33 = vld [vmem:[#allocation6 + $0x7c0] sm:$0xff]  ;;  %v9609_v29 = vcombine.low %v789_v7, %v793_v12  ;;  %v809_v10 = vld [vmem:[#allocation6 + $0x828] sm:$0xff]  ;;  %v9624_v60 = vcombine.high %v804_v18, %v808_v28  ;;  %v9623_v9 = vcombine.low %v804_v18, %v808_v28 }
 0x138   :  { %3723 = vmatprep.subr.bf16.mxu0 %v9568_v16  ;;  %3895 = vmatprep.subr.bf16.mxu1 %v9570_v15  ;;  %v800_v3 = vld [vmem:[#allocation6 + $0x7e0] sm:$0xff]  ;;  %v801_v16 = vld [vmem:[#allocation6 + $0x7e8] sm:$0xff]  ;;  %v9607_v15 = vcombine.low %v788_v52, %v792_v6 }
 0x139   :  { %v9616_v53 = vcombine.high %v796_v33, %v800_v3  ;;  %v9618_v44 = vcombine.high %v797_v61, %v801_v16  ;;  %v816_v5 = vld [vmem:[#allocation6 + $0x860] sm:$0xff]  ;;  %v813_v59 = vld [vmem:[#allocation6 + $0x848] sm:$0xff] }
 0x13a   :  { %v817_v1 = vld [vmem:[#allocation6 + $0x868] sm:$0xff]  ;;  %v824_v4 = vld [vmem:[#allocation6 + $0x8a0] sm:$0xff] }
 0x13b   :  { %3724 = vmatpush1.bf16.msra.mxu0 %v9567_v55  ;;  %3896 = vmatpush1.bf16.msra.mxu1 %v9569_v58  ;;  %v9615_v55 = vcombine.low %v796_v33, %v800_v3  ;;  %v9617_v58 = vcombine.low %v797_v61, %v801_v16  ;;  %v821_v57 = vld [vmem:[#allocation6 + $0x888] sm:$0xff]  ;;  %v832_v45 = vld [vmem:[#allocation6 + $0x8e0] sm:$0xff] }
 0x13c   :  { %3725 = vmatprep.subr.bf16.mxu0 %v9576_v14  ;;  %3897 = vmatprep.subr.bf16.mxu1 %v9578_v20  ;;  %v9626_v14 = vcombine.high %v805_v50, %v809_v10  ;;  %v812_v20 = vld [vmem:[#allocation6 + $0x840] sm:$0xff]  ;;  %v825_v39 = vld [vmem:[#allocation6 + $0x8a8] sm:$0xff] }
 0x13d   :  { %v9631_v11 = vcombine.low %v812_v20, %v816_v5  ;;  %v829_v34 = vld [vmem:[#allocation6 + $0x8c8] sm:$0xff]  ;;  %v840_v52 = vld [vmem:[#allocation6 + $0x920] sm:$0xff] }
 0x13e   :  { %v833_v46 = vld [vmem:[#allocation6 + $0x8e8] sm:$0xff]  ;;  %v848_v33 = vld [vmem:[#allocation6 + $0x960] sm:$0xff] }
 0x13f   :  { %3726 = vmatpush1.bf16.msra.mxu0 %v9575_v47  ;;  %3898 = vmatpush1.bf16.msra.mxu1 %v9577_v63  ;;  %v9625_v47 = vcombine.low %v805_v50, %v809_v10  ;;  %v9632_v63 = vcombine.high %v812_v20, %v816_v5  ;;  %v837_v6 = vld [vmem:[#allocation6 + $0x908] sm:$0xff]  ;;  %v856_v18 = vld [vmem:[#allocation6 + $0x9a0] sm:$0xff] }
 0x140   :  { %3727 = vmatprep.subr.bf16.mxu0 %v9584_v27  ;;  %3899 = vmatprep.subr.bf16.mxu1 %v9586_v41  ;;  %v9634_v27 = vcombine.high %v813_v59, %v817_v1  ;;  %v820_v41 = vld [vmem:[#allocation6 + $0x880] sm:$0xff]  ;;  %v841_v7 = vld [vmem:[#allocation6 + $0x928] sm:$0xff] }
 0x141   :  { %v9639_v49 = vcombine.low %v820_v41, %v824_v4  ;;  %v845_v3 = vld [vmem:[#allocation6 + $0x948] sm:$0xff]  ;;  %v864_v20 = vld [vmem:[#allocation6 + $0x9e0] sm:$0xff] }
 0x142   :  { %v849_v61 = vld [vmem:[#allocation6 + $0x968] sm:$0xff] }
 0x143   :  { %3728 = vmatpush1.bf16.msra.mxu0 %v9583_v32  ;;  %3900 = vmatpush1.bf16.msra.mxu1 %v9585_v48  ;;  %v9633_v32 = vcombine.low %v813_v59, %v817_v1  ;;  %v9640_v48 = vcombine.high %v820_v41, %v824_v4  ;;  %v853_v28 = vld [vmem:[#allocation6 + $0x988] sm:$0xff]  ;;  %v872_v41 = vld [vmem:[#allocation6 + $0xa20] sm:$0xff] }
 0x144   :  { %3729 = vmatprep.subr.bf16.mxu0 %v9592_v2  ;;  %3901 = vmatprep.subr.bf16.mxu1 %v9594_v23  ;;  %v9642_v2 = vcombine.high %v821_v57, %v825_v39  ;;  %v828_v23 = vld [vmem:[#allocation6 + $0x8c0] sm:$0xff]  ;;  %v857_v50 = vld [vmem:[#allocation6 + $0x9a8] sm:$0xff] }
 0x145   :  { %v9647_v12 = vcombine.low %v828_v23, %v832_v45  ;;  %v861_v5 = vld [vmem:[#allocation6 + $0x9c8] sm:$0xff] }
 0x146   :  { %v865_v59 = vld [vmem:[#allocation6 + $0x9e8] sm:$0xff] }
 0x147   :  { %3730 = vmatpush1.bf16.msra.mxu0 %v9591_v42  ;;  %3902 = vmatpush1.bf16.msra.mxu1 %v9593_v43  ;;  %v9641_v42 = vcombine.low %v821_v57, %v825_v39  ;;  %v9648_v43 = vcombine.high %v828_v23, %v832_v45  ;;  %v869_v4 = vld [vmem:[#allocation6 + $0xa08] sm:$0xff]  ;;  %v880_v23 = vld [vmem:[#allocation6 + $0xa60] sm:$0xff] }
 0x148   :  { %3731 = vmatprep.subr.bf16.mxu0 %v9600_v51  ;;  %3903 = vmatprep.subr.bf16.mxu1 %v9602_v19  ;;  %v9650_v51 = vcombine.high %v829_v34, %v833_v46  ;;  %v836_v19 = vld [vmem:[#allocation6 + $0x900] sm:$0xff]  ;;  %v873_v57 = vld [vmem:[#allocation6 + $0xa28] sm:$0xff] }
 0x149   :  { %v9655_v16 = vcombine.low %v836_v19, %v840_v52  ;;  %v877_v45 = vld [vmem:[#allocation6 + $0xa48] sm:$0xff] }
 0x14b   :  { %3732 = vmatpush1.bf16.msra.mxu0 %v9599_v38  ;;  %3904 = vmatpush1.bf16.msra.mxu1 %v9601_v62  ;;  %v9649_v38 = vcombine.low %v829_v34, %v833_v46  ;;  %v9656_v62 = vcombine.high %v836_v19, %v840_v52  ;;  %v881_v34 = vld [vmem:[#allocation6 + $0xa68] sm:$0xff]  ;;  %v888_v19 = vld [vmem:[#allocation6 + $0xaa0] sm:$0xff] }
 0x14c   :  { %3733 = vmatprep.subr.bf16.mxu0 %v9608_v17  ;;  %3905 = vmatprep.subr.bf16.mxu1 %v9610_v40  ;;  %v9658_v17 = vcombine.high %v837_v6, %v841_v7  ;;  %v844_v40 = vld [vmem:[#allocation6 + $0x940] sm:$0xff]  ;;  %v885_v52 = vld [vmem:[#allocation6 + $0xa88] sm:$0xff] }
 0x14d   :  { %v9663_v10 = vcombine.low %v844_v40, %v848_v33 }
 0x14f   :  { %3734 = vmatpush1.bf16.msra.mxu0 %v9607_v15  ;;  %3906 = vmatpush1.bf16.msra.mxu1 %v9609_v29  ;;  %v9657_v15 = vcombine.low %v837_v6, %v841_v7  ;;  %v9664_v29 = vcombine.high %v844_v40, %v848_v33  ;;  %v889_v6 = vld [vmem:[#allocation6 + $0xaa8] sm:$0xff]  ;;  %v896_v40 = vld [vmem:[#allocation6 + $0xae0] sm:$0xff] }
 0x150   :  { %3735 = vmatprep.subr.bf16.mxu0 %v9616_v53  ;;  %3907 = vmatprep.subr.bf16.mxu1 %v9618_v44  ;;  %v9666_v53 = vcombine.high %v845_v3, %v849_v61  ;;  %v852_v44 = vld [vmem:[#allocation6 + $0x980] sm:$0xff]  ;;  %v893_v33 = vld [vmem:[#allocation6 + $0xac8] sm:$0xff] }
 0x151   :  { %v9671_v1 = vcombine.low %v852_v44, %v856_v18 }
 0x153   :  { %3736 = vmatpush1.bf16.msra.mxu0 %v9615_v55  ;;  %3908 = vmatpush1.bf16.msra.mxu1 %v9617_v58  ;;  %v9665_v55 = vcombine.low %v845_v3, %v849_v61  ;;  %v9672_v58 = vcombine.high %v852_v44, %v856_v18  ;;  %v897_v3 = vld [vmem:[#allocation6 + $0xae8] sm:$0xff]  ;;  %v904_v44 = vld [vmem:[#allocation6 + $0xb20] sm:$0xff] }
 0x154   :  { %3748 = vmatprep.subr.bf16.mxu0 %v9624_v60  ;;  %3920 = vmatprep.subr.bf16.mxu1 %v9626_v14  ;;  %v9674_v60 = vcombine.high %v853_v28, %v857_v50  ;;  %v860_v14 = vld [vmem:[#allocation6 + $0x9c0] sm:$0xff]  ;;  %v901_v18 = vld [vmem:[#allocation6 + $0xb08] sm:$0xff] }
 0x155   :  { %v9679_v39 = vcombine.low %v860_v14, %v864_v20 }
 0x156   :  { %3738 = vmatmul.mubr.bf16.vlgmr.msra.gmra.mrb[0].mxu0 %v11312_v35  ;;  %3910 = vmatmul.mubr.bf16.vlgmr.msra.gmra.mrb[0].mxu1 %v11312_v35 }
 0x157   :  { %3749 = vmatpush1.bf16.msra.mxu0 %v9623_v9  ;;  %3780 = vmatprep.mubr.bf16.mxu0 %v11366_v13  ;;  %v9673_v9 = vcombine.low %v853_v28, %v857_v50  ;;  %v905_v28 = vld [vmem:[#allocation6 + $0xb28] sm:$0xff] }
 0x158   :  { %3921 = vmatpush1.bf16.msra.mxu1 %v9625_v47  ;;  %3952 = vmatprep.mubr.bf16.mxu1 %v11366_v13  ;;  %v9680_v47 = vcombine.high %v860_v14, %v864_v20  ;;  %v912_v14 = vld [vmem:[#allocation6 + $0xb60] sm:$0xff]  ;;  %v909_v20 = vld [vmem:[#allocation6 + $0xb48] sm:$0xff] }
 0x159   :  { %3750 = vmatprep.subr.bf16.mxu0 %v9632_v63  ;;  %3922 = vmatprep.subr.bf16.mxu1 %v9634_v27  ;;  %v9682_v63 = vcombine.high %v861_v5, %v865_v59  ;;  %v868_v27 = vld [vmem:[#allocation6 + $0xa00] sm:$0xff] }
 0x15a   :  { %v9687_v46 = vcombine.low %v868_v27, %v872_v41 }
 0x15b   :  { %3751 = vmatpush1.bf16.msra.mxu0 %v9631_v11  ;;  %v9681_v11 = vcombine.low %v861_v5, %v865_v59  ;;  %v913_v5 = vld [vmem:[#allocation6 + $0xb68] sm:$0xff] }
 0x15c   :  { %3923 = vmatpush1.bf16.msra.mxu1 %v9633_v32  ;;  %3752 = vmatprep.subr.bf16.mxu0 %v9640_v48  ;;  %v9688_v32 = vcombine.high %v868_v27, %v872_v41  ;;  %v9690_v48 = vcombine.high %v869_v4, %v873_v57  ;;  %v920_v27 = vld [vmem:[#allocation6 + $0xba0] sm:$0xff]  ;;  %v917_v41 = vld [vmem:[#allocation6 + $0xb88] sm:$0xff] }
 0x15d   :  { %3924 = vmatprep.subr.bf16.mxu1 %v9642_v2  ;;  %v876_v2 = vld [vmem:[#allocation6 + $0xa40] sm:$0xff] }
 0x15e   :  { %v9695_v7 = vcombine.low %v876_v2, %v880_v23 }
 0x15f   :  { %3753 = vmatpush1.bf16.msra.mxu0 %v9639_v49  ;;  %v9689_v49 = vcombine.low %v869_v4, %v873_v57  ;;  %v921_v4 = vld [vmem:[#allocation6 + $0xba8] sm:$0xff] }
 0x160   :  { %3925 = vmatpush1.bf16.msra.mxu1 %v9641_v42  ;;  %3754 = vmatprep.subr.bf16.mxu0 %v9648_v43  ;;  %v9696_v42 = vcombine.high %v876_v2, %v880_v23  ;;  %v9698_v43 = vcombine.high %v877_v45, %v881_v34  ;;  %v928_v2 = vld [vmem:[#allocation6 + $0xbe0] sm:$0xff]  ;;  %v925_v23 = vld [vmem:[#allocation6 + $0xbc8] sm:$0xff] }
 0x161   :  { %3926 = vmatprep.subr.bf16.mxu1 %v9650_v51  ;;  %v884_v51 = vld [vmem:[#allocation6 + $0xa80] sm:$0xff] }
 0x162   :  { %v9703_v61 = vcombine.low %v884_v51, %v888_v19 }
 0x163   :  { %3755 = vmatpush1.bf16.msra.mxu0 %v9647_v12  ;;  %v9697_v12 = vcombine.low %v877_v45, %v881_v34  ;;  %v929_v45 = vld [vmem:[#allocation6 + $0xbe8] sm:$0xff] }
 0x164   :  { %3927 = vmatpush1.bf16.msra.mxu1 %v9649_v38  ;;  %3756 = vmatprep.subr.bf16.mxu0 %v9656_v62  ;;  %v9704_v38 = vcombine.high %v884_v51, %v888_v19  ;;  %v9706_v62 = vcombine.high %v885_v52, %v889_v6  ;;  %v936_v51 = vld [vmem:[#allocation6 + $0xc20] sm:$0xff]  ;;  %v933_v19 = vld [vmem:[#allocation6 + $0xc08] sm:$0xff] }
 0x165   :  { %3928 = vmatprep.subr.bf16.mxu1 %v9658_v17  ;;  %v892_v17 = vld [vmem:[#allocation6 + $0xac0] sm:$0xff] }
 0x166   :  { %v9711_v50 = vcombine.low %v892_v17, %v896_v40 }
 0x167   :  { %3757 = vmatpush1.bf16.msra.mxu0 %v9655_v16  ;;  %v9705_v16 = vcombine.low %v885_v52, %v889_v6  ;;  %v937_v52 = vld [vmem:[#allocation6 + $0xc28] sm:$0xff] }
 0x168   :  { %3929 = vmatpush1.bf16.msra.mxu1 %v9657_v15  ;;  %3758 = vmatprep.subr.bf16.mxu0 %v9664_v29  ;;  %v9712_v15 = vcombine.high %v892_v17, %v896_v40  ;;  %v9714_v29 = vcombine.high %v893_v33, %v897_v3  ;;  %v944_v17 = vld [vmem:[#allocation6 + $0xc60] sm:$0xff] }
 0x169   :  { %3930 = vmatprep.subr.bf16.mxu1 %v9666_v53  ;;  %v900_v53 = vld [vmem:[#allocation6 + $0xb00] sm:$0xff] }
 0x16a   :  { %v9719_v59 = vcombine.low %v900_v53, %v904_v44 }
 0x16b   :  { %3759 = vmatpush1.bf16.msra.mxu0 %v9663_v10  ;;  %v9713_v10 = vcombine.low %v893_v33, %v897_v3  ;;  %v941_v33 = vld [vmem:[#allocation6 + $0xc48] sm:$0xff] }
 0x16c   :  { %3931 = vmatpush1.bf16.msra.mxu1 %v9665_v55  ;;  %3760 = vmatprep.subr.bf16.mxu0 %v9672_v58  ;;  %v9720_v55 = vcombine.high %v900_v53, %v904_v44  ;;  %v9722_v58 = vcombine.high %v901_v18, %v905_v28  ;;  %v945_v3 = vld [vmem:[#allocation6 + $0xc68] sm:$0xff] }
 0x16d   :  { %3932 = vmatprep.subr.bf16.mxu1 %v9674_v60  ;;  %v908_v60 = vld [vmem:[#allocation6 + $0xb40] sm:$0xff]  ;;  %v9762_v53 = vcombine.high %v941_v33, %v945_v3  ;;  %v949_v44 = vld [vmem:[#allocation6 + $0xc88] sm:$0xff] }
 0x16e   :  { %v9727_v57 = vcombine.low %v908_v60, %v912_v14 }
 0x16f   :  { %3761 = vmatpush1.bf16.msra.mxu0 %v9671_v1  ;;  %v9721_v1 = vcombine.low %v901_v18, %v905_v28  ;;  %v953_v18 = vld [vmem:[#allocation6 + $0xca8] sm:$0xff] }
 0x170   :  { %3933 = vmatpush1.bf16.msra.mxu1 %v9673_v9  ;;  %3762 = vmatprep.subr.bf16.mxu0 %v9680_v47  ;;  %v9728_v9 = vcombine.high %v908_v60, %v912_v14  ;;  %v9730_v47 = vcombine.high %v909_v20, %v913_v5  ;;  %v960_v60 = vld [vmem:[#allocation6 + $0xce0] sm:$0xff]  ;;  %v957_v14 = vld [vmem:[#allocation6 + $0xcc8] sm:$0xff] }
 0x171   :  { %3934 = vmatprep.subr.bf16.mxu1 %v9682_v63  ;;  %v916_v63 = vld [vmem:[#allocation6 + $0xb80] sm:$0xff] }
 0x172   :  { %v9735_v34 = vcombine.low %v916_v63, %v920_v27 }
 0x173   :  { %3763 = vmatpush1.bf16.msra.mxu0 %v9679_v39  ;;  %v9729_v39 = vcombine.low %v909_v20, %v913_v5  ;;  %v961_v20 = vld [vmem:[#allocation6 + $0xce8] sm:$0xff] }
 0x174   :  { %3935 = vmatpush1.bf16.msra.mxu1 %v9681_v11  ;;  %3764 = vmatprep.subr.bf16.mxu0 %v9688_v32  ;;  %v9736_v11 = vcombine.high %v916_v63, %v920_v27  ;;  %v9738_v32 = vcombine.high %v917_v41, %v921_v4  ;;  %v968_v63 = vld [vmem:[#allocation6 + $0xd20] sm:$0xff]  ;;  %v965_v27 = vld [vmem:[#allocation6 + $0xd08] sm:$0xff] }
 0x175   :  { %3936 = vmatprep.subr.bf16.mxu1 %v9690_v48  ;;  %v924_v48 = vld [vmem:[#allocation6 + $0xbc0] sm:$0xff] }
 0x176   :  { %v9743_v6 = vcombine.low %v924_v48, %v928_v2 }
 0x177   :  { %3765 = vmatpush1.bf16.msra.mxu0 %v9687_v46  ;;  %v9737_v46 = vcombine.low %v917_v41, %v921_v4  ;;  %v969_v41 = vld [vmem:[#allocation6 + $0xd28] sm:$0xff] }
 0x178   :  { %3937 = vmatpush1.bf16.msra.mxu1 %v9689_v49  ;;  %3766 = vmatprep.subr.bf16.mxu0 %v9696_v42  ;;  %v9744_v49 = vcombine.high %v924_v48, %v928_v2  ;;  %v9746_v42 = vcombine.high %v925_v23, %v929_v45  ;;  %v976_v48 = vld [vmem:[#allocation6 + $0xd60] sm:$0xff]  ;;  %v973_v2 = vld [vmem:[#allocation6 + $0xd48] sm:$0xff] }
 0x179   :  { %3938 = vmatprep.subr.bf16.mxu1 %v9698_v43  ;;  %v932_v43 = vld [vmem:[#allocation6 + $0xc00] sm:$0xff] }
 0x17a   :  { %v9751_v40 = vcombine.low %v932_v43, %v936_v51 }
 0x17b   :  { %3767 = vmatpush1.bf16.msra.mxu0 %v9695_v7  ;;  %v9745_v7 = vcombine.low %v925_v23, %v929_v45  ;;  %v977_v23 = vld [vmem:[#allocation6 + $0xd68] sm:$0xff] }
 0x17c   :  { %3939 = vmatpush1.bf16.msra.mxu1 %v9697_v12  ;;  %3768 = vmatprep.subr.bf16.mxu0 %v9704_v38  ;;  %v9752_v12 = vcombine.high %v932_v43, %v936_v51  ;;  %v9754_v38 = vcombine.high %v933_v19, %v937_v52  ;;  %v984_v43 = vld [vmem:[#allocation6 + $0xda0] sm:$0xff]  ;;  %v981_v51 = vld [vmem:[#allocation6 + $0xd88] sm:$0xff] }
 0x17d   :  { %3940 = vmatprep.subr.bf16.mxu1 %v9706_v62  ;;  %v940_v62 = vld [vmem:[#allocation6 + $0xc40] sm:$0xff] }
 0x17e   :  { %v9759_v28 = vcombine.low %v940_v62, %v944_v17 }
 0x17f   :  { %3769 = vmatpush1.bf16.msra.mxu0 %v9703_v61  ;;  %v9753_v61 = vcombine.low %v933_v19, %v937_v52  ;;  %v985_v19 = vld [vmem:[#allocation6 + $0xda8] sm:$0xff] }
 0x180   :  { %3941 = vmatpush1.bf16.msra.mxu1 %v9705_v16  ;;  %3770 = vmatprep.subr.bf16.mxu0 %v9712_v15  ;;  %v9760_v16 = vcombine.high %v940_v62, %v944_v17  ;;  %v948_v15 = vld [vmem:[#allocation6 + $0xc80] sm:$0xff]  ;;  %v989_v17 = vld [vmem:[#allocation6 + $0xdc8] sm:$0xff] }
 0x181   :  { %3942 = vmatprep.subr.bf16.mxu1 %v9714_v29  ;;  %v952_v29 = vld [vmem:[#allocation6 + $0xca0] sm:$0xff] }
 0x182   :  { %v9767_v5 = vcombine.low %v948_v15, %v952_v29  ;;  %v992_v62 = vld [vmem:[#allocation6 + $0xde0] sm:$0xff] }
 0x183   :  { %3771 = vmatpush1.bf16.msra.mxu0 %v9711_v50  ;;  %v9761_v50 = vcombine.low %v941_v33, %v945_v3  ;;  %v9801_v3 = vcombine.low %v981_v51, %v985_v19 }
 0x184   :  { %3943 = vmatpush1.bf16.msra.mxu1 %v9713_v10  ;;  %3772 = vmatprep.subr.bf16.mxu0 %v9720_v55  ;;  %v9768_v10 = vcombine.high %v948_v15, %v952_v29  ;;  %v9770_v55 = vcombine.high %v949_v44, %v953_v18  ;;  %v996_v15 = vld [vmem:[#allocation6 + $0xe00] sm:$0xff] }
 0x185   :  { %3944 = vmatprep.subr.bf16.mxu1 %v9722_v58  ;;  %v956_v58 = vld [vmem:[#allocation6 + $0xcc0] sm:$0xff] }
 0x186   :  { %v9775_v4 = vcombine.low %v956_v58, %v960_v60  ;;  %v1000_v29 = vld [vmem:[#allocation6 + $0xe20] sm:$0xff] }
 0x187   :  { %3773 = vmatpush1.bf16.msra.mxu0 %v9719_v59  ;;  %v9769_v59 = vcombine.low %v949_v44, %v953_v18  ;;  %v1001_v44 = vld [vmem:[#allocation6 + $0xe28] sm:$0xff] }
 0x188   :  { %3945 = vmatpush1.bf16.msra.mxu1 %v9721_v1  ;;  %3774 = vmatprep.subr.bf16.mxu0 %v9728_v9  ;;  %v9776_v1 = vcombine.high %v956_v58, %v960_v60  ;;  %v9778_v9 = vcombine.high %v957_v14, %v961_v20  ;;  %v1008_v58 = vld [vmem:[#allocation6 + $0xe60] sm:$0xff]  ;;  %v1005_v60 = vld [vmem:[#allocation6 + $0xe48] sm:$0xff] }
 0x189   :  { %3946 = vmatprep.subr.bf16.mxu1 %v9730_v47  ;;  %v964_v47 = vld [vmem:[#allocation6 + $0xd00] sm:$0xff] }
 0x18a   :  { %v9783_v45 = vcombine.low %v964_v47, %v968_v63 }
 0x18b   :  { %3775 = vmatpush1.bf16.msra.mxu0 %v9727_v57  ;;  %v9777_v57 = vcombine.low %v957_v14, %v961_v20  ;;  %v1009_v14 = vld [vmem:[#allocation6 + $0xe68] sm:$0xff]  ;;  %v9815_v20 = vcombine.low %v996_v15, %v1000_v29 }
 0x18c   :  { %3947 = vmatpush1.bf16.msra.mxu1 %v9729_v39  ;;  %3776 = vmatprep.subr.bf16.mxu0 %v9736_v11  ;;  %v9784_v39 = vcombine.high %v964_v47, %v968_v63  ;;  %v9786_v11 = vcombine.high %v965_v27, %v969_v41  ;;  %v1016_v47 = vld [vmem:[#allocation6 + $0xea0] sm:$0xff]  ;;  %v1013_v63 = vld [vmem:[#allocation6 + $0xe88] sm:$0xff] }
 0x18d   :  { %3948 = vmatprep.subr.bf16.mxu1 %v9738_v32  ;;  %v972_v32 = vld [vmem:[#allocation6 + $0xd40] sm:$0xff] }
 0x18e   :  { %v9791_v52 = vcombine.low %v972_v32, %v976_v48 }
 0x18f   :  { %3777 = vmatpush1.bf16.msra.mxu0 %v9735_v34  ;;  %v9785_v34 = vcombine.low %v965_v27, %v969_v41  ;;  %v1017_v27 = vld [vmem:[#allocation6 + $0xea8] sm:$0xff] }
 0x190   :  { %3949 = vmatpush1.bf16.msra.mxu1 %v9737_v46  ;;  %3778 = vmatprep.subr.bf16.mxu0 %v9744_v49  ;;  %v9792_v46 = vcombine.high %v972_v32, %v976_v48  ;;  %v9794_v49 = vcombine.high %v973_v2, %v977_v23  ;;  %v1024_v32 = vld [vmem:[#allocation6 + $0xee0] sm:$0xff]  ;;  %v1021_v48 = vld [vmem:[#allocation6 + $0xec8] sm:$0xff] }
 0x191   :  { %3950 = vmatprep.subr.bf16.mxu1 %v9746_v42  ;;  %v980_v42 = vld [vmem:[#allocation6 + $0xd80] sm:$0xff] }
 0x192   :  { %v9799_v33 = vcombine.low %v980_v42, %v984_v43 }
 0x193   :  { %3779 = vmatpush1.bf16.msra.mxu0 %v9743_v6  ;;  %v9793_v6 = vcombine.low %v973_v2, %v977_v23  ;;  %v1025_v2 = vld [vmem:[#allocation6 + $0xee8] sm:$0xff] }
 0x194   :  { %3951 = vmatpush1.bf16.msra.mxu1 %v9745_v7  ;;  %3791 = vmatprep.subr.bf16.mxu0 %v9752_v12  ;;  %v9800_v7 = vcombine.high %v980_v42, %v984_v43  ;;  %v9802_v12 = vcombine.high %v981_v51, %v985_v19  ;;  %v1032_v42 = vld [vmem:[#allocation6 + $0xf20] sm:$0xff]  ;;  %v1029_v43 = vld [vmem:[#allocation6 + $0xf08] sm:$0xff] }
 0x195   :  { %3963 = vmatprep.subr.bf16.mxu1 %v9754_v38  ;;  %v988_v38 = vld [vmem:[#allocation6 + $0xdc0] sm:$0xff]  ;;  %v1033_v51 = vld [vmem:[#allocation6 + $0xf28] sm:$0xff] }
 0x196   :  { %3781 = vmatmul.mubr.bf16.vlgmr.msra.gmra.mrb[0].mxu0 %v11406_v56  ;;  %v9807_v18 = vcombine.low %v988_v38, %v992_v62 }
 0x197   :  { %3953 = vmatmul.mubr.bf16.vlgmr.msra.gmra.mrb[0].mxu1 %v11406_v56  ;;  %3792 = vmatpush1.bf16.msra.mxu0 %v9751_v40  ;;  %v993_v40 = vld [vmem:[#allocation6 + $0xde8] sm:$0xff] }
 0x198   :  { %3823 = vmatprep.mubr.bf16.mxu0 %v11413_v30  ;;  %3964 = vmatpush1.bf16.msra.mxu1 %v9753_v61  ;;  %v9808_v61 = vcombine.high %v988_v38, %v992_v62  ;;  %v1040_v38 = vld [vmem:[#allocation6 + $0xf60] sm:$0xff]  ;;  %v1037_v62 = vld [vmem:[#allocation6 + $0xf48] sm:$0xff] }
 0x199   :  { %3995 = vmatprep.mubr.bf16.mxu1 %v11413_v30  ;;  %3793 = vmatprep.subr.bf16.mxu0 %v9760_v16  ;;  %v9810_v16 = vcombine.high %v989_v17, %v993_v40 }
 0x19a   :  { %3965 = vmatprep.subr.bf16.mxu1 %v9762_v53  ;;  %v997_v53 = vld [vmem:[#allocation6 + $0xe08] sm:$0xff] }
 0x19b   :  { %3794 = vmatpush1.bf16.msra.mxu0 %v9759_v28  ;;  %v9809_v28 = vcombine.low %v989_v17, %v993_v40  ;;  %v1041_v17 = vld [vmem:[#allocation6 + $0xf68] sm:$0xff] }
 0x19c   :  { %3966 = vmatpush1.bf16.msra.mxu1 %v9761_v50  ;;  %3795 = vmatprep.subr.bf16.mxu0 %v9768_v10  ;;  %v9816_v50 = vcombine.high %v996_v15, %v1000_v29  ;;  %v9818_v10 = vcombine.high %v997_v53, %v1001_v44  ;;  %v1048_v15 = vld [vmem:[#allocation6 + $0xfa0] sm:$0xff]  ;;  %v1045_v29 = vld [vmem:[#allocation6 + $0xf88] sm:$0xff] }
 0x19d   :  { %3967 = vmatprep.subr.bf16.mxu1 %v9770_v55  ;;  %v1004_v55 = vld [vmem:[#allocation6 + $0xe40] sm:$0xff] }
 0x19e   :  { %v9823_v41 = vcombine.low %v1004_v55, %v1008_v58 }
 0x19f   :  { %3796 = vmatpush1.bf16.msra.mxu0 %v9767_v5  ;;  %v9817_v5 = vcombine.low %v997_v53, %v1001_v44  ;;  %v1049_v53 = vld [vmem:[#allocation6 + $0xfa8] sm:$0xff] }
 0x1a0   :  { %3968 = vmatpush1.bf16.msra.mxu1 %v9769_v59  ;;  %3797 = vmatprep.subr.bf16.mxu0 %v9776_v1  ;;  %v9824_v59 = vcombine.high %v1004_v55, %v1008_v58  ;;  %v9826_v1 = vcombine.high %v1005_v60, %v1009_v14  ;;  %v1056_v55 = vld [vmem:[#allocation6 + $0xfe0] sm:$0xff]  ;;  %v1053_v58 = vld [vmem:[#allocation6 + $0xfc8] sm:$0xff] }
 0x1a1   :  { %3969 = vmatprep.subr.bf16.mxu1 %v9778_v9  ;;  %v1012_v9 = vld [vmem:[#allocation6 + $0xe80] sm:$0xff] }
 0x1a2   :  { %v9831_v23 = vcombine.low %v1012_v9, %v1016_v47 }
 0x1a3   :  { %3798 = vmatpush1.bf16.msra.mxu0 %v9775_v4  ;;  %v9825_v4 = vcombine.low %v1005_v60, %v1009_v14  ;;  %v1057_v60 = vld [vmem:[#allocation6 + $0xfe8] sm:$0xff] }
 0x1a4   :  { %3970 = vmatpush1.bf16.msra.mxu1 %v9777_v57  ;;  %3799 = vmatprep.subr.bf16.mxu0 %v9784_v39  ;;  %v9832_v57 = vcombine.high %v1012_v9, %v1016_v47  ;;  %v9834_v39 = vcombine.high %v1013_v63, %v1017_v27  ;;  %v554_v9 = vld [vmem:[#allocation6 + $0x30] sm:$0xff]  ;;  %v551_v47 = vld [vmem:[#allocation6 + $0x18] sm:$0xff] }
 0x1a5   :  { %3971 = vmatprep.subr.bf16.mxu1 %v9786_v11  ;;  %v1020_v11 = vld [vmem:[#allocation6 + $0xec0] sm:$0xff] }
 0x1a6   :  { %v9839_v19 = vcombine.low %v1020_v11, %v1024_v32 }
 0x1a7   :  { %3800 = vmatpush1.bf16.msra.mxu0 %v9783_v45  ;;  %v9833_v45 = vcombine.low %v1013_v63, %v1017_v27  ;;  %v555_v63 = vld [vmem:[#allocation6 + $0x38] sm:$0xff] }
 0x1a8   :  { %3972 = vmatpush1.bf16.msra.mxu1 %v9785_v34  ;;  %3801 = vmatprep.subr.bf16.mxu0 %v9792_v46  ;;  %v9840_v34 = vcombine.high %v1020_v11, %v1024_v32  ;;  %v9842_v46 = vcombine.high %v1021_v48, %v1025_v2  ;;  %v562_v11 = vld [vmem:[#allocation6 + $0x70] sm:$0xff] }
 0x1a9   :  { %3973 = vmatprep.subr.bf16.mxu1 %v9794_v49  ;;  %v1028_v49 = vld [vmem:[#allocation6 + $0xf00] sm:$0xff] }
 0x1aa   :  { %v9847_v40 = vcombine.low %v1028_v49, %v1032_v42 }
 0x1ab   :  { %3802 = vmatpush1.bf16.msra.mxu0 %v9791_v52  ;;  %v9841_v52 = vcombine.low %v1021_v48, %v1025_v2  ;;  %v559_v48 = vld [vmem:[#allocation6 + $0x58] sm:$0xff] }
 0x1ac   :  { %3974 = vmatpush1.bf16.msra.mxu1 %v9793_v6  ;;  %3803 = vmatprep.subr.bf16.mxu0 %v9800_v7  ;;  %v9848_v6 = vcombine.high %v1028_v49, %v1032_v42  ;;  %v9850_v7 = vcombine.high %v1029_v43, %v1033_v51  ;;  %v563_v2 = vld [vmem:[#allocation6 + $0x78] sm:$0xff] }
 0x1ad   :  { %3975 = vmatprep.subr.bf16.mxu1 %v9802_v12  ;;  %v1036_v12 = vld [vmem:[#allocation6 + $0xf40] sm:$0xff]  ;;  %v9382_v49 = vcombine.high %v559_v48, %v563_v2  ;;  %v567_v42 = vld [vmem:[#allocation6 + $0x98] sm:$0xff] }
 0x1ae   :  { %v9855_v44 = vcombine.low %v1036_v12, %v1040_v38 }
 0x1af   :  { %3804 = vmatpush1.bf16.msra.mxu0 %v9799_v33  ;;  %v9849_v33 = vcombine.low %v1029_v43, %v1033_v51  ;;  %v571_v43 = vld [vmem:[#allocation6 + $0xb8] sm:$0xff] }
 0x1b0   :  { %3976 = vmatpush1.bf16.msra.mxu1 %v9801_v3  ;;  %3805 = vmatprep.subr.bf16.mxu0 %v9808_v61  ;;  %v9856_v3 = vcombine.high %v1036_v12, %v1040_v38  ;;  %v9858_v61 = vcombine.high %v1037_v62, %v1041_v17  ;;  %v578_v12 = vld [vmem:[#allocation6 + $0xf0] sm:$0xff]  ;;  %v575_v38 = vld [vmem:[#allocation6 + $0xd8] sm:$0xff] }
 0x1b1   :  { %3977 = vmatprep.subr.bf16.mxu1 %v9810_v16  ;;  %v1044_v16 = vld [vmem:[#allocation6 + $0xf80] sm:$0xff] }
 0x1b2   :  { %v9863_v14 = vcombine.low %v1044_v16, %v1048_v15 }
 0x1b3   :  { %3806 = vmatpush1.bf16.msra.mxu0 %v9807_v18  ;;  %v9857_v18 = vcombine.low %v1037_v62, %v1041_v17  ;;  %v579_v62 = vld [vmem:[#allocation6 + $0xf8] sm:$0xff] }
 0x1b4   :  { %3978 = vmatpush1.bf16.msra.mxu1 %v9809_v28  ;;  %3807 = vmatprep.subr.bf16.mxu0 %v9816_v50  ;;  %v9864_v28 = vcombine.high %v1044_v16, %v1048_v15  ;;  %v9866_v50 = vcombine.high %v1045_v29, %v1049_v53  ;;  %v586_v16 = vld [vmem:[#allocation6 + $0x130] sm:$0xff]  ;;  %v583_v15 = vld [vmem:[#allocation6 + $0x118] sm:$0xff] }
 0x1b5   :  { %3979 = vmatprep.subr.bf16.mxu1 %v9818_v10  ;;  %v1052_v10 = vld [vmem:[#allocation6 + $0xfc0] sm:$0xff] }
 0x1b6   :  { %v9871_v27 = vcombine.low %v1052_v10, %v1056_v55 }
 0x1b7   :  { %3808 = vmatpush1.bf16.msra.mxu0 %v9815_v20  ;;  %v9865_v20 = vcombine.low %v1045_v29, %v1049_v53  ;;  %v587_v29 = vld [vmem:[#allocation6 + $0x138] sm:$0xff]  ;;  %v9397_v53 = vcombine.low %v575_v38, %v579_v62 }
 0x1b8   :  { %3980 = vmatpush1.bf16.msra.mxu1 %v9817_v5  ;;  %3809 = vmatprep.subr.bf16.mxu0 %v9824_v59  ;;  %v9872_v5 = vcombine.high %v1052_v10, %v1056_v55  ;;  %v9874_v59 = vcombine.high %v1053_v58, %v1057_v60  ;;  %v591_v10 = vld [vmem:[#allocation6 + $0x158] sm:$0xff] }
 0x1b9   :  { %3981 = vmatprep.subr.bf16.mxu1 %v9826_v1  ;;  %v550_v1 = vld [vmem:[#allocation6 + $0x10] sm:$0xff]  ;;  %v595_v55 = vld [vmem:[#allocation6 + $0x178] sm:$0xff] }
 0x1ba   :  { %v9371_v32 = vcombine.low %v550_v1, %v554_v9 }
 0x1bb   :  { %3810 = vmatpush1.bf16.msra.mxu0 %v9823_v41  ;;  %v9873_v41 = vcombine.low %v1053_v58, %v1057_v60  ;;  %v9405_v60 = vcombine.low %v583_v15, %v587_v29 }
 0x1bc   :  { %3982 = vmatpush1.bf16.msra.mxu1 %v9825_v4  ;;  %3811 = vmatprep.subr.bf16.mxu0 %v9832_v57  ;;  %v9372_v4 = vcombine.high %v550_v1, %v554_v9  ;;  %v9374_v57 = vcombine.high %v551_v47, %v555_v63  ;;  %v599_v1 = vld [vmem:[#allocation6 + $0x198] sm:$0xff] }
 0x1bd   :  { %3983 = vmatprep.subr.bf16.mxu1 %v9834_v39  ;;  %v558_v39 = vld [vmem:[#allocation6 + $0x50] sm:$0xff]  ;;  %v603_v9 = vld [vmem:[#allocation6 + $0x1b8] sm:$0xff] }
 0x1be   :  { %v9379_v51 = vcombine.low %v558_v39, %v562_v11 }
 0x1bf   :  { %3812 = vmatpush1.bf16.msra.mxu0 %v9831_v23  ;;  %v9373_v23 = vcombine.low %v551_v47, %v555_v63  ;;  %v9413_v63 = vcombine.low %v591_v10, %v595_v55 }
 0x1c0   :  { %3984 = vmatpush1.bf16.msra.mxu1 %v9833_v45  ;;  %3813 = vmatprep.subr.bf16.mxu0 %v9840_v34  ;;  %v9380_v45 = vcombine.high %v558_v39, %v562_v11  ;;  %v566_v34 = vld [vmem:[#allocation6 + $0x90] sm:$0xff]  ;;  %v607_v39 = vld [vmem:[#allocation6 + $0x1d8] sm:$0xff] }
 0x1c1   :  { %3985 = vmatprep.subr.bf16.mxu1 %v9842_v46  ;;  %v570_v46 = vld [vmem:[#allocation6 + $0xb0] sm:$0xff]  ;;  %v611_v11 = vld [vmem:[#allocation6 + $0x1f8] sm:$0xff] }
 0x1c2   :  { %v9387_v17 = vcombine.low %v566_v34, %v570_v46 }
 0x1c3   :  { %3814 = vmatpush1.bf16.msra.mxu0 %v9839_v19  ;;  %v9381_v19 = vcombine.low %v559_v48, %v563_v2  ;;  %v9421_v48 = vcombine.low %v599_v1, %v603_v9 }
 0x1c4   :  { %3986 = vmatpush1.bf16.msra.mxu1 %v9841_v52  ;;  %3815 = vmatprep.subr.bf16.mxu0 %v9848_v6  ;;  %v9388_v52 = vcombine.high %v566_v34, %v570_v46  ;;  %v9390_v6 = vcombine.high %v567_v42, %v571_v43  ;;  %v618_v34 = vld [vmem:[#allocation6 + $0x230] sm:$0xff]  ;;  %v615_v46 = vld [vmem:[#allocation6 + $0x218] sm:$0xff] }
 0x1c5   :  { %3987 = vmatprep.subr.bf16.mxu1 %v9850_v7  ;;  %v574_v7 = vld [vmem:[#allocation6 + $0xd0] sm:$0xff] }
 0x1c7   :  { %3816 = vmatpush1.bf16.msra.mxu0 %v9847_v40  ;;  %v9389_v40 = vcombine.low %v567_v42, %v571_v43  ;;  %v9429_v43 = vcombine.low %v607_v39, %v611_v11 }
 0x1c8   :  { %3988 = vmatpush1.bf16.msra.mxu1 %v9849_v33  ;;  %3817 = vmatprep.subr.bf16.mxu0 %v9856_v3  ;;  %v9396_v33 = vcombine.high %v574_v7, %v578_v12  ;;  %v9398_v3 = vcombine.high %v575_v38, %v579_v62 }
 0x1c9   :  { %3989 = vmatprep.subr.bf16.mxu1 %v9858_v61  ;;  %v582_v61 = vld [vmem:[#allocation6 + $0x110] sm:$0xff] }
 0x1ca   :  { %v9403_v58 = vcombine.low %v582_v61, %v586_v16 }
 0x1cb   :  { %3818 = vmatpush1.bf16.msra.mxu0 %v9855_v44  ;;  %v9404_v44 = vcombine.high %v582_v61, %v586_v16  ;;  %v631_v61 = vld [vmem:[#allocation6 + $0x298] sm:$0xff] }
 0x1cc   :  { %3990 = vmatpush1.bf16.msra.mxu1 %v9857_v18  ;;  %3819 = vmatprep.subr.bf16.mxu0 %v9864_v28  ;;  %v9406_v18 = vcombine.high %v583_v15, %v587_v29  ;;  %v590_v28 = vld [vmem:[#allocation6 + $0x150] sm:$0xff]  ;;  %v635_v16 = vld [vmem:[#allocation6 + $0x2b8] sm:$0xff] }
 0x1cd   :  { %3991 = vmatprep.subr.bf16.mxu1 %v9866_v50  ;;  %v594_v50 = vld [vmem:[#allocation6 + $0x170] sm:$0xff] }
 0x1ce   :  { %v9411_v47 = vcombine.low %v590_v28, %v594_v50 }
 0x1cf   :  { %3820 = vmatpush1.bf16.msra.mxu0 %v9863_v14  ;;  %v9412_v14 = vcombine.high %v590_v28, %v594_v50  ;;  %v639_v28 = vld [vmem:[#allocation6 + $0x2d8] sm:$0xff] }
 0x1d0   :  { %3992 = vmatpush1.bf16.msra.mxu1 %v9865_v20  ;;  %3821 = vmatprep.subr.bf16.mxu0 %v9872_v5  ;;  %v9414_v20 = vcombine.high %v591_v10, %v595_v55  ;;  %v598_v5 = vld [vmem:[#allocation6 + $0x190] sm:$0xff]  ;;  %v643_v50 = vld [vmem:[#allocation6 + $0x2f8] sm:$0xff]  ;;  %v9453_v55 = vcombine.low %v631_v61, %v635_v16 }
 0x1d1   :  { %3993 = vmatprep.subr.bf16.mxu1 %v9874_v59  ;;  %v602_v59 = vld [vmem:[#allocation6 + $0x1b0] sm:$0xff] }
 0x1d3   :  { %3822 = vmatpush1.bf16.msra.mxu0 %v9871_v27  ;;  %v9420_v27 = vcombine.high %v598_v5, %v602_v59 }
 0x1d4   :  { %3994 = vmatpush1.bf16.msra.mxu1 %v9873_v41  ;;  %4006 = vmatprep.subr.bf16.mxu0 %v9372_v4  ;;  %v9422_v41 = vcombine.high %v599_v1, %v603_v9  ;;  %v606_v4 = vld [vmem:[#allocation6 + $0x1d0] sm:$0xff]  ;;  %v9461_v9 = vcombine.low %v639_v28, %v643_v50 }
 0x1d5   :  { %4178 = vmatprep.subr.bf16.mxu1 %v9374_v57  ;;  %v610_v57 = vld [vmem:[#allocation6 + $0x1f0] sm:$0xff] }
 0x1d6   :  { %3824 = vmatmul.mubr.bf16.vlgmr.msra.gmra.mrb[0].mxu0 %v11420_v37  ;;  %v9428_v2 = vcombine.high %v606_v4, %v610_v57  ;;  %v9427_v42 = vcombine.low %v606_v4, %v610_v57  ;;  %v655_v4 = vld [vmem:[#allocation6 + $0x358] sm:$0xff] }
 0x1d7   :  { %3996 = vmatmul.mubr.bf16.vlgmr.msra.gmra.mrb[0].mxu1 %v11420_v37  ;;  %4007 = vmatpush1.bf16.msra.mxu0 %v9371_v32  ;;  %v9419_v32 = vcombine.low %v598_v5, %v602_v59  ;;  %v647_v5 = vld [vmem:[#allocation6 + $0x318] sm:$0xff] }
 0x1d8   :  { %4038 = vmatprep.mubr.bf16.mxu0 %v11278_v0  ;;  %4179 = vmatpush1.bf16.msra.mxu1 %v9373_v23  ;;  %v9430_v23 = vcombine.high %v607_v39, %v611_v11  ;;  %v651_v59 = vld [vmem:[#allocation6 + $0x338] sm:$0xff] }
 0x1d9   :  { %4210 = vmatprep.mubr.bf16.mxu1 %v11278_v0  ;;  %4008 = vmatprep.subr.bf16.mxu0 %v9380_v45  ;;  %v9395_v0 = vcombine.low %v574_v7, %v578_v12  ;;  %v614_v45 = vld [vmem:[#allocation6 + $0x210] sm:$0xff]  ;;  %v623_v7 = vld [vmem:[#allocation6 + $0x258] sm:$0xff]  ;;  %v9469_v11 = vcombine.low %v647_v5, %v651_v59 }
 0x1da   :  { %4180 = vmatprep.subr.bf16.mxu1 %v9382_v49  ;;  %v619_v49 = vld [vmem:[#allocation6 + $0x238] sm:$0xff]  ;;  %v9435_v38 = vcombine.low %v614_v45, %v618_v34 }
 0x1db   :  { %4009 = vmatpush1.bf16.msra.mxu0 %v9379_v51  ;;  %v9436_v51 = vcombine.high %v614_v45, %v618_v34  ;;  %v627_v12 = vld [vmem:[#allocation6 + $0x278] sm:$0xff]  ;;  %v9437_v62 = vcombine.low %v615_v46, %v619_v49 }
 0x1dc   :  { %4181 = vmatpush1.bf16.msra.mxu1 %v9381_v19  ;;  %4010 = vmatprep.subr.bf16.mxu0 %v9388_v52  ;;  %v9438_v19 = vcombine.high %v615_v46, %v619_v49  ;;  %v622_v52 = vld [vmem:[#allocation6 + $0x250] sm:$0xff]  ;;  %v9445_v29 = vcombine.low %v623_v7, %v627_v12  ;;  %v659_v57 = vld [vmem:[#allocation6 + $0x378] sm:$0xff] }
 0x1dd   :  { %4182 = vmatprep.subr.bf16.mxu1 %v9390_v6  ;;  %v626_v6 = vld [vmem:[#allocation6 + $0x270] sm:$0xff]  ;;  %v663_v45 = vld [vmem:[#allocation6 + $0x398] sm:$0xff]  ;;  %v9477_v49 = vcombine.low %v655_v4, %v659_v57 }
 0x1de   :  { %v9443_v15 = vcombine.low %v622_v52, %v626_v6  ;;  %v667_v34 = vld [vmem:[#allocation6 + $0x3b8] sm:$0xff] }
 0x1df   :  { %4011 = vmatpush1.bf16.msra.mxu0 %v9387_v17  ;;  %v9444_v17 = vcombine.high %v622_v52, %v626_v6  ;;  %v671_v52 = vld [vmem:[#allocation6 + $0x3d8] sm:$0xff] }
 0x1e0   :  { %4183 = vmatpush1.bf16.msra.mxu1 %v9389_v40  ;;  %4012 = vmatprep.subr.bf16.mxu0 %v9396_v33  ;;  %v9446_v40 = vcombine.high %v623_v7, %v627_v12  ;;  %v630_v33 = vld [vmem:[#allocation6 + $0x290] sm:$0xff]  ;;  %v675_v6 = vld [vmem:[#allocation6 + $0x3f8] sm:$0xff]  ;;  %v9485_v12 = vcombine.low %v663_v45, %v667_v34 }
 0x1e1   :  { %4184 = vmatprep.subr.bf16.mxu1 %v9398_v3  ;;  %v634_v3 = vld [vmem:[#allocation6 + $0x2b0] sm:$0xff] }
 0x1e2   :  { %v9451_v10 = vcombine.low %v630_v33, %v634_v3 }
 0x1e3   :  { %4013 = vmatpush1.bf16.msra.mxu0 %v9395_v0  ;;  %v9452_v0 = vcombine.high %v630_v33, %v634_v3  ;;  %v679_v33 = vld [vmem:[#allocation6 + $0x418] sm:$0xff] }
 0x1e4   :  { %4185 = vmatpush1.bf16.msra.mxu1 %v9397_v53  ;;  %4014 = vmatprep.subr.bf16.mxu0 %v9404_v44  ;;  %v9454_v53 = vcombine.high %v631_v61, %v635_v16  ;;  %v638_v44 = vld [vmem:[#allocation6 + $0x2d0] sm:$0xff]  ;;  %v683_v3 = vld [vmem:[#allocation6 + $0x438] sm:$0xff]  ;;  %v9493_v16 = vcombine.low %v671_v52, %v675_v6 }
 0x1e5   :  { %4186 = vmatprep.subr.bf16.mxu1 %v9406_v18  ;;  %v642_v18 = vld [vmem:[#allocation6 + $0x2f0] sm:$0xff] }
 0x1e6   :  { %v9459_v1 = vcombine.low %v638_v44, %v642_v18 }
 0x1e7   :  { %4015 = vmatpush1.bf16.msra.mxu0 %v9403_v58  ;;  %v9460_v58 = vcombine.high %v638_v44, %v642_v18  ;;  %v687_v18 = vld [vmem:[#allocation6 + $0x458] sm:$0xff] }
 0x1e8   :  { %4187 = vmatpush1.bf16.msra.mxu1 %v9405_v60  ;;  %4016 = vmatprep.subr.bf16.mxu0 %v9412_v14  ;;  %v9462_v60 = vcombine.high %v639_v28, %v643_v50  ;;  %v646_v14 = vld [vmem:[#allocation6 + $0x310] sm:$0xff]  ;;  %v691_v28 = vld [vmem:[#allocation6 + $0x478] sm:$0xff]  ;;  %v9501_v50 = vcombine.low %v679_v33, %v683_v3 }
 0x1e9   :  { %4188 = vmatprep.subr.bf16.mxu1 %v9414_v20  ;;  %v650_v20 = vld [vmem:[#allocation6 + $0x330] sm:$0xff] }
 0x1ea   :  { %v9467_v39 = vcombine.low %v646_v14, %v650_v20 }
 0x1eb   :  { %4017 = vmatpush1.bf16.msra.mxu0 %v9411_v47  ;;  %v9468_v47 = vcombine.high %v646_v14, %v650_v20  ;;  %v695_v14 = vld [vmem:[#allocation6 + $0x498] sm:$0xff] }
 0x1ec   :  { %4189 = vmatpush1.bf16.msra.mxu1 %v9413_v63  ;;  %4018 = vmatprep.subr.bf16.mxu0 %v9420_v27  ;;  %v9470_v63 = vcombine.high %v647_v5, %v651_v59  ;;  %v654_v27 = vld [vmem:[#allocation6 + $0x350] sm:$0xff]  ;;  %v699_v20 = vld [vmem:[#allocation6 + $0x4b8] sm:$0xff]  ;;  %v9509_v59 = vcombine.low %v687_v18, %v691_v28 }
 0x1ed   :  { %4190 = vmatprep.subr.bf16.mxu1 %v9422_v41  ;;  %v658_v41 = vld [vmem:[#allocation6 + $0x370] sm:$0xff] }
 0x1ee   :  { %v9475_v46 = vcombine.low %v654_v27, %v658_v41 }
 0x1ef   :  { %4019 = vmatpush1.bf16.msra.mxu0 %v9419_v32  ;;  %v9476_v32 = vcombine.high %v654_v27, %v658_v41  ;;  %v703_v27 = vld [vmem:[#allocation6 + $0x4d8] sm:$0xff] }
 0x1f0   :  { %4191 = vmatpush1.bf16.msra.mxu1 %v9421_v48  ;;  %4020 = vmatprep.subr.bf16.mxu0 %v9428_v2  ;;  %v9478_v48 = vcombine.high %v655_v4, %v659_v57  ;;  %v662_v2 = vld [vmem:[#allocation6 + $0x390] sm:$0xff]  ;;  %v707_v41 = vld [vmem:[#allocation6 + $0x4f8] sm:$0xff] }
 0x1f1   :  { %4192 = vmatprep.subr.bf16.mxu1 %v9430_v23  ;;  %v666_v23 = vld [vmem:[#allocation6 + $0x3b0] sm:$0xff] }
 0x1f2   :  { %v9483_v7 = vcombine.low %v662_v2, %v666_v23 }
 0x1f3   :  { %4021 = vmatpush1.bf16.msra.mxu0 %v9427_v42  ;;  %v9484_v42 = vcombine.high %v662_v2, %v666_v23  ;;  %v715_v2 = vld [vmem:[#allocation6 + $0x538] sm:$0xff]  ;;  %v9525_v23 = vcombine.low %v703_v27, %v707_v41 }
 0x1f4   :  { %4193 = vmatpush1.bf16.msra.mxu1 %v9429_v43  ;;  %4022 = vmatprep.subr.bf16.mxu0 %v9436_v51  ;;  %v9486_v43 = vcombine.high %v663_v45, %v667_v34  ;;  %v670_v51 = vld [vmem:[#allocation6 + $0x3d0] sm:$0xff] }
 0x1f5   :  { %4194 = vmatprep.subr.bf16.mxu1 %v9438_v19  ;;  %v674_v19 = vld [vmem:[#allocation6 + $0x3f0] sm:$0xff] }
 0x1f6   :  { %v9491_v61 = vcombine.low %v670_v51, %v674_v19 }
 0x1f7   :  { %4023 = vmatpush1.bf16.msra.mxu0 %v9435_v38  ;;  %v9492_v38 = vcombine.high %v670_v51, %v674_v19 }
 0x1f8   :  { %4195 = vmatpush1.bf16.msra.mxu1 %v9437_v62  ;;  %4024 = vmatprep.subr.bf16.mxu0 %v9444_v17  ;;  %v9494_v62 = vcombine.high %v671_v52, %v675_v6  ;;  %v678_v17 = vld [vmem:[#allocation6 + $0x410] sm:$0xff] }
 0x1f9   :  { %4196 = vmatprep.subr.bf16.mxu1 %v9446_v40  ;;  %v682_v40 = vld [vmem:[#allocation6 + $0x430] sm:$0xff] }
 0x1fa   :  { %v9499_v44 = vcombine.low %v678_v17, %v682_v40 }
 0x1fb   :  { %4025 = vmatpush1.bf16.msra.mxu0 %v9443_v15  ;;  %v9500_v15 = vcombine.high %v678_v17, %v682_v40 }
 0x1fc   :  { %4197 = vmatpush1.bf16.msra.mxu1 %v9445_v29  ;;  %4026 = vmatprep.subr.bf16.mxu0 %v9452_v0  ;;  %v9502_v29 = vcombine.high %v679_v33, %v683_v3  ;;  %v686_v0 = vld [vmem:[#allocation6 + $0x450] sm:$0xff] }
 0x1fd   :  { %4198 = vmatprep.subr.bf16.mxu1 %v9454_v53  ;;  %v690_v53 = vld [vmem:[#allocation6 + $0x470] sm:$0xff] }
 0x1fe   :  { %v9507_v5 = vcombine.low %v686_v0, %v690_v53 }
 0x1ff   :  { %4027 = vmatpush1.bf16.msra.mxu0 %v9451_v10  ;;  %v9508_v10 = vcombine.high %v686_v0, %v690_v53 }
 0x200   :  { %4199 = vmatpush1.bf16.msra.mxu1 %v9453_v55  ;;  %4028 = vmatprep.subr.bf16.mxu0 %v9460_v58  ;;  %v694_v55 = vld [vmem:[#allocation6 + $0x490] sm:$0xff] }
 0x201   :  { %4200 = vmatprep.subr.bf16.mxu1 %v9462_v60  ;;  %v698_v58 = vld [vmem:[#allocation6 + $0x4b0] sm:$0xff]  ;;  %v9510_v60 = vcombine.high %v687_v18, %v691_v28 }
 0x202   :  { %v9515_v4 = vcombine.low %v694_v55, %v698_v58  ;;  %v742_v28 = vld [vmem:[#allocation6 + $0x610] sm:$0xff] }
 0x203   :  { %4029 = vmatpush1.bf16.msra.mxu0 %v9459_v1  ;;  %v9516_v1 = vcombine.high %v694_v55, %v698_v58  ;;  %v747_v55 = vld [vmem:[#allocation6 + $0x638] sm:$0xff] }
 0x204   :  { %4201 = vmatpush1.bf16.msra.mxu1 %v9461_v9  ;;  %4030 = vmatprep.subr.bf16.mxu0 %v9468_v47  ;;  %v9518_v9 = vcombine.high %v695_v14, %v699_v20  ;;  %v702_v47 = vld [vmem:[#allocation6 + $0x4d0] sm:$0xff] }
 0x205   :  { %4202 = vmatprep.subr.bf16.mxu1 %v9470_v63  ;;  %v706_v63 = vld [vmem:[#allocation6 + $0x4f0] sm:$0xff] }
 0x206   :  { %v9524_v57 = vcombine.high %v702_v47, %v706_v63 }
 0x207   :  { %4031 = vmatpush1.bf16.msra.mxu0 %v9467_v39  ;;  %v9526_v39 = vcombine.high %v703_v27, %v707_v41 }
 0x208   :  { %4203 = vmatpush1.bf16.msra.mxu1 %v9469_v11  ;;  %4032 = vmatprep.subr.bf16.mxu0 %v9476_v32  ;;  %v710_v11 = vld [vmem:[#allocation6 + $0x510] sm:$0xff] }
 0x209   :  { %4204 = vmatprep.subr.bf16.mxu1 %v9478_v48  ;;  %v714_v32 = vld [vmem:[#allocation6 + $0x530] sm:$0xff]  ;;  %v711_v48 = vld [vmem:[#allocation6 + $0x518] sm:$0xff] }
 0x20a   :  { %v9532_v45 = vcombine.high %v710_v11, %v714_v32  ;;  %v9534_v34 = vcombine.high %v711_v48, %v715_v2  ;;  %v9531_v51 = vcombine.low %v710_v11, %v714_v32  ;;  %v9533_v19 = vcombine.low %v711_v48, %v715_v2 }
 0x20b   :  { %4033 = vmatpush1.bf16.msra.mxu0 %v9475_v46  ;;  %v718_v46 = vld [vmem:[#allocation6 + $0x550] sm:$0xff] }
 0x20c   :  { %4205 = vmatpush1.bf16.msra.mxu1 %v9477_v49  ;;  %4034 = vmatprep.subr.bf16.mxu0 %v9484_v42  ;;  %v722_v49 = vld [vmem:[#allocation6 + $0x570] sm:$0xff]  ;;  %v719_v42 = vld [vmem:[#allocation6 + $0x558] sm:$0xff] }
 0x20d   :  { %4206 = vmatprep.subr.bf16.mxu1 %v9486_v43  ;;  %v723_v43 = vld [vmem:[#allocation6 + $0x578] sm:$0xff]  ;;  %v9540_v52 = vcombine.high %v718_v46, %v722_v49  ;;  %v9539_v17 = vcombine.low %v718_v46, %v722_v49 }
 0x20e   :  { %v9542_v6 = vcombine.high %v719_v42, %v723_v43  ;;  %v9541_v40 = vcombine.low %v719_v42, %v723_v43 }
 0x20f   :  { %4035 = vmatpush1.bf16.msra.mxu0 %v9483_v7  ;;  %v726_v7 = vld [vmem:[#allocation6 + $0x590] sm:$0xff] }
 0x210   :  { %4207 = vmatpush1.bf16.msra.mxu1 %v9485_v12  ;;  %4036 = vmatprep.subr.bf16.mxu0 %v9492_v38  ;;  %v730_v12 = vld [vmem:[#allocation6 + $0x5b0] sm:$0xff]  ;;  %v727_v38 = vld [vmem:[#allocation6 + $0x598] sm:$0xff] }
 0x211   :  { %4208 = vmatprep.subr.bf16.mxu1 %v9494_v62  ;;  %v731_v62 = vld [vmem:[#allocation6 + $0x5b8] sm:$0xff]  ;;  %v9548_v33 = vcombine.high %v726_v7, %v730_v12  ;;  %v9547_v0 = vcombine.low %v726_v7, %v730_v12 }
 0x212   :  { %v9550_v3 = vcombine.high %v727_v38, %v731_v62  ;;  %v9549_v53 = vcombine.low %v727_v38, %v731_v62 }
 0x213   :  { %4037 = vmatpush1.bf16.msra.mxu0 %v9491_v61  ;;  %v734_v61 = vld [vmem:[#allocation6 + $0x5d0] sm:$0xff] }
 0x214   :  { %4209 = vmatpush1.bf16.msra.mxu1 %v9493_v16  ;;  %4049 = vmatprep.subr.bf16.mxu0 %v9500_v15  ;;  %v738_v16 = vld [vmem:[#allocation6 + $0x5f0] sm:$0xff]  ;;  %v735_v15 = vld [vmem:[#allocation6 + $0x5d8] sm:$0xff] }
 0x215   :  { %4221 = vmatprep.subr.bf16.mxu1 %v9502_v29  ;;  %v739_v29 = vld [vmem:[#allocation6 + $0x5f8] sm:$0xff]  ;;  %v9555_v58 = vcombine.low %v734_v61, %v738_v16 }
 0x216   :  { %4039 = vmatmul.mubr.bf16.vlgmr.msra.gmra.mrb[4].mxu0 %v11282_v36  ;;  %v9558_v18 = vcombine.high %v735_v15, %v739_v29 }
 0x217   :  { %4211 = vmatmul.mubr.bf16.vlgmr.msra.gmra.mrb[4].mxu1 %v11282_v36  ;;  %4050 = vmatpush1.bf16.msra.mxu0 %v9499_v44  ;;  %v9517_v36 = vcombine.low %v695_v14, %v699_v20  ;;  %v9556_v44 = vcombine.high %v734_v61, %v738_v16 }
 0x218   :  { %4081 = vmatprep.mubr.bf16.mxu0 %v11296_v54  ;;  %4222 = vmatpush1.bf16.msra.mxu1 %v9501_v50  ;;  %v746_v50 = vld [vmem:[#allocation6 + $0x630] sm:$0xff] }
 0x219   :  { %4253 = vmatprep.mubr.bf16.mxu1 %v11296_v54  ;;  %4051 = vmatprep.subr.bf16.mxu0 %v9508_v10  ;;  %v9523_v54 = vcombine.low %v702_v47, %v706_v63  ;;  %v743_v10 = vld [vmem:[#allocation6 + $0x618] sm:$0xff]  ;;  %v9564_v14 = vcombine.high %v742_v28, %v746_v50  ;;  %v9563_v47 = vcombine.low %v742_v28, %v746_v50 }
 0x21a   :  { %4223 = vmatprep.subr.bf16.mxu1 %v9510_v60  ;;  %v9557_v60 = vcombine.low %v735_v15, %v739_v29  ;;  %v9566_v20 = vcombine.high %v743_v10, %v747_v55  ;;  %v9565_v63 = vcombine.low %v743_v10, %v747_v55 }
 0x21b   :  { %4052 = vmatpush1.bf16.msra.mxu0 %v9507_v5  ;;  %v750_v5 = vld [vmem:[#allocation6 + $0x650] sm:$0xff] }
 0x21c   :  { %4224 = vmatpush1.bf16.msra.mxu1 %v9509_v59  ;;  %4053 = vmatprep.subr.bf16.mxu0 %v9516_v1  ;;  %v754_v59 = vld [vmem:[#allocation6 + $0x670] sm:$0xff]  ;;  %v751_v1 = vld [vmem:[#allocation6 + $0x658] sm:$0xff] }
 0x21d   :  { %4225 = vmatprep.subr.bf16.mxu1 %v9518_v9  ;;  %v755_v9 = vld [vmem:[#allocation6 + $0x678] sm:$0xff]  ;;  %v9572_v27 = vcombine.high %v750_v5, %v754_v59  ;;  %v9571_v11 = vcombine.low %v750_v5, %v754_v59 }
 0x21e   :  { %v9574_v41 = vcombine.high %v751_v1, %v755_v9  ;;  %v9573_v32 = vcombine.low %v751_v1, %v755_v9 }
 0x21f   :  { %4054 = vmatpush1.bf16.msra.mxu0 %v9515_v4  ;;  %v758_v4 = vld [vmem:[#allocation6 + $0x690] sm:$0xff] }
 0x220   :  { %4226 = vmatpush1.bf16.msra.mxu1 %v9517_v36  ;;  %4055 = vmatprep.subr.bf16.mxu0 %v9524_v57  ;;  %v762_v36 = vld [vmem:[#allocation6 + $0x6b0] sm:$0xff]  ;;  %v759_v57 = vld [vmem:[#allocation6 + $0x698] sm:$0xff] }
 0x221   :  { %4227 = vmatprep.subr.bf16.mxu1 %v9526_v39  ;;  %v763_v39 = vld [vmem:[#allocation6 + $0x6b8] sm:$0xff]  ;;  %v9580_v48 = vcombine.high %v758_v4, %v762_v36  ;;  %v9579_v46 = vcombine.low %v758_v4, %v762_v36 }
 0x222   :  { %v9582_v2 = vcombine.high %v759_v57, %v763_v39  ;;  %v9581_v49 = vcombine.low %v759_v57, %v763_v39 }
 0x223   :  { %4056 = vmatpush1.bf16.msra.mxu0 %v9523_v54  ;;  %v766_v54 = vld [vmem:[#allocation6 + $0x6d0] sm:$0xff] }
 0x224   :  { %4228 = vmatpush1.bf16.msra.mxu1 %v9525_v23  ;;  %4057 = vmatprep.subr.bf16.mxu0 %v9532_v45  ;;  %v770_v23 = vld [vmem:[#allocation6 + $0x6f0] sm:$0xff]  ;;  %v767_v45 = vld [vmem:[#allocation6 + $0x6d8] sm:$0xff] }
 0x225   :  { %4229 = vmatprep.subr.bf16.mxu1 %v9534_v34  ;;  %v771_v34 = vld [vmem:[#allocation6 + $0x6f8] sm:$0xff]  ;;  %v9588_v42 = vcombine.high %v766_v54, %v770_v23  ;;  %v9587_v7 = vcombine.low %v766_v54, %v770_v23 }
 0x226   :  { %v9590_v43 = vcombine.high %v767_v45, %v771_v34  ;;  %v9589_v12 = vcombine.low %v767_v45, %v771_v34  ;;  %v819_v54 = vld [vmem:[#allocation6 + $0x878] sm:$0xff]  ;;  %v822_v34 = vld [vmem:[#allocation6 + $0x890] sm:$0xff] }
 0x227   :  { %4058 = vmatpush1.bf16.msra.mxu0 %v9531_v51  ;;  %v774_v51 = vld [vmem:[#allocation6 + $0x710] sm:$0xff] }
 0x228   :  { %4230 = vmatpush1.bf16.msra.mxu1 %v9533_v19  ;;  %4059 = vmatprep.subr.bf16.mxu0 %v9540_v52  ;;  %v778_v19 = vld [vmem:[#allocation6 + $0x730] sm:$0xff]  ;;  %v775_v52 = vld [vmem:[#allocation6 + $0x718] sm:$0xff] }
 0x229   :  { %4231 = vmatprep.subr.bf16.mxu1 %v9542_v6  ;;  %v779_v6 = vld [vmem:[#allocation6 + $0x738] sm:$0xff]  ;;  %v9596_v38 = vcombine.high %v774_v51, %v778_v19  ;;  %v9595_v61 = vcombine.low %v774_v51, %v778_v19 }
 0x22a   :  { %v9598_v62 = vcombine.high %v775_v52, %v779_v6  ;;  %v9597_v16 = vcombine.low %v775_v52, %v779_v6 }
 0x22b   :  { %4060 = vmatpush1.bf16.msra.mxu0 %v9539_v17  ;;  %v782_v17 = vld [vmem:[#allocation6 + $0x750] sm:$0xff] }
 0x22c   :  { %4232 = vmatpush1.bf16.msra.mxu1 %v9541_v40  ;;  %4061 = vmatprep.subr.bf16.mxu0 %v9548_v33  ;;  %v786_v40 = vld [vmem:[#allocation6 + $0x770] sm:$0xff]  ;;  %v783_v33 = vld [vmem:[#allocation6 + $0x758] sm:$0xff] }
 0x22d   :  { %4233 = vmatprep.subr.bf16.mxu1 %v9550_v3  ;;  %v787_v3 = vld [vmem:[#allocation6 + $0x778] sm:$0xff]  ;;  %v9604_v15 = vcombine.high %v782_v17, %v786_v40  ;;  %v9603_v28 = vcombine.low %v782_v17, %v786_v40 }
 0x22e   :  { %v9606_v29 = vcombine.high %v783_v33, %v787_v3  ;;  %v9605_v50 = vcombine.low %v783_v33, %v787_v3  ;;  %v838_v3 = vld [vmem:[#allocation6 + $0x910] sm:$0xff] }
 0x22f   :  { %4062 = vmatpush1.bf16.msra.mxu0 %v9547_v0  ;;  %v790_v0 = vld [vmem:[#allocation6 + $0x790] sm:$0xff] }
 0x230   :  { %4234 = vmatpush1.bf16.msra.mxu1 %v9549_v53  ;;  %4063 = vmatprep.subr.bf16.mxu0 %v9556_v44  ;;  %v794_v53 = vld [vmem:[#allocation6 + $0x7b0] sm:$0xff]  ;;  %v791_v44 = vld [vmem:[#allocation6 + $0x798] sm:$0xff] }
 0x231   :  { %4235 = vmatprep.subr.bf16.mxu1 %v9558_v18  ;;  %v795_v18 = vld [vmem:[#allocation6 + $0x7b8] sm:$0xff]  ;;  %v9612_v10 = vcombine.high %v790_v0, %v794_v53  ;;  %v9611_v5 = vcombine.low %v790_v0, %v794_v53 }
 0x232   :  { %v9614_v55 = vcombine.high %v791_v44, %v795_v18  ;;  %v9613_v59 = vcombine.low %v791_v44, %v795_v18  ;;  %v846_v44 = vld [vmem:[#allocation6 + $0x950] sm:$0xff] }
 0x233   :  { %4064 = vmatpush1.bf16.msra.mxu0 %v9555_v58  ;;  %v798_v58 = vld [vmem:[#allocation6 + $0x7d0] sm:$0xff] }
 0x234   :  { %4236 = vmatpush1.bf16.msra.mxu1 %v9557_v60  ;;  %4065 = vmatprep.subr.bf16.mxu0 %v9564_v14  ;;  %v802_v60 = vld [vmem:[#allocation6 + $0x7f0] sm:$0xff]  ;;  %v799_v14 = vld [vmem:[#allocation6 + $0x7d8] sm:$0xff] }
 0x235   :  { %4237 = vmatprep.subr.bf16.mxu1 %v9566_v20  ;;  %v803_v20 = vld [vmem:[#allocation6 + $0x7f8] sm:$0xff]  ;;  %v9620_v1 = vcombine.high %v798_v58, %v802_v60  ;;  %v9619_v4 = vcombine.low %v798_v58, %v802_v60  ;;  %v850_v18 = vld [vmem:[#allocation6 + $0x970] sm:$0xff] }
 0x236   :  { %v9622_v9 = vcombine.high %v799_v14, %v803_v20  ;;  %v9621_v36 = vcombine.low %v799_v14, %v803_v20  ;;  %v9668_v58 = vcombine.high %v846_v44, %v850_v18  ;;  %v854_v14 = vld [vmem:[#allocation6 + $0x990] sm:$0xff] }
 0x237   :  { %4066 = vmatpush1.bf16.msra.mxu0 %v9563_v47  ;;  %v806_v47 = vld [vmem:[#allocation6 + $0x810] sm:$0xff] }
 0x238   :  { %4238 = vmatpush1.bf16.msra.mxu1 %v9565_v63  ;;  %4067 = vmatprep.subr.bf16.mxu0 %v9572_v27  ;;  %v810_v63 = vld [vmem:[#allocation6 + $0x830] sm:$0xff]  ;;  %v807_v27 = vld [vmem:[#allocation6 + $0x818] sm:$0xff] }
 0x239   :  { %4239 = vmatprep.subr.bf16.mxu1 %v9574_v41  ;;  %v811_v41 = vld [vmem:[#allocation6 + $0x838] sm:$0xff]  ;;  %v9628_v57 = vcombine.high %v806_v47, %v810_v63  ;;  %v858_v20 = vld [vmem:[#allocation6 + $0x9b0] sm:$0xff] }
 0x23a   :  { %v9630_v39 = vcombine.high %v807_v27, %v811_v41  ;;  %v9629_v23 = vcombine.low %v807_v27, %v811_v41  ;;  %v862_v27 = vld [vmem:[#allocation6 + $0x9d0] sm:$0xff] }
 0x23b   :  { %4068 = vmatpush1.bf16.msra.mxu0 %v9571_v11  ;;  %v814_v11 = vld [vmem:[#allocation6 + $0x850] sm:$0xff] }
 0x23c   :  { %4240 = vmatpush1.bf16.msra.mxu1 %v9573_v32  ;;  %4069 = vmatprep.subr.bf16.mxu0 %v9580_v48  ;;  %v818_v32 = vld [vmem:[#allocation6 + $0x870] sm:$0xff]  ;;  %v9627_v48 = vcombine.low %v806_v47, %v810_v63  ;;  %v9676_v47 = vcombine.high %v854_v14, %v858_v20 }
 0x23d   :  { %4241 = vmatprep.subr.bf16.mxu1 %v9582_v2  ;;  %v815_v2 = vld [vmem:[#allocation6 + $0x858] sm:$0xff]  ;;  %v9636_v45 = vcombine.high %v814_v11, %v818_v32  ;;  %v9635_v51 = vcombine.low %v814_v11, %v818_v32  ;;  %v866_v41 = vld [vmem:[#allocation6 + $0x9f0] sm:$0xff] }
 0x23e   :  { %v9637_v19 = vcombine.low %v815_v2, %v819_v54  ;;  %v9684_v11 = vcombine.high %v862_v27, %v866_v41 }
 0x23f   :  { %4070 = vmatpush1.bf16.msra.mxu0 %v9579_v46  ;;  %v826_v46 = vld [vmem:[#allocation6 + $0x8b0] sm:$0xff] }
 0x240   :  { %4242 = vmatpush1.bf16.msra.mxu1 %v9581_v49  ;;  %4071 = vmatprep.subr.bf16.mxu0 %v9588_v42  ;;  %v9638_v49 = vcombine.high %v815_v2, %v819_v54  ;;  %v823_v42 = vld [vmem:[#allocation6 + $0x898] sm:$0xff]  ;;  %v9644_v52 = vcombine.high %v822_v34, %v826_v46  ;;  %v9643_v17 = vcombine.low %v822_v34, %v826_v46  ;;  %v874_v2 = vld [vmem:[#allocation6 + $0xa30] sm:$0xff] }
 0x241   :  { %4243 = vmatprep.subr.bf16.mxu1 %v9590_v43  ;;  %v827_v43 = vld [vmem:[#allocation6 + $0x8b8] sm:$0xff] }
 0x242   :  { %v9646_v6 = vcombine.high %v823_v42, %v827_v43  ;;  %v871_v54 = vld [vmem:[#allocation6 + $0xa18] sm:$0xff] }
 0x243   :  { %4072 = vmatpush1.bf16.msra.mxu0 %v9587_v7  ;;  %v830_v7 = vld [vmem:[#allocation6 + $0x8d0] sm:$0xff] }
 0x244   :  { %4244 = vmatpush1.bf16.msra.mxu1 %v9589_v12  ;;  %4073 = vmatprep.subr.bf16.mxu0 %v9596_v38  ;;  %v834_v12 = vld [vmem:[#allocation6 + $0x8f0] sm:$0xff]  ;;  %v831_v38 = vld [vmem:[#allocation6 + $0x8d8] sm:$0xff] }
 0x245   :  { %4245 = vmatprep.subr.bf16.mxu1 %v9598_v62  ;;  %v835_v62 = vld [vmem:[#allocation6 + $0x8f8] sm:$0xff]  ;;  %v9652_v40 = vcombine.high %v830_v7, %v834_v12 }
 0x246   :  { %v9654_v33 = vcombine.high %v831_v38, %v835_v62 }
 0x247   :  { %4074 = vmatpush1.bf16.msra.mxu0 %v9595_v61  ;;  %v842_v61 = vld [vmem:[#allocation6 + $0x930] sm:$0xff] }
 0x248   :  { %4246 = vmatpush1.bf16.msra.mxu1 %v9597_v16  ;;  %4075 = vmatprep.subr.bf16.mxu0 %v9604_v15  ;;  %v839_v16 = vld [vmem:[#allocation6 + $0x918] sm:$0xff]  ;;  %v9660_v0 = vcombine.high %v838_v3, %v842_v61 }
 0x249   :  { %4247 = vmatprep.subr.bf16.mxu1 %v9606_v29  ;;  %v843_v15 = vld [vmem:[#allocation6 + $0x938] sm:$0xff]  ;;  %v9653_v29 = vcombine.low %v831_v38, %v835_v62  ;;  %v886_v38 = vld [vmem:[#allocation6 + $0xa90] sm:$0xff] }
 0x24a   :  { %v9662_v53 = vcombine.high %v839_v16, %v843_v15  ;;  %v890_v62 = vld [vmem:[#allocation6 + $0xab0] sm:$0xff] }
 0x24b   :  { %4076 = vmatpush1.bf16.msra.mxu0 %v9603_v28  ;;  %v847_v28 = vld [vmem:[#allocation6 + $0x958] sm:$0xff] }
 0x24c   :  { %4248 = vmatpush1.bf16.msra.mxu1 %v9605_v50  ;;  %4077 = vmatprep.subr.bf16.mxu0 %v9612_v10  ;;  %v851_v50 = vld [vmem:[#allocation6 + $0x978] sm:$0xff]  ;;  %v9659_v10 = vcombine.low %v838_v3, %v842_v61  ;;  %v9708_v3 = vcombine.high %v886_v38, %v890_v62 }
 0x24d   :  { %4249 = vmatprep.subr.bf16.mxu1 %v9614_v55  ;;  %v9661_v55 = vcombine.low %v839_v16, %v843_v15  ;;  %v9670_v60 = vcombine.high %v847_v28, %v851_v50  ;;  %v894_v16 = vld [vmem:[#allocation6 + $0xad0] sm:$0xff] }
 0x24e   :  { %v898_v15 = vld [vmem:[#allocation6 + $0xaf0] sm:$0xff] }
 0x24f   :  { %4078 = vmatpush1.bf16.msra.mxu0 %v9611_v5  ;;  %v855_v5 = vld [vmem:[#allocation6 + $0x998] sm:$0xff] }
 0x250   :  { %4250 = vmatpush1.bf16.msra.mxu1 %v9613_v59  ;;  %4079 = vmatprep.subr.bf16.mxu0 %v9620_v1  ;;  %v859_v59 = vld [vmem:[#allocation6 + $0x9b8] sm:$0xff]  ;;  %v9667_v1 = vcombine.low %v846_v44, %v850_v18  ;;  %v9716_v44 = vcombine.high %v894_v16, %v898_v15 }
 0x251   :  { %4251 = vmatprep.subr.bf16.mxu1 %v9622_v9  ;;  %v9669_v9 = vcombine.low %v847_v28, %v851_v50  ;;  %v9678_v63 = vcombine.high %v855_v5, %v859_v59  ;;  %v902_v28 = vld [vmem:[#allocation6 + $0xb10] sm:$0xff] }
 0x252   :  { %v906_v50 = vld [vmem:[#allocation6 + $0xb30] sm:$0xff] }
 0x253   :  { %4080 = vmatpush1.bf16.msra.mxu0 %v9619_v4  ;;  %v863_v4 = vld [vmem:[#allocation6 + $0x9d8] sm:$0xff] }
 0x254   :  { %4252 = vmatpush1.bf16.msra.mxu1 %v9621_v36  ;;  %4092 = vmatprep.subr.bf16.mxu0 %v9628_v57  ;;  %v867_v36 = vld [vmem:[#allocation6 + $0x9f8] sm:$0xff]  ;;  %v9675_v57 = vcombine.low %v854_v14, %v858_v20  ;;  %v9724_v14 = vcombine.high %v902_v28, %v906_v50 }
 0x255   :  { %4264 = vmatprep.subr.bf16.mxu1 %v9630_v39  ;;  %v9677_v39 = vcombine.low %v855_v5, %v859_v59  ;;  %v9686_v32 = vcombine.high %v863_v4, %v867_v36  ;;  %v9685_v34 = vcombine.low %v863_v4, %v867_v36  ;;  %v910_v5 = vld [vmem:[#allocation6 + $0xb50] sm:$0xff] }
 0x256   :  { %4082 = vmatmul.mubr.bf16.vlgmr.msra.gmra.mrb[4].mxu0 %v11312_v35  ;;  %v914_v59 = vld [vmem:[#allocation6 + $0xb70] sm:$0xff] }
 0x257   :  { %4254 = vmatmul.mubr.bf16.vlgmr.msra.gmra.mrb[4].mxu1 %v11312_v35  ;;  %4093 = vmatpush1.bf16.msra.mxu0 %v9627_v48  ;;  %v9645_v35 = vcombine.low %v823_v42, %v827_v43  ;;  %v870_v48 = vld [vmem:[#allocation6 + $0xa10] sm:$0xff] }
 0x258   :  { %4124 = vmatprep.mubr.bf16.mxu0 %v11366_v13  ;;  %4265 = vmatpush1.bf16.msra.mxu1 %v9629_v23  ;;  %v875_v23 = vld [vmem:[#allocation6 + $0xa38] sm:$0xff]  ;;  %v9692_v46 = vcombine.high %v870_v48, %v874_v2  ;;  %v878_v42 = vld [vmem:[#allocation6 + $0xa50] sm:$0xff] }
 0x259   :  { %4296 = vmatprep.mubr.bf16.mxu1 %v11366_v13  ;;  %4094 = vmatprep.subr.bf16.mxu0 %v9636_v45  ;;  %v9651_v13 = vcombine.low %v830_v7, %v834_v12  ;;  %v9683_v45 = vcombine.low %v862_v27, %v866_v41  ;;  %v882_v43 = vld [vmem:[#allocation6 + $0xa70] sm:$0xff]  ;;  %v9732_v27 = vcombine.high %v910_v5, %v914_v59 }
 0x25a   :  { %4266 = vmatprep.subr.bf16.mxu1 %v9638_v49  ;;  %v9694_v49 = vcombine.high %v871_v54, %v875_v23  ;;  %v9700_v7 = vcombine.high %v878_v42, %v882_v43  ;;  %v918_v4 = vld [vmem:[#allocation6 + $0xb90] sm:$0xff] }
 0x25b   :  { %4095 = vmatpush1.bf16.msra.mxu0 %v9635_v51  ;;  %v879_v51 = vld [vmem:[#allocation6 + $0xa58] sm:$0xff]  ;;  %v922_v36 = vld [vmem:[#allocation6 + $0xbb0] sm:$0xff] }
 0x25c   :  { %4267 = vmatpush1.bf16.msra.mxu1 %v9637_v19  ;;  %4096 = vmatprep.subr.bf16.mxu0 %v9644_v52  ;;  %v883_v19 = vld [vmem:[#allocation6 + $0xa78] sm:$0xff]  ;;  %v9691_v52 = vcombine.low %v870_v48, %v874_v2  ;;  %v9740_v48 = vcombine.high %v918_v4, %v922_v36 }
 0x25d   :  { %4268 = vmatprep.subr.bf16.mxu1 %v9646_v6  ;;  %v9693_v6 = vcombine.low %v871_v54, %v875_v23  ;;  %v9702_v12 = vcombine.high %v879_v51, %v883_v19  ;;  %v926_v54 = vld [vmem:[#allocation6 + $0xbd0] sm:$0xff] }
 0x25e   :  { %v930_v23 = vld [vmem:[#allocation6 + $0xbf0] sm:$0xff] }
 0x25f   :  { %4097 = vmatpush1.bf16.msra.mxu0 %v9643_v17  ;;  %v887_v17 = vld [vmem:[#allocation6 + $0xa98] sm:$0xff] }
 0x260   :  { %4269 = vmatpush1.bf16.msra.mxu1 %v9645_v35  ;;  %4098 = vmatprep.subr.bf16.mxu0 %v9652_v40  ;;  %v891_v35 = vld [vmem:[#allocation6 + $0xab8] sm:$0xff]  ;;  %v9699_v40 = vcombine.low %v878_v42, %v882_v43  ;;  %v9748_v42 = vcombine.high %v926_v54, %v930_v23 }
 0x261   :  { %4270 = vmatprep.subr.bf16.mxu1 %v9654_v33  ;;  %v9701_v33 = vcombine.low %v879_v51, %v883_v19  ;;  %v9710_v61 = vcombine.high %v887_v17, %v891_v35  ;;  %v934_v51 = vld [vmem:[#allocation6 + $0xc10] sm:$0xff] }
 0x262   :  { %v938_v19 = vld [vmem:[#allocation6 + $0xc30] sm:$0xff] }
 0x263   :  { %4099 = vmatpush1.bf16.msra.mxu0 %v9651_v13  ;;  %v895_v13 = vld [vmem:[#allocation6 + $0xad8] sm:$0xff] }
 0x264   :  { %4271 = vmatpush1.bf16.msra.mxu1 %v9653_v29  ;;  %4100 = vmatprep.subr.bf16.mxu0 %v9660_v0  ;;  %v899_v29 = vld [vmem:[#allocation6 + $0xaf8] sm:$0xff]  ;;  %v9707_v0 = vcombine.low %v886_v38, %v890_v62  ;;  %v9756_v38 = vcombine.high %v934_v51, %v938_v19 }
 0x265   :  { %4272 = vmatprep.subr.bf16.mxu1 %v9662_v53  ;;  %v9709_v53 = vcombine.low %v887_v17, %v891_v35  ;;  %v9718_v18 = vcombine.high %v895_v13, %v899_v29  ;;  %v942_v17 = vld [vmem:[#allocation6 + $0xc50] sm:$0xff] }
 0x266   :  { %v946_v35 = vld [vmem:[#allocation6 + $0xc70] sm:$0xff] }
 0x267   :  { %4101 = vmatpush1.bf16.msra.mxu0 %v9659_v10  ;;  %v903_v10 = vld [vmem:[#allocation6 + $0xb18] sm:$0xff] }
 0x268   :  { %4273 = vmatpush1.bf16.msra.mxu1 %v9661_v55  ;;  %4102 = vmatprep.subr.bf16.mxu0 %v9668_v58  ;;  %v907_v55 = vld [vmem:[#allocation6 + $0xb38] sm:$0xff]  ;;  %v9715_v58 = vcombine.low %v894_v16, %v898_v15  ;;  %v9764_v16 = vcombine.high %v942_v17, %v946_v35  ;;  %v950_v15 = vld [vmem:[#allocation6 + $0xc90] sm:$0xff] }
 0x269   :  { %4274 = vmatprep.subr.bf16.mxu1 %v9670_v60  ;;  %v9717_v60 = vcombine.low %v895_v13, %v899_v29  ;;  %v9726_v20 = vcombine.high %v903_v10, %v907_v55  ;;  %v954_v13 = vld [vmem:[#allocation6 + $0xcb0] sm:$0xff] }
 0x26b   :  { %4103 = vmatpush1.bf16.msra.mxu0 %v9667_v1  ;;  %v911_v1 = vld [vmem:[#allocation6 + $0xb58] sm:$0xff] }
 0x26c   :  { %4275 = vmatpush1.bf16.msra.mxu1 %v9669_v9  ;;  %4104 = vmatprep.subr.bf16.mxu0 %v9676_v47  ;;  %v915_v9 = vld [vmem:[#allocation6 + $0xb78] sm:$0xff]  ;;  %v9723_v47 = vcombine.low %v902_v28, %v906_v50  ;;  %v9772_v28 = vcombine.high %v950_v15, %v954_v13 }
 0x26d   :  { %4276 = vmatprep.subr.bf16.mxu1 %v9678_v63  ;;  %v9725_v63 = vcombine.low %v903_v10, %v907_v55  ;;  %v9734_v41 = vcombine.high %v911_v1, %v915_v9  ;;  %v958_v10 = vld [vmem:[#allocation6 + $0xcd0] sm:$0xff] }
 0x26e   :  { %v962_v55 = vld [vmem:[#allocation6 + $0xcf0] sm:$0xff] }
 0x26f   :  { %4105 = vmatpush1.bf16.msra.mxu0 %v9675_v57  ;;  %v919_v57 = vld [vmem:[#allocation6 + $0xb98] sm:$0xff] }
 0x270   :  { %4277 = vmatpush1.bf16.msra.mxu1 %v9677_v39  ;;  %4106 = vmatprep.subr.bf16.mxu0 %v9684_v11  ;;  %v923_v39 = vld [vmem:[#allocation6 + $0xbb8] sm:$0xff]  ;;  %v9731_v11 = vcombine.low %v910_v5, %v914_v59  ;;  %v966_v59 = vld [vmem:[#allocation6 + $0xd10] sm:$0xff] }
 0x271   :  { %4278 = vmatprep.subr.bf16.mxu1 %v9686_v32  ;;  %v9733_v32 = vcombine.low %v911_v1, %v915_v9  ;;  %v9742_v2 = vcombine.high %v919_v57, %v923_v39  ;;  %v970_v1 = vld [vmem:[#allocation6 + $0xd30] sm:$0xff]  ;;  %v967_v9 = vld [vmem:[#allocation6 + $0xd18] sm:$0xff] }
 0x273   :  { %4107 = vmatpush1.bf16.msra.mxu0 %v9683_v45  ;;  %v927_v45 = vld [vmem:[#allocation6 + $0xbd8] sm:$0xff] }
 0x274   :  { %4279 = vmatpush1.bf16.msra.mxu1 %v9685_v34  ;;  %4108 = vmatprep.subr.bf16.mxu0 %v9692_v46  ;;  %v931_v34 = vld [vmem:[#allocation6 + $0xbf8] sm:$0xff]  ;;  %v9739_v46 = vcombine.low %v918_v4, %v922_v36  ;;  %v974_v4 = vld [vmem:[#allocation6 + $0xd50] sm:$0xff] }
 0x275   :  { %4280 = vmatprep.subr.bf16.mxu1 %v9694_v49  ;;  %v9741_v49 = vcombine.low %v919_v57, %v923_v39  ;;  %v9750_v43 = vcombine.high %v927_v45, %v931_v34  ;;  %v978_v36 = vld [vmem:[#allocation6 + $0xd70] sm:$0xff]  ;;  %v975_v57 = vld [vmem:[#allocation6 + $0xd58] sm:$0xff] }
 0x276   :  { %v979_v39 = vld [vmem:[#allocation6 + $0xd78] sm:$0xff] }
 0x277   :  { %4109 = vmatpush1.bf16.msra.mxu0 %v9691_v52  ;;  %v935_v52 = vld [vmem:[#allocation6 + $0xc18] sm:$0xff] }
 0x278   :  { %4281 = vmatpush1.bf16.msra.mxu1 %v9693_v6  ;;  %4110 = vmatprep.subr.bf16.mxu0 %v9700_v7  ;;  %v939_v6 = vld [vmem:[#allocation6 + $0xc38] sm:$0xff]  ;;  %v9747_v7 = vcombine.low %v926_v54, %v930_v23  ;;  %v9798_v54 = vcombine.high %v975_v57, %v979_v39  ;;  %v982_v23 = vld [vmem:[#allocation6 + $0xd90] sm:$0xff] }
 0x279   :  { %4282 = vmatprep.subr.bf16.mxu1 %v9702_v12  ;;  %v9749_v12 = vcombine.low %v927_v45, %v931_v34  ;;  %v9758_v62 = vcombine.high %v935_v52, %v939_v6  ;;  %v986_v45 = vld [vmem:[#allocation6 + $0xdb0] sm:$0xff] }
 0x27b   :  { %4111 = vmatpush1.bf16.msra.mxu0 %v9699_v40  ;;  %v9755_v40 = vcombine.low %v934_v51, %v938_v19  ;;  %v9795_v51 = vcombine.low %v974_v4, %v978_v36  ;;  %v12060_v19 = vld [vmem:[#allocation17_spill] sm:$0xff] }
 0x27c   :  { %4283 = vmatpush1.bf16.msra.mxu1 %v9701_v33  ;;  %4112 = vmatprep.subr.bf16.mxu0 %v9708_v3  ;;  %v943_v33 = vld [vmem:[#allocation6 + $0xc58] sm:$0xff] }
 0x27d   :  { %4284 = vmatprep.subr.bf16.mxu1 %v9710_v61  ;;  %v947_v3 = vld [vmem:[#allocation6 + $0xc78] sm:$0xff]  ;;  %v9757_v61 = vcombine.low %v935_v52, %v939_v6  ;;  %v9797_v6 = vcombine.low %v975_v57, %v979_v39 }
 0x27e   :  { %v9766_v29 = vcombine.high %v943_v33, %v947_v3 }
 0x27f   :  { %4113 = vmatpush1.bf16.msra.mxu0 %v9707_v0  ;;  %v951_v0 = vld [vmem:[#allocation6 + $0xc98] sm:$0xff] }
 0x280   :  { %4285 = vmatpush1.bf16.msra.mxu1 %v9709_v53  ;;  %4114 = vmatprep.subr.bf16.mxu0 %v9716_v44  ;;  %v955_v53 = vld [vmem:[#allocation6 + $0xcb8] sm:$0xff]  ;;  %v9763_v44 = vcombine.low %v942_v17, %v946_v35 }
 0x281   :  { %4286 = vmatprep.subr.bf16.mxu1 %v9718_v18  ;;  %v9765_v18 = vcombine.low %v943_v33, %v947_v3  ;;  %v9774_v50 = vcombine.high %v951_v0, %v955_v53  ;;  %v11454_v35 = vld [vmem:[#allocation6 + $0xdd8] sm:$0xff] }
 0x283   :  { %4115 = vmatpush1.bf16.msra.mxu0 %v9715_v58  ;;  %v959_v58 = vld [vmem:[#allocation6 + $0xcd8] sm:$0xff] }
 0x284   :  { %4287 = vmatpush1.bf16.msra.mxu1 %v9717_v60  ;;  %4116 = vmatprep.subr.bf16.mxu0 %v9724_v14  ;;  %v963_v60 = vld [vmem:[#allocation6 + $0xcf8] sm:$0xff]  ;;  %v9771_v14 = vcombine.low %v950_v15, %v954_v13 }
 0x285   :  { %4288 = vmatprep.subr.bf16.mxu1 %v9726_v20  ;;  %v9780_v20 = vcombine.high %v958_v10, %v962_v55  ;;  %v9782_v5 = vcombine.high %v959_v58, %v963_v60 }
 0x287   :  { %4117 = vmatpush1.bf16.msra.mxu0 %v9723_v47  ;;  %v971_v47 = vld [vmem:[#allocation6 + $0xd38] sm:$0xff] }
 0x288   :  { %4289 = vmatpush1.bf16.msra.mxu1 %v9725_v63  ;;  %4118 = vmatprep.subr.bf16.mxu0 %v9732_v27  ;;  %v9781_v63 = vcombine.low %v959_v58, %v963_v60  ;;  %v9788_v27 = vcombine.high %v966_v59, %v970_v1 }
 0x289   :  { %4290 = vmatprep.subr.bf16.mxu1 %v9734_v41  ;;  %v9790_v41 = vcombine.high %v967_v9, %v971_v47 }
 0x28b   :  { %4119 = vmatpush1.bf16.msra.mxu0 %v9731_v11  ;;  %v9787_v11 = vcombine.low %v966_v59, %v970_v1 }
 0x28c   :  { %4291 = vmatpush1.bf16.msra.mxu1 %v9733_v32  ;;  %4120 = vmatprep.subr.bf16.mxu0 %v9740_v48  ;;  %v1060_v32 = vld [vmem:[#allocation7] sm:$0xff]  ;;  %v9789_v48 = vcombine.low %v967_v9, %v971_v47  ;;  %v1003_v47 = vld [vmem:[#allocation6 + $0xe38] sm:$0xff] }
 0x28d   :  { %4292 = vmatprep.subr.bf16.mxu1 %v9742_v2  ;;  %v9796_v2 = vcombine.high %v974_v4, %v978_v36  ;;  %v1065_v34 = vrot.slane %v1060_v32, %v11101_v24  ;;  %v1077_v52 = vrot.slane %v1060_v32, %v12060_v19 }
 0x28f   :  { %4121 = vmatpush1.bf16.msra.mxu0 %v9739_v46  ;;  %v983_v46 = vld [vmem:[#allocation6 + $0xd98] sm:$0xff] }
 0x290   :  { %4293 = vmatpush1.bf16.msra.mxu1 %v9741_v49  ;;  %4122 = vmatprep.subr.bf16.mxu0 %v9748_v42  ;;  %v987_v49 = vld [vmem:[#allocation6 + $0xdb8] sm:$0xff]  ;;  %v1073_v42 = vrot.slane %v1060_v32, %v11114_v31 }
 0x291   :  { %4294 = vmatprep.subr.bf16.mxu1 %v9750_v43  ;;  %v1069_v43 = vrot.slane %v1060_v32, %v11104_v25  ;;  %v9806_v17 = vcombine.high %v983_v46, %v987_v49 }
 0x293   :  { %4123 = vmatpush1.bf16.msra.mxu0 %v9747_v7  ;;  %v9804_v7 = vcombine.high %v982_v23, %v986_v45 }
 0x294   :  { %4295 = vmatpush1.bf16.msra.mxu1 %v9749_v12  ;;  %4135 = vmatprep.subr.bf16.mxu0 %v9756_v38  ;;  %v11450_v12 = vld [vmem:[#allocation6 + $0xdd0] sm:$0xff] }
 0x295   :  { %4307 = vmatprep.subr.bf16.mxu1 %v9758_v62  ;;  %v11452_v38 = vld [vmem:[#allocation6 + $0xdf0] sm:$0xff] }
 0x296   :  { %4125 = vmatmul.mubr.bf16.vlgmr.msra.gmra.mrb[4].mxu0 %v11406_v56 }
 0x297   :  { %4297 = vmatmul.mubr.bf16.vlgmr.msra.gmra.mrb[4].mxu1 %v11406_v56  ;;  %4136 = vmatpush1.bf16.msra.mxu0 %v9755_v40  ;;  %v9773_v56 = vcombine.low %v951_v0, %v955_v53  ;;  %v995_v40 = vld [vmem:[#allocation6 + $0xdf8] sm:$0xff]  ;;  %v9805_v53 = vcombine.low %v983_v46, %v987_v49  ;;  %v1006_v46 = vld [vmem:[#allocation6 + $0xe50] sm:$0xff] }
 0x298   :  { %4167 = vmatprep.mubr.bf16.mxu0 %v11413_v30  ;;  %4308 = vmatpush1.bf16.msra.mxu1 %v9757_v61  ;;  %v9814_v60 = vcombine.high %v11454_v35, %v995_v40  ;;  %v9813_v57 = vcombine.low %v11454_v35, %v995_v40  ;;  %v1010_v49 = vld [vmem:[#allocation6 + $0xe70] sm:$0xff] }
 0x299   :  { %4339 = vmatprep.mubr.bf16.mxu1 %v11413_v30  ;;  %4137 = vmatprep.subr.bf16.mxu0 %v9764_v16  ;;  %v9779_v30 = vcombine.low %v958_v10, %v962_v55  ;;  %v9803_v16 = vcombine.low %v982_v23, %v986_v45  ;;  %v9828_v35 = vcombine.high %v1006_v46, %v1010_v49 }
 0x29a   :  { %4309 = vmatprep.subr.bf16.mxu1 %v9766_v29 }
 0x29b   :  { %4138 = vmatpush1.bf16.msra.mxu0 %v9763_v44  ;;  %v9812_v44 = vcombine.high %v11450_v12, %v11452_v38 }
 0x29c   :  { %4310 = vmatpush1.bf16.msra.mxu1 %v9765_v18  ;;  %4139 = vmatprep.subr.bf16.mxu0 %v9772_v28  ;;  %v998_v18 = vld [vmem:[#allocation6 + $0xe10] sm:$0xff] }
 0x29d   :  { %4311 = vmatprep.subr.bf16.mxu1 %v9774_v50 }
 0x29f   :  { %4140 = vmatpush1.bf16.msra.mxu0 %v9771_v14  ;;  %v1002_v14 = vld [vmem:[#allocation6 + $0xe30] sm:$0xff] }
 0x2a0   :  { %4312 = vmatpush1.bf16.msra.mxu1 %v9773_v56  ;;  %4141 = vmatprep.subr.bf16.mxu0 %v9780_v20  ;;  %v999_v56 = vld [vmem:[#allocation6 + $0xe18] sm:$0xff]  ;;  %v9820_v39 = vcombine.high %v998_v18, %v1002_v14 }
 0x2a1   :  { %4313 = vmatprep.subr.bf16.mxu1 %v9782_v5 }
 0x2a3   :  { %4142 = vmatpush1.bf16.msra.mxu0 %v9779_v30 }
 0x2a4   :  { %4314 = vmatpush1.bf16.msra.mxu1 %v9781_v63  ;;  %4143 = vmatprep.subr.bf16.mxu0 %v9788_v27 }
 0x2a5   :  { %4315 = vmatprep.subr.bf16.mxu1 %v9790_v41  ;;  %v9811_v41 = vcombine.low %v11450_v12, %v11452_v38  ;;  %v9819_v38 = vcombine.low %v998_v18, %v1002_v14  ;;  %v1023_v18 = vld [vmem:[#allocation6 + $0xed8] sm:$0xff]  ;;  %v1034_v14 = vld [vmem:[#allocation6 + $0xf30] sm:$0xff] }
 0x2a7   :  { %4144 = vmatpush1.bf16.msra.mxu0 %v9787_v11 }
 0x2a8   :  { %4316 = vmatpush1.bf16.msra.mxu1 %v9789_v48  ;;  %4145 = vmatprep.subr.bf16.mxu0 %v9796_v2  ;;  %v9822_v2 = vcombine.high %v999_v56, %v1003_v47 }
 0x2a9   :  { %v3825_v62 = vpop.f32.mrb[0].mxu0  ;;  %4317 = vmatprep.subr.bf16.mxu1 %v9798_v54 }
 0x2aa   :  { %v10544_v33 = vadd.f32 %v3825_v62, %v1065_v34  ;;  %v3997_v3 = vpop.f32.mrb[0].mxu1  ;;  %v3827_v61 = vpop.f32.mrb[1].mxu0 }
 0x2ab   :  { %v10548_v15 = vadd.f32 %v3997_v3, %v1073_v42  ;;  %v10545_v13 = vadd.f32 %v3827_v61, %v1069_v43  ;;  %v3999_v29 = vpop.f32.mrb[1].mxu1  ;;  %v3829_v0 = vpop.f32.mrb[2].mxu0  ;;  %4146 = vmatpush1.bf16.msra.mxu0 %v9795_v51  ;;  %v1018_v3 = vld [vmem:[#allocation6 + $0xeb0] sm:$0xff]  ;;  %v1015_v61 = vld [vmem:[#allocation6 + $0xe98] sm:$0xff] }
 0x2ac   :  { %v4350_v28 = vmul.f32 0.01, %v10544_v33  ;;  %v10549_v50 = vadd.f32 %v3999_v29, %v1077_v52  ;;  %v10546_v10 = vadd.f32 %v3829_v0, %v1065_v34  ;;  %v4001_v55 = vpop.f32.mrb[2].mxu1  ;;  %4318 = vmatpush1.bf16.msra.mxu1 %v9797_v6  ;;  %v3831_v58 = vpop.f32.mrb[3].mxu0  ;;  %4147 = vmatprep.subr.bf16.mxu0 %v9804_v7  ;;  %v1011_v6 = vld [vmem:[#allocation6 + $0xe78] sm:$0xff] }
 0x2ad   :  { %v4352_v20 = vmul.f32 0.01, %v10548_v15  ;;  %v4351_v5 = vmul.f32 0.01, %v10545_v13  ;;  %v10550_v59 = vadd.f32 %v4001_v55, %v1073_v42  ;;  %v10547_v1 = vadd.f32 %v3831_v58, %v1069_v43  ;;  %v4003_v9 = vpop.f32.mrb[3].mxu1  ;;  %4319 = vmatprep.subr.bf16.mxu1 %v9806_v17 }
 0x2ae   :  { %v4353_v30 = vmul.f32 0.01, %v10549_v50  ;;  %v4358_v63 = vmul.f32 0.01, %v10546_v10  ;;  %v10551_v27 = vadd.f32 %v4003_v9, %v1077_v52  ;;  %v4366_v11 = vmax.f32 %v10544_v33, %v4350_v28  ;;  %v1007_v52 = vld [vmem:[#allocation6 + $0xe58] sm:$0xff]  ;;  %v1014_v33 = vld [vmem:[#allocation6 + $0xe90] sm:$0xff] }
 0x2af   :  { %v4360_v4 = vmul.f32 0.01, %v10550_v59  ;;  %v4359_v36 = vmul.f32 0.01, %v10547_v1  ;;  %4148 = vmatpush1.bf16.msra.mxu0 %v9803_v16  ;;  %v4368_v54 = vmax.f32 %v10548_v15, %v4352_v20  ;;  %v4367_v23 = vmax.f32 %v10545_v13, %v4351_v5  ;;  %v1019_v16 = vld [vmem:[#allocation6 + $0xeb8] sm:$0xff] }
 0x2b0   :  { %v4374_v32 = vmax.f32 %v10546_v10, %v4358_v63  ;;  %v4361_v48 = vmul.f32 0.01, %v10551_v27  ;;  %4320 = vmatpush1.bf16.msra.mxu1 %v9805_v53  ;;  %4149 = vmatprep.subr.bf16.mxu0 %v9812_v44  ;;  %v4369_v42 = vmax.f32 %v10549_v50, %v4353_v30  ;;  %v9821_v17 = vcombine.low %v999_v56, %v1003_v47  ;;  %v1022_v53 = vld [vmem:[#allocation6 + $0xed0] sm:$0xff]  ;;  %v1027_v28 = vld [vmem:[#allocation6 + $0xef8] sm:$0xff] }
 0x2b1   :  { %v4376_v45 = vmax.f32 %v10550_v59, %v4360_v4  ;;  %v4375_v34 = vmax.f32 %v10547_v1, %v4359_v36  ;;  %4321 = vmatprep.subr.bf16.mxu1 %v9814_v60  ;;  %v9830_v40 = vcombine.high %v1007_v52, %v1011_v6  ;;  %v9827_v15 = vcombine.low %v1006_v46, %v1010_v49  ;;  %v1026_v44 = vld [vmem:[#allocation6 + $0xef0] sm:$0xff]  ;;  %v1031_v56 = vld [vmem:[#allocation6 + $0xf18] sm:$0xff] }
 0x2b2   :  { %v11462_v43 = vpack.c.bf16 %v4374_v32, %v4366_v11  ;;  %v4377_v51 = vmax.f32 %v10551_v27, %v4361_v48  ;;  %v9829_v13 = vcombine.low %v1007_v52, %v1011_v6  ;;  %v9836_v29 = vcombine.high %v1014_v33, %v1018_v3  ;;  %v1030_v60 = vld [vmem:[#allocation6 + $0xf10] sm:$0xff]  ;;  %v1035_v20 = vld [vmem:[#allocation6 + $0xf38] sm:$0xff] }
 0x2b3   :  { %v11464_v7 = vpack.c.bf16 %v4376_v45, %v4368_v54  ;;  %v11466_v12 = vpack.c.bf16 %v4375_v34, %v4367_v23  ;;  %4150 = vmatpush1.bf16.msra.mxu0 %v9811_v41  ;;  %v9838_v0 = vcombine.high %v1015_v61, %v1019_v16  ;;  %v9835_v50 = vcombine.low %v1014_v33, %v1018_v3  ;;  %v1038_v47 = vld [vmem:[#allocation6 + $0xf50] sm:$0xff]  ;;  %v1039_v63 = vld [vmem:[#allocation6 + $0xf58] sm:$0xff] }
 0x2b4   :  { %v11468_v62 = vpack.c.bf16 %v4377_v51, %v4369_v42  ;;  %4322 = vmatpush1.bf16.msra.mxu1 %v9813_v57  ;;  %4151 = vmatprep.subr.bf16.mxu0 %v9820_v39  ;;  %v9837_v10 = vcombine.low %v1015_v61, %v1019_v16  ;;  %v9844_v55 = vcombine.high %v1022_v53, %v1026_v44  ;;  %v1042_v30 = vld [vmem:[#allocation6 + $0xf70] sm:$0xff]  ;;  %v1043_v27 = vld [vmem:[#allocation6 + $0xf78] sm:$0xff] }
 0x2b5   :  { %4323 = vmatprep.subr.bf16.mxu1 %v9822_v2  ;;  %v9846_v58 = vcombine.high %v1023_v18, %v1027_v28  ;;  %v9843_v5 = vcombine.low %v1022_v53, %v1026_v44  ;;  %v9845_v59 = vcombine.low %v1023_v18, %v1027_v28  ;;  %v9852_v1 = vcombine.high %v1030_v60, %v1034_v14  ;;  %v1046_v39 = vld [vmem:[#allocation6 + $0xf90] sm:$0xff]  ;;  %v1047_v32 = vld [vmem:[#allocation6 + $0xf98] sm:$0xff] }
 0x2b6   :  { %v9854_v9 = vcombine.high %v1031_v56, %v1035_v20  ;;  %v9851_v41 = vcombine.low %v1030_v60, %v1034_v14  ;;  %v9853_v4 = vcombine.low %v1031_v56, %v1035_v20  ;;  %v9860_v36 = vcombine.high %v1038_v47, %v1042_v30  ;;  %v1050_v11 = vld [vmem:[#allocation6 + $0xfb0] sm:$0xff]  ;;  %v1051_v48 = vld [vmem:[#allocation6 + $0xfb8] sm:$0xff] }
 0x2b7   :  { %4152 = vmatpush1.bf16.msra.mxu0 %v9819_v38  ;;  %v9862_v57 = vcombine.high %v1039_v63, %v1043_v27  ;;  %v9859_v2 = vcombine.low %v1038_v47, %v1042_v30  ;;  %v9861_v54 = vcombine.low %v1039_v63, %v1043_v27  ;;  %v9868_v23 = vcombine.high %v1046_v39, %v1050_v11  ;;  %v1054_v34 = vld [vmem:[#allocation6 + $0xfd0] sm:$0xff]  ;;  %v1055_v49 = vld [vmem:[#allocation6 + $0xfd8] sm:$0xff] }
 0x2b8   :  { %4324 = vmatpush1.bf16.msra.mxu1 %v9821_v17  ;;  %4153 = vmatprep.subr.bf16.mxu0 %v9828_v35  ;;  %v9870_v45 = vcombine.high %v1047_v32, %v1051_v48  ;;  %v1058_v46 = vld [vmem:[#allocation6 + $0xff0] sm:$0xff]  ;;  %v1059_v42 = vld [vmem:[#allocation6 + $0xff8] sm:$0xff]  ;;  %v9867_v51 = vcombine.low %v1046_v39, %v1050_v11  ;;  %v9869_v52 = vcombine.low %v1047_v32, %v1051_v48  ;;  %v4390_v17 = vld [vmem:[#allocation9] sm:$0xff] }
 0x2b9   :  { %4325 = vmatprep.subr.bf16.mxu1 %v9830_v40  ;;  %v9876_v6 = vcombine.high %v1054_v34, %v1058_v46  ;;  %v9878_v38 = vcombine.high %v1055_v49, %v1059_v42  ;;  %v4394_v35 = vld [vmem:[#allocation9 + $0x20] sm:$0xff]  ;;  %v4391_v40 = vld [vmem:[#allocation9 + $0x8] sm:$0xff]  ;;  %v9875_v3 = vcombine.low %v1054_v34, %v1058_v46  ;;  %v9877_v61 = vcombine.low %v1055_v49, %v1059_v42 }
 0x2ba   :  { %v4395_v33 = vld [vmem:[#allocation9 + $0x28] sm:$0xff]  ;;  %v9880_v16 = vcombine.high %v4390_v17, %v4394_v35 }
 0x2bb   :  { %4154 = vmatpush1.bf16.msra.mxu0 %v9827_v15  ;;  %v9882_v15 = vcombine.high %v4391_v40, %v4395_v33  ;;  %v4399_v53 = vld [vmem:[#allocation9 + $0x48] sm:$0xff]  ;;  %v9881_v18 = vcombine.low %v4391_v40, %v4395_v33 }
 0x2bc   :  { %4326 = vmatpush1.bf16.msra.mxu1 %v9829_v13  ;;  %4155 = vmatprep.subr.bf16.mxu0 %v9836_v29  ;;  %v4398_v13 = vld [vmem:[#allocation9 + $0x40] sm:$0xff]  ;;  %v4403_v44 = vld [vmem:[#allocation9 + $0x68] sm:$0xff] }
 0x2bd   :  { %4327 = vmatprep.subr.bf16.mxu1 %v9838_v0  ;;  %v4402_v29 = vld [vmem:[#allocation9 + $0x60] sm:$0xff]  ;;  %v9879_v0 = vcombine.low %v4390_v17, %v4394_v35  ;;  %v4411_v60 = vld [vmem:[#allocation9 + $0xa8] sm:$0xff]  ;;  %v9889_v56 = vcombine.low %v4399_v53, %v4403_v44 }
 0x2be   :  { %v9888_v28 = vcombine.high %v4398_v13, %v4402_v29  ;;  %v9887_v14 = vcombine.low %v4398_v13, %v4402_v29  ;;  %v4419_v47 = vld [vmem:[#allocation9 + $0xe8] sm:$0xff] }
 0x2bf   :  { %4156 = vmatpush1.bf16.msra.mxu0 %v9835_v50  ;;  %v4406_v50 = vld [vmem:[#allocation9 + $0x80] sm:$0xff] }
 0x2c0   :  { %4328 = vmatpush1.bf16.msra.mxu1 %v9837_v10  ;;  %4157 = vmatprep.subr.bf16.mxu0 %v9844_v55  ;;  %v4410_v10 = vld [vmem:[#allocation9 + $0xa0] sm:$0xff]  ;;  %v9890_v55 = vcombine.high %v4399_v53, %v4403_v44 }
 0x2c1   :  { %4329 = vmatprep.subr.bf16.mxu1 %v9846_v58  ;;  %v4407_v58 = vld [vmem:[#allocation9 + $0x88] sm:$0xff]  ;;  %v9896_v20 = vcombine.high %v4406_v50, %v4410_v10  ;;  %v9895_v30 = vcombine.low %v4406_v50, %v4410_v10  ;;  %v4454_v44 = vld [vmem:[#allocation9 + $0x200] sm:$0xff] }
 0x2c2   :  { %v4459_v50 = vld [vmem:[#allocation9 + $0x228] sm:$0xff] }
 0x2c3   :  { %4158 = vmatpush1.bf16.msra.mxu0 %v9843_v5  ;;  %v9898_v5 = vcombine.high %v4407_v58, %v4411_v60 }
 0x2c4   :  { %4330 = vmatpush1.bf16.msra.mxu1 %v9845_v59  ;;  %4159 = vmatprep.subr.bf16.mxu0 %v9852_v1  ;;  %v4414_v59 = vld [vmem:[#allocation9 + $0xc0] sm:$0xff] }
 0x2c5   :  { %4331 = vmatprep.subr.bf16.mxu1 %v9854_v9  ;;  %v4418_v1 = vld [vmem:[#allocation9 + $0xe0] sm:$0xff]  ;;  %v4415_v9 = vld [vmem:[#allocation9 + $0xc8] sm:$0xff] }
 0x2c6   :  { %v9904_v63 = vcombine.high %v4414_v59, %v4418_v1  ;;  %v9906_v27 = vcombine.high %v4415_v9, %v4419_v47  ;;  %v9903_v39 = vcombine.low %v4414_v59, %v4418_v1  ;;  %v9905_v11 = vcombine.low %v4415_v9, %v4419_v47 }
 0x2c7   :  { %4160 = vmatpush1.bf16.msra.mxu0 %v9851_v41  ;;  %v4422_v41 = vld [vmem:[#allocation9 + $0x100] sm:$0xff] }
 0x2c8   :  { %4332 = vmatpush1.bf16.msra.mxu1 %v9853_v4  ;;  %4161 = vmatprep.subr.bf16.mxu0 %v9860_v36  ;;  %v4426_v4 = vld [vmem:[#allocation9 + $0x120] sm:$0xff]  ;;  %v4423_v36 = vld [vmem:[#allocation9 + $0x108] sm:$0xff] }
 0x2c9   :  { %4333 = vmatprep.subr.bf16.mxu1 %v9862_v57  ;;  %v4427_v57 = vld [vmem:[#allocation9 + $0x128] sm:$0xff]  ;;  %v9912_v32 = vcombine.high %v4422_v41, %v4426_v4  ;;  %v9911_v34 = vcombine.low %v4422_v41, %v4426_v4 }
 0x2ca   :  { %v9914_v48 = vcombine.high %v4423_v36, %v4427_v57  ;;  %v9913_v46 = vcombine.low %v4423_v36, %v4427_v57 }
 0x2cb   :  { %4162 = vmatpush1.bf16.msra.mxu0 %v9859_v2  ;;  %v4430_v2 = vld [vmem:[#allocation9 + $0x140] sm:$0xff] }
 0x2cc   :  { %4334 = vmatpush1.bf16.msra.mxu1 %v9861_v54  ;;  %4163 = vmatprep.subr.bf16.mxu0 %v9868_v23  ;;  %v4434_v54 = vld [vmem:[#allocation9 + $0x160] sm:$0xff]  ;;  %v4431_v23 = vld [vmem:[#allocation9 + $0x148] sm:$0xff] }
 0x2cd   :  { %4335 = vmatprep.subr.bf16.mxu1 %v9870_v45  ;;  %v4435_v45 = vld [vmem:[#allocation9 + $0x168] sm:$0xff]  ;;  %v9920_v49 = vcombine.high %v4430_v2, %v4434_v54  ;;  %v9919_v17 = vcombine.low %v4430_v2, %v4434_v54 }
 0x2ce   :  { %v9922_v42 = vcombine.high %v4431_v23, %v4435_v45  ;;  %v9921_v35 = vcombine.low %v4431_v23, %v4435_v45 }
 0x2cf   :  { %4164 = vmatpush1.bf16.msra.mxu0 %v9867_v51  ;;  %v4438_v51 = vld [vmem:[#allocation9 + $0x180] sm:$0xff] }
 0x2d0   :  { %4336 = vmatpush1.bf16.msra.mxu1 %v9869_v52  ;;  %4165 = vmatprep.subr.bf16.mxu0 %v9876_v6  ;;  %v4442_v52 = vld [vmem:[#allocation9 + $0x1a0] sm:$0xff]  ;;  %v4439_v6 = vld [vmem:[#allocation9 + $0x188] sm:$0xff] }
 0x2d1   :  { %4337 = vmatprep.subr.bf16.mxu1 %v9878_v38  ;;  %v4443_v38 = vld [vmem:[#allocation9 + $0x1a8] sm:$0xff]  ;;  %v9928_v40 = vcombine.high %v4438_v51, %v4442_v52  ;;  %v9927_v13 = vcombine.low %v4438_v51, %v4442_v52 }
 0x2d2   :  { %v9930_v33 = vcombine.high %v4439_v6, %v4443_v38  ;;  %v9929_v29 = vcombine.low %v4439_v6, %v4443_v38 }
 0x2d3   :  { %4166 = vmatpush1.bf16.msra.mxu0 %v9875_v3  ;;  %v4446_v3 = vld [vmem:[#allocation9 + $0x1c0] sm:$0xff] }
 0x2d4   :  { %4338 = vmatpush1.bf16.msra.mxu1 %v9877_v61  ;;  %7504 = vmatprep.subr.bf16.mxu0 %v9880_v16  ;;  %v4450_v61 = vld [vmem:[#allocation9 + $0x1e0] sm:$0xff]  ;;  %v4447_v16 = vld [vmem:[#allocation9 + $0x1c8] sm:$0xff] }
 0x2d5   :  { %7676 = vmatprep.subr.bf16.mxu1 %v9882_v15  ;;  %v4451_v15 = vld [vmem:[#allocation9 + $0x1e8] sm:$0xff]  ;;  %v9935_v10 = vcombine.low %v4446_v3, %v4450_v61 }
 0x2d6   :  { %4168 = vmatmul.mubr.bf16.vlgmr.msra.gmra.mrb[4].mxu0 %v11420_v37  ;;  %v9938_v53 = vcombine.high %v4447_v16, %v4451_v15 }
 0x2d7   :  { %4340 = vmatmul.mubr.bf16.vlgmr.msra.gmra.mrb[4].mxu1 %v11420_v37  ;;  %7505 = vmatpush1.bf16.msra.mxu0 %v9879_v0  ;;  %v9897_v37 = vcombine.low %v4407_v58, %v4411_v60  ;;  %v9936_v0 = vcombine.high %v4446_v3, %v4450_v61 }
 0x2d8   :  { %7536 = vmatprep.mubr.bf16.mxu0 %v11466_v12  ;;  %7677 = vmatpush1.bf16.msra.mxu1 %v9881_v18  ;;  %v4458_v18 = vld [vmem:[#allocation9 + $0x220] sm:$0xff] }
 0x2d9   :  { %7708 = vmatprep.mubr.bf16.mxu1 %v11466_v12  ;;  %7506 = vmatprep.subr.bf16.mxu0 %v9888_v28  ;;  %v4455_v28 = vld [vmem:[#allocation9 + $0x208] sm:$0xff]  ;;  %v9944_v58 = vcombine.high %v4454_v44, %v4458_v18  ;;  %v9943_v59 = vcombine.low %v4454_v44, %v4458_v18 }
 0x2da   :  { %7678 = vmatprep.subr.bf16.mxu1 %v9890_v55  ;;  %v9937_v55 = vcombine.low %v4447_v16, %v4451_v15  ;;  %v9946_v60 = vcombine.high %v4455_v28, %v4459_v50  ;;  %v9945_v1 = vcombine.low %v4455_v28, %v4459_v50 }
 0x2db   :  { %7507 = vmatpush1.bf16.msra.mxu0 %v9887_v14  ;;  %v4462_v14 = vld [vmem:[#allocation9 + $0x240] sm:$0xff] }
 0x2dc   :  { %7679 = vmatpush1.bf16.msra.mxu1 %v9889_v56  ;;  %7508 = vmatprep.subr.bf16.mxu0 %v9896_v20  ;;  %v4466_v56 = vld [vmem:[#allocation9 + $0x260] sm:$0xff]  ;;  %v4463_v20 = vld [vmem:[#allocation9 + $0x248] sm:$0xff] }
 0x2dd   :  { %7680 = vmatprep.subr.bf16.mxu1 %v9898_v5  ;;  %v4467_v5 = vld [vmem:[#allocation9 + $0x268] sm:$0xff]  ;;  %v9952_v9 = vcombine.high %v4462_v14, %v4466_v56  ;;  %v9951_v41 = vcombine.low %v4462_v14, %v4466_v56 }
 0x2de   :  { %v9954_v47 = vcombine.high %v4463_v20, %v4467_v5  ;;  %v9953_v4 = vcombine.low %v4463_v20, %v4467_v5 }
 0x2df   :  { %7509 = vmatpush1.bf16.msra.mxu0 %v9895_v30  ;;  %v4470_v30 = vld [vmem:[#allocation9 + $0x280] sm:$0xff] }
 0x2e0   :  { %7681 = vmatpush1.bf16.msra.mxu1 %v9897_v37  ;;  %7510 = vmatprep.subr.bf16.mxu0 %v9904_v63  ;;  %v4474_v37 = vld [vmem:[#allocation9 + $0x2a0] sm:$0xff]  ;;  %v4471_v63 = vld [vmem:[#allocation9 + $0x288] sm:$0xff] }
 0x2e1   :  { %7682 = vmatprep.subr.bf16.mxu1 %v9906_v27  ;;  %v4475_v27 = vld [vmem:[#allocation9 + $0x2a8] sm:$0xff]  ;;  %v9960_v36 = vcombine.high %v4470_v30, %v4474_v37  ;;  %v9959_v2 = vcombine.low %v4470_v30, %v4474_v37 }
 0x2e2   :  { %v9962_v57 = vcombine.high %v4471_v63, %v4475_v27  ;;  %v9961_v54 = vcombine.low %v4471_v63, %v4475_v27 }
 0x2e3   :  { %7511 = vmatpush1.bf16.msra.mxu0 %v9903_v39  ;;  %v4478_v39 = vld [vmem:[#allocation9 + $0x2c0] sm:$0xff] }
 0x2e4   :  { %7683 = vmatpush1.bf16.msra.mxu1 %v9905_v11  ;;  %7512 = vmatprep.subr.bf16.mxu0 %v9912_v32  ;;  %v4482_v11 = vld [vmem:[#allocation9 + $0x2e0] sm:$0xff]  ;;  %v4479_v32 = vld [vmem:[#allocation9 + $0x2c8] sm:$0xff] }
 0x2e5   :  { %7684 = vmatprep.subr.bf16.mxu1 %v9914_v48  ;;  %v4483_v48 = vld [vmem:[#allocation9 + $0x2e8] sm:$0xff]  ;;  %v9968_v23 = vcombine.high %v4478_v39, %v4482_v11  ;;  %v9967_v51 = vcombine.low %v4478_v39, %v4482_v11 }
 0x2e6   :  { %v9970_v45 = vcombine.high %v4479_v32, %v4483_v48  ;;  %v9969_v52 = vcombine.low %v4479_v32, %v4483_v48  ;;  %v4531_v39 = vld [vmem:[#allocation9 + $0x468] sm:$0xff]  ;;  %v4534_v48 = vld [vmem:[#allocation9 + $0x480] sm:$0xff] }
 0x2e7   :  { %7513 = vmatpush1.bf16.msra.mxu0 %v9911_v34  ;;  %v4486_v34 = vld [vmem:[#allocation9 + $0x300] sm:$0xff] }
 0x2e8   :  { %7685 = vmatpush1.bf16.msra.mxu1 %v9913_v46  ;;  %7514 = vmatprep.subr.bf16.mxu0 %v9920_v49  ;;  %v4490_v46 = vld [vmem:[#allocation9 + $0x320] sm:$0xff]  ;;  %v4487_v49 = vld [vmem:[#allocation9 + $0x308] sm:$0xff] }
 0x2e9   :  { %7686 = vmatprep.subr.bf16.mxu1 %v9922_v42  ;;  %v4491_v42 = vld [vmem:[#allocation9 + $0x328] sm:$0xff]  ;;  %v9976_v6 = vcombine.high %v4486_v34, %v4490_v46  ;;  %v9975_v3 = vcombine.low %v4486_v34, %v4490_v46 }
 0x2ea   :  { %v9978_v38 = vcombine.high %v4487_v49, %v4491_v42  ;;  %v9977_v61 = vcombine.low %v4487_v49, %v4491_v42 }
 0x2eb   :  { %7515 = vmatpush1.bf16.msra.mxu0 %v9919_v17  ;;  %v4494_v17 = vld [vmem:[#allocation9 + $0x340] sm:$0xff] }
 0x2ec   :  { %7687 = vmatpush1.bf16.msra.mxu1 %v9921_v35  ;;  %7516 = vmatprep.subr.bf16.mxu0 %v9928_v40  ;;  %v4498_v35 = vld [vmem:[#allocation9 + $0x360] sm:$0xff]  ;;  %v4495_v40 = vld [vmem:[#allocation9 + $0x348] sm:$0xff] }
 0x2ed   :  { %7688 = vmatprep.subr.bf16.mxu1 %v9930_v33  ;;  %v4499_v33 = vld [vmem:[#allocation9 + $0x368] sm:$0xff]  ;;  %v9984_v16 = vcombine.high %v4494_v17, %v4498_v35  ;;  %v9983_v44 = vcombine.low %v4494_v17, %v4498_v35 }
 0x2ee   :  { %v9986_v15 = vcombine.high %v4495_v40, %v4499_v33  ;;  %v9985_v18 = vcombine.low %v4495_v40, %v4499_v33 }
 0x2ef   :  { %7517 = vmatpush1.bf16.msra.mxu0 %v9927_v13  ;;  %v4502_v13 = vld [vmem:[#allocation9 + $0x380] sm:$0xff] }
 0x2f0   :  { %7689 = vmatpush1.bf16.msra.mxu1 %v9929_v29  ;;  %7518 = vmatprep.subr.bf16.mxu0 %v9936_v0  ;;  %v4506_v29 = vld [vmem:[#allocation9 + $0x3a0] sm:$0xff]  ;;  %v4503_v0 = vld [vmem:[#allocation9 + $0x388] sm:$0xff] }
 0x2f1   :  { %7690 = vmatprep.subr.bf16.mxu1 %v9938_v53  ;;  %v4507_v53 = vld [vmem:[#allocation9 + $0x3a8] sm:$0xff]  ;;  %v9992_v28 = vcombine.high %v4502_v13, %v4506_v29  ;;  %v9991_v14 = vcombine.low %v4502_v13, %v4506_v29 }
 0x2f2   :  { %v9994_v50 = vcombine.high %v4503_v0, %v4507_v53  ;;  %v9993_v56 = vcombine.low %v4503_v0, %v4507_v53 }
 0x2f3   :  { %7519 = vmatpush1.bf16.msra.mxu0 %v9935_v10  ;;  %v4510_v10 = vld [vmem:[#allocation9 + $0x3c0] sm:$0xff] }
 0x2f4   :  { %7691 = vmatpush1.bf16.msra.mxu1 %v9937_v55  ;;  %7520 = vmatprep.subr.bf16.mxu0 %v9944_v58  ;;  %v4514_v55 = vld [vmem:[#allocation9 + $0x3e0] sm:$0xff]  ;;  %v4511_v58 = vld [vmem:[#allocation9 + $0x3c8] sm:$0xff] }
 0x2f5   :  { %7692 = vmatprep.subr.bf16.mxu1 %v9946_v60  ;;  %v4515_v60 = vld [vmem:[#allocation9 + $0x3e8] sm:$0xff]  ;;  %v10000_v20 = vcombine.high %v4510_v10, %v4514_v55  ;;  %v9999_v30 = vcombine.low %v4510_v10, %v4514_v55 }
 0x2f6   :  { %v10002_v5 = vcombine.high %v4511_v58, %v4515_v60  ;;  %v10001_v37 = vcombine.low %v4511_v58, %v4515_v60 }
 0x2f7   :  { %7521 = vmatpush1.bf16.msra.mxu0 %v9943_v59  ;;  %v4518_v59 = vld [vmem:[#allocation9 + $0x400] sm:$0xff] }
 0x2f8   :  { %7693 = vmatpush1.bf16.msra.mxu1 %v9945_v1  ;;  %7522 = vmatprep.subr.bf16.mxu0 %v9952_v9  ;;  %v4522_v1 = vld [vmem:[#allocation9 + $0x420] sm:$0xff]  ;;  %v4519_v9 = vld [vmem:[#allocation9 + $0x408] sm:$0xff] }
 0x2f9   :  { %7694 = vmatprep.subr.bf16.mxu1 %v9954_v47  ;;  %v4523_v47 = vld [vmem:[#allocation9 + $0x428] sm:$0xff]  ;;  %v10008_v63 = vcombine.high %v4518_v59, %v4522_v1 }
 0x2fa   :  { %v10010_v27 = vcombine.high %v4519_v9, %v4523_v47  ;;  %v10009_v11 = vcombine.low %v4519_v9, %v4523_v47 }
 0x2fb   :  { %7523 = vmatpush1.bf16.msra.mxu0 %v9951_v41  ;;  %v4526_v41 = vld [vmem:[#allocation9 + $0x440] sm:$0xff] }
 0x2fc   :  { %7695 = vmatpush1.bf16.msra.mxu1 %v9953_v4  ;;  %7524 = vmatprep.subr.bf16.mxu0 %v9960_v36  ;;  %v4530_v4 = vld [vmem:[#allocation9 + $0x460] sm:$0xff]  ;;  %v10007_v36 = vcombine.low %v4518_v59, %v4522_v1 }
 0x2fd   :  { %7696 = vmatprep.subr.bf16.mxu1 %v9962_v57  ;;  %v4527_v57 = vld [vmem:[#allocation9 + $0x448] sm:$0xff]  ;;  %v10016_v32 = vcombine.high %v4526_v41, %v4530_v4  ;;  %v10015_v34 = vcombine.low %v4526_v41, %v4530_v4 }
 0x2fe   :  { %v10017_v46 = vcombine.low %v4527_v57, %v4531_v39 }
 0x2ff   :  { %7525 = vmatpush1.bf16.msra.mxu0 %v9959_v2  ;;  %v4538_v2 = vld [vmem:[#allocation9 + $0x4a0] sm:$0xff] }
 0x300   :  { %7697 = vmatpush1.bf16.msra.mxu1 %v9961_v54  ;;  %7526 = vmatprep.subr.bf16.mxu0 %v9968_v23  ;;  %v10018_v54 = vcombine.high %v4527_v57, %v4531_v39  ;;  %v4535_v23 = vld [vmem:[#allocation9 + $0x488] sm:$0xff]  ;;  %v10024_v49 = vcombine.high %v4534_v48, %v4538_v2  ;;  %v10023_v17 = vcombine.low %v4534_v48, %v4538_v2  ;;  %v4582_v39 = vld [vmem:[#allocation9 + $0x600] sm:$0xff] }
 0x301   :  { %7698 = vmatprep.subr.bf16.mxu1 %v9970_v45  ;;  %v4539_v45 = vld [vmem:[#allocation9 + $0x4a8] sm:$0xff] }
 0x302   :  { %v10026_v42 = vcombine.high %v4535_v23, %v4539_v45  ;;  %v10025_v35 = vcombine.low %v4535_v23, %v4539_v45  ;;  %v4587_v48 = vld [vmem:[#allocation9 + $0x628] sm:$0xff] }
 0x303   :  { %7527 = vmatpush1.bf16.msra.mxu0 %v9967_v51  ;;  %v4542_v51 = vld [vmem:[#allocation9 + $0x4c0] sm:$0xff] }
 0x304   :  { %7699 = vmatpush1.bf16.msra.mxu1 %v9969_v52  ;;  %7528 = vmatprep.subr.bf16.mxu0 %v9976_v6  ;;  %v4546_v52 = vld [vmem:[#allocation9 + $0x4e0] sm:$0xff]  ;;  %v4543_v6 = vld [vmem:[#allocation9 + $0x4c8] sm:$0xff] }
 0x305   :  { %7700 = vmatprep.subr.bf16.mxu1 %v9978_v38  ;;  %v4547_v38 = vld [vmem:[#allocation9 + $0x4e8] sm:$0xff]  ;;  %v10032_v40 = vcombine.high %v4542_v51, %v4546_v52  ;;  %v10031_v13 = vcombine.low %v4542_v51, %v4546_v52 }
 0x306   :  { %v10034_v33 = vcombine.high %v4543_v6, %v4547_v38  ;;  %v10033_v29 = vcombine.low %v4543_v6, %v4547_v38 }
 0x307   :  { %7529 = vmatpush1.bf16.msra.mxu0 %v9975_v3  ;;  %v4550_v3 = vld [vmem:[#allocation9 + $0x500] sm:$0xff] }
 0x308   :  { %7701 = vmatpush1.bf16.msra.mxu1 %v9977_v61  ;;  %7530 = vmatprep.subr.bf16.mxu0 %v9984_v16  ;;  %v4554_v61 = vld [vmem:[#allocation9 + $0x520] sm:$0xff]  ;;  %v4551_v16 = vld [vmem:[#allocation9 + $0x508] sm:$0xff] }
 0x309   :  { %7702 = vmatprep.subr.bf16.mxu1 %v9986_v15  ;;  %v4555_v15 = vld [vmem:[#allocation9 + $0x528] sm:$0xff]  ;;  %v10040_v0 = vcombine.high %v4550_v3, %v4554_v61  ;;  %v10039_v10 = vcombine.low %v4550_v3, %v4554_v61 }
 0x30a   :  { %v10042_v53 = vcombine.high %v4551_v16, %v4555_v15  ;;  %v10041_v55 = vcombine.low %v4551_v16, %v4555_v15 }
 0x30b   :  { %7531 = vmatpush1.bf16.msra.mxu0 %v9983_v44  ;;  %v4558_v44 = vld [vmem:[#allocation9 + $0x540] sm:$0xff] }
 0x30c   :  { %7703 = vmatpush1.bf16.msra.mxu1 %v9985_v18  ;;  %7532 = vmatprep.subr.bf16.mxu0 %v9992_v28  ;;  %v4562_v18 = vld [vmem:[#allocation9 + $0x560] sm:$0xff]  ;;  %v4559_v28 = vld [vmem:[#allocation9 + $0x548] sm:$0xff] }
 0x30d   :  { %7704 = vmatprep.subr.bf16.mxu1 %v9994_v50  ;;  %v4563_v50 = vld [vmem:[#allocation9 + $0x568] sm:$0xff]  ;;  %v10048_v58 = vcombine.high %v4558_v44, %v4562_v18  ;;  %v10047_v59 = vcombine.low %v4558_v44, %v4562_v18 }
 0x30e   :  { %v10050_v60 = vcombine.high %v4559_v28, %v4563_v50  ;;  %v10049_v1 = vcombine.low %v4559_v28, %v4563_v50 }
 0x30f   :  { %7533 = vmatpush1.bf16.msra.mxu0 %v9991_v14  ;;  %v4566_v14 = vld [vmem:[#allocation9 + $0x580] sm:$0xff] }
 0x310   :  { %7705 = vmatpush1.bf16.msra.mxu1 %v9993_v56  ;;  %7534 = vmatprep.subr.bf16.mxu0 %v10000_v20  ;;  %v4570_v56 = vld [vmem:[#allocation9 + $0x5a0] sm:$0xff]  ;;  %v4567_v20 = vld [vmem:[#allocation9 + $0x588] sm:$0xff] }
 0x311   :  { %7706 = vmatprep.subr.bf16.mxu1 %v10002_v5  ;;  %v4571_v5 = vld [vmem:[#allocation9 + $0x5a8] sm:$0xff]  ;;  %v10056_v9 = vcombine.high %v4566_v14, %v4570_v56  ;;  %v10055_v41 = vcombine.low %v4566_v14, %v4570_v56 }
 0x312   :  { %v10058_v47 = vcombine.high %v4567_v20, %v4571_v5  ;;  %v10057_v4 = vcombine.low %v4567_v20, %v4571_v5 }
 0x313   :  { %7535 = vmatpush1.bf16.msra.mxu0 %v9999_v30  ;;  %v4574_v30 = vld [vmem:[#allocation9 + $0x5c0] sm:$0xff] }
 0x314   :  { %7707 = vmatpush1.bf16.msra.mxu1 %v10001_v37  ;;  %7547 = vmatprep.subr.bf16.mxu0 %v10008_v63  ;;  %v4578_v37 = vld [vmem:[#allocation9 + $0x5e0] sm:$0xff]  ;;  %v4575_v63 = vld [vmem:[#allocation9 + $0x5c8] sm:$0xff] }
 0x315   :  { %7719 = vmatprep.subr.bf16.mxu1 %v10010_v27  ;;  %v4579_v27 = vld [vmem:[#allocation9 + $0x5e8] sm:$0xff]  ;;  %v10063_v2 = vcombine.low %v4574_v30, %v4578_v37 }
 0x316   :  { %7537 = vmatmul.mubr.bf16.vlgmr.msra.gmra.mrb[8].mxu0 %v11462_v43  ;;  %v10066_v57 = vcombine.high %v4575_v63, %v4579_v27 }
 0x317   :  { %7709 = vmatmul.mubr.bf16.vlgmr.msra.gmra.mrb[8].mxu1 %v11462_v43  ;;  %7548 = vmatpush1.bf16.msra.mxu0 %v10007_v36  ;;  %v10064_v36 = vcombine.high %v4574_v30, %v4578_v37 }
 0x318   :  { %7579 = vmatprep.mubr.bf16.mxu0 %v11468_v62  ;;  %7720 = vmatpush1.bf16.msra.mxu1 %v10009_v11  ;;  %v4586_v11 = vld [vmem:[#allocation9 + $0x620] sm:$0xff] }
 0x319   :  { %7751 = vmatprep.mubr.bf16.mxu1 %v11468_v62  ;;  %7549 = vmatprep.subr.bf16.mxu0 %v10016_v32  ;;  %v4583_v32 = vld [vmem:[#allocation9 + $0x608] sm:$0xff]  ;;  %v10072_v23 = vcombine.high %v4582_v39, %v4586_v11  ;;  %v10071_v51 = vcombine.low %v4582_v39, %v4586_v11 }
 0x31a   :  { %7721 = vmatprep.subr.bf16.mxu1 %v10018_v54  ;;  %v10065_v54 = vcombine.low %v4575_v63, %v4579_v27  ;;  %v10074_v45 = vcombine.high %v4583_v32, %v4587_v48  ;;  %v10073_v52 = vcombine.low %v4583_v32, %v4587_v48 }
 0x31b   :  { %7550 = vmatpush1.bf16.msra.mxu0 %v10015_v34  ;;  %v4590_v34 = vld [vmem:[#allocation9 + $0x640] sm:$0xff] }
 0x31c   :  { %7722 = vmatpush1.bf16.msra.mxu1 %v10017_v46  ;;  %7551 = vmatprep.subr.bf16.mxu0 %v10024_v49  ;;  %v4594_v46 = vld [vmem:[#allocation9 + $0x660] sm:$0xff]  ;;  %v4591_v49 = vld [vmem:[#allocation9 + $0x648] sm:$0xff] }
 0x31d   :  { %7723 = vmatprep.subr.bf16.mxu1 %v10026_v42  ;;  %v4595_v42 = vld [vmem:[#allocation9 + $0x668] sm:$0xff]  ;;  %v10080_v6 = vcombine.high %v4590_v34, %v4594_v46  ;;  %v10079_v3 = vcombine.low %v4590_v34, %v4594_v46 }
 0x31e   :  { %v10082_v38 = vcombine.high %v4591_v49, %v4595_v42  ;;  %v10081_v61 = vcombine.low %v4591_v49, %v4595_v42 }
 0x31f   :  { %7552 = vmatpush1.bf16.msra.mxu0 %v10023_v17  ;;  %v4598_v17 = vld [vmem:[#allocation9 + $0x680] sm:$0xff] }
 0x320   :  { %7724 = vmatpush1.bf16.msra.mxu1 %v10025_v35  ;;  %7553 = vmatprep.subr.bf16.mxu0 %v10032_v40  ;;  %v4602_v35 = vld [vmem:[#allocation9 + $0x6a0] sm:$0xff]  ;;  %v4599_v40 = vld [vmem:[#allocation9 + $0x688] sm:$0xff] }
 0x321   :  { %7725 = vmatprep.subr.bf16.mxu1 %v10034_v33  ;;  %v4603_v33 = vld [vmem:[#allocation9 + $0x6a8] sm:$0xff]  ;;  %v10088_v16 = vcombine.high %v4598_v17, %v4602_v35  ;;  %v10087_v44 = vcombine.low %v4598_v17, %v4602_v35 }
 0x322   :  { %v10090_v15 = vcombine.high %v4599_v40, %v4603_v33  ;;  %v10089_v18 = vcombine.low %v4599_v40, %v4603_v33 }
 0x323   :  { %7554 = vmatpush1.bf16.msra.mxu0 %v10031_v13  ;;  %v4606_v13 = vld [vmem:[#allocation9 + $0x6c0] sm:$0xff] }
 0x324   :  { %7726 = vmatpush1.bf16.msra.mxu1 %v10033_v29  ;;  %7555 = vmatprep.subr.bf16.mxu0 %v10040_v0  ;;  %v4610_v29 = vld [vmem:[#allocation9 + $0x6e0] sm:$0xff]  ;;  %v4607_v0 = vld [vmem:[#allocation9 + $0x6c8] sm:$0xff] }
 0x325   :  { %7727 = vmatprep.subr.bf16.mxu1 %v10042_v53  ;;  %v4611_v53 = vld [vmem:[#allocation9 + $0x6e8] sm:$0xff]  ;;  %v10096_v28 = vcombine.high %v4606_v13, %v4610_v29  ;;  %v10095_v14 = vcombine.low %v4606_v13, %v4610_v29 }
 0x326   :  { %v10098_v50 = vcombine.high %v4607_v0, %v4611_v53  ;;  %v10097_v56 = vcombine.low %v4607_v0, %v4611_v53 }
 0x327   :  { %7556 = vmatpush1.bf16.msra.mxu0 %v10039_v10  ;;  %v4614_v10 = vld [vmem:[#allocation9 + $0x700] sm:$0xff] }
 0x328   :  { %7728 = vmatpush1.bf16.msra.mxu1 %v10041_v55  ;;  %7557 = vmatprep.subr.bf16.mxu0 %v10048_v58  ;;  %v4618_v55 = vld [vmem:[#allocation9 + $0x720] sm:$0xff]  ;;  %v4615_v58 = vld [vmem:[#allocation9 + $0x708] sm:$0xff] }
 0x329   :  { %7729 = vmatprep.subr.bf16.mxu1 %v10050_v60  ;;  %v4619_v60 = vld [vmem:[#allocation9 + $0x728] sm:$0xff]  ;;  %v10104_v20 = vcombine.high %v4614_v10, %v4618_v55  ;;  %v10103_v30 = vcombine.low %v4614_v10, %v4618_v55 }
 0x32a   :  { %v10106_v5 = vcombine.high %v4615_v58, %v4619_v60  ;;  %v10105_v37 = vcombine.low %v4615_v58, %v4619_v60 }
 0x32b   :  { %7558 = vmatpush1.bf16.msra.mxu0 %v10047_v59  ;;  %v4622_v59 = vld [vmem:[#allocation9 + $0x740] sm:$0xff] }
 0x32c   :  { %7730 = vmatpush1.bf16.msra.mxu1 %v10049_v1  ;;  %7559 = vmatprep.subr.bf16.mxu0 %v10056_v9  ;;  %v4626_v1 = vld [vmem:[#allocation9 + $0x760] sm:$0xff]  ;;  %v4623_v9 = vld [vmem:[#allocation9 + $0x748] sm:$0xff] }
 0x32d   :  { %7731 = vmatprep.subr.bf16.mxu1 %v10058_v47  ;;  %v4627_v47 = vld [vmem:[#allocation9 + $0x768] sm:$0xff]  ;;  %v10112_v63 = vcombine.high %v4622_v59, %v4626_v1  ;;  %v10111_v39 = vcombine.low %v4622_v59, %v4626_v1 }
 0x32e   :  { %v10114_v27 = vcombine.high %v4623_v9, %v4627_v47  ;;  %v10113_v11 = vcombine.low %v4623_v9, %v4627_v47 }
 0x32f   :  { %7560 = vmatpush1.bf16.msra.mxu0 %v10055_v41  ;;  %v4630_v41 = vld [vmem:[#allocation9 + $0x780] sm:$0xff] }
 0x330   :  { %7732 = vmatpush1.bf16.msra.mxu1 %v10057_v4  ;;  %7561 = vmatprep.subr.bf16.mxu0 %v10064_v36  ;;  %v4634_v4 = vld [vmem:[#allocation9 + $0x7a0] sm:$0xff]  ;;  %v4631_v36 = vld [vmem:[#allocation9 + $0x788] sm:$0xff] }
 0x331   :  { %7733 = vmatprep.subr.bf16.mxu1 %v10066_v57  ;;  %v4635_v57 = vld [vmem:[#allocation9 + $0x7a8] sm:$0xff]  ;;  %v10120_v32 = vcombine.high %v4630_v41, %v4634_v4  ;;  %v10119_v34 = vcombine.low %v4630_v41, %v4634_v4 }
 0x332   :  { %v10122_v48 = vcombine.high %v4631_v36, %v4635_v57  ;;  %v10121_v46 = vcombine.low %v4631_v36, %v4635_v57 }
 0x333   :  { %7562 = vmatpush1.bf16.msra.mxu0 %v10063_v2  ;;  %v4638_v2 = vld [vmem:[#allocation9 + $0x7c0] sm:$0xff] }
 0x334   :  { %7734 = vmatpush1.bf16.msra.mxu1 %v10065_v54  ;;  %7563 = vmatprep.subr.bf16.mxu0 %v10072_v23  ;;  %v4642_v54 = vld [vmem:[#allocation9 + $0x7e0] sm:$0xff]  ;;  %v4639_v23 = vld [vmem:[#allocation9 + $0x7c8] sm:$0xff] }
 0x335   :  { %7735 = vmatprep.subr.bf16.mxu1 %v10074_v45  ;;  %v4643_v45 = vld [vmem:[#allocation9 + $0x7e8] sm:$0xff]  ;;  %v10128_v49 = vcombine.high %v4638_v2, %v4642_v54  ;;  %v10127_v17 = vcombine.low %v4638_v2, %v4642_v54 }
 0x336   :  { %v10130_v42 = vcombine.high %v4639_v23, %v4643_v45  ;;  %v10129_v35 = vcombine.low %v4639_v23, %v4643_v45 }
 0x337   :  { %7564 = vmatpush1.bf16.msra.mxu0 %v10071_v51  ;;  %v4646_v51 = vld [vmem:[#allocation9 + $0x800] sm:$0xff] }
 0x338   :  { %7736 = vmatpush1.bf16.msra.mxu1 %v10073_v52  ;;  %7565 = vmatprep.subr.bf16.mxu0 %v10080_v6  ;;  %v4650_v52 = vld [vmem:[#allocation9 + $0x820] sm:$0xff]  ;;  %v4647_v6 = vld [vmem:[#allocation9 + $0x808] sm:$0xff] }
 0x339   :  { %7737 = vmatprep.subr.bf16.mxu1 %v10082_v38  ;;  %v4651_v38 = vld [vmem:[#allocation9 + $0x828] sm:$0xff]  ;;  %v10136_v40 = vcombine.high %v4646_v51, %v4650_v52  ;;  %v10135_v13 = vcombine.low %v4646_v51, %v4650_v52 }
 0x33a   :  { %v10138_v33 = vcombine.high %v4647_v6, %v4651_v38  ;;  %v10137_v29 = vcombine.low %v4647_v6, %v4651_v38 }
 0x33b   :  { %7566 = vmatpush1.bf16.msra.mxu0 %v10079_v3  ;;  %v4654_v3 = vld [vmem:[#allocation9 + $0x840] sm:$0xff] }
 0x33c   :  { %7738 = vmatpush1.bf16.msra.mxu1 %v10081_v61  ;;  %7567 = vmatprep.subr.bf16.mxu0 %v10088_v16  ;;  %v4658_v61 = vld [vmem:[#allocation9 + $0x860] sm:$0xff]  ;;  %v4655_v16 = vld [vmem:[#allocation9 + $0x848] sm:$0xff] }
 0x33d   :  { %7739 = vmatprep.subr.bf16.mxu1 %v10090_v15  ;;  %v4659_v15 = vld [vmem:[#allocation9 + $0x868] sm:$0xff]  ;;  %v10144_v0 = vcombine.high %v4654_v3, %v4658_v61  ;;  %v10143_v10 = vcombine.low %v4654_v3, %v4658_v61 }
 0x33e   :  { %v10146_v53 = vcombine.high %v4655_v16, %v4659_v15  ;;  %v10145_v55 = vcombine.low %v4655_v16, %v4659_v15 }
 0x33f   :  { %7568 = vmatpush1.bf16.msra.mxu0 %v10087_v44  ;;  %v4662_v44 = vld [vmem:[#allocation9 + $0x880] sm:$0xff] }
 0x340   :  { %7740 = vmatpush1.bf16.msra.mxu1 %v10089_v18  ;;  %7569 = vmatprep.subr.bf16.mxu0 %v10096_v28  ;;  %v4666_v18 = vld [vmem:[#allocation9 + $0x8a0] sm:$0xff]  ;;  %v4663_v28 = vld [vmem:[#allocation9 + $0x888] sm:$0xff] }
 0x341   :  { %7741 = vmatprep.subr.bf16.mxu1 %v10098_v50  ;;  %v4667_v50 = vld [vmem:[#allocation9 + $0x8a8] sm:$0xff]  ;;  %v10152_v58 = vcombine.high %v4662_v44, %v4666_v18  ;;  %v10151_v59 = vcombine.low %v4662_v44, %v4666_v18 }
 0x342   :  { %v10154_v60 = vcombine.high %v4663_v28, %v4667_v50  ;;  %v10153_v1 = vcombine.low %v4663_v28, %v4667_v50 }
 0x343   :  { %7570 = vmatpush1.bf16.msra.mxu0 %v10095_v14  ;;  %v4670_v14 = vld [vmem:[#allocation9 + $0x8c0] sm:$0xff] }
 0x344   :  { %7742 = vmatpush1.bf16.msra.mxu1 %v10097_v56  ;;  %7571 = vmatprep.subr.bf16.mxu0 %v10104_v20  ;;  %v4674_v56 = vld [vmem:[#allocation9 + $0x8e0] sm:$0xff]  ;;  %v4671_v20 = vld [vmem:[#allocation9 + $0x8c8] sm:$0xff] }
 0x345   :  { %7743 = vmatprep.subr.bf16.mxu1 %v10106_v5  ;;  %v4675_v5 = vld [vmem:[#allocation9 + $0x8e8] sm:$0xff]  ;;  %v10160_v9 = vcombine.high %v4670_v14, %v4674_v56  ;;  %v10159_v41 = vcombine.low %v4670_v14, %v4674_v56 }
 0x346   :  { %v10162_v47 = vcombine.high %v4671_v20, %v4675_v5  ;;  %v10161_v4 = vcombine.low %v4671_v20, %v4675_v5 }
 0x347   :  { %7572 = vmatpush1.bf16.msra.mxu0 %v10103_v30  ;;  %v4678_v30 = vld [vmem:[#allocation9 + $0x900] sm:$0xff] }
 0x348   :  { %7744 = vmatpush1.bf16.msra.mxu1 %v10105_v37  ;;  %7573 = vmatprep.subr.bf16.mxu0 %v10112_v63  ;;  %v4682_v37 = vld [vmem:[#allocation9 + $0x920] sm:$0xff]  ;;  %v4679_v63 = vld [vmem:[#allocation9 + $0x908] sm:$0xff] }
 0x349   :  { %7745 = vmatprep.subr.bf16.mxu1 %v10114_v27  ;;  %v4683_v27 = vld [vmem:[#allocation9 + $0x928] sm:$0xff]  ;;  %v10168_v36 = vcombine.high %v4678_v30, %v4682_v37  ;;  %v10167_v2 = vcombine.low %v4678_v30, %v4682_v37 }
 0x34a   :  { %v10170_v57 = vcombine.high %v4679_v63, %v4683_v27  ;;  %v10169_v54 = vcombine.low %v4679_v63, %v4683_v27 }
 0x34b   :  { %7574 = vmatpush1.bf16.msra.mxu0 %v10111_v39  ;;  %v4686_v39 = vld [vmem:[#allocation9 + $0x940] sm:$0xff] }
 0x34c   :  { %7746 = vmatpush1.bf16.msra.mxu1 %v10113_v11  ;;  %7575 = vmatprep.subr.bf16.mxu0 %v10120_v32  ;;  %v4690_v11 = vld [vmem:[#allocation9 + $0x960] sm:$0xff]  ;;  %v4687_v32 = vld [vmem:[#allocation9 + $0x948] sm:$0xff] }
 0x34d   :  { %7747 = vmatprep.subr.bf16.mxu1 %v10122_v48  ;;  %v4691_v48 = vld [vmem:[#allocation9 + $0x968] sm:$0xff]  ;;  %v10176_v23 = vcombine.high %v4686_v39, %v4690_v11  ;;  %v10175_v51 = vcombine.low %v4686_v39, %v4690_v11 }
 0x34e   :  { %v10178_v45 = vcombine.high %v4687_v32, %v4691_v48  ;;  %v10177_v52 = vcombine.low %v4687_v32, %v4691_v48 }
 0x34f   :  { %7576 = vmatpush1.bf16.msra.mxu0 %v10119_v34  ;;  %v4694_v34 = vld [vmem:[#allocation9 + $0x980] sm:$0xff] }
 0x350   :  { %7748 = vmatpush1.bf16.msra.mxu1 %v10121_v46  ;;  %7577 = vmatprep.subr.bf16.mxu0 %v10128_v49  ;;  %v4698_v46 = vld [vmem:[#allocation9 + $0x9a0] sm:$0xff]  ;;  %v4695_v49 = vld [vmem:[#allocation9 + $0x988] sm:$0xff] }
 0x351   :  { %7749 = vmatprep.subr.bf16.mxu1 %v10130_v42  ;;  %v4699_v42 = vld [vmem:[#allocation9 + $0x9a8] sm:$0xff]  ;;  %v10184_v6 = vcombine.high %v4694_v34, %v4698_v46  ;;  %v10183_v3 = vcombine.low %v4694_v34, %v4698_v46 }
 0x352   :  { %v10186_v38 = vcombine.high %v4695_v49, %v4699_v42  ;;  %v10185_v61 = vcombine.low %v4695_v49, %v4699_v42 }
 0x353   :  { %7578 = vmatpush1.bf16.msra.mxu0 %v10127_v17  ;;  %v4702_v17 = vld [vmem:[#allocation9 + $0x9c0] sm:$0xff] }
 0x354   :  { %7750 = vmatpush1.bf16.msra.mxu1 %v10129_v35  ;;  %7590 = vmatprep.subr.bf16.mxu0 %v10136_v40  ;;  %v4706_v35 = vld [vmem:[#allocation9 + $0x9e0] sm:$0xff]  ;;  %v4703_v40 = vld [vmem:[#allocation9 + $0x9c8] sm:$0xff] }
 0x355   :  { %7762 = vmatprep.subr.bf16.mxu1 %v10138_v33  ;;  %v4707_v33 = vld [vmem:[#allocation9 + $0x9e8] sm:$0xff]  ;;  %v10192_v16 = vcombine.high %v4702_v17, %v4706_v35  ;;  %v10191_v44 = vcombine.low %v4702_v17, %v4706_v35 }
 0x356   :  { %7580 = vmatmul.mubr.bf16.vlgmr.msra.gmra.mrb[8].mxu0 %v11464_v7  ;;  %v10194_v15 = vcombine.high %v4703_v40, %v4707_v33  ;;  %v10193_v18 = vcombine.low %v4703_v40, %v4707_v33 }
 0x357   :  { %7752 = vmatmul.mubr.bf16.vlgmr.msra.gmra.mrb[8].mxu1 %v11464_v7  ;;  %7591 = vmatpush1.bf16.msra.mxu0 %v10135_v13  ;;  %v4710_v13 = vld [vmem:[#allocation9 + $0xa00] sm:$0xff] }
 0x358   :  { %7763 = vmatpush1.bf16.msra.mxu1 %v10137_v29  ;;  %7592 = vmatprep.subr.bf16.mxu0 %v10144_v0  ;;  %v4714_v29 = vld [vmem:[#allocation9 + $0xa20] sm:$0xff]  ;;  %v4711_v0 = vld [vmem:[#allocation9 + $0xa08] sm:$0xff] }
 0x359   :  { %7764 = vmatprep.subr.bf16.mxu1 %v10146_v53  ;;  %v4715_v53 = vld [vmem:[#allocation9 + $0xa28] sm:$0xff]  ;;  %v10200_v28 = vcombine.high %v4710_v13, %v4714_v29  ;;  %v10199_v14 = vcombine.low %v4710_v13, %v4714_v29 }
 0x35a   :  { %v10202_v50 = vcombine.high %v4711_v0, %v4715_v53  ;;  %v10201_v56 = vcombine.low %v4711_v0, %v4715_v53 }
 0x35b   :  { %7593 = vmatpush1.bf16.msra.mxu0 %v10143_v10  ;;  %v4718_v10 = vld [vmem:[#allocation9 + $0xa40] sm:$0xff] }
 0x35c   :  { %7765 = vmatpush1.bf16.msra.mxu1 %v10145_v55  ;;  %7594 = vmatprep.subr.bf16.mxu0 %v10152_v58  ;;  %v4722_v55 = vld [vmem:[#allocation9 + $0xa60] sm:$0xff]  ;;  %v4719_v58 = vld [vmem:[#allocation9 + $0xa48] sm:$0xff] }
 0x35d   :  { %7766 = vmatprep.subr.bf16.mxu1 %v10154_v60  ;;  %v4723_v60 = vld [vmem:[#allocation9 + $0xa68] sm:$0xff]  ;;  %v10208_v20 = vcombine.high %v4718_v10, %v4722_v55  ;;  %v10207_v30 = vcombine.low %v4718_v10, %v4722_v55 }
 0x35e   :  { %v10210_v5 = vcombine.high %v4719_v58, %v4723_v60  ;;  %v10209_v37 = vcombine.low %v4719_v58, %v4723_v60 }
 0x35f   :  { %7595 = vmatpush1.bf16.msra.mxu0 %v10151_v59  ;;  %v4726_v59 = vld [vmem:[#allocation9 + $0xa80] sm:$0xff] }
 0x360   :  { %7767 = vmatpush1.bf16.msra.mxu1 %v10153_v1  ;;  %7596 = vmatprep.subr.bf16.mxu0 %v10160_v9  ;;  %v4730_v1 = vld [vmem:[#allocation9 + $0xaa0] sm:$0xff]  ;;  %v4727_v9 = vld [vmem:[#allocation9 + $0xa88] sm:$0xff] }
 0x361   :  { %7768 = vmatprep.subr.bf16.mxu1 %v10162_v47  ;;  %v4731_v47 = vld [vmem:[#allocation9 + $0xaa8] sm:$0xff]  ;;  %v10216_v63 = vcombine.high %v4726_v59, %v4730_v1  ;;  %v10215_v39 = vcombine.low %v4726_v59, %v4730_v1 }
 0x362   :  { %v10218_v27 = vcombine.high %v4727_v9, %v4731_v47  ;;  %v10217_v11 = vcombine.low %v4727_v9, %v4731_v47 }
 0x363   :  { %7597 = vmatpush1.bf16.msra.mxu0 %v10159_v41  ;;  %v4734_v41 = vld [vmem:[#allocation9 + $0xac0] sm:$0xff] }
 0x364   :  { %7769 = vmatpush1.bf16.msra.mxu1 %v10161_v4  ;;  %7598 = vmatprep.subr.bf16.mxu0 %v10168_v36  ;;  %v4738_v4 = vld [vmem:[#allocation9 + $0xae0] sm:$0xff]  ;;  %v4735_v36 = vld [vmem:[#allocation9 + $0xac8] sm:$0xff] }
 0x365   :  { %7770 = vmatprep.subr.bf16.mxu1 %v10170_v57  ;;  %v4739_v57 = vld [vmem:[#allocation9 + $0xae8] sm:$0xff]  ;;  %v10224_v32 = vcombine.high %v4734_v41, %v4738_v4  ;;  %v10223_v34 = vcombine.low %v4734_v41, %v4738_v4 }
 0x366   :  { %v10226_v48 = vcombine.high %v4735_v36, %v4739_v57  ;;  %v10225_v46 = vcombine.low %v4735_v36, %v4739_v57 }
 0x367   :  { %7599 = vmatpush1.bf16.msra.mxu0 %v10167_v2  ;;  %v4742_v2 = vld [vmem:[#allocation9 + $0xb00] sm:$0xff] }
 0x368   :  { %7771 = vmatpush1.bf16.msra.mxu1 %v10169_v54  ;;  %7600 = vmatprep.subr.bf16.mxu0 %v10176_v23  ;;  %v4746_v54 = vld [vmem:[#allocation9 + $0xb20] sm:$0xff]  ;;  %v4743_v23 = vld [vmem:[#allocation9 + $0xb08] sm:$0xff] }
 0x369   :  { %7772 = vmatprep.subr.bf16.mxu1 %v10178_v45  ;;  %v4747_v45 = vld [vmem:[#allocation9 + $0xb28] sm:$0xff]  ;;  %v10232_v49 = vcombine.high %v4742_v2, %v4746_v54  ;;  %v10231_v17 = vcombine.low %v4742_v2, %v4746_v54 }
 0x36a   :  { %v10234_v42 = vcombine.high %v4743_v23, %v4747_v45  ;;  %v10233_v35 = vcombine.low %v4743_v23, %v4747_v45 }
 0x36b   :  { %7601 = vmatpush1.bf16.msra.mxu0 %v10175_v51  ;;  %v4750_v51 = vld [vmem:[#allocation9 + $0xb40] sm:$0xff] }
 0x36c   :  { %7773 = vmatpush1.bf16.msra.mxu1 %v10177_v52  ;;  %7602 = vmatprep.subr.bf16.mxu0 %v10184_v6  ;;  %v4754_v52 = vld [vmem:[#allocation9 + $0xb60] sm:$0xff]  ;;  %v4751_v6 = vld [vmem:[#allocation9 + $0xb48] sm:$0xff] }
 0x36d   :  { %7774 = vmatprep.subr.bf16.mxu1 %v10186_v38  ;;  %v4755_v38 = vld [vmem:[#allocation9 + $0xb68] sm:$0xff]  ;;  %v10240_v40 = vcombine.high %v4750_v51, %v4754_v52  ;;  %v10239_v13 = vcombine.low %v4750_v51, %v4754_v52 }
 0x36e   :  { %v10242_v33 = vcombine.high %v4751_v6, %v4755_v38  ;;  %v10241_v29 = vcombine.low %v4751_v6, %v4755_v38 }
 0x36f   :  { %7603 = vmatpush1.bf16.msra.mxu0 %v10183_v3  ;;  %v4758_v3 = vld [vmem:[#allocation9 + $0xb80] sm:$0xff] }
 0x370   :  { %7775 = vmatpush1.bf16.msra.mxu1 %v10185_v61  ;;  %7604 = vmatprep.subr.bf16.mxu0 %v10192_v16  ;;  %v4762_v61 = vld [vmem:[#allocation9 + $0xba0] sm:$0xff]  ;;  %v4759_v16 = vld [vmem:[#allocation9 + $0xb88] sm:$0xff] }
 0x371   :  { %7776 = vmatprep.subr.bf16.mxu1 %v10194_v15  ;;  %v4763_v15 = vld [vmem:[#allocation9 + $0xba8] sm:$0xff]  ;;  %v10248_v0 = vcombine.high %v4758_v3, %v4762_v61  ;;  %v10247_v10 = vcombine.low %v4758_v3, %v4762_v61 }
 0x372   :  { %v10250_v53 = vcombine.high %v4759_v16, %v4763_v15  ;;  %v10249_v55 = vcombine.low %v4759_v16, %v4763_v15 }
 0x373   :  { %7605 = vmatpush1.bf16.msra.mxu0 %v10191_v44  ;;  %v4766_v44 = vld [vmem:[#allocation9 + $0xbc0] sm:$0xff] }
 0x374   :  { %7777 = vmatpush1.bf16.msra.mxu1 %v10193_v18  ;;  %7606 = vmatprep.subr.bf16.mxu0 %v10200_v28  ;;  %v4770_v18 = vld [vmem:[#allocation9 + $0xbe0] sm:$0xff]  ;;  %v4767_v28 = vld [vmem:[#allocation9 + $0xbc8] sm:$0xff] }
 0x375   :  { %7778 = vmatprep.subr.bf16.mxu1 %v10202_v50  ;;  %v4771_v50 = vld [vmem:[#allocation9 + $0xbe8] sm:$0xff]  ;;  %v10256_v58 = vcombine.high %v4766_v44, %v4770_v18  ;;  %v10255_v59 = vcombine.low %v4766_v44, %v4770_v18 }
 0x376   :  { %v10258_v60 = vcombine.high %v4767_v28, %v4771_v50  ;;  %v10257_v1 = vcombine.low %v4767_v28, %v4771_v50  ;;  %v4786_v50 = vld [vmem:[#allocation9 + $0xc60] sm:$0xff] }
 0x377   :  { %7607 = vmatpush1.bf16.msra.mxu0 %v10199_v14  ;;  %v11480_v14 = vld [vmem:[#allocation9 + $0xc00] sm:$0xff] }
 0x378   :  { %7779 = vmatpush1.bf16.msra.mxu1 %v10201_v56  ;;  %7608 = vmatprep.subr.bf16.mxu0 %v10208_v20  ;;  %v11482_v56 = vld [vmem:[#allocation9 + $0xc20] sm:$0xff]  ;;  %v11484_v20 = vld [vmem:[#allocation9 + $0xc08] sm:$0xff] }
 0x379   :  { %7780 = vmatprep.subr.bf16.mxu1 %v10210_v5  ;;  %v11486_v5 = vld [vmem:[#allocation9 + $0xc28] sm:$0xff]  ;;  %v10264_v9 = vcombine.high %v11480_v14, %v11482_v56 }
 0x37a   :  { %v10266_v47 = vcombine.high %v11484_v20, %v11486_v5 }
 0x37b   :  { %7609 = vmatpush1.bf16.msra.mxu0 %v10207_v30  ;;  %v10761_v30 = vld [vmem:[#allocation7] sm:$0xff] }
 0x37c   :  { %7781 = vmatpush1.bf16.msra.mxu1 %v10209_v37  ;;  %7610 = vmatprep.subr.bf16.mxu0 %v10216_v63  ;;  %v1081_v37 = vrot.slane %v10761_v30, %v11095_v21  ;;  %v1089_v63 = vrot.slane %v10761_v30, %v11107_v26  ;;  %v1093_v41 = vrot.slane %v10761_v30, %v11315_v8 }
 0x37d   :  { %7782 = vmatprep.subr.bf16.mxu1 %v10218_v27  ;;  %v1085_v27 = vrot.slane %v10761_v30, %v11098_v22 }
 0x37f   :  { %7611 = vmatpush1.bf16.msra.mxu0 %v10215_v39 }
 0x380   :  { %7783 = vmatpush1.bf16.msra.mxu1 %v10217_v11  ;;  %7612 = vmatprep.subr.bf16.mxu0 %v10224_v32 }
 0x381   :  { %7784 = vmatprep.subr.bf16.mxu1 %v10226_v48 }
 0x383   :  { %7613 = vmatpush1.bf16.msra.mxu0 %v10223_v34 }
 0x384   :  { %7785 = vmatpush1.bf16.msra.mxu1 %v10225_v46  ;;  %7614 = vmatprep.subr.bf16.mxu0 %v10232_v49 }
 0x385   :  { %7786 = vmatprep.subr.bf16.mxu1 %v10234_v42 }
 0x387   :  { %7615 = vmatpush1.bf16.msra.mxu0 %v10231_v17 }
 0x388   :  { %7787 = vmatpush1.bf16.msra.mxu1 %v10233_v35  ;;  %7616 = vmatprep.subr.bf16.mxu0 %v10240_v40 }
 0x389   :  { %7788 = vmatprep.subr.bf16.mxu1 %v10242_v33 }
 0x38b   :  { %7617 = vmatpush1.bf16.msra.mxu0 %v10239_v13 }
 0x38c   :  { %7789 = vmatpush1.bf16.msra.mxu1 %v10241_v29  ;;  %7618 = vmatprep.subr.bf16.mxu0 %v10248_v0 }
 0x38d   :  { %7790 = vmatprep.subr.bf16.mxu1 %v10250_v53  ;;  %v4782_v53 = vld [vmem:[#allocation9 + $0xc40] sm:$0xff] }
 0x38e   :  { %v10272_v30 = vcombine.high %v4782_v53, %v4786_v50 }
 0x38f   :  { %7619 = vmatpush1.bf16.msra.mxu0 %v10247_v10  ;;  %v4783_v10 = vld [vmem:[#allocation9 + $0xc48] sm:$0xff] }
 0x390   :  { %7791 = vmatpush1.bf16.msra.mxu1 %v10249_v55  ;;  %7620 = vmatprep.subr.bf16.mxu0 %v10256_v58  ;;  %v4787_v55 = vld [vmem:[#allocation9 + $0xc68] sm:$0xff] }
 0x391   :  { %7792 = vmatprep.subr.bf16.mxu1 %v10258_v60 }
 0x393   :  { %7621 = vmatpush1.bf16.msra.mxu0 %v10255_v59  ;;  %v10263_v59 = vcombine.low %v11480_v14, %v11482_v56  ;;  %v10271_v14 = vcombine.low %v4782_v53, %v4786_v50  ;;  %v10273_v56 = vcombine.low %v4783_v10, %v4787_v55  ;;  %v4834_v50 = vld [vmem:[#allocation9 + $0xde0] sm:$0xff] }
 0x394   :  { %7793 = vmatpush1.bf16.msra.mxu1 %v10257_v1  ;;  %7633 = vmatprep.subr.bf16.mxu0 %v10264_v9  ;;  %v10265_v1 = vcombine.low %v11484_v20, %v11486_v5 }
 0x395   :  { %7805 = vmatprep.subr.bf16.mxu1 %v10266_v47  ;;  %v4790_v47 = vld [vmem:[#allocation9 + $0xc80] sm:$0xff] }
 0x3a9   :  { %v4169_v4 = vpop.f32.mrb[4].mxu0 }
 0x3aa   :  { %v10552_v36 = vadd.f32 %v4169_v4, %v1081_v37  ;;  %v4341_v57 = vpop.f32.mrb[4].mxu1  ;;  %v4171_v39 = vpop.f32.mrb[5].mxu0  ;;  %v4798_v4 = vld [vmem:[#allocation9 + $0xcc0] sm:$0xff] }
 0x3ab   :  { %v10556_v11 = vadd.f32 %v4341_v57, %v1089_v63  ;;  %v10553_v32 = vadd.f32 %v4171_v39, %v1085_v27  ;;  %v4343_v48 = vpop.f32.mrb[5].mxu1  ;;  %v4173_v2 = vpop.f32.mrb[6].mxu0  ;;  %v4799_v57 = vld [vmem:[#allocation9 + $0xcc8] sm:$0xff] }
 0x3ac   :  { %v4354_v54 = vmul.f32 0.01, %v10552_v36  ;;  %v10557_v23 = vadd.f32 %v4343_v48, %v1093_v41  ;;  %v10554_v45 = vadd.f32 %v4173_v2, %v1081_v37  ;;  %v4345_v34 = vpop.f32.mrb[6].mxu1  ;;  %v4175_v46 = vpop.f32.mrb[7].mxu0  ;;  %v10274_v37 = vcombine.high %v4783_v10, %v4787_v55  ;;  %v4803_v39 = vld [vmem:[#allocation9 + $0xce8] sm:$0xff] }
 0x3ad   :  { %v4356_v49 = vmul.f32 0.01, %v10556_v11  ;;  %v4355_v42 = vmul.f32 0.01, %v10553_v32  ;;  %v10558_v51 = vadd.f32 %v4345_v34, %v1089_v63  ;;  %v10555_v52 = vadd.f32 %v4175_v46, %v1085_v27  ;;  %v4347_v6 = vpop.f32.mrb[7].mxu1  ;;  %v4794_v63 = vld [vmem:[#allocation9 + $0xca0] sm:$0xff] }
 0x3ae   :  { %v4357_v38 = vmul.f32 0.01, %v10557_v23  ;;  %v4362_v17 = vmul.f32 0.01, %v10554_v45  ;;  %v10559_v35 = vadd.f32 %v4347_v6, %v1093_v41  ;;  %v4370_v3 = vmax.f32 %v10552_v36, %v4354_v54  ;;  %v4791_v27 = vld [vmem:[#allocation9 + $0xc88] sm:$0xff]  ;;  %v4802_v36 = vld [vmem:[#allocation9 + $0xce0] sm:$0xff] }
 0x3af   :  { %v4364_v40 = vmul.f32 0.01, %v10558_v51  ;;  %v4363_v33 = vmul.f32 0.01, %v10555_v52  ;;  %v4372_v15 = vmax.f32 %v10556_v11, %v4356_v49  ;;  %v4371_v13 = vmax.f32 %v10553_v32, %v4355_v42  ;;  %v4795_v41 = vld [vmem:[#allocation9 + $0xca8] sm:$0xff]  ;;  %v4806_v54 = vld [vmem:[#allocation9 + $0xd00] sm:$0xff] }
 0x3b0   :  { %v4378_v61 = vmax.f32 %v10554_v45, %v4362_v17  ;;  %v4365_v16 = vmul.f32 0.01, %v10559_v35  ;;  %v4373_v44 = vmax.f32 %v10557_v23, %v4357_v38  ;;  %v10280_v20 = vcombine.high %v4790_v47, %v4794_v63  ;;  %v4810_v23 = vld [vmem:[#allocation9 + $0xd20] sm:$0xff]  ;;  %v4807_v45 = vld [vmem:[#allocation9 + $0xd08] sm:$0xff] }
 0x3b1   :  { %v4380_v29 = vmax.f32 %v10558_v51, %v4364_v40  ;;  %v4379_v0 = vmax.f32 %v10555_v52, %v4363_v33  ;;  %v10282_v5 = vcombine.high %v4791_v27, %v4795_v41  ;;  %v10279_v11 = vcombine.low %v4790_v47, %v4794_v63  ;;  %v4811_v34 = vld [vmem:[#allocation9 + $0xd28] sm:$0xff]  ;;  %v4814_v52 = vld [vmem:[#allocation9 + $0xd40] sm:$0xff] }
 0x3b2   :  { %v11496_v18 = vpack.c.bf16 %v4378_v61, %v4370_v3  ;;  %v4381_v28 = vmax.f32 %v10559_v35, %v4365_v16  ;;  %v10281_v32 = vcombine.low %v4791_v27, %v4795_v41  ;;  %v10288_v48 = vcombine.high %v4798_v4, %v4802_v36  ;;  %v4818_v6 = vld [vmem:[#allocation9 + $0xd60] sm:$0xff]  ;;  %v4815_v38 = vld [vmem:[#allocation9 + $0xd48] sm:$0xff] }
 0x3b3   :  { %v11498_v58 = vpack.c.bf16 %v4380_v29, %v4372_v15  ;;  %v11500_v60 = vpack.c.bf16 %v4379_v0, %v4371_v13  ;;  %v10290_v2 = vcombine.high %v4799_v57, %v4803_v39  ;;  %v10287_v46 = vcombine.low %v4798_v4, %v4802_v36  ;;  %v4819_v17 = vld [vmem:[#allocation9 + $0xd68] sm:$0xff]  ;;  %v4822_v61 = vld [vmem:[#allocation9 + $0xd80] sm:$0xff] }
 0x3b4   :  { %v11506_v9 = vpack.c.bf16 %v4381_v28, %v4373_v44  ;;  %v10289_v49 = vcombine.low %v4799_v57, %v4803_v39  ;;  %v10296_v42 = vcombine.high %v4806_v54, %v4810_v23  ;;  %v10298_v51 = vcombine.high %v4807_v45, %v4811_v34  ;;  %v4826_v16 = vld [vmem:[#allocation9 + $0xda0] sm:$0xff]  ;;  %v4823_v15 = vld [vmem:[#allocation9 + $0xd88] sm:$0xff] }
 0x3b5   :  { %7622 = vmatprep.mubr.bf16.mxu0 %v11500_v60  ;;  %7794 = vmatprep.mubr.bf16.mxu1 %v11500_v60  ;;  %v10295_v35 = vcombine.low %v4806_v54, %v4810_v23  ;;  %v10297_v40 = vcombine.low %v4807_v45, %v4811_v34  ;;  %v10304_v33 = vcombine.high %v4814_v52, %v4818_v6  ;;  %v4827_v13 = vld [vmem:[#allocation9 + $0xda8] sm:$0xff]  ;;  %v4830_v28 = vld [vmem:[#allocation9 + $0xdc0] sm:$0xff] }
 0x3b6   :  { %7623 = vmatmul.mubr.bf16.vlgmr.msra.gmra.mrb[8].mxu0 %v11496_v18  ;;  %7795 = vmatmul.mubr.bf16.vlgmr.msra.gmra.mrb[8].mxu1 %v11496_v18  ;;  %v10306_v3 = vcombine.high %v4815_v38, %v4819_v17  ;;  %v10303_v29 = vcombine.low %v4814_v52, %v4818_v6  ;;  %v10305_v0 = vcombine.low %v4815_v38, %v4819_v17  ;;  %v4831_v10 = vld [vmem:[#allocation9 + $0xdc8] sm:$0xff]  ;;  %v4842_v63 = vld [vmem:[#allocation9 + $0xe20] sm:$0xff] }
 0x3b7   :  { %7634 = vmatpush1.bf16.msra.mxu0 %v10263_v59  ;;  %7806 = vmatpush1.bf16.msra.mxu1 %v10265_v1  ;;  %v10312_v53 = vcombine.high %v4822_v61, %v4826_v16  ;;  %v10314_v44 = vcombine.high %v4823_v15, %v4827_v13  ;;  %v4835_v55 = vld [vmem:[#allocation9 + $0xde8] sm:$0xff]  ;;  %v10311_v59 = vcombine.low %v4822_v61, %v4826_v16  ;;  %v4846_v4 = vld [vmem:[#allocation9 + $0xe40] sm:$0xff] }
 0x3b8   :  { %7665 = vmatprep.mubr.bf16.mxu0 %v11506_v9  ;;  %7837 = vmatprep.mubr.bf16.mxu1 %v11506_v9  ;;  %v10313_v1 = vcombine.low %v4823_v15, %v4827_v13  ;;  %v10320_v47 = vcombine.high %v4830_v28, %v4834_v50  ;;  %v4839_v27 = vld [vmem:[#allocation9 + $0xe08] sm:$0xff]  ;;  %v4850_v36 = vld [vmem:[#allocation9 + $0xe60] sm:$0xff] }
 0x3b9   :  { %7635 = vmatprep.subr.bf16.mxu0 %v10272_v30  ;;  %7807 = vmatprep.subr.bf16.mxu1 %v10274_v37  ;;  %v10322_v30 = vcombine.high %v4831_v10, %v4835_v55  ;;  %v4838_v37 = vld [vmem:[#allocation9 + $0xe00] sm:$0xff]  ;;  %v4843_v41 = vld [vmem:[#allocation9 + $0xe28] sm:$0xff] }
 0x3ba   :  { %v4847_v57 = vld [vmem:[#allocation9 + $0xe48] sm:$0xff]  ;;  %v4854_v54 = vld [vmem:[#allocation9 + $0xe80] sm:$0xff] }
 0x3bb   :  { %7636 = vmatpush1.bf16.msra.mxu0 %v10271_v14  ;;  %7808 = vmatpush1.bf16.msra.mxu1 %v10273_v56  ;;  %v10319_v14 = vcombine.low %v4830_v28, %v4834_v50  ;;  %v10321_v56 = vcombine.low %v4831_v10, %v4835_v55  ;;  %v4851_v39 = vld [vmem:[#allocation9 + $0xe68] sm:$0xff]  ;;  %v4858_v23 = vld [vmem:[#allocation9 + $0xea0] sm:$0xff] }
 0x3bc   :  { %7637 = vmatprep.subr.bf16.mxu0 %v10280_v20  ;;  %7809 = vmatprep.subr.bf16.mxu1 %v10282_v5  ;;  %v10328_v20 = vcombine.high %v4838_v37, %v4842_v63  ;;  %v10330_v5 = vcombine.high %v4839_v27, %v4843_v41  ;;  %v4855_v45 = vld [vmem:[#allocation9 + $0xe88] sm:$0xff]  ;;  %v4862_v52 = vld [vmem:[#allocation9 + $0xec0] sm:$0xff] }
 0x3bd   :  { %v4859_v34 = vld [vmem:[#allocation9 + $0xea8] sm:$0xff]  ;;  %v4866_v6 = vld [vmem:[#allocation9 + $0xee0] sm:$0xff] }
 0x3be   :  { %v4863_v38 = vld [vmem:[#allocation9 + $0xec8] sm:$0xff]  ;;  %v4870_v61 = vld [vmem:[#allocation9 + $0xf00] sm:$0xff] }
 0x3bf   :  { %7638 = vmatpush1.bf16.msra.mxu0 %v10279_v11  ;;  %7810 = vmatpush1.bf16.msra.mxu1 %v10281_v32  ;;  %v10327_v11 = vcombine.low %v4838_v37, %v4842_v63  ;;  %v10329_v32 = vcombine.low %v4839_v27, %v4843_v41  ;;  %v4867_v17 = vld [vmem:[#allocation9 + $0xee8] sm:$0xff]  ;;  %v4874_v16 = vld [vmem:[#allocation9 + $0xf20] sm:$0xff] }
 0x3c0   :  { %7639 = vmatprep.subr.bf16.mxu0 %v10288_v48  ;;  %7811 = vmatprep.subr.bf16.mxu1 %v10290_v2  ;;  %v10336_v48 = vcombine.high %v4846_v4, %v4850_v36  ;;  %v10338_v2 = vcombine.high %v4847_v57, %v4851_v39  ;;  %v4871_v15 = vld [vmem:[#allocation9 + $0xf08] sm:$0xff]  ;;  %v4878_v28 = vld [vmem:[#allocation9 + $0xf40] sm:$0xff] }
 0x3c1   :  { %v4875_v13 = vld [vmem:[#allocation9 + $0xf28] sm:$0xff]  ;;  %v4882_v50 = vld [vmem:[#allocation9 + $0xf60] sm:$0xff] }
 0x3c2   :  { %v4879_v10 = vld [vmem:[#allocation9 + $0xf48] sm:$0xff]  ;;  %v4886_v37 = vld [vmem:[#allocation9 + $0xf80] sm:$0xff] }
 0x3c3   :  { %7640 = vmatpush1.bf16.msra.mxu0 %v10287_v46  ;;  %7812 = vmatpush1.bf16.msra.mxu1 %v10289_v49  ;;  %v10335_v46 = vcombine.low %v4846_v4, %v4850_v36  ;;  %v10337_v49 = vcombine.low %v4847_v57, %v4851_v39  ;;  %v4883_v55 = vld [vmem:[#allocation9 + $0xf68] sm:$0xff]  ;;  %v4890_v63 = vld [vmem:[#allocation9 + $0xfa0] sm:$0xff] }
 0x3c4   :  { %7641 = vmatprep.subr.bf16.mxu0 %v10296_v42  ;;  %7813 = vmatprep.subr.bf16.mxu1 %v10298_v51  ;;  %v10344_v42 = vcombine.high %v4854_v54, %v4858_v23  ;;  %v10346_v51 = vcombine.high %v4855_v45, %v4859_v34  ;;  %v4887_v27 = vld [vmem:[#allocation9 + $0xf88] sm:$0xff]  ;;  %v4894_v4 = vld [vmem:[#allocation9 + $0xfc0] sm:$0xff] }
 0x3c5   :  { %v4891_v41 = vld [vmem:[#allocation9 + $0xfa8] sm:$0xff]  ;;  %v4898_v36 = vld [vmem:[#allocation9 + $0xfe0] sm:$0xff] }
 0x3c6   :  { %v4895_v57 = vld [vmem:[#allocation9 + $0xfc8] sm:$0xff] }
 0x3c7   :  { %7642 = vmatpush1.bf16.msra.mxu0 %v10295_v35  ;;  %7814 = vmatpush1.bf16.msra.mxu1 %v10297_v40  ;;  %v10343_v35 = vcombine.low %v4854_v54, %v4858_v23  ;;  %v10345_v40 = vcombine.low %v4855_v45, %v4859_v34  ;;  %v4899_v39 = vld [vmem:[#allocation9 + $0xfe8] sm:$0xff]  ;;  %v4392_v54 = vld [vmem:[#allocation9 + $0x10] sm:$0xff]  ;;  %v4393_v45 = vld [vmem:[#allocation9 + $0x18] sm:$0xff] }
 0x3c8   :  { %7643 = vmatprep.subr.bf16.mxu0 %v10304_v33  ;;  %7815 = vmatprep.subr.bf16.mxu1 %v10306_v3  ;;  %v10352_v33 = vcombine.high %v4862_v52, %v4866_v6  ;;  %v10354_v3 = vcombine.high %v4863_v38, %v4867_v17  ;;  %v4396_v23 = vld [vmem:[#allocation9 + $0x30] sm:$0xff]  ;;  %v4397_v34 = vld [vmem:[#allocation9 + $0x38] sm:$0xff] }
 0x3cb   :  { %7644 = vmatpush1.bf16.msra.mxu0 %v10303_v29  ;;  %7816 = vmatpush1.bf16.msra.mxu1 %v10305_v0  ;;  %v10351_v29 = vcombine.low %v4862_v52, %v4866_v6  ;;  %v10353_v0 = vcombine.low %v4863_v38, %v4867_v17  ;;  %v4400_v52 = vld [vmem:[#allocation9 + $0x50] sm:$0xff]  ;;  %v4401_v38 = vld [vmem:[#allocation9 + $0x58] sm:$0xff] }
 0x3cc   :  { %7645 = vmatprep.subr.bf16.mxu0 %v10312_v53  ;;  %7817 = vmatprep.subr.bf16.mxu1 %v10314_v44  ;;  %v10360_v53 = vcombine.high %v4870_v61, %v4874_v16  ;;  %v10362_v44 = vcombine.high %v4871_v15, %v4875_v13  ;;  %v4404_v6 = vld [vmem:[#allocation9 + $0x70] sm:$0xff]  ;;  %v4405_v17 = vld [vmem:[#allocation9 + $0x78] sm:$0xff] }
 0x3cf   :  { %7646 = vmatpush1.bf16.msra.mxu0 %v10311_v59  ;;  %7818 = vmatpush1.bf16.msra.mxu1 %v10313_v1  ;;  %v10359_v59 = vcombine.low %v4870_v61, %v4874_v16  ;;  %v10361_v1 = vcombine.low %v4871_v15, %v4875_v13  ;;  %v4408_v61 = vld [vmem:[#allocation9 + $0x90] sm:$0xff]  ;;  %v4409_v15 = vld [vmem:[#allocation9 + $0x98] sm:$0xff] }
 0x3d0   :  { %7647 = vmatprep.subr.bf16.mxu0 %v10320_v47  ;;  %7819 = vmatprep.subr.bf16.mxu1 %v10322_v30  ;;  %v10368_v47 = vcombine.high %v4878_v28, %v4882_v50  ;;  %v10370_v30 = vcombine.high %v4879_v10, %v4883_v55  ;;  %v4412_v16 = vld [vmem:[#allocation9 + $0xb0] sm:$0xff]  ;;  %v4413_v13 = vld [vmem:[#allocation9 + $0xb8] sm:$0xff] }
 0x3d3   :  { %7648 = vmatpush1.bf16.msra.mxu0 %v10319_v14  ;;  %7820 = vmatpush1.bf16.msra.mxu1 %v10321_v56  ;;  %v10367_v14 = vcombine.low %v4878_v28, %v4882_v50  ;;  %v10369_v56 = vcombine.low %v4879_v10, %v4883_v55  ;;  %v4416_v28 = vld [vmem:[#allocation9 + $0xd0] sm:$0xff]  ;;  %v4417_v10 = vld [vmem:[#allocation9 + $0xd8] sm:$0xff] }
 0x3d4   :  { %7649 = vmatprep.subr.bf16.mxu0 %v10328_v20  ;;  %7821 = vmatprep.subr.bf16.mxu1 %v10330_v5  ;;  %v10376_v20 = vcombine.high %v4886_v37, %v4890_v63  ;;  %v10378_v5 = vcombine.high %v4887_v27, %v4891_v41  ;;  %v4420_v50 = vld [vmem:[#allocation9 + $0xf0] sm:$0xff]  ;;  %v4421_v55 = vld [vmem:[#allocation9 + $0xf8] sm:$0xff] }
 0x3d7   :  { %7650 = vmatpush1.bf16.msra.mxu0 %v10327_v11  ;;  %7822 = vmatpush1.bf16.msra.mxu1 %v10329_v32  ;;  %v10375_v11 = vcombine.low %v4886_v37, %v4890_v63  ;;  %v10377_v32 = vcombine.low %v4887_v27, %v4891_v41  ;;  %v4424_v37 = vld [vmem:[#allocation9 + $0x110] sm:$0xff]  ;;  %v4429_v27 = vld [vmem:[#allocation9 + $0x138] sm:$0xff]  ;;  %v9907_v41 = vcombine.low %v4416_v28, %v4420_v50 }
 0x3d8   :  { %7651 = vmatprep.subr.bf16.mxu0 %v10336_v48  ;;  %7823 = vmatprep.subr.bf16.mxu1 %v10338_v2  ;;  %v10384_v48 = vcombine.high %v4894_v4, %v4898_v36  ;;  %v10386_v2 = vcombine.high %v4895_v57, %v4899_v39  ;;  %v4428_v63 = vld [vmem:[#allocation9 + $0x130] sm:$0xff] }
 0x3db   :  { %7652 = vmatpush1.bf16.msra.mxu0 %v10335_v46  ;;  %7824 = vmatpush1.bf16.msra.mxu1 %v10337_v49  ;;  %v10383_v46 = vcombine.low %v4894_v4, %v4898_v36  ;;  %v10385_v49 = vcombine.low %v4895_v57, %v4899_v39  ;;  %v4436_v4 = vld [vmem:[#allocation9 + $0x170] sm:$0xff]  ;;  %v4433_v36 = vld [vmem:[#allocation9 + $0x158] sm:$0xff]  ;;  %v9915_v39 = vcombine.low %v4424_v37, %v4428_v63 }
 0x3dc   :  { %7653 = vmatprep.subr.bf16.mxu0 %v10344_v42  ;;  %7825 = vmatprep.subr.bf16.mxu1 %v10346_v51  ;;  %v9884_v42 = vcombine.high %v4392_v54, %v4396_v23  ;;  %v9886_v51 = vcombine.high %v4393_v45, %v4397_v34  ;;  %v4437_v57 = vld [vmem:[#allocation9 + $0x178] sm:$0xff] }
 0x3df   :  { %7654 = vmatpush1.bf16.msra.mxu0 %v10343_v35  ;;  %7826 = vmatpush1.bf16.msra.mxu1 %v10345_v40  ;;  %v9883_v35 = vcombine.low %v4392_v54, %v4396_v23  ;;  %v9885_v40 = vcombine.low %v4393_v45, %v4397_v34  ;;  %v4444_v54 = vld [vmem:[#allocation9 + $0x1b0] sm:$0xff]  ;;  %v4441_v23 = vld [vmem:[#allocation9 + $0x198] sm:$0xff] }
 0x3e0   :  { %7655 = vmatprep.subr.bf16.mxu0 %v10352_v33  ;;  %7827 = vmatprep.subr.bf16.mxu1 %v10354_v3  ;;  %v9892_v33 = vcombine.high %v4400_v52, %v4404_v6  ;;  %v9894_v3 = vcombine.high %v4401_v38, %v4405_v17  ;;  %v4445_v45 = vld [vmem:[#allocation9 + $0x1b8] sm:$0xff] }
 0x3e3   :  { %7656 = vmatpush1.bf16.msra.mxu0 %v10351_v29  ;;  %7828 = vmatpush1.bf16.msra.mxu1 %v10353_v0  ;;  %v9891_v29 = vcombine.low %v4400_v52, %v4404_v6  ;;  %v9893_v0 = vcombine.low %v4401_v38, %v4405_v17  ;;  %v4452_v52 = vld [vmem:[#allocation9 + $0x1f0] sm:$0xff]  ;;  %v4449_v6 = vld [vmem:[#allocation9 + $0x1d8] sm:$0xff] }
 0x3e4   :  { %7657 = vmatprep.subr.bf16.mxu0 %v10360_v53  ;;  %7829 = vmatprep.subr.bf16.mxu1 %v10362_v44  ;;  %v9900_v53 = vcombine.high %v4408_v61, %v4412_v16  ;;  %v9902_v44 = vcombine.high %v4409_v15, %v4413_v13  ;;  %v4453_v38 = vld [vmem:[#allocation9 + $0x1f8] sm:$0xff] }
 0x3e7   :  { %7658 = vmatpush1.bf16.msra.mxu0 %v10359_v59  ;;  %7830 = vmatpush1.bf16.msra.mxu1 %v10361_v1  ;;  %v9899_v59 = vcombine.low %v4408_v61, %v4412_v16  ;;  %v9901_v1 = vcombine.low %v4409_v15, %v4413_v13  ;;  %v4460_v61 = vld [vmem:[#allocation9 + $0x230] sm:$0xff]  ;;  %v4457_v16 = vld [vmem:[#allocation9 + $0x218] sm:$0xff] }
 0x3e8   :  { %7659 = vmatprep.subr.bf16.mxu0 %v10368_v47  ;;  %7831 = vmatprep.subr.bf16.mxu1 %v10370_v30  ;;  %v9908_v47 = vcombine.high %v4416_v28, %v4420_v50  ;;  %v9910_v30 = vcombine.high %v4417_v10, %v4421_v55  ;;  %v4461_v15 = vld [vmem:[#allocation9 + $0x238] sm:$0xff]  ;;  %v4468_v28 = vld [vmem:[#allocation9 + $0x270] sm:$0xff] }
 0x3e9   :  { %v4465_v50 = vld [vmem:[#allocation9 + $0x258] sm:$0xff] }
 0x3eb   :  { %7660 = vmatpush1.bf16.msra.mxu0 %v10367_v14  ;;  %7832 = vmatpush1.bf16.msra.mxu1 %v10369_v56  ;;  %v9909_v14 = vcombine.low %v4417_v10, %v4421_v55  ;;  %v9916_v56 = vcombine.high %v4424_v37, %v4428_v63  ;;  %v4469_v10 = vld [vmem:[#allocation9 + $0x278] sm:$0xff]  ;;  %v4476_v37 = vld [vmem:[#allocation9 + $0x2b0] sm:$0xff] }
 0x3ec   :  { %7661 = vmatprep.subr.bf16.mxu0 %v10376_v20  ;;  %7833 = vmatprep.subr.bf16.mxu1 %v10378_v5  ;;  %v4432_v5 = vld [vmem:[#allocation9 + $0x150] sm:$0xff]  ;;  %v4473_v63 = vld [vmem:[#allocation9 + $0x298] sm:$0xff] }
 0x3ed   :  { %v9923_v34 = vcombine.low %v4432_v5, %v4436_v4 }
 0x3ef   :  { %7662 = vmatpush1.bf16.msra.mxu0 %v10375_v11  ;;  %7834 = vmatpush1.bf16.msra.mxu1 %v10377_v32  ;;  %v9924_v32 = vcombine.high %v4432_v5, %v4436_v4  ;;  %v4484_v5 = vld [vmem:[#allocation9 + $0x2f0] sm:$0xff]  ;;  %v4481_v4 = vld [vmem:[#allocation9 + $0x2d8] sm:$0xff] }
 0x3f0   :  { %7663 = vmatprep.subr.bf16.mxu0 %v10384_v48  ;;  %7835 = vmatprep.subr.bf16.mxu1 %v10386_v2  ;;  %v9926_v48 = vcombine.high %v4433_v36, %v4437_v57  ;;  %v4440_v2 = vld [vmem:[#allocation9 + $0x190] sm:$0xff] }
 0x3f1   :  { %v9931_v17 = vcombine.low %v4440_v2, %v4444_v54 }
 0x3f3   :  { %7664 = vmatpush1.bf16.msra.mxu0 %v10383_v46  ;;  %7836 = vmatpush1.bf16.msra.mxu1 %v10385_v49  ;;  %v9925_v46 = vcombine.low %v4433_v36, %v4437_v57  ;;  %v9932_v49 = vcombine.high %v4440_v2, %v4444_v54  ;;  %v4485_v36 = vld [vmem:[#allocation9 + $0x2f8] sm:$0xff]  ;;  %v4492_v2 = vld [vmem:[#allocation9 + $0x330] sm:$0xff] }
 0x3f4   :  { %7848 = vmatprep.subr.bf16.mxu0 %v9884_v42  ;;  %8020 = vmatprep.subr.bf16.mxu1 %v9886_v51  ;;  %v9934_v42 = vcombine.high %v4441_v23, %v4445_v45  ;;  %v4448_v51 = vld [vmem:[#allocation9 + $0x1d0] sm:$0xff]  ;;  %v4489_v54 = vld [vmem:[#allocation9 + $0x318] sm:$0xff] }
 0x3f5   :  { %v9939_v13 = vcombine.low %v4448_v51, %v4452_v52 }
 0x3f6   :  { %7666 = vmatmul.mubr.bf16.vlgmr.msra.gmra.mrb[8].mxu0 %v11498_v58  ;;  %7838 = vmatmul.mubr.bf16.vlgmr.msra.gmra.mrb[8].mxu1 %v11498_v58 }
 0x3f7   :  { %7849 = vmatpush1.bf16.msra.mxu0 %v9883_v35  ;;  %7880 = vmatprep.mubr.bf16.mxu0 %v11466_v12  ;;  %v9933_v35 = vcombine.low %v4441_v23, %v4445_v45  ;;  %v4493_v23 = vld [vmem:[#allocation9 + $0x338] sm:$0xff] }
 0x3f8   :  { %8021 = vmatpush1.bf16.msra.mxu1 %v9885_v40  ;;  %8052 = vmatprep.mubr.bf16.mxu1 %v11466_v12  ;;  %v4425_v12 = vld [vmem:[#allocation9 + $0x118] sm:$0xff]  ;;  %v9940_v40 = vcombine.high %v4448_v51, %v4452_v52  ;;  %v4500_v51 = vld [vmem:[#allocation9 + $0x370] sm:$0xff] }
 0x3f9   :  { %7850 = vmatprep.subr.bf16.mxu0 %v9892_v33  ;;  %8022 = vmatprep.subr.bf16.mxu1 %v9894_v3  ;;  %v9918_v20 = vcombine.high %v4425_v12, %v4429_v27  ;;  %v9917_v11 = vcombine.low %v4425_v12, %v4429_v27  ;;  %v9942_v33 = vcombine.high %v4449_v6, %v4453_v38  ;;  %v4456_v3 = vld [vmem:[#allocation9 + $0x210] sm:$0xff]  ;;  %v4477_v12 = vld [vmem:[#allocation9 + $0x2b8] sm:$0xff] }
 0x3fa   :  { %v9947_v55 = vcombine.low %v4456_v3, %v4460_v61  ;;  %v4497_v52 = vld [vmem:[#allocation9 + $0x358] sm:$0xff] }
 0x3fb   :  { %7851 = vmatpush1.bf16.msra.mxu0 %v9891_v29  ;;  %v9941_v29 = vcombine.low %v4449_v6, %v4453_v38  ;;  %v4501_v6 = vld [vmem:[#allocation9 + $0x378] sm:$0xff] }
 0x3fc   :  { %8023 = vmatpush1.bf16.msra.mxu1 %v9893_v0  ;;  %7852 = vmatprep.subr.bf16.mxu0 %v9900_v53  ;;  %v9948_v0 = vcombine.high %v4456_v3, %v4460_v61  ;;  %v9950_v53 = vcombine.high %v4457_v16, %v4461_v15  ;;  %v4508_v3 = vld [vmem:[#allocation9 + $0x3b0] sm:$0xff]  ;;  %v4505_v61 = vld [vmem:[#allocation9 + $0x398] sm:$0xff] }
 0x3fd   :  { %8024 = vmatprep.subr.bf16.mxu1 %v9902_v44  ;;  %v4464_v44 = vld [vmem:[#allocation9 + $0x250] sm:$0xff] }
 0x3fe   :  { %v9955_v27 = vcombine.low %v4464_v44, %v4468_v28 }
 0x3ff   :  { %7853 = vmatpush1.bf16.msra.mxu0 %v9899_v59  ;;  %v9949_v59 = vcombine.low %v4457_v16, %v4461_v15  ;;  %v4509_v16 = vld [vmem:[#allocation9 + $0x3b8] sm:$0xff] }
 0x400   :  { %8025 = vmatpush1.bf16.msra.mxu1 %v9901_v1  ;;  %7854 = vmatprep.subr.bf16.mxu0 %v9908_v47  ;;  %v9956_v1 = vcombine.high %v4464_v44, %v4468_v28  ;;  %v9958_v47 = vcombine.high %v4465_v50, %v4469_v10  ;;  %v4516_v44 = vld [vmem:[#allocation9 + $0x3f0] sm:$0xff]  ;;  %v4513_v28 = vld [vmem:[#allocation9 + $0x3d8] sm:$0xff] }
 0x401   :  { %8026 = vmatprep.subr.bf16.mxu1 %v9910_v30  ;;  %v4472_v30 = vld [vmem:[#allocation9 + $0x290] sm:$0xff] }
 0x402   :  { %v9963_v57 = vcombine.low %v4472_v30, %v4476_v37 }
 0x403   :  { %7855 = vmatpush1.bf16.msra.mxu0 %v9907_v41  ;;  %v9957_v41 = vcombine.low %v4465_v50, %v4469_v10  ;;  %v4517_v50 = vld [vmem:[#allocation9 + $0x3f8] sm:$0xff] }
 0x404   :  { %8027 = vmatpush1.bf16.msra.mxu1 %v9909_v14  ;;  %7856 = vmatprep.subr.bf16.mxu0 %v9916_v56  ;;  %v9964_v14 = vcombine.high %v4472_v30, %v4476_v37  ;;  %v9966_v56 = vcombine.high %v4473_v63, %v4477_v12  ;;  %v4524_v30 = vld [vmem:[#allocation9 + $0x430] sm:$0xff]  ;;  %v4521_v37 = vld [vmem:[#allocation9 + $0x418] sm:$0xff] }
 0x405   :  { %8028 = vmatprep.subr.bf16.mxu1 %v9918_v20  ;;  %v4480_v20 = vld [vmem:[#allocation9 + $0x2d0] sm:$0xff] }
 0x406   :  { %v9971_v45 = vcombine.low %v4480_v20, %v4484_v5 }
 0x407   :  { %7857 = vmatpush1.bf16.msra.mxu0 %v9915_v39  ;;  %v9965_v39 = vcombine.low %v4473_v63, %v4477_v12  ;;  %v4525_v63 = vld [vmem:[#allocation9 + $0x438] sm:$0xff] }
 0x408   :  { %8029 = vmatpush1.bf16.msra.mxu1 %v9917_v11  ;;  %7858 = vmatprep.subr.bf16.mxu0 %v9924_v32  ;;  %v9972_v11 = vcombine.high %v4480_v20, %v4484_v5  ;;  %v9974_v32 = vcombine.high %v4481_v4, %v4485_v36  ;;  %v4532_v20 = vld [vmem:[#allocation9 + $0x470] sm:$0xff] }
 0x409   :  { %8030 = vmatprep.subr.bf16.mxu1 %v9926_v48  ;;  %v4488_v48 = vld [vmem:[#allocation9 + $0x310] sm:$0xff] }
 0x40a   :  { %v9979_v38 = vcombine.low %v4488_v48, %v4492_v2 }
 0x40b   :  { %7859 = vmatpush1.bf16.msra.mxu0 %v9923_v34  ;;  %v9973_v34 = vcombine.low %v4481_v4, %v4485_v36  ;;  %v4529_v4 = vld [vmem:[#allocation9 + $0x458] sm:$0xff] }
 0x40c   :  { %8031 = vmatpush1.bf16.msra.mxu1 %v9925_v46  ;;  %7860 = vmatprep.subr.bf16.mxu0 %v9932_v49  ;;  %v9980_v46 = vcombine.high %v4488_v48, %v4492_v2  ;;  %v9982_v49 = vcombine.high %v4489_v54, %v4493_v23  ;;  %v4533_v36 = vld [vmem:[#allocation9 + $0x478] sm:$0xff] }
 0x40d   :  { %8032 = vmatprep.subr.bf16.mxu1 %v9934_v42  ;;  %v4496_v42 = vld [vmem:[#allocation9 + $0x350] sm:$0xff]  ;;  %v10022_v48 = vcombine.high %v4529_v4, %v4533_v36  ;;  %v4537_v2 = vld [vmem:[#allocation9 + $0x498] sm:$0xff] }
 0x40e   :  { %v9987_v15 = vcombine.low %v4496_v42, %v4500_v51 }
 0x40f   :  { %7861 = vmatpush1.bf16.msra.mxu0 %v9931_v17  ;;  %v9981_v17 = vcombine.low %v4489_v54, %v4493_v23  ;;  %v4541_v54 = vld [vmem:[#allocation9 + $0x4b8] sm:$0xff] }
 0x410   :  { %8033 = vmatpush1.bf16.msra.mxu1 %v9933_v35  ;;  %7862 = vmatprep.subr.bf16.mxu0 %v9940_v40  ;;  %v9988_v35 = vcombine.high %v4496_v42, %v4500_v51  ;;  %v9990_v40 = vcombine.high %v4497_v52, %v4501_v6  ;;  %v4548_v42 = vld [vmem:[#allocation9 + $0x4f0] sm:$0xff]  ;;  %v4545_v51 = vld [vmem:[#allocation9 + $0x4d8] sm:$0xff] }
 0x411   :  { %8034 = vmatprep.subr.bf16.mxu1 %v9942_v33  ;;  %v4504_v33 = vld [vmem:[#allocation9 + $0x390] sm:$0xff] }
 0x412   :  { %v9995_v10 = vcombine.low %v4504_v33, %v4508_v3 }
 0x413   :  { %7863 = vmatpush1.bf16.msra.mxu0 %v9939_v13  ;;  %v9989_v13 = vcombine.low %v4497_v52, %v4501_v6  ;;  %v4549_v52 = vld [vmem:[#allocation9 + $0x4f8] sm:$0xff] }
 0x414   :  { %8035 = vmatpush1.bf16.msra.mxu1 %v9941_v29  ;;  %7864 = vmatprep.subr.bf16.mxu0 %v9948_v0  ;;  %v9996_v29 = vcombine.high %v4504_v33, %v4508_v3  ;;  %v9998_v0 = vcombine.high %v4505_v61, %v4509_v16  ;;  %v4553_v33 = vld [vmem:[#allocation9 + $0x518] sm:$0xff] }
 0x415   :  { %8036 = vmatprep.subr.bf16.mxu1 %v9950_v53  ;;  %v4512_v53 = vld [vmem:[#allocation9 + $0x3d0] sm:$0xff]  ;;  %v4557_v3 = vld [vmem:[#allocation9 + $0x538] sm:$0xff] }
 0x416   :  { %v10003_v12 = vcombine.low %v4512_v53, %v4516_v44 }
 0x417   :  { %7865 = vmatpush1.bf16.msra.mxu0 %v9947_v55  ;;  %v9997_v55 = vcombine.low %v4505_v61, %v4509_v16  ;;  %v10037_v61 = vcombine.low %v4545_v51, %v4549_v52 }
 0x418   :  { %8037 = vmatpush1.bf16.msra.mxu1 %v9949_v59  ;;  %7866 = vmatprep.subr.bf16.mxu0 %v9956_v1  ;;  %v10004_v59 = vcombine.high %v4512_v53, %v4516_v44  ;;  %v10006_v1 = vcombine.high %v4513_v28, %v4517_v50  ;;  %v4565_v53 = vld [vmem:[#allocation9 + $0x578] sm:$0xff] }
 0x419   :  { %8038 = vmatprep.subr.bf16.mxu1 %v9958_v47  ;;  %v4520_v47 = vld [vmem:[#allocation9 + $0x410] sm:$0xff] }
 0x41a   :  { %v10011_v5 = vcombine.low %v4520_v47, %v4524_v30 }
 0x41b   :  { %7867 = vmatpush1.bf16.msra.mxu0 %v9955_v27  ;;  %v10005_v27 = vcombine.low %v4513_v28, %v4517_v50  ;;  %v10045_v28 = vcombine.low %v4553_v33, %v4557_v3 }
 0x41c   :  { %8039 = vmatpush1.bf16.msra.mxu1 %v9957_v41  ;;  %7868 = vmatprep.subr.bf16.mxu0 %v9964_v14  ;;  %v10012_v41 = vcombine.high %v4520_v47, %v4524_v30  ;;  %v10014_v14 = vcombine.high %v4521_v37, %v4525_v63  ;;  %v4573_v47 = vld [vmem:[#allocation9 + $0x5b8] sm:$0xff] }
 0x41d   :  { %8040 = vmatprep.subr.bf16.mxu1 %v9966_v56  ;;  %v4528_v56 = vld [vmem:[#allocation9 + $0x450] sm:$0xff] }
 0x41e   :  { %v10019_v23 = vcombine.low %v4528_v56, %v4532_v20 }
 0x41f   :  { %7869 = vmatpush1.bf16.msra.mxu0 %v9963_v57  ;;  %v10013_v57 = vcombine.low %v4521_v37, %v4525_v63 }
 0x420   :  { %8041 = vmatpush1.bf16.msra.mxu1 %v9965_v39  ;;  %7870 = vmatprep.subr.bf16.mxu0 %v9972_v11  ;;  %v10020_v39 = vcombine.high %v4528_v56, %v4532_v20  ;;  %v4536_v11 = vld [vmem:[#allocation9 + $0x490] sm:$0xff]  ;;  %v4581_v56 = vld [vmem:[#allocation9 + $0x5f8] sm:$0xff] }
 0x421   :  { %8042 = vmatprep.subr.bf16.mxu1 %v9974_v32  ;;  %v4540_v32 = vld [vmem:[#allocation9 + $0x4b0] sm:$0xff] }
 0x422   :  { %v10027_v6 = vcombine.low %v4536_v11, %v4540_v32 }
 0x423   :  { %7871 = vmatpush1.bf16.msra.mxu0 %v9971_v45  ;;  %v10021_v45 = vcombine.low %v4529_v4, %v4533_v36 }
 0x424   :  { %8043 = vmatpush1.bf16.msra.mxu1 %v9973_v34  ;;  %7872 = vmatprep.subr.bf16.mxu0 %v9980_v46  ;;  %v10028_v34 = vcombine.high %v4536_v11, %v4540_v32  ;;  %v10030_v46 = vcombine.high %v4537_v2, %v4541_v54  ;;  %v4585_v11 = vld [vmem:[#allocation9 + $0x618] sm:$0xff] }
 0x425   :  { %8044 = vmatprep.subr.bf16.mxu1 %v9982_v49  ;;  %v4544_v49 = vld [vmem:[#allocation9 + $0x4d0] sm:$0xff]  ;;  %v4589_v32 = vld [vmem:[#allocation9 + $0x638] sm:$0xff] }
 0x427   :  { %7873 = vmatpush1.bf16.msra.mxu0 %v9979_v38  ;;  %v10036_v38 = vcombine.high %v4544_v49, %v4548_v42 }
 0x428   :  { %8045 = vmatpush1.bf16.msra.mxu1 %v9981_v17  ;;  %7874 = vmatprep.subr.bf16.mxu0 %v9988_v35  ;;  %v10038_v17 = vcombine.high %v4545_v51, %v4549_v52  ;;  %v4552_v35 = vld [vmem:[#allocation9 + $0x510] sm:$0xff]  ;;  %v10077_v51 = vcombine.low %v4585_v11, %v4589_v32 }
 0x429   :  { %8046 = vmatprep.subr.bf16.mxu1 %v9990_v40  ;;  %v4556_v40 = vld [vmem:[#allocation9 + $0x530] sm:$0xff] }
 0x42a   :  { %v10044_v16 = vcombine.high %v4552_v35, %v4556_v40  ;;  %v10043_v44 = vcombine.low %v4552_v35, %v4556_v40  ;;  %v4605_v35 = vld [vmem:[#allocation9 + $0x6b8] sm:$0xff] }
 0x42b   :  { %7875 = vmatpush1.bf16.msra.mxu0 %v9987_v15  ;;  %v10046_v15 = vcombine.high %v4553_v33, %v4557_v3 }
 0x42c   :  { %8047 = vmatpush1.bf16.msra.mxu1 %v9989_v13  ;;  %7876 = vmatprep.subr.bf16.mxu0 %v9996_v29  ;;  %v4560_v13 = vld [vmem:[#allocation9 + $0x550] sm:$0xff] }
 0x42d   :  { %8048 = vmatprep.subr.bf16.mxu1 %v9998_v0  ;;  %v4564_v29 = vld [vmem:[#allocation9 + $0x570] sm:$0xff]  ;;  %v4561_v0 = vld [vmem:[#allocation9 + $0x558] sm:$0xff] }
 0x42e   :  { %v10052_v50 = vcombine.high %v4560_v13, %v4564_v29  ;;  %v10051_v30 = vcombine.low %v4560_v13, %v4564_v29  ;;  %v10053_v37 = vcombine.low %v4561_v0, %v4565_v53  ;;  %v4613_v13 = vld [vmem:[#allocation9 + $0x6f8] sm:$0xff] }
 0x42f   :  { %7877 = vmatpush1.bf16.msra.mxu0 %v9995_v10  ;;  %v10054_v10 = vcombine.high %v4561_v0, %v4565_v53 }
 0x430   :  { %8049 = vmatpush1.bf16.msra.mxu1 %v9997_v55  ;;  %7878 = vmatprep.subr.bf16.mxu0 %v10004_v59  ;;  %v4568_v55 = vld [vmem:[#allocation9 + $0x590] sm:$0xff] }
 0x431   :  { %8050 = vmatprep.subr.bf16.mxu1 %v10006_v1  ;;  %v4572_v59 = vld [vmem:[#allocation9 + $0x5b0] sm:$0xff]  ;;  %v4569_v1 = vld [vmem:[#allocation9 + $0x598] sm:$0xff] }
 0x432   :  { %v10060_v63 = vcombine.high %v4568_v55, %v4572_v59  ;;  %v10059_v20 = vcombine.low %v4568_v55, %v4572_v59  ;;  %v4621_v55 = vld [vmem:[#allocation9 + $0x738] sm:$0xff] }
 0x433   :  { %7879 = vmatpush1.bf16.msra.mxu0 %v10003_v12  ;;  %v10062_v12 = vcombine.high %v4569_v1, %v4573_v47 }
 0x434   :  { %8051 = vmatpush1.bf16.msra.mxu1 %v10005_v27  ;;  %7891 = vmatprep.subr.bf16.mxu0 %v10012_v41  ;;  %v4576_v27 = vld [vmem:[#allocation9 + $0x5d0] sm:$0xff] }
 0x435   :  { %8063 = vmatprep.subr.bf16.mxu1 %v10014_v14  ;;  %v4580_v41 = vld [vmem:[#allocation9 + $0x5f0] sm:$0xff]  ;;  %v4577_v14 = vld [vmem:[#allocation9 + $0x5d8] sm:$0xff] }
 0x436   :  { %7881 = vmatmul.mubr.bf16.vlgmr.msra.gmra.mrb[12].mxu0 %v11462_v43  ;;  %v10068_v4 = vcombine.high %v4576_v27, %v4580_v41  ;;  %v10070_v36 = vcombine.high %v4577_v14, %v4581_v56 }
 0x437   :  { %8053 = vmatmul.mubr.bf16.vlgmr.msra.gmra.mrb[12].mxu1 %v11462_v43  ;;  %7892 = vmatpush1.bf16.msra.mxu0 %v10011_v5  ;;  %v10029_v43 = vcombine.low %v4537_v2, %v4541_v54  ;;  %v10061_v5 = vcombine.low %v4569_v1, %v4573_v47  ;;  %v10069_v2 = vcombine.low %v4577_v14, %v4581_v56 }
 0x438   :  { %7923 = vmatprep.mubr.bf16.mxu0 %v11468_v62  ;;  %8064 = vmatpush1.bf16.msra.mxu1 %v10013_v57  ;;  %v4584_v57 = vld [vmem:[#allocation9 + $0x610] sm:$0xff] }
 0x439   :  { %8095 = vmatprep.mubr.bf16.mxu1 %v11468_v62  ;;  %7893 = vmatprep.subr.bf16.mxu0 %v10020_v39  ;;  %v10035_v62 = vcombine.low %v4544_v49, %v4548_v42  ;;  %v4588_v39 = vld [vmem:[#allocation9 + $0x630] sm:$0xff]  ;;  %v4597_v49 = vld [vmem:[#allocation9 + $0x678] sm:$0xff] }
 0x43a   :  { %8065 = vmatprep.subr.bf16.mxu1 %v10022_v48  ;;  %v10067_v48 = vcombine.low %v4576_v27, %v4580_v41  ;;  %v10076_v54 = vcombine.high %v4584_v57, %v4588_v39  ;;  %v10075_v42 = vcombine.low %v4584_v57, %v4588_v39  ;;  %v4629_v27 = vld [vmem:[#allocation9 + $0x778] sm:$0xff] }
 0x43b   :  { %7894 = vmatpush1.bf16.msra.mxu0 %v10019_v23  ;;  %v10078_v23 = vcombine.high %v4585_v11, %v4589_v32  ;;  %v4637_v57 = vld [vmem:[#allocation9 + $0x7b8] sm:$0xff] }
 0x43c   :  { %8066 = vmatpush1.bf16.msra.mxu1 %v10021_v45  ;;  %7895 = vmatprep.subr.bf16.mxu0 %v10028_v34  ;;  %v4592_v45 = vld [vmem:[#allocation9 + $0x650] sm:$0xff] }
 0x43d   :  { %8067 = vmatprep.subr.bf16.mxu1 %v10030_v46  ;;  %v4596_v34 = vld [vmem:[#allocation9 + $0x670] sm:$0xff]  ;;  %v4593_v46 = vld [vmem:[#allocation9 + $0x658] sm:$0xff] }
 0x43e   :  { %v10084_v52 = vcombine.high %v4592_v45, %v4596_v34  ;;  %v10083_v40 = vcombine.low %v4592_v45, %v4596_v34  ;;  %v10085_v33 = vcombine.low %v4593_v46, %v4597_v49  ;;  %v4645_v45 = vld [vmem:[#allocation9 + $0x7f8] sm:$0xff] }
 0x43f   :  { %7896 = vmatpush1.bf16.msra.mxu0 %v10027_v6  ;;  %v10086_v6 = vcombine.high %v4593_v46, %v4597_v49 }
 0x440   :  { %8068 = vmatpush1.bf16.msra.mxu1 %v10029_v43  ;;  %7897 = vmatprep.subr.bf16.mxu0 %v10036_v38  ;;  %v4600_v43 = vld [vmem:[#allocation9 + $0x690] sm:$0xff] }
 0x441   :  { %8069 = vmatprep.subr.bf16.mxu1 %v10038_v17  ;;  %v4604_v38 = vld [vmem:[#allocation9 + $0x6b0] sm:$0xff]  ;;  %v4601_v17 = vld [vmem:[#allocation9 + $0x698] sm:$0xff] }
 0x442   :  { %v10092_v3 = vcombine.high %v4600_v43, %v4604_v38  ;;  %v10091_v29 = vcombine.low %v4600_v43, %v4604_v38  ;;  %v10093_v0 = vcombine.low %v4601_v17, %v4605_v35  ;;  %v4653_v43 = vld [vmem:[#allocation9 + $0x838] sm:$0xff] }
 0x443   :  { %7898 = vmatpush1.bf16.msra.mxu0 %v10035_v62  ;;  %v10094_v62 = vcombine.high %v4601_v17, %v4605_v35 }
 0x444   :  { %8070 = vmatpush1.bf16.msra.mxu1 %v10037_v61  ;;  %7899 = vmatprep.subr.bf16.mxu0 %v10044_v16  ;;  %v4608_v61 = vld [vmem:[#allocation9 + $0x6d0] sm:$0xff] }
 0x445   :  { %8071 = vmatprep.subr.bf16.mxu1 %v10046_v15  ;;  %v4612_v16 = vld [vmem:[#allocation9 + $0x6f0] sm:$0xff]  ;;  %v4609_v15 = vld [vmem:[#allocation9 + $0x6d8] sm:$0xff] }
 0x446   :  { %v10100_v53 = vcombine.high %v4608_v61, %v4612_v16  ;;  %v10099_v59 = vcombine.low %v4608_v61, %v4612_v16  ;;  %v10101_v1 = vcombine.low %v4609_v15, %v4613_v13  ;;  %v4657_v61 = vld [vmem:[#allocation9 + $0x858] sm:$0xff] }
 0x447   :  { %7900 = vmatpush1.bf16.msra.mxu0 %v10043_v44  ;;  %v10102_v44 = vcombine.high %v4609_v15, %v4613_v13  ;;  %v4661_v16 = vld [vmem:[#allocation9 + $0x878] sm:$0xff] }
 0x448   :  { %8072 = vmatpush1.bf16.msra.mxu1 %v10045_v28  ;;  %7901 = vmatprep.subr.bf16.mxu0 %v10052_v50  ;;  %v4616_v28 = vld [vmem:[#allocation9 + $0x710] sm:$0xff] }
 0x449   :  { %8073 = vmatprep.subr.bf16.mxu1 %v10054_v10  ;;  %v4620_v50 = vld [vmem:[#allocation9 + $0x730] sm:$0xff]  ;;  %v4617_v10 = vld [vmem:[#allocation9 + $0x718] sm:$0xff] }
 0x44a   :  { %v10108_v47 = vcombine.high %v4616_v28, %v4620_v50  ;;  %v10107_v41 = vcombine.low %v4616_v28, %v4620_v50  ;;  %v10109_v14 = vcombine.low %v4617_v10, %v4621_v55  ;;  %v4669_v28 = vld [vmem:[#allocation9 + $0x8b8] sm:$0xff] }
 0x44b   :  { %7902 = vmatpush1.bf16.msra.mxu0 %v10051_v30  ;;  %v10110_v30 = vcombine.high %v4617_v10, %v4621_v55  ;;  %v10149_v10 = vcombine.low %v4657_v61, %v4661_v16 }
 0x44c   :  { %8074 = vmatpush1.bf16.msra.mxu1 %v10053_v37  ;;  %7903 = vmatprep.subr.bf16.mxu0 %v10060_v63  ;;  %v4624_v37 = vld [vmem:[#allocation9 + $0x750] sm:$0xff] }
 0x44d   :  { %8075 = vmatprep.subr.bf16.mxu1 %v10062_v12  ;;  %v4628_v63 = vld [vmem:[#allocation9 + $0x770] sm:$0xff]  ;;  %v4625_v12 = vld [vmem:[#allocation9 + $0x758] sm:$0xff] }
 0x44e   :  { %v10116_v56 = vcombine.high %v4624_v37, %v4628_v63  ;;  %v10115_v39 = vcombine.low %v4624_v37, %v4628_v63  ;;  %v10117_v11 = vcombine.low %v4625_v12, %v4629_v27  ;;  %v4677_v37 = vld [vmem:[#allocation9 + $0x8f8] sm:$0xff] }
 0x44f   :  { %7904 = vmatpush1.bf16.msra.mxu0 %v10059_v20  ;;  %v10118_v20 = vcombine.high %v4625_v12, %v4629_v27 }
 0x450   :  { %8076 = vmatpush1.bf16.msra.mxu1 %v10061_v5  ;;  %7905 = vmatprep.subr.bf16.mxu0 %v10068_v4  ;;  %v4632_v5 = vld [vmem:[#allocation9 + $0x790] sm:$0xff] }
 0x451   :  { %8077 = vmatprep.subr.bf16.mxu1 %v10070_v36  ;;  %v4636_v4 = vld [vmem:[#allocation9 + $0x7b0] sm:$0xff]  ;;  %v4633_v36 = vld [vmem:[#allocation9 + $0x798] sm:$0xff] }
 0x452   :  { %v10124_v32 = vcombine.high %v4632_v5, %v4636_v4  ;;  %v10123_v34 = vcombine.low %v4632_v5, %v4636_v4  ;;  %v10125_v46 = vcombine.low %v4633_v36, %v4637_v57 }
 0x453   :  { %7906 = vmatpush1.bf16.msra.mxu0 %v10067_v48  ;;  %v10126_v48 = vcombine.high %v4633_v36, %v4637_v57  ;;  %v4688_v57 = vld [vmem:[#allocation9 + $0x950] sm:$0xff] }
 0x454   :  { %8078 = vmatpush1.bf16.msra.mxu1 %v10069_v2  ;;  %7907 = vmatprep.subr.bf16.mxu0 %v10076_v54  ;;  %v4640_v2 = vld [vmem:[#allocation9 + $0x7d0] sm:$0xff] }
 0x455   :  { %8079 = vmatprep.subr.bf16.mxu1 %v10078_v23  ;;  %v4644_v54 = vld [vmem:[#allocation9 + $0x7f0] sm:$0xff]  ;;  %v4641_v23 = vld [vmem:[#allocation9 + $0x7d8] sm:$0xff] }
 0x456   :  { %v10132_v49 = vcombine.high %v4640_v2, %v4644_v54  ;;  %v10131_v38 = vcombine.low %v4640_v2, %v4644_v54  ;;  %v10133_v17 = vcombine.low %v4641_v23, %v4645_v45 }
 0x457   :  { %7908 = vmatpush1.bf16.msra.mxu0 %v10075_v42  ;;  %v10134_v42 = vcombine.high %v4641_v23, %v4645_v45  ;;  %v4696_v45 = vld [vmem:[#allocation9 + $0x990] sm:$0xff] }
 0x458   :  { %8080 = vmatpush1.bf16.msra.mxu1 %v10077_v51  ;;  %7909 = vmatprep.subr.bf16.mxu0 %v10084_v52  ;;  %v4648_v51 = vld [vmem:[#allocation9 + $0x810] sm:$0xff] }
 0x459   :  { %8081 = vmatprep.subr.bf16.mxu1 %v10086_v6  ;;  %v4652_v52 = vld [vmem:[#allocation9 + $0x830] sm:$0xff]  ;;  %v4649_v6 = vld [vmem:[#allocation9 + $0x818] sm:$0xff] }
 0x45a   :  { %v10140_v35 = vcombine.high %v4648_v51, %v4652_v52  ;;  %v10141_v15 = vcombine.low %v4649_v6, %v4653_v43 }
 0x45b   :  { %7910 = vmatpush1.bf16.msra.mxu0 %v10083_v40  ;;  %v10142_v40 = vcombine.high %v4649_v6, %v4653_v43  ;;  %v4704_v43 = vld [vmem:[#allocation9 + $0x9d0] sm:$0xff] }
 0x45c   :  { %8082 = vmatpush1.bf16.msra.mxu1 %v10085_v33  ;;  %7911 = vmatprep.subr.bf16.mxu0 %v10092_v3  ;;  %v4656_v33 = vld [vmem:[#allocation9 + $0x850] sm:$0xff] }
 0x45d   :  { %8083 = vmatprep.subr.bf16.mxu1 %v10094_v62  ;;  %v4660_v3 = vld [vmem:[#allocation9 + $0x870] sm:$0xff]  ;;  %v10139_v62 = vcombine.low %v4648_v51, %v4652_v52 }
 0x45e   :  { %v10148_v13 = vcombine.high %v4656_v33, %v4660_v3  ;;  %v10147_v50 = vcombine.low %v4656_v33, %v4660_v3 }
 0x45f   :  { %7912 = vmatpush1.bf16.msra.mxu0 %v10091_v29  ;;  %v4664_v29 = vld [vmem:[#allocation9 + $0x890] sm:$0xff] }
 0x460   :  { %8084 = vmatpush1.bf16.msra.mxu1 %v10093_v0  ;;  %7913 = vmatprep.subr.bf16.mxu0 %v10100_v53  ;;  %v4668_v0 = vld [vmem:[#allocation9 + $0x8b0] sm:$0xff]  ;;  %v10150_v53 = vcombine.high %v4657_v61, %v4661_v16 }
 0x461   :  { %8085 = vmatprep.subr.bf16.mxu1 %v10102_v44  ;;  %v4665_v44 = vld [vmem:[#allocation9 + $0x898] sm:$0xff]  ;;  %v10156_v55 = vcombine.high %v4664_v29, %v4668_v0  ;;  %v10155_v63 = vcombine.low %v4664_v29, %v4668_v0  ;;  %v4712_v61 = vld [vmem:[#allocation9 + $0xa10] sm:$0xff] }
 0x462   :  { %v4716_v16 = vld [vmem:[#allocation9 + $0xa30] sm:$0xff] }
 0x463   :  { %7914 = vmatpush1.bf16.msra.mxu0 %v10099_v59  ;;  %v10158_v59 = vcombine.high %v4665_v44, %v4669_v28 }
 0x464   :  { %8086 = vmatpush1.bf16.msra.mxu1 %v10101_v1  ;;  %7915 = vmatprep.subr.bf16.mxu0 %v10108_v47  ;;  %v4672_v1 = vld [vmem:[#allocation9 + $0x8d0] sm:$0xff] }
 0x465   :  { %8087 = vmatprep.subr.bf16.mxu1 %v10110_v30  ;;  %v4676_v47 = vld [vmem:[#allocation9 + $0x8f0] sm:$0xff]  ;;  %v4673_v30 = vld [vmem:[#allocation9 + $0x8d8] sm:$0xff] }
 0x466   :  { %v10164_v12 = vcombine.high %v4672_v1, %v4676_v47  ;;  %v10166_v27 = vcombine.high %v4673_v30, %v4677_v37  ;;  %v10165_v5 = vcombine.low %v4673_v30, %v4677_v37  ;;  %v4728_v37 = vld [vmem:[#allocation9 + $0xa90] sm:$0xff] }
 0x467   :  { %7916 = vmatpush1.bf16.msra.mxu0 %v10107_v41  ;;  %v4680_v41 = vld [vmem:[#allocation9 + $0x910] sm:$0xff] }
 0x468   :  { %8088 = vmatpush1.bf16.msra.mxu1 %v10109_v14  ;;  %7917 = vmatprep.subr.bf16.mxu0 %v10116_v56  ;;  %v4684_v14 = vld [vmem:[#allocation9 + $0x930] sm:$0xff]  ;;  %v4681_v56 = vld [vmem:[#allocation9 + $0x918] sm:$0xff] }
 0x469   :  { %8089 = vmatprep.subr.bf16.mxu1 %v10118_v20  ;;  %v4685_v20 = vld [vmem:[#allocation9 + $0x938] sm:$0xff]  ;;  %v10172_v4 = vcombine.high %v4680_v41, %v4684_v14 }
 0x46a   :  { %v10174_v36 = vcombine.high %v4681_v56, %v4685_v20  ;;  %v10173_v2 = vcombine.low %v4681_v56, %v4685_v20  ;;  %v4736_v20 = vld [vmem:[#allocation9 + $0xad0] sm:$0xff] }
 0x46b   :  { %7918 = vmatpush1.bf16.msra.mxu0 %v10115_v39  ;;  %v4692_v39 = vld [vmem:[#allocation9 + $0x970] sm:$0xff] }
 0x46c   :  { %8090 = vmatpush1.bf16.msra.mxu1 %v10117_v11  ;;  %7919 = vmatprep.subr.bf16.mxu0 %v10124_v32  ;;  %v4689_v11 = vld [vmem:[#allocation9 + $0x958] sm:$0xff]  ;;  %v10180_v54 = vcombine.high %v4688_v57, %v4692_v39 }
 0x46d   :  { %8091 = vmatprep.subr.bf16.mxu1 %v10126_v48  ;;  %v4693_v32 = vld [vmem:[#allocation9 + $0x978] sm:$0xff]  ;;  %v10171_v48 = vcombine.low %v4680_v41, %v4684_v14 }
 0x46e   :  { %v10182_v23 = vcombine.high %v4689_v11, %v4693_v32  ;;  %v10181_v51 = vcombine.low %v4689_v11, %v4693_v32  ;;  %v4744_v32 = vld [vmem:[#allocation9 + $0xb10] sm:$0xff] }
 0x46f   :  { %7920 = vmatpush1.bf16.msra.mxu0 %v10123_v34  ;;  %v4700_v34 = vld [vmem:[#allocation9 + $0x9b0] sm:$0xff] }
 0x470   :  { %8092 = vmatpush1.bf16.msra.mxu1 %v10125_v46  ;;  %7921 = vmatprep.subr.bf16.mxu0 %v10132_v49  ;;  %v4697_v46 = vld [vmem:[#allocation9 + $0x998] sm:$0xff]  ;;  %v10188_v52 = vcombine.high %v4696_v45, %v4700_v34 }
 0x471   :  { %8093 = vmatprep.subr.bf16.mxu1 %v10134_v42  ;;  %v4701_v49 = vld [vmem:[#allocation9 + $0x9b8] sm:$0xff]  ;;  %v10179_v42 = vcombine.low %v4688_v57, %v4692_v39 }
 0x472   :  { %v10190_v6 = vcombine.high %v4697_v46, %v4701_v49  ;;  %v10189_v33 = vcombine.low %v4697_v46, %v4701_v49  ;;  %v4752_v49 = vld [vmem:[#allocation9 + $0xb50] sm:$0xff] }
 0x473   :  { %7922 = vmatpush1.bf16.msra.mxu0 %v10131_v38  ;;  %v4708_v38 = vld [vmem:[#allocation9 + $0x9f0] sm:$0xff] }
 0x474   :  { %8094 = vmatpush1.bf16.msra.mxu1 %v10133_v17  ;;  %7934 = vmatprep.subr.bf16.mxu0 %v10140_v35  ;;  %v4705_v17 = vld [vmem:[#allocation9 + $0x9d8] sm:$0xff]  ;;  %v10196_v3 = vcombine.high %v4704_v43, %v4708_v38  ;;  %v10195_v29 = vcombine.low %v4704_v43, %v4708_v38 }
 0x475   :  { %8106 = vmatprep.subr.bf16.mxu1 %v10142_v40  ;;  %v4709_v35 = vld [vmem:[#allocation9 + $0x9f8] sm:$0xff]  ;;  %v10187_v40 = vcombine.low %v4696_v45, %v4700_v34 }
 0x476   :  { %7924 = vmatmul.mubr.bf16.vlgmr.msra.gmra.mrb[12].mxu0 %v11464_v7  ;;  %v10197_v0 = vcombine.low %v4705_v17, %v4709_v35 }
 0x477   :  { %8096 = vmatmul.mubr.bf16.vlgmr.msra.gmra.mrb[12].mxu1 %v11464_v7  ;;  %7935 = vmatpush1.bf16.msra.mxu0 %v10139_v62  ;;  %v10157_v7 = vcombine.low %v4665_v44, %v4669_v28  ;;  %v10198_v62 = vcombine.high %v4705_v17, %v4709_v35  ;;  %v4720_v28 = vld [vmem:[#allocation9 + $0xa50] sm:$0xff] }
 0x478   :  { %7966 = vmatprep.mubr.bf16.mxu0 %v11500_v60  ;;  %8107 = vmatpush1.bf16.msra.mxu1 %v10141_v15  ;;  %v4713_v15 = vld [vmem:[#allocation9 + $0xa18] sm:$0xff]  ;;  %v4760_v35 = vld [vmem:[#allocation9 + $0xb90] sm:$0xff] }
 0x479   :  { %8138 = vmatprep.mubr.bf16.mxu1 %v11500_v60  ;;  %7936 = vmatprep.subr.bf16.mxu0 %v10148_v13  ;;  %v10163_v60 = vcombine.low %v4672_v1, %v4676_v47  ;;  %v4717_v13 = vld [vmem:[#allocation9 + $0xa38] sm:$0xff] }
 0x47a   :  { %8108 = vmatprep.subr.bf16.mxu1 %v10150_v53  ;;  %v10204_v53 = vcombine.high %v4712_v61, %v4716_v16  ;;  %v10206_v44 = vcombine.high %v4713_v15, %v4717_v13  ;;  %v10205_v1 = vcombine.low %v4713_v15, %v4717_v13  ;;  %v4768_v13 = vld [vmem:[#allocation9 + $0xbd0] sm:$0xff] }
 0x47b   :  { %7937 = vmatpush1.bf16.msra.mxu0 %v10147_v50  ;;  %v4724_v50 = vld [vmem:[#allocation9 + $0xa70] sm:$0xff] }
 0x47c   :  { %8109 = vmatpush1.bf16.msra.mxu1 %v10149_v10  ;;  %7938 = vmatprep.subr.bf16.mxu0 %v10156_v55  ;;  %v4721_v10 = vld [vmem:[#allocation9 + $0xa58] sm:$0xff]  ;;  %v10212_v47 = vcombine.high %v4720_v28, %v4724_v50 }
 0x47d   :  { %8110 = vmatprep.subr.bf16.mxu1 %v10158_v59  ;;  %v4725_v55 = vld [vmem:[#allocation9 + $0xa78] sm:$0xff]  ;;  %v10203_v59 = vcombine.low %v4712_v61, %v4716_v16 }
 0x47e   :  { %v10214_v30 = vcombine.high %v4721_v10, %v4725_v55  ;;  %v10213_v41 = vcombine.low %v4721_v10, %v4725_v55  ;;  %v4776_v55 = vld [vmem:[#allocation9 + $0xc10] sm:$0xff] }
 0x47f   :  { %7939 = vmatpush1.bf16.msra.mxu0 %v10155_v63  ;;  %v4732_v63 = vld [vmem:[#allocation9 + $0xab0] sm:$0xff] }
 0x480   :  { %8111 = vmatpush1.bf16.msra.mxu1 %v10157_v7  ;;  %7940 = vmatprep.subr.bf16.mxu0 %v10164_v12  ;;  %v4729_v7 = vld [vmem:[#allocation9 + $0xa98] sm:$0xff]  ;;  %v10220_v14 = vcombine.high %v4728_v37, %v4732_v63 }
 0x481   :  { %8112 = vmatprep.subr.bf16.mxu1 %v10166_v27  ;;  %v4733_v12 = vld [vmem:[#allocation9 + $0xab8] sm:$0xff]  ;;  %v10211_v27 = vcombine.low %v4720_v28, %v4724_v50 }
 0x482   :  { %v10222_v56 = vcombine.high %v4729_v7, %v4733_v12  ;;  %v10221_v57 = vcombine.low %v4729_v7, %v4733_v12  ;;  %v4784_v12 = vld [vmem:[#allocation9 + $0xc50] sm:$0xff] }
 0x483   :  { %7941 = vmatpush1.bf16.msra.mxu0 %v10163_v60  ;;  %v4740_v60 = vld [vmem:[#allocation9 + $0xaf0] sm:$0xff] }
 0x484   :  { %8113 = vmatpush1.bf16.msra.mxu1 %v10165_v5  ;;  %7942 = vmatprep.subr.bf16.mxu0 %v10172_v4  ;;  %v4737_v5 = vld [vmem:[#allocation9 + $0xad8] sm:$0xff]  ;;  %v10228_v39 = vcombine.high %v4736_v20, %v4740_v60 }
 0x485   :  { %8114 = vmatprep.subr.bf16.mxu1 %v10174_v36  ;;  %v4741_v4 = vld [vmem:[#allocation9 + $0xaf8] sm:$0xff]  ;;  %v10219_v36 = vcombine.low %v4728_v37, %v4732_v63 }
 0x486   :  { %v10230_v11 = vcombine.high %v4737_v5, %v4741_v4  ;;  %v10229_v45 = vcombine.low %v4737_v5, %v4741_v4  ;;  %v4792_v5 = vld [vmem:[#allocation9 + $0xc90] sm:$0xff] }
 0x487   :  { %7943 = vmatpush1.bf16.msra.mxu0 %v10171_v48  ;;  %v4748_v48 = vld [vmem:[#allocation9 + $0xb30] sm:$0xff] }
 0x488   :  { %8115 = vmatpush1.bf16.msra.mxu1 %v10173_v2  ;;  %7944 = vmatprep.subr.bf16.mxu0 %v10180_v54  ;;  %v4745_v2 = vld [vmem:[#allocation9 + $0xb18] sm:$0xff]  ;;  %v10236_v34 = vcombine.high %v4744_v32, %v4748_v48  ;;  %v4796_v4 = vld [vmem:[#allocation9 + $0xcb0] sm:$0xff] }
 0x489   :  { %8116 = vmatprep.subr.bf16.mxu1 %v10182_v23  ;;  %v4749_v54 = vld [vmem:[#allocation9 + $0xb38] sm:$0xff]  ;;  %v10227_v23 = vcombine.low %v4736_v20, %v4740_v60 }
 0x48a   :  { %v10238_v46 = vcombine.high %v4745_v2, %v4749_v54  ;;  %v10237_v43 = vcombine.low %v4745_v2, %v4749_v54  ;;  %v4800_v54 = vld [vmem:[#allocation9 + $0xcd0] sm:$0xff] }
 0x48b   :  { %7945 = vmatpush1.bf16.msra.mxu0 %v10179_v42  ;;  %v4756_v42 = vld [vmem:[#allocation9 + $0xb70] sm:$0xff] }
 0x48c   :  { %8117 = vmatpush1.bf16.msra.mxu1 %v10181_v51  ;;  %7946 = vmatprep.subr.bf16.mxu0 %v10188_v52  ;;  %v4753_v51 = vld [vmem:[#allocation9 + $0xb58] sm:$0xff]  ;;  %v10244_v38 = vcombine.high %v4752_v49, %v4756_v42 }
 0x48d   :  { %8118 = vmatprep.subr.bf16.mxu1 %v10190_v6  ;;  %v4757_v52 = vld [vmem:[#allocation9 + $0xb78] sm:$0xff]  ;;  %v10235_v6 = vcombine.low %v4744_v32, %v4748_v48  ;;  %v10284_v48 = vcombine.high %v4792_v5, %v4796_v4 }
 0x48e   :  { %v10246_v17 = vcombine.high %v4753_v51, %v4757_v52  ;;  %v10245_v61 = vcombine.low %v4753_v51, %v4757_v52  ;;  %v4808_v51 = vld [vmem:[#allocation9 + $0xd10] sm:$0xff] }
 0x48f   :  { %7947 = vmatpush1.bf16.msra.mxu0 %v10187_v40  ;;  %v4764_v40 = vld [vmem:[#allocation9 + $0xbb0] sm:$0xff] }
 0x490   :  { %8119 = vmatpush1.bf16.msra.mxu1 %v10189_v33  ;;  %7948 = vmatprep.subr.bf16.mxu0 %v10196_v3  ;;  %v4761_v33 = vld [vmem:[#allocation9 + $0xb98] sm:$0xff]  ;;  %v10252_v16 = vcombine.high %v4760_v35, %v4764_v40  ;;  %v4812_v52 = vld [vmem:[#allocation9 + $0xd30] sm:$0xff] }
 0x491   :  { %8120 = vmatprep.subr.bf16.mxu1 %v10198_v62  ;;  %v4765_v3 = vld [vmem:[#allocation9 + $0xbb8] sm:$0xff]  ;;  %v10243_v62 = vcombine.low %v4752_v49, %v4756_v42 }
 0x492   :  { %v10254_v15 = vcombine.high %v4761_v33, %v4765_v3  ;;  %v10253_v28 = vcombine.low %v4761_v33, %v4765_v3  ;;  %v4820_v33 = vld [vmem:[#allocation9 + $0xd70] sm:$0xff]  ;;  %v4817_v3 = vld [vmem:[#allocation9 + $0xd58] sm:$0xff] }
 0x493   :  { %7949 = vmatpush1.bf16.msra.mxu0 %v10195_v29  ;;  %v4772_v29 = vld [vmem:[#allocation9 + $0xbf0] sm:$0xff] }
 0x494   :  { %8121 = vmatpush1.bf16.msra.mxu1 %v10197_v0  ;;  %7950 = vmatprep.subr.bf16.mxu0 %v10204_v53  ;;  %v4769_v0 = vld [vmem:[#allocation9 + $0xbd8] sm:$0xff]  ;;  %v10260_v50 = vcombine.high %v4768_v13, %v4772_v29 }
 0x495   :  { %8122 = vmatprep.subr.bf16.mxu1 %v10206_v44  ;;  %v4773_v53 = vld [vmem:[#allocation9 + $0xbf8] sm:$0xff]  ;;  %v10251_v44 = vcombine.low %v4760_v35, %v4764_v40  ;;  %v4816_v40 = vld [vmem:[#allocation9 + $0xd50] sm:$0xff] }
 0x496   :  { %v10262_v10 = vcombine.high %v4769_v0, %v4773_v53  ;;  %v10261_v37 = vcombine.low %v4769_v0, %v4773_v53  ;;  %v4824_v0 = vld [vmem:[#allocation9 + $0xd90] sm:$0xff] }
 0x497   :  { %7951 = vmatpush1.bf16.msra.mxu0 %v10203_v59  ;;  %v4780_v59 = vld [vmem:[#allocation9 + $0xc30] sm:$0xff] }
 0x498   :  { %8123 = vmatpush1.bf16.msra.mxu1 %v10205_v1  ;;  %7952 = vmatprep.subr.bf16.mxu0 %v10212_v47  ;;  %v4777_v1 = vld [vmem:[#allocation9 + $0xc18] sm:$0xff]  ;;  %v10268_v63 = vcombine.high %v4776_v55, %v4780_v59  ;;  %v4828_v53 = vld [vmem:[#allocation9 + $0xdb0] sm:$0xff] }
 0x499   :  { %8124 = vmatprep.subr.bf16.mxu1 %v10214_v30  ;;  %v4781_v47 = vld [vmem:[#allocation9 + $0xc38] sm:$0xff]  ;;  %v10259_v30 = vcombine.low %v4768_v13, %v4772_v29  ;;  %v10308_v13 = vcombine.high %v4816_v40, %v4820_v33 }
 0x49a   :  { %v10270_v7 = vcombine.high %v4777_v1, %v4781_v47  ;;  %v10269_v20 = vcombine.low %v4777_v1, %v4781_v47  ;;  %v10307_v1 = vcombine.low %v4816_v40, %v4820_v33  ;;  %v11540_v47 = vld [vmem:[#allocation9 + $0xdd0] sm:$0xff] }
 0x49b   :  { %7953 = vmatpush1.bf16.msra.mxu0 %v10211_v27  ;;  %v4788_v27 = vld [vmem:[#allocation9 + $0xc70] sm:$0xff] }
 0x49c   :  { %8125 = vmatpush1.bf16.msra.mxu1 %v10213_v41  ;;  %7954 = vmatprep.subr.bf16.mxu0 %v10220_v14  ;;  %v10267_v41 = vcombine.low %v4776_v55, %v4780_v59  ;;  %v4785_v14 = vld [vmem:[#allocation9 + $0xc58] sm:$0xff]  ;;  %v10276_v60 = vcombine.high %v4784_v12, %v4788_v27 }
 0x49d   :  { %8126 = vmatprep.subr.bf16.mxu1 %v10222_v56  ;;  %v4789_v56 = vld [vmem:[#allocation9 + $0xc78] sm:$0xff] }
 0x49e   :  { %v10277_v32 = vcombine.low %v4785_v14, %v4789_v56 }
 0x49f   :  { %7955 = vmatpush1.bf16.msra.mxu0 %v10219_v36  ;;  %v10278_v36 = vcombine.high %v4785_v14, %v4789_v56 }
 0x4a0   :  { %8127 = vmatpush1.bf16.msra.mxu1 %v10221_v57  ;;  %7956 = vmatprep.subr.bf16.mxu0 %v10228_v39  ;;  %v4793_v57 = vld [vmem:[#allocation9 + $0xc98] sm:$0xff] }
 0x4a1   :  { %8128 = vmatprep.subr.bf16.mxu1 %v10230_v11  ;;  %v4797_v39 = vld [vmem:[#allocation9 + $0xcb8] sm:$0xff]  ;;  %v10275_v11 = vcombine.low %v4784_v12, %v4788_v27 }
 0x4a2   :  { %v10286_v2 = vcombine.high %v4793_v57, %v4797_v39 }
 0x4a3   :  { %7957 = vmatpush1.bf16.msra.mxu0 %v10227_v23  ;;  %v4804_v23 = vld [vmem:[#allocation9 + $0xcf0] sm:$0xff] }
 0x4a4   :  { %8129 = vmatpush1.bf16.msra.mxu1 %v10229_v45  ;;  %7958 = vmatprep.subr.bf16.mxu0 %v10236_v34  ;;  %v4801_v45 = vld [vmem:[#allocation9 + $0xcd8] sm:$0xff]  ;;  %v10292_v49 = vcombine.high %v4800_v54, %v4804_v23 }
 0x4a5   :  { %8130 = vmatprep.subr.bf16.mxu1 %v10238_v46  ;;  %v4805_v34 = vld [vmem:[#allocation9 + $0xcf8] sm:$0xff]  ;;  %v10283_v46 = vcombine.low %v4792_v5, %v4796_v4  ;;  %v11550_v5 = vld [vmem:[#allocation9 + $0xe10] sm:$0xff] }
 0x4a6   :  { %v10294_v42 = vcombine.high %v4801_v45, %v4805_v34 }
 0x4a7   :  { %7959 = vmatpush1.bf16.msra.mxu0 %v10235_v6  ;;  %v4809_v6 = vld [vmem:[#allocation9 + $0xd18] sm:$0xff] }
 0x4a8   :  { %8131 = vmatpush1.bf16.msra.mxu1 %v10237_v43  ;;  %7960 = vmatprep.subr.bf16.mxu0 %v10244_v38  ;;  %v4813_v43 = vld [vmem:[#allocation9 + $0xd38] sm:$0xff]  ;;  %v10293_v38 = vcombine.low %v4801_v45, %v4805_v34 }
 0x4a9   :  { %8132 = vmatprep.subr.bf16.mxu1 %v10246_v17  ;;  %v10300_v17 = vcombine.high %v4808_v51, %v4812_v52  ;;  %v10302_v35 = vcombine.high %v4809_v6, %v4813_v43 }
 0x4ab   :  { %7961 = vmatpush1.bf16.msra.mxu0 %v10243_v62  ;;  %v4821_v62 = vld [vmem:[#allocation9 + $0xd78] sm:$0xff] }
 0x4ac   :  { %8133 = vmatpush1.bf16.msra.mxu1 %v10245_v61  ;;  %7962 = vmatprep.subr.bf16.mxu0 %v10252_v16  ;;  %v10299_v61 = vcombine.low %v4808_v51, %v4812_v52  ;;  %v11530_v16 = vld [vmem:[#allocation10] sm:$0xff]  ;;  %v10310_v29 = vcombine.high %v4817_v3, %v4821_v62 }
 0x4ad   :  { %8134 = vmatprep.subr.bf16.mxu1 %v10254_v15  ;;  %v10301_v15 = vcombine.low %v4809_v6, %v4813_v43  ;;  %v4911_v55 = vrot.slane %v11530_v16, %v11104_v25  ;;  %v4919_v59 = vrot.slane %v11530_v16, %v12060_v19  ;;  %v10315_v25 = vcombine.low %v4824_v0, %v4828_v53 }
 0x4af   :  { %7963 = vmatpush1.bf16.msra.mxu0 %v10251_v44  ;;  %v4907_v44 = vrot.slane %v11530_v16, %v11101_v24  ;;  %v10309_v24 = vcombine.low %v4817_v3, %v4821_v62 }
 0x4b0   :  { %8135 = vmatpush1.bf16.msra.mxu1 %v10253_v28  ;;  %7964 = vmatprep.subr.bf16.mxu0 %v10260_v50  ;;  %v4915_v28 = vrot.slane %v11530_v16, %v11114_v31  ;;  %v4825_v50 = vld [vmem:[#allocation9 + $0xd98] sm:$0xff] }
 0x4b1   :  { %8136 = vmatprep.subr.bf16.mxu1 %v10262_v10  ;;  %v4829_v10 = vld [vmem:[#allocation9 + $0xdb8] sm:$0xff] }
 0x4b2   :  { %v11546_v31 = vld [vmem:[#allocation9 + $0xdf8] sm:$0xff]  ;;  %v10318_v27 = vcombine.high %v4825_v50, %v4829_v10 }
 0x4b3   :  { %7965 = vmatpush1.bf16.msra.mxu0 %v10259_v30  ;;  %v11542_v30 = vld [vmem:[#allocation9 + $0xdf0] sm:$0xff] }
 0x4b4   :  { %8137 = vmatpush1.bf16.msra.mxu1 %v10261_v37  ;;  %7977 = vmatprep.subr.bf16.mxu0 %v10268_v63  ;;  %v10316_v37 = vcombine.high %v4824_v0, %v4828_v53  ;;  %v11544_v63 = vld [vmem:[#allocation9 + $0xdd8] sm:$0xff] }
 0x4b5   :  { %8149 = vmatprep.subr.bf16.mxu1 %v10270_v7 }
 0x4b6   :  { %7967 = vmatmul.mubr.bf16.vlgmr.msra.gmra.mrb[12].mxu0 %v11496_v18 }
 0x4b7   :  { %8139 = vmatmul.mubr.bf16.vlgmr.msra.gmra.mrb[12].mxu1 %v11496_v18  ;;  %7978 = vmatpush1.bf16.msra.mxu0 %v10267_v41  ;;  %v10285_v18 = vcombine.low %v4793_v57, %v4797_v39 }
 0x4b8   :  { %8009 = vmatprep.mubr.bf16.mxu0 %v11506_v9  ;;  %8150 = vmatpush1.bf16.msra.mxu1 %v10269_v20  ;;  %v10317_v20 = vcombine.low %v4825_v50, %v4829_v10 }
 0x4b9   :  { %8181 = vmatprep.mubr.bf16.mxu1 %v11506_v9  ;;  %7979 = vmatprep.subr.bf16.mxu0 %v10276_v60  ;;  %v10291_v9 = vcombine.low %v4800_v54, %v4804_v23  ;;  %v10323_v60 = vcombine.low %v11540_v47, %v11542_v30  ;;  %v4845_v54 = vld [vmem:[#allocation9 + $0xe38] sm:$0xff] }
 0x4ba   :  { %8151 = vmatprep.subr.bf16.mxu1 %v10278_v36 }
 0x4bb   :  { %7980 = vmatpush1.bf16.msra.mxu0 %v10275_v11  ;;  %v10324_v11 = vcombine.high %v11540_v47, %v11542_v30 }
 0x4bc   :  { %8152 = vmatpush1.bf16.msra.mxu1 %v10277_v32  ;;  %7981 = vmatprep.subr.bf16.mxu0 %v10284_v48  ;;  %v10326_v32 = vcombine.high %v11544_v63, %v11546_v31  ;;  %v4844_v48 = vld [vmem:[#allocation9 + $0xe30] sm:$0xff] }
 0x4bd   :  { %8153 = vmatprep.subr.bf16.mxu1 %v10286_v2  ;;  %v4841_v2 = vld [vmem:[#allocation9 + $0xe18] sm:$0xff] }
 0x4be   :  { %v10334_v3 = vcombine.high %v4841_v2, %v4845_v54 }
 0x4bf   :  { %7982 = vmatpush1.bf16.msra.mxu0 %v10283_v46 }
 0x4c0   :  { %8154 = vmatpush1.bf16.msra.mxu1 %v10285_v18  ;;  %7983 = vmatprep.subr.bf16.mxu0 %v10292_v49 }
 0x4c1   :  { %8155 = vmatprep.subr.bf16.mxu1 %v10294_v42 }
 0x4c3   :  { %7984 = vmatpush1.bf16.msra.mxu0 %v10291_v9 }
 0x4c4   :  { %8156 = vmatpush1.bf16.msra.mxu1 %v10293_v38  ;;  %7985 = vmatprep.subr.bf16.mxu0 %v10300_v17  ;;  %v10325_v38 = vcombine.low %v11544_v63, %v11546_v31  ;;  %v10332_v17 = vcombine.high %v11550_v5, %v4844_v48  ;;  %v4856_v31 = vld [vmem:[#allocation9 + $0xe90] sm:$0xff] }
 0x4c5   :  { %8157 = vmatprep.subr.bf16.mxu1 %v10302_v35 }
 0x4c7   :  { %7986 = vmatpush1.bf16.msra.mxu0 %v10299_v61 }
 0x4c8   :  { %8158 = vmatpush1.bf16.msra.mxu1 %v10301_v15  ;;  %7987 = vmatprep.subr.bf16.mxu0 %v10308_v13 }
 0x4c9   :  { %v7667_v7 = vpop.f32.mrb[8].mxu0  ;;  %v7839_v12 = vpop.f32.mrb[8].mxu1  ;;  %8159 = vmatprep.subr.bf16.mxu1 %v10310_v29 }
 0x4ca   :  { %v10560_v41 = vadd.f32 %v7667_v7, %v4907_v44  ;;  %v10564_v19 = vadd.f32 %v7839_v12, %v4915_v28  ;;  %v7669_v14 = vpop.f32.mrb[9].mxu0  ;;  %v7841_v56 = vpop.f32.mrb[9].mxu1  ;;  %v4860_v7 = vld [vmem:[#allocation9 + $0xeb0] sm:$0xff]  ;;  %v4857_v12 = vld [vmem:[#allocation9 + $0xe98] sm:$0xff] }
 0x4cb   :  { %v10561_v4 = vadd.f32 %v7669_v14, %v4911_v55  ;;  %v10565_v36 = vadd.f32 %v7841_v56, %v4919_v59  ;;  %v7671_v57 = vpop.f32.mrb[10].mxu0  ;;  %v7843_v39 = vpop.f32.mrb[10].mxu1  ;;  %7988 = vmatpush1.bf16.msra.mxu0 %v10307_v1  ;;  %v10331_v1 = vcombine.low %v11550_v5, %v4844_v48  ;;  %v4864_v56 = vld [vmem:[#allocation9 + $0xed0] sm:$0xff]  ;;  %v4869_v5 = vld [vmem:[#allocation9 + $0xef8] sm:$0xff] }
 0x4cc   :  { %v8192_v23 = vmul.f32 0.01, %v10560_v41  ;;  %v8194_v45 = vmul.f32 0.01, %v10564_v19  ;;  %v10562_v34 = vadd.f32 %v7671_v57, %v4907_v44  ;;  %v10566_v46 = vadd.f32 %v7843_v39, %v4915_v28  ;;  %8160 = vmatpush1.bf16.msra.mxu1 %v10309_v24  ;;  %v7673_v18 = vpop.f32.mrb[11].mxu0  ;;  %v7845_v49 = vpop.f32.mrb[11].mxu1  ;;  %7989 = vmatprep.subr.bf16.mxu0 %v10316_v37 }
 0x4cd   :  { %v8193_v42 = vmul.f32 0.01, %v10561_v4  ;;  %v8195_v51 = vmul.f32 0.01, %v10565_v36  ;;  %v10563_v52 = vadd.f32 %v7673_v18, %v4911_v55  ;;  %v10567_v6 = vadd.f32 %v7845_v49, %v4919_v59  ;;  %8161 = vmatprep.subr.bf16.mxu1 %v10318_v27  ;;  %v4848_v44 = vld [vmem:[#allocation9 + $0xe50] sm:$0xff]  ;;  %v4849_v55 = vld [vmem:[#allocation9 + $0xe58] sm:$0xff] }
 0x4ce   :  { %v8200_v43 = vmul.f32 0.01, %v10562_v34  ;;  %v8202_v9 = vmul.f32 0.01, %v10566_v46  ;;  %v8208_v35 = vmax.f32 %v10560_v41, %v8192_v23  ;;  %v8210_v62 = vmax.f32 %v10564_v19, %v8194_v45  ;;  %v4852_v28 = vld [vmem:[#allocation9 + $0xe70] sm:$0xff]  ;;  %v4853_v59 = vld [vmem:[#allocation9 + $0xe78] sm:$0xff] }
 0x4cf   :  { %v8201_v40 = vmul.f32 0.01, %v10563_v52  ;;  %v8203_v33 = vmul.f32 0.01, %v10567_v6  ;;  %7990 = vmatpush1.bf16.msra.mxu0 %v10315_v25  ;;  %v8209_v13 = vmax.f32 %v10561_v4, %v8193_v42  ;;  %v8211_v29 = vmax.f32 %v10565_v36, %v8195_v51  ;;  %v4861_v25 = vld [vmem:[#allocation9 + $0xeb8] sm:$0xff]  ;;  %v4884_v18 = vld [vmem:[#allocation9 + $0xf70] sm:$0xff] }
 0x4d0   :  { %v8216_v61 = vmax.f32 %v10562_v34, %v8200_v43  ;;  %v8218_v15 = vmax.f32 %v10566_v46, %v8202_v9  ;;  %8162 = vmatpush1.bf16.msra.mxu1 %v10317_v20  ;;  %7991 = vmatprep.subr.bf16.mxu0 %v10324_v11  ;;  %v10333_v24 = vcombine.low %v4841_v2, %v4845_v54  ;;  %v4868_v20 = vld [vmem:[#allocation9 + $0xef0] sm:$0xff]  ;;  %v4873_v48 = vld [vmem:[#allocation9 + $0xf18] sm:$0xff] }
 0x4d1   :  { %v8217_v0 = vmax.f32 %v10563_v52, %v8201_v40  ;;  %v8219_v53 = vmax.f32 %v10567_v6, %v8203_v33  ;;  %8163 = vmatprep.subr.bf16.mxu1 %v10326_v32  ;;  %v10340_v37 = vcombine.high %v4848_v44, %v4852_v28  ;;  %v10342_v63 = vcombine.high %v4849_v55, %v4853_v59  ;;  %v4872_v11 = vld [vmem:[#allocation9 + $0xf10] sm:$0xff]  ;;  %v4877_v2 = vld [vmem:[#allocation9 + $0xf38] sm:$0xff] }
 0x4d2   :  { %v11559_v50 = vpack.c.bf16 %v8216_v61, %v8208_v35  ;;  %v11561_v10 = vpack.c.bf16 %v8218_v15, %v8210_v62  ;;  %v10339_v27 = vcombine.low %v4848_v44, %v4852_v28  ;;  %v10341_v41 = vcombine.low %v4849_v55, %v4853_v59  ;;  %v4876_v32 = vld [vmem:[#allocation9 + $0xf30] sm:$0xff]  ;;  %v4881_v49 = vld [vmem:[#allocation9 + $0xf58] sm:$0xff] }
 0x4d3   :  { %7992 = vmatpush1.bf16.msra.mxu0 %v10323_v60  ;;  %v11564_v47 = vpack.c.bf16 %v8217_v0, %v8209_v13  ;;  %v11566_v30 = vpack.c.bf16 %v8219_v53, %v8211_v29  ;;  %v10348_v19 = vcombine.high %v4856_v31, %v4860_v7  ;;  %v10350_v14 = vcombine.high %v4857_v12, %v4861_v25  ;;  %v4865_v60 = vld [vmem:[#allocation9 + $0xed8] sm:$0xff]  ;;  %v4880_v46 = vld [vmem:[#allocation9 + $0xf50] sm:$0xff] }
 0x4d4   :  { %8164 = vmatpush1.bf16.msra.mxu1 %v10325_v38  ;;  %7993 = vmatprep.subr.bf16.mxu0 %v10332_v17  ;;  %v10347_v4 = vcombine.low %v4856_v31, %v4860_v7  ;;  %v10349_v36 = vcombine.low %v4857_v12, %v4861_v25  ;;  %v10356_v57 = vcombine.high %v4864_v56, %v4868_v20  ;;  %v4885_v42 = vld [vmem:[#allocation9 + $0xf78] sm:$0xff]  ;;  %v4888_v9 = vld [vmem:[#allocation9 + $0xf90] sm:$0xff] }
 0x4d5   :  { %8165 = vmatprep.subr.bf16.mxu1 %v10334_v3  ;;  %v10358_v39 = vcombine.high %v4865_v60, %v4869_v5  ;;  %v10355_v54 = vcombine.low %v4864_v56, %v4868_v20  ;;  %v10357_v23 = vcombine.low %v4865_v60, %v4869_v5  ;;  %v10364_v45 = vcombine.high %v4872_v11, %v4876_v32  ;;  %v4892_v38 = vld [vmem:[#allocation9 + $0xfb0] sm:$0xff]  ;;  %v4889_v17 = vld [vmem:[#allocation9 + $0xf98] sm:$0xff]  ;;  %v10704_v56 = vld [vmem:[%s12022_s7 + $0x98] sm:$0xff]  }
 0x4d6   :  { %v10366_v34 = vcombine.high %v4873_v48, %v4877_v2  ;;  %v10363_v51 = vcombine.low %v4872_v11, %v4876_v32  ;;  %v10365_v52 = vcombine.low %v4873_v48, %v4877_v2  ;;  %v10372_v6 = vcombine.high %v4880_v46, %v4884_v18  ;;  %v4893_v35 = vld [vmem:[#allocation9 + $0xfb8] sm:$0xff]  ;;  %v4896_v61 = vld [vmem:[#allocation9 + $0xfd0] sm:$0xff]  ;;  %v10713_v32 = vld [vmem:[%s12022_s7 + $0x70] sm:$0xff]  }
 0x4d7   :  { %7994 = vmatpush1.bf16.msra.mxu0 %v10331_v1  ;;  %v10374_v43 = vcombine.high %v4881_v49, %v4885_v42  ;;  %v10371_v40 = vcombine.low %v4880_v46, %v4884_v18  ;;  %v10373_v33 = vcombine.low %v4881_v49, %v4885_v42  ;;  %v10380_v3 = vcombine.high %v4888_v9, %v4892_v38  ;;  %v4900_v15 = vld [vmem:[#allocation9 + $0xff0] sm:$0xff]  ;;  %v4897_v13 = vld [vmem:[#allocation9 + $0xfd8] sm:$0xff]  ;;  %v10714_v48 = vld [vmem:[%s12022_s7 + $0xf0] sm:$0xff]  }
 0x4d8   :  { %8166 = vmatpush1.bf16.msra.mxu1 %v10333_v24  ;;  %7995 = vmatprep.subr.bf16.mxu0 %v10340_v37  ;;  %v10382_v62 = vcombine.high %v4889_v17, %v4893_v35  ;;  %v4901_v29 = vld [vmem:[#allocation9 + $0xff8] sm:$0xff]  ;;  %v10379_v0 = vcombine.low %v4888_v9, %v4892_v38  ;;  %v10381_v53 = vcombine.low %v4889_v17, %v4893_v35  ;;  %v10689_v1 = vld [vmem:[%s12022_s7 + $0x40] sm:$0xff]   ;;  %v10715_v2 = vld [vmem:[%s12022_s7 + $0x30] sm:$0xff]  }
 0x4d9   :  { %8167 = vmatprep.subr.bf16.mxu1 %v10342_v63  ;;  %v10388_v44 = vcombine.high %v4896_v61, %v4900_v15  ;;  %v10390_v28 = vcombine.high %v4897_v13, %v4901_v29  ;;  %v10387_v55 = vcombine.low %v4896_v61, %v4900_v15  ;;  %v10389_v59 = vcombine.low %v4897_v13, %v4901_v29  ;;  %v10690_v24 = vld [vmem:[%s12022_s7 + $0xc0] sm:$0xff]   ;;  %v10693_v31 = vld [vmem:[%s12022_s7 + $0x48] sm:$0xff]   ;;  %v10720_v46 = vld [vmem:[%s12022_s7 + $0xb8] sm:$0xff]  }
 0x4da   :  { %v10691_v37 = vld [vmem:[%s12022_s7] sm:$0xff]   ;;  %v10694_v7 = vld [vmem:[%s12022_s7 + $0xc8] sm:$0xff]   ;;  %v10729_v38 = vld [vmem:[%s12022_s7 + $0x150] sm:$0xff]  }
 0x4db   :  { %7996 = vmatpush1.bf16.msra.mxu0 %v10339_v27  ;;  %v10692_v63 = vld [vmem:[%s12022_s7 + $0x80] sm:$0xff]   ;;  %v10695_v12 = vld [vmem:[%s12022_s7 + $0x8] sm:$0xff]   ;;  %v10697_v27 = vld [vmem:[%s12022_s7 + $0x50] sm:$0xff]  }
 0x4dc   :  { %8168 = vmatpush1.bf16.msra.mxu1 %v10341_v41  ;;  %7997 = vmatprep.subr.bf16.mxu0 %v10348_v19  ;;  %v10696_v25 = vld [vmem:[%s12022_s7 + $0x88] sm:$0xff]   ;;  %v10700_v41 = vld [vmem:[%s12022_s7 + $0x90] sm:$0xff]   ;;  %v10702_v19 = vld [vmem:[%s12022_s7 + $0xd8] sm:$0xff]  }
 0x4dd   :  { %8169 = vmatprep.subr.bf16.mxu1 %v10350_v14  ;;  %v10703_v14 = vld [vmem:[%s12022_s7 + $0x18] sm:$0xff]   ;;  %v10705_v20 = vld [vmem:[%s12022_s7 + $0x60] sm:$0xff]   ;;  %v10712_v11 = vld [vmem:[%s12022_s7 + $0xa8] sm:$0xff]  }
 0x4de   :  { %v10706_v60 = vld [vmem:[%s12022_s7 + $0xe0] sm:$0xff]   ;;  %v10728_v9 = vld [vmem:[%s12022_s7 + $0x188] sm:$0xff]   ;;  %v10732_v17 = vld [vmem:[%s12022_s7 + $0x190] sm:$0xff]  }
 0x4df   :  { %7998 = vmatpush1.bf16.msra.mxu0 %v10347_v4  ;;  %v10707_v5 = vld [vmem:[%s12022_s7 + $0x20] sm:$0xff]   ;;  %v10733_v35 = vld [vmem:[%s12022_s7 + $0x158] sm:$0xff]   ;;  %v10741_v29 = vld [vmem:[%s12022_s7 + $0x168] sm:$0xff]  }
 0x4e0   :  { %8170 = vmatpush1.bf16.msra.mxu1 %v10349_v36  ;;  %7999 = vmatprep.subr.bf16.mxu0 %v10356_v57  ;;  %v10708_v4 = vld [vmem:[%s12022_s7 + $0xa0] sm:$0xff]   ;;  %v10709_v36 = vld [vmem:[%s12022_s7 + $0x68] sm:$0xff]  }
 0x4e1   :  { %8171 = vmatprep.subr.bf16.mxu1 %v10358_v39  ;;  %v10710_v57 = vld [vmem:[%s12022_s7 + $0xe8] sm:$0xff]   ;;  %v10721_v18 = vld [vmem:[%s12022_s7 + $0x140] sm:$0xff]  }
 0x4e2   :  { %v10711_v39 = vld [vmem:[%s12022_s7 + $0x28] sm:$0xff]   ;;  %v10722_v49 = vld [vmem:[%s12022_s7 + $0x1c0] sm:$0xff]  }
 0x4e3   :  { %8000 = vmatpush1.bf16.msra.mxu0 %v10355_v54  ;;  %v10716_v54 = vld [vmem:[%s12022_s7 + $0xb0] sm:$0xff]   ;;  %v10723_v42 = vld [vmem:[%s12022_s7 + $0x100] sm:$0xff]  }
 0x4e4   :  { %8172 = vmatpush1.bf16.msra.mxu1 %v10357_v23  ;;  %8001 = vmatprep.subr.bf16.mxu0 %v10364_v45  ;;  %v10717_v23 = vld [vmem:[%s12022_s7 + $0x78] sm:$0xff]   ;;  %v10738_v61 = vld [vmem:[%s12022_s7 + $0x1e0] sm:$0xff]  }
 0x4e5   :  { %8173 = vmatprep.subr.bf16.mxu1 %v10366_v34  ;;  %v10718_v45 = vld [vmem:[%s12022_s7 + $0xf8] sm:$0xff]   ;;  %v10739_v15 = vld [vmem:[%s12022_s7 + $0x120] sm:$0xff]  }
 0x4e6   :  { %v10719_v34 = vld [vmem:[%s12022_s7 + $0x38] sm:$0xff]   ;;  %v10740_v13 = vld [vmem:[%s12022_s7 + $0x1a0] sm:$0xff]  }
 0x4e7   :  { %8002 = vmatpush1.bf16.msra.mxu0 %v10363_v51  ;;  %v10724_v51 = vld [vmem:[%s12022_s7 + $0x180] sm:$0xff]  }
 0x4e8   :  { %8174 = vmatpush1.bf16.msra.mxu1 %v10365_v52  ;;  %8003 = vmatprep.subr.bf16.mxu0 %v10372_v6  ;;  %v10725_v52 = vld [vmem:[%s12022_s7 + $0x148] sm:$0xff]  }
 0x4e9   :  { %8175 = vmatprep.subr.bf16.mxu1 %v10374_v43  ;;  %v10726_v6 = vld [vmem:[%s12022_s7 + $0x1c8] sm:$0xff]  }
 0x4ea   :  { %v10727_v43 = vld [vmem:[%s12022_s7 + $0x108] sm:$0xff]  }
 0x4eb   :  { %8004 = vmatpush1.bf16.msra.mxu0 %v10371_v40  ;;  %v10734_v40 = vld [vmem:[%s12022_s7 + $0x1d8] sm:$0xff]  }
 0x4ec   :  { %8176 = vmatpush1.bf16.msra.mxu1 %v10373_v33  ;;  %8005 = vmatprep.subr.bf16.mxu0 %v10380_v3  ;;  %v10735_v33 = vld [vmem:[%s12022_s7 + $0x118] sm:$0xff]  }
 0x4ed   :  { %8177 = vmatprep.subr.bf16.mxu1 %v10382_v62  ;;  %v10736_v3 = vld [vmem:[%s12022_s7 + $0x198] sm:$0xff]   ;;  %v10737_v62 = vld [vmem:[%s12022_s7 + $0x160] sm:$0xff]  }
 0x4ef   :  { %8006 = vmatpush1.bf16.msra.mxu0 %v10379_v0  ;;  %v10742_v0 = vld [vmem:[%s12022_s7 + $0x1e8] sm:$0xff]  }
 0x4f0   :  { %8178 = vmatpush1.bf16.msra.mxu1 %v10381_v53  ;;  %8007 = vmatprep.subr.bf16.mxu0 %v10388_v44  ;;  %v10743_v53 = vld [vmem:[%s12022_s7 + $0x128] sm:$0xff]  }
 0x4f1   :  { %8179 = vmatprep.subr.bf16.mxu1 %v10390_v28  ;;  %v10744_v44 = vld [vmem:[%s12022_s7 + $0x1a8] sm:$0xff]   ;;  %v10745_v28 = vld [vmem:[%s12022_s7 + $0x170] sm:$0xff]  }
 0x4f3   :  { %8008 = vmatpush1.bf16.msra.mxu0 %v10387_v55  ;;  %v10746_v55 = vld [vmem:[%s12022_s7 + $0x1f0] sm:$0xff]  }
 0x4f4   :  { %8180 = vmatpush1.bf16.msra.mxu1 %v10389_v59  ;;  %10456 = vmatprep.subr.bf16.mxu0 %v10689_v1  ;;  %v10747_v59 = vld [vmem:[%s12022_s7 + $0x130] sm:$0xff]  }
 0x4f5   :  { %10478 = vmatprep.subr.bf16.mxu1 %v10690_v24  ;;  %v10748_v1 = vld [vmem:[%s12022_s7 + $0x1b0] sm:$0xff]   ;;  %v10749_v24 = vld [vmem:[%s12022_s7 + $0x178] sm:$0xff]  }
 0x4f6   :  { %8010 = vmatmul.mubr.bf16.vlgmr.msra.gmra.mrb[12].mxu0 %v11498_v58 }
 0x4f7   :  { %8182 = vmatmul.mubr.bf16.vlgmr.msra.gmra.mrb[12].mxu1 %v11498_v58  ;;  %10457 = vmatpush3.bf16.msra.mxu0 %v10691_v37  ;;  %v10698_v58 = vld [vmem:[%s12022_s7 + $0xd0] sm:$0xff]   ;;  %v10750_v37 = vld [vmem:[%s12022_s7 + $0x1f8] sm:$0xff]  }
 0x4f8   :  { %8783 = vmatprep.mubr.bf16.mxu0 %v11564_v47  ;;  %10479 = vmatpush3.bf16.msra.mxu1 %v10692_v63  ;;  %v10699_v47 = vld [vmem:[%s12022_s7 + $0x10] sm:$0xff]   ;;  %v10751_v63 = vld [vmem:[%s12022_s7 + $0x138] sm:$0xff]  }
 0x4f9   :  { %8824 = vmatprep.mubr.bf16.mxu1 %v11566_v30  ;;  %10458 = vmatprep.subr.bf16.mxu0 %v10693_v31  ;;  %v10701_v30 = vld [vmem:[%s12022_s7 + $0x58] sm:$0xff]  }
 0x4fa   :  { %10480 = vmatprep.subr.bf16.mxu1 %v10694_v7  ;;  %v10752_v31 = vld [vmem:[%s12022_s7 + $0x1b8] sm:$0xff]   ;;  %v4923_v7 = vrot.slane %v11530_v16, %v11095_v21 }
 0x4fb   :  { %10459 = vmatpush3.bf16.msra.mxu0 %v10695_v12  ;;  %v4931_v12 = vrot.slane %v11530_v16, %v11107_v26 }
 0x4fc   :  { %10481 = vmatpush3.bf16.msra.mxu1 %v10696_v25  ;;  %10460 = vmatprep.subr.bf16.mxu0 %v10697_v27  ;;  %v4927_v25 = vrot.slane %v11530_v16, %v11098_v22  ;;  %v4935_v27 = vrot.slane %v11530_v16, %v11315_v8 }
 0x4fd   :  { %10482 = vmatprep.subr.bf16.mxu1 %v10698_v58 }
 0x4ff   :  { %10461 = vmatpush3.bf16.msra.mxu0 %v10699_v47 }
 0x500   :  { %10483 = vmatpush3.bf16.msra.mxu1 %v10700_v41  ;;  %10462 = vmatprep.subr.bf16.mxu0 %v10701_v30 }
 0x501   :  { %10484 = vmatprep.subr.bf16.mxu1 %v10702_v19 }
 0x503   :  { %10463 = vmatpush3.bf16.msra.mxu0 %v10703_v14 }
 0x504   :  { %10485 = vmatpush3.bf16.msra.mxu1 %v10704_v56  ;;  %10464 = vmatprep.subr.bf16.mxu0 %v10705_v20 }
 0x505   :  { %10486 = vmatprep.subr.bf16.mxu1 %v10706_v60 }
 0x507   :  { %10465 = vmatpush3.bf16.msra.mxu0 %v10707_v5 }
 0x508   :  { %10487 = vmatpush3.bf16.msra.mxu1 %v10708_v4  ;;  %10466 = vmatprep.subr.bf16.mxu0 %v10709_v36 }
 0x509   :  { %10488 = vmatprep.subr.bf16.mxu1 %v10710_v57 }
 0x50b   :  { %10467 = vmatpush3.bf16.msra.mxu0 %v10711_v39 }
 0x50c   :  { %10489 = vmatpush3.bf16.msra.mxu1 %v10712_v11  ;;  %10468 = vmatprep.subr.bf16.mxu0 %v10713_v32 }
 0x50d   :  { %10490 = vmatprep.subr.bf16.mxu1 %v10714_v48 }
 0x50f   :  { %10469 = vmatpush3.bf16.msra.mxu0 %v10715_v2 }
 0x510   :  { %10491 = vmatpush3.bf16.msra.mxu1 %v10716_v54  ;;  %10470 = vmatprep.subr.bf16.mxu0 %v10717_v23 }
 0x511   :  { %10492 = vmatprep.subr.bf16.mxu1 %v10718_v45 }
 0x513   :  { %10471 = vmatpush3.bf16.msra.mxu0 %v10719_v34 }
 0x514   :  { %10493 = vmatpush3.bf16.msra.mxu1 %v10720_v46  ;;  %10500 = vmatprep.subr.bf16.mxu0 %v10721_v18 }
 0x515   :  { %10522 = vmatprep.subr.bf16.mxu1 %v10722_v49 }
 0x516   :  { %8784 = vmatmul.mubr.bf16.vlgmr.msra.gmra.mrb[16].mxu0 %v11559_v50  ;;  %v10730_v50 = vld [vmem:[%s12022_s7 + $0x1d0] sm:$0xff]  }
 0x517   :  { %8825 = vmatmul.mubr.bf16.vlgmr.msra.gmra.mrb[16].mxu1 %v11561_v10  ;;  %10501 = vmatpush3.bf16.msra.mxu0 %v10723_v42  ;;  %v10731_v10 = vld [vmem:[%s12022_s7 + $0x110] sm:$0xff]  }
 0x518   :  { %10523 = vmatpush3.bf16.msra.mxu1 %v10724_v51  ;;  %10502 = vmatprep.subr.bf16.mxu0 %v10725_v52 }
 0x519   :  { %10524 = vmatprep.subr.bf16.mxu1 %v10726_v6 }
 0x51b   :  { %10503 = vmatpush3.bf16.msra.mxu0 %v10727_v43 }
 0x51c   :  { %10525 = vmatpush3.bf16.msra.mxu1 %v10728_v9  ;;  %10504 = vmatprep.subr.bf16.mxu0 %v10729_v38 }
 0x51d   :  { %10526 = vmatprep.subr.bf16.mxu1 %v10730_v50 }
 0x51f   :  { %10505 = vmatpush3.bf16.msra.mxu0 %v10731_v10  ;;  %v10391_v10 = vld [vmem:[#allocation12] ss:$0 sm:$0xff] }
 0x520   :  { %10527 = vmatpush3.bf16.msra.mxu1 %v10732_v17  ;;  %10506 = vmatprep.subr.bf16.mxu0 %v10733_v35 }
 0x521   :  { %10528 = vmatprep.subr.bf16.mxu1 %v10734_v40 }
 0x523   :  { %10507 = vmatpush3.bf16.msra.mxu0 %v10735_v33 }
 0x524   :  { %10529 = vmatpush3.bf16.msra.mxu1 %v10736_v3  ;;  %10508 = vmatprep.subr.bf16.mxu0 %v10737_v62 }
 0x525   :  { %10530 = vmatprep.subr.bf16.mxu1 %v10738_v61 }
 0x527   :  { %10509 = vmatpush3.bf16.msra.mxu0 %v10739_v15 }
 0x528   :  { %10531 = vmatpush3.bf16.msra.mxu1 %v10740_v13  ;;  %10510 = vmatprep.subr.bf16.mxu0 %v10741_v29 }
 0x529   :  { %10532 = vmatprep.subr.bf16.mxu1 %v10742_v0 }
 0x52b   :  { %10511 = vmatpush3.bf16.msra.mxu0 %v10743_v53 }
 0x52c   :  { %10533 = vmatpush3.bf16.msra.mxu1 %v10744_v44  ;;  %10512 = vmatprep.subr.bf16.mxu0 %v10745_v28 }
 0x52d   :  { %10534 = vmatprep.subr.bf16.mxu1 %v10746_v55 }
 0x52f   :  { %10513 = vmatpush3.bf16.msra.mxu0 %v10747_v59 }
 0x530   :  { %10535 = vmatpush3.bf16.msra.mxu1 %v10748_v1  ;;  %10514 = vmatprep.subr.bf16.mxu0 %v10749_v24 }
 0x531   :  { %10536 = vmatprep.subr.bf16.mxu1 %v10750_v37 }
 0x533   :  { %10515 = vmatpush3.bf16.msra.mxu0 %v10751_v63 }
 0x534   :  { %10537 = vmatpush3.bf16.msra.mxu1 %v10752_v31 }
 0x5c9   :  { %v8011_v58 = vpop.f32.mrb[12].mxu0 }
 0x5ca   :  { %v10568_v47 = vadd.f32 %v8011_v58, %v4923_v7  ;;  %v8183_v41 = vpop.f32.mrb[12].mxu1  ;;  %v8013_v30 = vpop.f32.mrb[13].mxu0 }
 0x5cb   :  { %v10572_v19 = vadd.f32 %v8183_v41, %v4931_v12  ;;  %v10569_v14 = vadd.f32 %v8013_v30, %v4927_v25  ;;  %v8185_v56 = vpop.f32.mrb[13].mxu1  ;;  %v8015_v20 = vpop.f32.mrb[14].mxu0 }
 0x5cc   :  { %v8196_v60 = vmul.f32 0.01, %v10568_v47  ;;  %v10573_v5 = vadd.f32 %v8185_v56, %v4935_v27  ;;  %v10570_v21 = vadd.f32 %v8015_v20, %v4923_v7  ;;  %v8187_v4 = vpop.f32.mrb[14].mxu1  ;;  %v8017_v36 = vpop.f32.mrb[15].mxu0 }
 0x5cd   :  { %v8198_v26 = vmul.f32 0.01, %v10572_v19  ;;  %v8197_v57 = vmul.f32 0.01, %v10569_v14  ;;  %v10574_v39 = vadd.f32 %v8187_v4, %v4931_v12  ;;  %v10571_v22 = vadd.f32 %v8017_v36, %v4927_v25  ;;  %v8189_v11 = vpop.f32.mrb[15].mxu1 }
 0x5ce   :  { %v8199_v32 = vmul.f32 0.01, %v10573_v5  ;;  %v8204_v8 = vmul.f32 0.01, %v10570_v21  ;;  %v10575_v16 = vadd.f32 %v8189_v11, %v4935_v27  ;;  %v8212_v54 = vmax.f32 %v10568_v47, %v8196_v60 }
 0x5cf   :  { %v8206_v48 = vmul.f32 0.01, %v10574_v39  ;;  %v8205_v2 = vmul.f32 0.01, %v10571_v22  ;;  %v8214_v34 = vmax.f32 %v10572_v19, %v8198_v26  ;;  %v8213_v46 = vmax.f32 %v10569_v14, %v8197_v57 }
 0x5d0   :  { %v8220_v23 = vmax.f32 %v10570_v21, %v8204_v8  ;;  %v8207_v45 = vmul.f32 0.01, %v10575_v16  ;;  %v8215_v42 = vmax.f32 %v10573_v5, %v8199_v32 }
 0x5d1   :  { %v8222_v18 = vmax.f32 %v10574_v39, %v8206_v48  ;;  %v8221_v49 = vmax.f32 %v10571_v22, %v8205_v2 }
 0x5d2   :  { %v8228_v51 = vpack.c.bf16 %v8220_v23, %v8212_v54  ;;  %v8223_v52 = vmax.f32 %v10575_v16, %v8207_v45 }
 0x5d3   :  { %v8230_v6 = vpack.c.bf16 %v8222_v18, %v8214_v34  ;;  %v8229_v43 = vpack.c.bf16 %v8221_v49, %v8213_v46 }
 0x5d4   :  { %v8231_v9 = vpack.c.bf16 %v8223_v52, %v8215_v42 }
 0x5d5   :  { %8865 = vmatprep.mubr.bf16.mxu0 %v8229_v43 }
 0x5d6   :  { %8906 = vmatprep.mubr.bf16.mxu1 %v8231_v9  ;;  %8866 = vmatmul.mubr.bf16.vlgmr.msra.gmra.mrb[20].mxu0 %v8228_v51 }
 0x5d7   :  { %8907 = vmatmul.mubr.bf16.vlgmr.msra.gmra.mrb[20].mxu1 %v8230_v6 }
 0x5e9   :  { %v10472_v38 = vpop.f32.mrb[16].mxu0 }
 0x5ea   :  { %v10494_v50 = vpop.f32.mrb[16].mxu1  ;;  %v10473_v17 = vpop.f32.mrb[17].mxu0 }
 0x5eb   :  { %v10474_v35 = vadd.f32 %v10473_v17, %v10472_v38  ;;  %v10495_v40 = vpop.f32.mrb[17].mxu1  ;;  %v10475_v33 = vpop.f32.mrb[18].mxu0 }
 0x5ec   :  { %v10496_v3 = vadd.f32 %v10495_v40, %v10494_v50  ;;  %v10497_v62 = vpop.f32.mrb[18].mxu1  ;;  %v10476_v61 = vpop.f32.mrb[19].mxu0 }
 0x5ed   :  { %v8786_v15 = vadd.f32 %v10474_v35, %v10391_v10  ;;  %v10477_v13 = vadd.f32 %v10476_v61, %v10475_v33  ;;  %v10498_v29 = vpop.f32.mrb[19].mxu1 }
 0x5ee   :  { %v10499_v0 = vadd.f32 %v10498_v29, %v10497_v62 }
 0x5ef   :  { %v8827_v53 = vadd.f32 %v10496_v3, %v8786_v15  ;;  %v8789_v44 = vadd.f32 %v10477_v13, %v10391_v10 }
 0x5f1   :  { %v8830_v28 = vadd.f32 %v10499_v0, %v8789_v44 }
 0x6a9   :  { %v10516_v55 = vpop.f32.mrb[20].mxu0 }
 0x6aa   :  { %v10538_v59 = vpop.f32.mrb[20].mxu1  ;;  %v10517_v1 = vpop.f32.mrb[21].mxu0 }
 0x6ab   :  { %v10518_v24 = vadd.f32 %v10517_v1, %v10516_v55  ;;  %v10539_v37 = vpop.f32.mrb[21].mxu1  ;;  %v10519_v63 = vpop.f32.mrb[22].mxu0 }
 0x6ac   :  { %v10540_v31 = vadd.f32 %v10539_v37, %v10538_v59  ;;  %v10541_v7 = vpop.f32.mrb[22].mxu1  ;;  %v10520_v12 = vpop.f32.mrb[23].mxu0 }
 0x6ad   :  { %v8868_v25 = vadd.f32 %v10518_v24, %v8827_v53  ;;  %v10521_v27 = vadd.f32 %v10520_v12, %v10519_v63  ;;  %v10542_v58 = vpop.f32.mrb[23].mxu1 }
 0x6ae   :  { %v10543_v47 = vadd.f32 %v10542_v58, %v10541_v7 }
 0x6af   :  { %v8909_v41 = vadd.f32 %v10540_v31, %v8868_v25  ;;  %v8871_v30 = vadd.f32 %v10521_v27, %v8830_v28 }
 0x6b1   :  { %10753 = vtanh.f32 %v8909_v41  ;;  %v8912_v19 = vadd.f32 %v10543_v47, %v8871_v30 }
 0x6b3   :  { %10755 = vtanh.f32 %v8912_v19 }
 0x6bb   :  { %v10754_v14 = vpop.eup %10753 }
 0x6bc   :  { %8917 = vxpose.xlu1.b32.start [1/2] (short) (narrow) %v10754_v14, 16 }
 0x6bd   :  { %v10756_v56 = vpop.eup %10755 }
 0x6c0   :  { %8918 = vxpose.xlu1.b32.end [2/2] (short) (narrow) %v10756_v56, 16 }
 0x73c   :  { %v8933_v20 = vpop.trf.xlu1 }
 0x73d   :  { %v8949_v60 = vmul.f32 %v8933_v20, %v8933_v20  ;;  %v8971_v21 = vrot.slane %v8933_v20, 5  ;;  %v8985_v4 = vrot.slane %v8933_v20, 6  ;;  %v9007_v36 = vrot.slane %v8933_v20, 7 }
 0x73e   :  { %v8968_v8 = vrot.slane %v8933_v20, 1  ;;  %v8982_v45 = vrot.slane %v8933_v20, 2 }
 0x73f   :  { %v8951_v5 = vrot.slane %v8949_v60, 1  ;;  %v8954_v39 = vrot.slane %v8949_v60, 2  ;;  %v8957_v32 = vrot.slane %v8949_v60, 3  ;;  %v8973_v16 = vmul.f32 %v8971_v21, %v8933_v20 }
 0x740   :  { %v8934_v26 = vpop.trf.xlu1  ;;  %v8987_v48 = vmul.f32 %v8985_v4, %v8933_v20  ;;  %v9009_v2 = vmul.f32 %v9007_v36, %v8933_v20  ;;  %v8970_v18 = vmul.f32 %v8968_v8, %v8933_v20  ;;  %v8984_v9 = vmul.f32 %v8982_v45, %v8933_v20 }
 0x741   :  { %v11774_v57 = vadd.f32 %v8951_v5, %v8949_v60  ;;  %v9134_v22 = vmul.f32 %v8934_v26, %v8934_v26  ;;  %v9156_v54 = vrot.slane %v8934_v26, 5  ;;  %v9153_v46 = vrot.slane %v8934_v26, 1 }
 0x742   :  { %v8975_v49 = vrot.slane %v8973_v16, 2  ;;  %v8989_v51 = vrot.slane %v8987_v48, 1  ;;  %v9011_v52 = vrot.slane %v9009_v2, 7  ;;  %v9001_v38 = vadd.f32 %v8954_v39, %v8949_v60 }
 0x743   :  { %v8956_v11 = vadd.f32 %v8954_v39, %v11774_v57  ;;  %v9136_v34 = vrot.slane %v9134_v22, 1  ;;  %v9139_v6 = vrot.slane %v9134_v22, 2  ;;  %v9158_v43 = vmul.f32 %v9156_v54, %v8934_v26 }
 0x744   :  { %v9170_v50 = vrot.slane %v8934_v26, 6  ;;  %v9192_v10 = vrot.slane %v8934_v26, 7  ;;  %v9142_v35 = vrot.slane %v9134_v22, 3  ;;  %v9155_v40 = vmul.f32 %v9153_v46, %v8934_v26 }
 0x745   :  { %v8959_v23 = vadd.f32 %v8957_v32, %v8956_v11  ;;  %v11777_v42 = vadd.f32 %v9136_v34, %v9134_v22  ;;  %v9160_v33 = vrot.slane %v9158_v43, 2  ;;  %v8977_v3 = vsub.f32 %v8970_v18, %v8975_v49 }
 0x746   :  { %v9167_v62 = vrot.slane %v8934_v26, 2  ;;  %v9172_v61 = vmul.f32 %v9170_v50, %v8934_v26  ;;  %v9194_v15 = vmul.f32 %v9192_v10, %v8934_v26  ;;  %v8991_v13 = vadd.f32 %v8989_v51, %v8984_v9 }
 0x747   :  { %10757 = vrcp.f32 %v8959_v23  ;;  %v9141_v17 = vadd.f32 %v9139_v6, %v11777_v42  ;;  %v8996_v29 = vadd.f32 %v8975_v49, %v8970_v18  ;;  %v9013_v0 = vsub.f32 %v8970_v18, %v9011_v52 }
 0x748   :  { %v9018_v53 = vsub.f32 %v8984_v9, %v8989_v51  ;;  %v8963_v44 = vrot.slane %v11774_v57, 2  ;;  %v9003_v28 = vrot.slane %v9001_v38, 1  ;;  %v9023_v55 = vadd.f32 %v9011_v52, %v8970_v18 }
 0x749   :  { %v11781_v59 = vadd.f32 %v9139_v6, %v9134_v22  ;;  %v9028_v1 = vrot.slane %v11774_v57, 1  ;;  %v9144_v24 = vadd.f32 %v9142_v35, %v9141_v17  ;;  %v11784_v37 = vsub.f32 %v9155_v40, %v9160_v33 }
 0x74a   :  { %v11786_v63 = vadd.f32 %v9160_v33, %v9155_v40  ;;  %v8979_v31 = vrot.slane %v8977_v3, 1  ;;  %v9169_v7 = vmul.f32 %v9167_v62, %v8934_v26  ;;  %v9174_v12 = vrot.slane %v9172_v61, 1 }
 0x74b   :  { %v9196_v25 = vrot.slane %v9194_v15, 7  ;;  %v8993_v27 = vrot.slane %v8991_v13, 1  ;;  %v8998_v58 = vrot.slane %v8996_v29, 1  ;;  %v9015_v47 = vrot.slane %v9013_v0, 2 }
 0x74c   :  { %v9020_v41 = vrot.slane %v9018_v53, 1  ;;  %v9025_v19 = vrot.slane %v9023_v55, 2  ;;  %v9148_v14 = vrot.slane %v11777_v42, 2  ;;  %v9188_v56 = vrot.slane %v11781_v59, 1 }
 0x74d   :  { %v9213_v20 = vrot.slane %v11777_v42, 1  ;;  %10759 = vrcp.f32 %v9144_v24  ;;  %v9164_v5 = vrot.slane %v11784_v37, 1  ;;  %v9183_v21 = vrot.slane %v11786_v63, 1 }
 0x74e   :  { %v11793_v4 = vadd.f32 %v9174_v12, %v9169_v7  ;;  %v11795_v36 = vsub.f32 %v9155_v40, %v9196_v25  ;;  %v11797_v26 = vsub.f32 %v9169_v7, %v9174_v12  ;;  %v11799_v57 = vadd.f32 %v9196_v25, %v9155_v40 }
 0x750   :  { %v9178_v51 = vrot.slane %v11793_v4, 1  ;;  %v9200_v9 = vrot.slane %v11795_v36, 2 }
 0x751   :  { %v10758_v30 = vpop.eup %10757 }
 0x752   :  { %v8961_v60 = vmul.f32 2.0, %v10758_v30 }
 0x754   :  { %v8965_v39 = vmul.f32 %v8963_v44, %v8961_v60  ;;  %v8981_v22 = vmul.f32 %v8979_v31, %v8961_v60  ;;  %v8995_v11 = vmul.f32 %v8993_v27, %v8961_v60  ;;  %v11801_v32 = vmul.f32 %v8998_v58, %v8961_v60 }
 0x755   :  { %v9005_v8 = vmul.f32 %v9003_v28, %v8961_v60  ;;  %v11803_v16 = vmul.f32 %v9015_v47, %v8961_v60  ;;  %v11805_v48 = vmul.f32 %v9020_v41, %v8961_v60  ;;  %v11807_v2 = vmul.f32 %v9025_v19, %v8961_v60 }
 0x756   :  { %v8966_v54 = vsub.f32 1.0, %v8965_v39  ;;  %v9030_v23 = vmul.f32 %v9028_v1, %v8961_v60  ;;  %v11809_v45 = vmul.f32 0.5, %v8981_v22  ;;  %v11812_v34 = vrot.slane %v11801_v32, 4 }
 0x757   :  { %v11814_v46 = vsub.f32 1.0, %v9005_v8  ;;  %v11817_v18 = vmul.f32 0.5, %v11807_v2  ;;  %v11820_v49 = vrot.slane %v11805_v48, 4  ;;  %v11824_v6 = vrot.slane %v8995_v11, 4  ;;  %v11841_v29 = vpop.eup %10759 }
 0x758   :  { %v9036_v52 = vrot.slane %v11809_v45, 4  ;;  %v9063_v43 = vrot.slane %v8966_v54, 4  ;;  %v11827_v38 = vsub.f32 1.0, %v9030_v23  ;;  %v11834_v17 = vrot.slane %v11803_v16, 4 }
 0x759   :  { %v11830_v50 = vmul.f32 0.5, %v11814_v46  ;;  %v9045_v10 = vrot.slane %v11817_v18, 4  ;;  %v9069_v33 = vmul.f32 %v11812_v34, %v8981_v22  ;;  %v9074_v3 = vmul.f32 %v11820_v49, %v8995_v11 }
 0x75a   :  { %v9038_v35 = vmul.f32 %v9036_v52, %v8966_v54  ;;  %v9065_v40 = vmul.f32 %v9063_v43, %v8966_v54  ;;  %v9050_v15 = vmul.f32 %v9036_v52, %v11801_v32  ;;  %v9056_v13 = vmul.f32 %v9036_v52, %v11805_v48 }
 0x75b   :  { %v9040_v62 = vrot.slane %v11830_v50, 4  ;;  %v9047_v61 = vmul.f32 %v9045_v10, %v8995_v11  ;;  %v9053_v0 = vmul.f32 %v9045_v10, %v11803_v16  ;;  %v9077_v53 = vrot.slane %v8981_v22, 4 }
 0x75c   :  { %v9081_v44 = vrot.slane %v11814_v46, 4  ;;  %v9086_v28 = vrot.slane %v11807_v2, 4  ;;  %v9059_v31 = vmul.f32 %v9045_v10, %v11827_v38  ;;  %v9070_v7 = vadd.f32 %v9069_v33, %v9065_v40 }
 0x75d   :  { %v9042_v55 = vmul.f32 %v9040_v62, %v8981_v22  ;;  %v9051_v1 = vmul.f32 %v9040_v62, %v11814_v46  ;;  %v9057_v24 = vmul.f32 %v9040_v62, %v11807_v2  ;;  %v9079_v12 = vmul.f32 %v9077_v53, %v8966_v54 }
 0x75e   :  { %v9083_v25 = vmul.f32 %v9081_v44, %v8981_v22  ;;  %v9093_v27 = vmul.f32 %v11824_v6, %v8966_v54  ;;  %v9097_v30 = vmul.f32 %v11834_v17, %v8981_v22  ;;  %v9088_v60 = vmul.f32 %v9086_v28, %v8995_v11 }
 0x75f   :  { %v9043_v58 = vadd.f32 %v9042_v55, %v9038_v35  ;;  %v9052_v47 = vadd.f32 %v9051_v1, %v9050_v15  ;;  %v9058_v41 = vadd.f32 %v9057_v24, %v9056_v13  ;;  %v9100_v39 = vrot.slane %v11827_v38, 4 }
 0x760   :  { %v9084_v19 = vadd.f32 %v9083_v25, %v9079_v12  ;;  %v9104_v8 = vmul.f32 %v9063_v43, %v11801_v32  ;;  %v9105_v40 = vmul.f32 %v11812_v34, %v11814_v46  ;;  %v9098_v54 = vadd.f32 %v9097_v30, %v9093_v27 }
 0x761   :  { %v9048_v23 = vadd.f32 %v9047_v61, %v9043_v58  ;;  %v9054_v52 = vadd.f32 %v9053_v0, %v9052_v47  ;;  %v9060_v10 = vadd.f32 %v9059_v31, %v9058_v41  ;;  %v9102_v35 = vmul.f32 %v9100_v39, %v8995_v11 }
 0x762   :  { %v9205_v33 = vrot.slane %v11797_v26, 1  ;;  %v9210_v22 = vrot.slane %v11799_v57, 2  ;;  %v11857_v62 = vadd.f32 %v9074_v3, %v9070_v7  ;;  %v11859_v15 = vadd.f32 %v9088_v60, %v9084_v19 }
 0x763   :  { %v9106_v13 = vadd.f32 %v9105_v40, %v9104_v8  ;;  %v9107_v61 = vmul.f32 %v11820_v49, %v11803_v16  ;;  %v11864_v0 = vadd.f32 %v9048_v23, %v11809_v45  ;;  %v11867_v55 = vadd.f32 %v9054_v52, %v11830_v50 }
 0x764   :  { %v11870_v11 = vadd.f32 %v9060_v10, %v11817_v18  ;;  %v9110_v26 = vmul.f32 %v9081_v44, %v11814_v46  ;;  %v9109_v57 = vmul.f32 %v9077_v53, %v11801_v32  ;;  %v9114_v3 = vmul.f32 %v11824_v6, %v11801_v32 }
 0x765   :  { %v9115_v1 = vmul.f32 %v11834_v17, %v11814_v46  ;;  %v9119_v24 = vmul.f32 %v9063_v43, %v11805_v48  ;;  %v11879_v31 = vadd.f32 %v9102_v35, %v9098_v54  ;;  %v9112_v7 = vmul.f32 %v9086_v28, %v11803_v16 }
 0x766   :  { %v9117_v12 = vmul.f32 %v9100_v39, %v11803_v16  ;;  %v9120_v25 = vmul.f32 %v11812_v34, %v11807_v2  ;;  %v9111_v27 = vadd.f32 %v9110_v26, %v9109_v57  ;;  %v9124_v58 = vmul.f32 %v9077_v53, %v11805_v48 }
 0x767   :  { %v9125_v32 = vmul.f32 %v9081_v44, %v11807_v2  ;;  %v9129_v46 = vmul.f32 %v11824_v6, %v11805_v48  ;;  %v9116_v47 = vadd.f32 %v9115_v1, %v9114_v3  ;;  %v9122_v41 = vmul.f32 %v11820_v49, %v11827_v38 }
 0x768   :  { %v9121_v43 = vadd.f32 %v9120_v25, %v9119_v24  ;;  %v9130_v16 = vmul.f32 %v11834_v17, %v11807_v2  ;;  %v9127_v34 = vmul.f32 %v9086_v28, %v11827_v38  ;;  %v9132_v19 = vmul.f32 %v9100_v39, %v11827_v38 }
 0x769   :  { %v9126_v30 = vadd.f32 %v9125_v32, %v9124_v58  ;;  %v9310_v53 = vrot.slane %v11830_v50, 7  ;;  %v9312_v44 = vrot.slane %v11817_v18, 6  ;;  %v9315_v48 = vrot.slane %v11864_v0, 5 }
 0x76a   :  { %v9131_v60 = vadd.f32 %v9130_v16, %v9129_v46  ;;  %v9318_v6 = vrot.slane %v11867_v55, 4  ;;  %v11899_v8 = vadd.f32 %v9107_v61, %v9106_v13  ;;  %v11901_v49 = vadd.f32 %v9112_v7, %v9111_v27 }
 0x76b   :  { %v9339_v2 = vsel %vm9338_vm0, %v11809_v45, %v9310_v53  ;;  %v9146_v17 = vmul.f32 2.0, %v11841_v29  ;;  %v11906_v28 = vadd.f32 %v9117_v12, %v9116_v47  ;;  %v11908_v38 = vadd.f32 %v9122_v41, %v9121_v43 }
 0x76c   :  { %v11910_v50 = vadd.f32 %v9127_v34, %v9126_v30  ;;  %v9341_v18 = vsel %vm9340_vm1, %v9339_v2, %v9312_v44  ;;  %v9321_v39 = vrot.slane %v11870_v11, 3  ;;  %v11921_v29 = vadd.f32 %v9132_v19, %v9131_v60 }
 0x76d   :  { %v9343_v23 = vsel %vm9342_vm2, %v9341_v18, %v9315_v48  ;;  %v9150_v52 = vmul.f32 %v9148_v14, %v9146_v17  ;;  %v11919_v45 = vmul.f32 %v9164_v5, %v9146_v17  ;;  %v11926_v40 = vmul.f32 %v9178_v51, %v9146_v17 }
 0x76e   :  { %v9345_v10 = vsel %vm9344_vm3, %v9343_v23, %v9318_v6  ;;  %v9190_v54 = vmul.f32 %v9188_v56, %v9146_v17  ;;  %v9185_v13 = vmul.f32 %v9183_v21, %v9146_v17  ;;  %v11934_v37 = vmul.f32 %v9200_v9, %v9146_v17 }
 0x76f   :  { %v9151_v35 = vsub.f32 1.0, %v9150_v52  ;;  %v9212_v14 = vmul.f32 %v9210_v22, %v9146_v17  ;;  %v9207_v61 = vmul.f32 %v9205_v33, %v9146_v17  ;;  %v9215_v26 = vmul.f32 %v9213_v20, %v9146_v17 }
 0x770   :  { %v9191_v5 = vsub.f32 1.0, %v9190_v54  ;;  %v11939_v4 = vmul.f32 0.5, %v11919_v45  ;;  %v11942_v59 = vsel %vm9346_vm4, %v9345_v10, %v9321_v39  ;;  %v9239_v21 = vmul.f32 %v9185_v13, %v11859_v15 }
 0x771   :  { %v11944_v56 = vmul.f32 0.5, %v9212_v14  ;;  %v9238_v63 = vmul.f32 %v9151_v35, %v11857_v62  ;;  %v9241_v20 = vmul.f32 %v9207_v61, %v11879_v31  ;;  %v9216_v9 = vsub.f32 1.0, %v9215_v26 }
 0x772   :  { %v9218_v36 = vmul.f32 0.5, %v9191_v5  ;;  %v9220_v51 = vmul.f32 %v11939_v4, %v11857_v62  ;;  %v9226_v42 = vmul.f32 %v11939_v4, %v11899_v8  ;;  %v9243_v57 = vmul.f32 %v11919_v45, %v11857_v62 }
 0x773   :  { %v9223_v33 = vmul.f32 %v11944_v56, %v11879_v31  ;;  %v9229_v22 = vmul.f32 %v11944_v56, %v11906_v28  ;;  %v9232_v24 = vmul.f32 %v11939_v4, %v11908_v38  ;;  %v9240_v12 = vadd.f32 %v9239_v21, %v9238_v63 }
 0x774   :  { %v9221_v3 = vmul.f32 %v9218_v36, %v11859_v15  ;;  %v9227_v1 = vmul.f32 %v9218_v36, %v11901_v49  ;;  %v9233_v7 = vmul.f32 %v9218_v36, %v11910_v50  ;;  %v9244_v25 = vmul.f32 %v9191_v5, %v11859_v15 }
 0x775   :  { %v9248_v27 = vmul.f32 %v11926_v40, %v11857_v62  ;;  %v9249_v58 = vmul.f32 %v11934_v37, %v11859_v15  ;;  %v9235_v47 = vmul.f32 %v11944_v56, %v11921_v29  ;;  %v9246_v43 = vmul.f32 %v9212_v14, %v11879_v31 }
 0x776   :  { %v9222_v32 = vadd.f32 %v9221_v3, %v9220_v51  ;;  %v9228_v46 = vadd.f32 %v9227_v1, %v9226_v42  ;;  %v9245_v41 = vadd.f32 %v9244_v25, %v9243_v57  ;;  %v9251_v30 = vmul.f32 %v9216_v9, %v11879_v31 }
 0x777   :  { %v9250_v16 = vadd.f32 %v9249_v58, %v9248_v27  ;;  %v9253_v34 = vmul.f32 %v9151_v35, %v11899_v8  ;;  %v9234_v60 = vadd.f32 %v9233_v7, %v9232_v24  ;;  %v9254_v62 = vmul.f32 %v9185_v13, %v11901_v49 }
 0x778   :  { %v9224_v19 = vadd.f32 %v9223_v33, %v9222_v32  ;;  %v9230_v53 = vadd.f32 %v9229_v22, %v9228_v46  ;;  %v9242_v15 = vadd.f32 %v9241_v20, %v9240_v12  ;;  %v9247_v44 = vadd.f32 %v9246_v43, %v9245_v41 }
 0x779   :  { %v9252_v48 = vadd.f32 %v9251_v30, %v9250_v16  ;;  %v9258_v6 = vmul.f32 %v11919_v45, %v11899_v8  ;;  %v9255_v31 = vadd.f32 %v9254_v62, %v9253_v34  ;;  %v9256_v18 = vmul.f32 %v9207_v61, %v11906_v28 }
 0x77a   :  { %v9225_v2 = vadd.f32 %v9224_v19, %v11864_v0  ;;  %v9231_v17 = vadd.f32 %v9230_v53, %v11867_v55  ;;  %v9259_v39 = vmul.f32 %v9191_v5, %v11901_v49  ;;  %v9261_v23 = vmul.f32 %v9212_v14, %v11906_v28 }
 0x77b   :  { %v9263_v52 = vmul.f32 %v11926_v40, %v11899_v8  ;;  %v9264_v10 = vmul.f32 %v11934_v37, %v11901_v49  ;;  %v9257_v54 = vadd.f32 %v9256_v18, %v9255_v31  ;;  %v9266_v26 = vmul.f32 %v9216_v9, %v11906_v28 }
 0x77c   :  { %v9268_v0 = vmul.f32 %v9151_v35, %v11908_v38  ;;  %v9269_v55 = vmul.f32 %v9185_v13, %v11910_v50  ;;  %v9260_v63 = vadd.f32 %v9259_v39, %v9258_v6  ;;  %v9271_v51 = vmul.f32 %v9207_v61, %v11921_v29 }
 0x77d   :  { %v9265_v21 = vadd.f32 %v9264_v10, %v9263_v52  ;;  %v9273_v42 = vmul.f32 %v11919_v45, %v11908_v38  ;;  %v9274_v8 = vmul.f32 %v9191_v5, %v11910_v50  ;;  %v9276_v33 = vmul.f32 %v9212_v14, %v11921_v29 }
 0x77e   :  { %v9270_v20 = vadd.f32 %v9269_v55, %v9268_v0  ;;  %v9278_v49 = vmul.f32 %v11926_v40, %v11908_v38  ;;  %v9262_v28 = vadd.f32 %v9261_v23, %v9260_v63  ;;  %v9279_v35 = vmul.f32 %v11934_v37, %v11910_v50 }
 0x77f   :  { %v9267_v22 = vadd.f32 %v9266_v26, %v9265_v21  ;;  %v9281_v13 = vmul.f32 %v9216_v9, %v11921_v29  ;;  %v9275_v61 = vadd.f32 %v9274_v8, %v9273_v42  ;;  %v9284_v3 = vrot.slane %v11939_v4, 4 }
 0x780   :  { %v9272_v57 = vadd.f32 %v9271_v51, %v9270_v20  ;;  %v9288_v45 = vrot.slane %v9218_v36, 4  ;;  %v9280_v1 = vadd.f32 %v9279_v35, %v9278_v49  ;;  %v9293_v5 = vrot.slane %v11944_v56, 4 }
 0x781   :  { %v9324_v24 = vrot.slane %v9225_v2, 2  ;;  %v9327_v14 = vrot.slane %v9231_v17, 1  ;;  %v9277_v7 = vadd.f32 %v9276_v33, %v9275_v61  ;;  %v9286_v12 = vmul.f32 %v9284_v3, %v9242_v15 }
 0x782   :  { %v9290_v38 = vmul.f32 %v9288_v45, %v9247_v44  ;;  %v9298_v40 = vmul.f32 %v9284_v3, %v9257_v54  ;;  %v9236_v25 = vadd.f32 %v9235_v47, %v9234_v60  ;;  %v9282_v27 = vadd.f32 %v9281_v13, %v9280_v1 }
 0x783   :  { %v9295_v58 = vmul.f32 %v9293_v5, %v9252_v48  ;;  %v9299_v50 = vmul.f32 %v9288_v45, %v9262_v28  ;;  %v9304_v29 = vmul.f32 %v9284_v3, %v9272_v57  ;;  %v9305_v9 = vmul.f32 %v9288_v45, %v9277_v7 }
 0x784   :  { %v9291_v37 = vadd.f32 %v9290_v38, %v9286_v12  ;;  %v9349_v4 = vsel %vm9348_vm5, %v11942_v59, %v9324_v24  ;;  %v9301_v32 = vmul.f32 %v9293_v5, %v9267_v22  ;;  %v9307_v41 = vmul.f32 %v9293_v5, %v9282_v27 }
 0x785   :  { %v9300_v36 = vadd.f32 %v9299_v50, %v9298_v40  ;;  %v9351_v56 = vsel %vm9350_vm6, %v9349_v4, %v9327_v14  ;;  %v9306_v43 = vadd.f32 %v9305_v9, %v9304_v29  ;;  %v9237_v16 = vadd.f32 %v9236_v25, %v11870_v11 }
 0x786   :  { %v9296_v46 = vadd.f32 %v9295_v58, %v9291_v37  ;;  %9356 = vst.msk [vmem:[%s12024_s9] sm:$0xff] %vm9355_vm7, %v9351_v56 }
 0x787   :  { %v9302_v47 = vadd.f32 %v9301_v32, %v9300_v36  ;;  %v9308_v34 = vadd.f32 %v9307_v41, %v9306_v43 }
 0x788   :  { %v9297_v30 = vadd.f32 %v9296_v46, %v9225_v2 }
 0x789   :  { %v9303_v19 = vadd.f32 %v9302_v47, %v9231_v17  ;;  %v9309_v53 = vadd.f32 %v9308_v34, %v9237_v16 }
 0x78a   :  { %v9330_v59 = vrot.slane %v9297_v30, 7 }
 0x78b   :  { %v9333_v60 = vrot.slane %v9303_v19, 6  ;;  %v9336_v62 = vrot.slane %v9309_v53, 5 }
 0x78c   :  { %v9352_v15 = vsel %vm9338_vm0, %v9237_v16, %v9330_v59 }
 0x78d   :  { %v9353_v44 = vsel %vm9340_vm1, %v9352_v15, %v9333_v60 }
 0x78e   :  { %v9354_v48 = vsel %vm9342_vm2, %v9353_v44, %v9336_v62 }
 0x78f   :  { %9358 = vst.msk [vmem:[%s12024_s9 + $0x8] sm:$0xf] %vm9357_vm8, %v9354_v48 }
 0x790   :  { %9363 = vsyncpa [#allocation3], 1 }
 0x791   :  { %9364 = vsyncpa [#allocation5], 1 }
 0x792   :  { %9365 = vsyncpa [#allocation8], 1 }
 0x793   :  { %9366 = vsyncpa [#allocation11], 1 }

</bundles_post_ra>
